<compile_context>
chip_gen: v7x
topology: tpu7x:2x2x1
jax: 0.10.0
libtpu: 0.0.40
codegen_flags: <defaults>
</compile_context>

<pallas_src>
import functools
import jax
import jax.numpy as jnp
from jax.experimental import pallas as pl
from jax.experimental.pallas import tpu as pltpu


# ----------------------------------------------------------------------------
# 1. dVAE encoder: patch matmul + bias + masked log-softmax (lane-padded vocab)
# ----------------------------------------------------------------------------

def _dvae_encode_kernel(p_ref, w_ref, b_ref, o_ref, *, vocab):
    logits = jnp.dot(p_ref[...].astype(jnp.bfloat16), w_ref[...],
                     preferred_element_type=jnp.float32) + b_ref[...]
    col = jax.lax.broadcasted_iota(jnp.int32, logits.shape, 1)
    logits = jnp.where(col < vocab, logits, -1e30)          # mask lane padding
    m = jnp.max(logits, axis=-1, keepdims=True)
    z = logits - m
    lse = jnp.log(jnp.sum(jnp.exp(z), axis=-1, keepdims=True))
    o_ref[...] = z - lse


def _row_split(rows):
    # split token rows into 2 blocks when cleanly possible (v7x megacore), else 1
    if rows % 16 == 0:
        return 2, rows // 2
    return 1, rows


def dvae_encode_fused(patches, enc_w_pad, enc_b_pad, vocab):
    rows, ck = patches.shape
    vp = enc_w_pad.shape[-1]
    g, tb = _row_split(rows)
    kern = functools.partial(_dvae_encode_kernel, vocab=vocab)
    return pl.pallas_call(
        kern,
        grid=(g,),
        in_specs=[pl.BlockSpec((tb, ck), lambda i: (i, 0)),
                  pl.BlockSpec((ck, vp), lambda i: (0, 0)),
                  pl.BlockSpec((1, vp), lambda i: (0, 0))],
        out_specs=pl.BlockSpec((tb, vp), lambda i: (i, 0)),
        out_shape=jax.ShapeDtypeStruct((rows, vp), jnp.float32),
        compiler_params=pltpu.CompilerParams(dimension_semantics=("parallel",)),
    )(patches, enc_w_pad, enc_b_pad)


# ----------------------------------------------------------------------------
# 2. dVAE decoder: matmul + bias + squared-error reduction
# ----------------------------------------------------------------------------

def _dvae_decode_kernel(z_ref, w_ref, b_ref, p_ref, r_ref, e_ref):
    recon = jnp.dot(z_ref[...].astype(jnp.bfloat16), w_ref[...],
                    preferred_element_type=jnp.float32) + b_ref[...]
    r_ref[...] = recon
    d = p_ref[...] - recon
    per_row = jnp.sum(d * d, axis=-1, keepdims=True)
    e_ref[0] = jnp.sum(per_row, axis=0, keepdims=True)


def dvae_decode_fused(z, dec_w, dec_b, patches):
    rows, vocab = z.shape
    ck = dec_w.shape[-1]
    g, tb = _row_split(rows)
    recon, sq = pl.pallas_call(
        _dvae_decode_kernel,
        grid=(g,),
        in_specs=[pl.BlockSpec((tb, vocab), lambda i: (i, 0)),
                  pl.BlockSpec((vocab, ck), lambda i: (0, 0)),
                  pl.BlockSpec((1, ck), lambda i: (0, 0)),
                  pl.BlockSpec((tb, ck), lambda i: (i, 0))],
        out_specs=(pl.BlockSpec((tb, ck), lambda i: (i, 0)),
                   pl.BlockSpec((1, 1, 1), lambda i: (i, 0, 0))),
        out_shape=(jax.ShapeDtypeStruct((rows, ck), jnp.float32),
                   jax.ShapeDtypeStruct((g, 1, 1), jnp.float32)),
        compiler_params=pltpu.CompilerParams(dimension_semantics=("parallel",)),
    )(z, dec_w, dec_b, patches)
    return recon, jnp.sum(sq)


# ----------------------------------------------------------------------------
# 3. OneHotDictionary + PositionalEncoding (one-hot @ table + PE add)
# ----------------------------------------------------------------------------

def _emb_kernel(z_ref, e_ref, pos_ref, o_ref):
    o_ref[...] = jnp.dot(z_ref[...].astype(jnp.bfloat16), e_ref[...],
                         preferred_element_type=jnp.float32) + pos_ref[...]


def emb_fused(z_flat, dict_emb, pos_flat):
    rows = z_flat.shape[0]
    d = dict_emb.shape[-1]
    return pl.pallas_call(
        _emb_kernel,
        out_shape=jax.ShapeDtypeStruct((rows, d), jnp.float32),
    )(z_flat, dict_emb, pos_flat)


# ----------------------------------------------------------------------------
# 4. context_proj + example/segment add + slot_proj in one call
# ----------------------------------------------------------------------------

def _proj_kernel(c_in, c_w, c_add, s_in, s_w, c_out, s_out):
    c_out[...] = jnp.dot(c_in[...].astype(jnp.bfloat16), c_w[...],
                         preferred_element_type=jnp.float32) + c_add[...]
    s_out[...] = jnp.dot(s_in[...].astype(jnp.bfloat16), s_w[...],
                         preferred_element_type=jnp.float32)


def proj_fused(ctx_in, ctx_w, ctx_add, slot_in, slot_w):
    d = ctx_w.shape[-1]
    return pl.pallas_call(
        _proj_kernel,
        out_shape=(jax.ShapeDtypeStruct((ctx_in.shape[0], d), jnp.float32),
                   jax.ShapeDtypeStruct((slot_in.shape[0], d), jnp.float32)),
    )(ctx_in, ctx_w, ctx_add, slot_in, slot_w)


# ----------------------------------------------------------------------------
# 5/6. Fully fused transformer stack (N blocks + final LN [+ out proj + CE])
# ----------------------------------------------------------------------------

_WKEYS = ("ln1_g", "ln1_b", "wqkv", "wo1", "ln2_g", "ln2_b", "wq2", "wkv2", "wo2",
          "ln3_g", "ln3_b", "w1", "b1", "w2", "b2", "final_g", "final_b")


def _stack_kernel(*refs, num_heads, num_blocks, causal, with_ce):
    x_ref, ctx_ref = refs[0], refs[1]
    (ln1g, ln1b, wqkv, wo1, ln2g, ln2b, wq2, wkv2, wo2,
     ln3g, ln3b, w1, b1, w2, b2, fg, fb) = refs[2:19]
    if with_ce:
        outw_ref, zt_ref, o_ref = refs[19], refs[20], refs[21]
    else:
        o_ref = refs[19]

    x = x_ref[0]                       # (T, D)  f32
    ctx = ctx_ref[0]                   # (S, D)  f32
    D = x.shape[-1]
    dh = D // num_heads
    scale = 1.0 / (float(dh) ** 0.5)

    def layer_norm(v, g, b):
        mu = jnp.mean(v, axis=-1, keepdims=True)
        var = jnp.mean((v - mu) ** 2, axis=-1, keepdims=True)
        return (v - mu) * jax.lax.rsqrt(var + 1e-5) * g + b

    def mm(a, w):                      # bf16 MXU inputs, f32 accumulation
        return jnp.dot(a.astype(jnp.bfloat16), w, preferred_element_type=jnp.float32)

    def mha(q, k, v, wo, causal_flag):
        Tq, Sk = q.shape[0], k.shape[0]
        heads = []
        for h in range(num_heads):     # static unroll; heads sliced on the lane axis
            qh = q[:, h * dh:(h + 1) * dh]
            kh = k[:, h * dh:(h + 1) * dh]
            vh = v[:, h * dh:(h + 1) * dh]
            s = jnp.dot(qh, kh.T, preferred_element_type=jnp.float32) * scale
            if causal_flag:
                qi = jax.lax.broadcasted_iota(jnp.int32, (Tq, Sk), 0)
                ki = jax.lax.broadcasted_iota(jnp.int32, (Tq, Sk), 1)
                s = jnp.where(ki <= qi, s, -1e30)
            mx = jnp.max(s, axis=-1, keepdims=True)
            p = jnp.exp(s - mx)
            p = p * pl.reciprocal(jnp.sum(p, axis=-1, keepdims=True), approx=True)
            heads.append(jnp.dot(p, vh, preferred_element_type=jnp.float32))
        o = jnp.concatenate(heads, axis=-1)
        return mm(o, wo)

    for l in range(num_blocks):        # static unroll over blocks, weights stay in VMEM
        h = layer_norm(x, ln1g[l], ln1b[l])
        qkv = mm(h, wqkv[l])           # fused QKV projection (D, 3D)
        x = x + mha(qkv[:, :D], qkv[:, D:2 * D], qkv[:, 2 * D:], wo1[l], causal)
        h = layer_norm(x, ln2g[l], ln2b[l])
        qc = mm(h, wq2[l])
        kvc = mm(ctx, wkv2[l])         # fused KV projection (D, 2D)
        x = x + mha(qc, kvc[:, :D], kvc[:, D:], wo2[l], False)
        h = layer_norm(x, ln3g[l], ln3b[l])
        f = jnp.maximum(mm(h, w1[l]) + b1[l], 0.0)
        x = x + mm(f, w2[l]) + b2[l]

    x = layer_norm(x, fg[...], fb[...])

    if with_ce:
        # output projection + log-softmax + cross-entropy epilogue (no HBM store of pred)
        pred = mm(x, outw_ref[...])                       # (T, V)
        mx = jnp.max(pred, axis=-1, keepdims=True)
        z = pred - mx
        lse = jnp.log(jnp.sum(jnp.exp(z), axis=-1, keepdims=True))
        logp = z - lse
        per_row = -jnp.sum(zt_ref[0] * logp, axis=-1, keepdims=True)
        o_ref[0] = jnp.sum(per_row, axis=0, keepdims=True)
    else:
        o_ref[0] = x


def run_stack(x, ctx, sp, num_heads, causal, out_w=None, z_target=None):
    B, T, D = x.shape
    S = ctx.shape[1]
    L = sp["wqkv"].shape[0]
    weights = [sp[k] for k in _WKEYS]

    def full_spec(a):
        n = a.ndim
        return pl.BlockSpec(a.shape, lambda b, _n=n: (0,) * _n)

    in_specs = [pl.BlockSpec((1, T, D), lambda b: (b, 0, 0)),
                pl.BlockSpec((1, S, D), lambda b: (b, 0, 0))]
    in_specs += [full_spec(a) for a in weights]
    args = [x, ctx] + weights

    if out_w is None:
        kern = functools.partial(_stack_kernel, num_heads=num_heads, num_blocks=L,
                                 causal=causal, with_ce=False)
        out_specs = pl.BlockSpec((1, T, D), lambda b: (b, 0, 0))
        out_shape = jax.ShapeDtypeStruct((B, T, D), jnp.float32)
    else:
        V = out_w.shape[-1]
        in_specs += [full_spec(out_w), pl.BlockSpec((1, T, V), lambda b: (b, 0, 0))]
        args += [out_w, z_target]
        kern = functools.partial(_stack_kernel, num_heads=num_heads, num_blocks=L,
                                 causal=causal, with_ce=True)
        out_specs = pl.BlockSpec((1, 1, 1), lambda b: (b, 0, 0))
        out_shape = jax.ShapeDtypeStruct((B, 1, 1), jnp.float32)

    return pl.pallas_call(
        kern, grid=(B,), in_specs=in_specs, out_specs=out_specs, out_shape=out_shape,
        compiler_params=pltpu.CompilerParams(dimension_semantics=("parallel",)),
    )(*args)


# ------------------------------ glue (XLA layout) ---------------------------

def gumbel_softmax_hard(log_probs, tau, key):
    # forward value of torch gumbel_softmax with hard=True (straight-through one-hot)
    # TODO(synk): could be moved in-kernel with pltpu.prng_random_bits; kept in XLA.
    g = jax.random.gumbel(key, log_probs.shape, dtype=jnp.float32)
    idx = jnp.argmax((log_probs + g) / tau, axis=-1)
    return jax.nn.one_hot(idx, log_probs.shape[-1], dtype=jnp.float32)


# ------------------------------ forward pass --------------------------------

def patch_network_forward(params, support, query, tau, key, *, cfg):
    B, N, _, C, H, W = support.shape
    vocab, d, nh = cfg["vocab_size"], cfg["d_model"], cfg["num_heads"]
    HE, WE = H // 8, W // 8
    T = HE * WE                                            # num_slots

    all_inp = jnp.concatenate([support, query[:, None]], axis=1).reshape(-1, C, H, W)
    Btot = all_inp.shape[0]

    # TODO(synk): dVAE_patch's exact conv stack is not provided; a stride-8 8x8 patch
    # "conv" (patchify + matmul) stands in.  Patchify is a pure layout op in XLA.
    patches = all_inp.reshape(Btot, C, HE, 8, WE, 8).transpose(0, 2, 4, 1, 3, 5)
    patches = patches.reshape(Btot * T, C * 64)

    # dVAE encoder (matmul + bias + log-softmax fused, vocab padded to 128 lanes)
    z_logits = dvae_encode_fused(patches, params["dvae_enc_w"], params["dvae_enc_b"],
                                 vocab)[:, :vocab]          # == F.log_softmax(..., dim=1)

    k1, k2 = jax.random.split(key)
    z = gumbel_softmax_hard(z_logits, tau, k1)             # hard=True sample
    recon_patches, sq = dvae_decode_fused(z, params["dvae_dec_w"],
                                          params["dvae_dec_b"], patches)
    mse = sq / Btot
    recon = recon_patches.reshape(Btot, HE, WE, C, 8, 8).transpose(0, 3, 1, 4, 2, 5)
    recon = recon.reshape(Btot, C, H, W)

    z_hard = gumbel_softmax_hard(z_logits, tau, k2)        # second (detached) draw
    z_tt = z_hard.reshape(Btot, T, vocab)                  # z_transformer_target
    z_ti = jnp.concatenate([jnp.zeros((Btot, T, 1), jnp.float32), z_tt], axis=-1)
    bos = jnp.zeros((Btot, 1, vocab + 1), jnp.float32).at[:, 0, 0].set(1.0)
    z_ti = jnp.concatenate([bos, z_ti], axis=-2)           # (Btot, T+1, vocab+1)

    # OneHotDictionary + PositionalEncoding (dropout off / eval) fused
    pos = jnp.broadcast_to(params["pos_pe"][0, :T + 1], (Btot, T + 1, d))
    emb = emb_fused(z_ti.reshape(Btot * (T + 1), vocab + 1), params["dict_emb"],
                    pos.reshape(Btot * (T + 1), d))
    emb = emb.reshape(B, N + 1, 2, T + 1, d)
    z_tt = z_tt.reshape(B, N + 1, 2, T, vocab)

    slots_support = emb[:, :N, :, 1:]                      # (B, N, 2, T, d)
    slots_inp = emb[:, -1, 0, 1:]                          # (B, T, d)
    emb_input_target = emb[:, -1, 1]                       # (B, T+1, d)
    z_target = z_tt[:, -1, 1]                              # (B, T, vocab)

    # ExampleEncoding + segment embedding precomputed as one additive bias (tiny)
    add = params["example_pe"][:N, None, None, :] + params["segment_emb"][None, :, None, :]
    add = jnp.broadcast_to(add, (N, 2, T, d))
    add_flat = jnp.broadcast_to(add[None], (B, N, 2, T, d)).reshape(B * N * 2 * T, d)

    ctx_flat, inp_flat = proj_fused(slots_support.reshape(B * N * 2 * T, d),
                                    params["context_proj"], add_flat,
                                    slots_inp.reshape(B * T, d), params["slot_proj"])
    encoded_context = ctx_flat.reshape(B, N * 2 * T, d)
    encoded_inp = inp_flat.reshape(B, T, d)

    prompt = run_stack(encoded_inp, encoded_context, params["prompt_stack"], nh,
                       causal=False)
    ce_per_b = run_stack(emb_input_target[:, :-1], prompt, params["dec_stack"], nh,
                         causal=True, out_w=params["out_w"], z_target=z_target)
    ce = jnp.sum(ce_per_b) / B
    return jnp.clip(recon, 0.0, 1.0), ce, mse


# --------------------------- deterministic params ---------------------------

def init_params(key, *, img_channels, image_size, vocab_size, d_model, num_heads,
                num_dec_blocks):
    T = (image_size // 8) ** 2
    vp = ((vocab_size + 127) // 128) * 128                 # lane-pad vocab to 128
    ck = img_channels * 64
    keys = iter(jax.random.split(key, 512))
    bf16 = jnp.bfloat16

    def nrm(shape, scale=0.02, dtype=jnp.float32):
        return (scale * jax.random.normal(next(keys), shape, jnp.float32)).astype(dtype)

    def stack_params(L):
        d = d_model
        return {
            "ln1_g": jnp.ones((L, 1, d), jnp.float32), "ln1_b": jnp.zeros((L, 1, d), jnp.float32),
            "wqkv": nrm((L, d, 3 * d), dtype=bf16),
            "wo1": nrm((L, d, d), dtype=bf16),
            "ln2_g": jnp.ones((L, 1, d), jnp.float32), "ln2_b": jnp.zeros((L, 1, d), jnp.float32),
            "wq2": nrm((L, d, d), dtype=bf16),
            "wkv2": nrm((L, d, 2 * d), dtype=bf16),
            "wo2": nrm((L, d, d), dtype=bf16),
            "ln3_g": jnp.ones((L, 1, d), jnp.float32), "ln3_b": jnp.zeros((L, 1, d), jnp.float32),
            "w1": nrm((L, d, 4 * d), dtype=bf16), "b1": jnp.zeros((L, 1, 4 * d), jnp.float32),
            "w2": nrm((L, 4 * d, d), dtype=bf16), "b2": jnp.zeros((L, 1, d), jnp.float32),
            "final_g": jnp.ones((1, d), jnp.float32), "final_b": jnp.zeros((1, d), jnp.float32),
        }

    enc_w = nrm((ck, vocab_size), 0.1)
    enc_w_pad = jnp.zeros((ck, vp), jnp.float32).at[:, :vocab_size].set(enc_w).astype(bf16)

    params = {
        "dvae_enc_w": enc_w_pad,
        "dvae_enc_b": jnp.zeros((1, vp), jnp.float32),
        "dvae_dec_w": nrm((vocab_size, ck), 0.1, dtype=bf16),
        "dvae_dec_b": jnp.zeros((1, ck), jnp.float32),
        "pos_pe": nrm((1, 1 + T, d_model)),
        "segment_emb": nrm((2, d_model)),
        "dict_emb": nrm((vocab_size + 1, d_model), dtype=bf16),
        "slot_proj": nrm((d_model, d_model), dtype=bf16),
        "context_proj": nrm((d_model, d_model), dtype=bf16),
        "example_pe": nrm((3, d_model)),                   # ExampleEncoding(3, d_model)
        "out_w": nrm((d_model, vocab_size), dtype=bf16),
        "dec_stack": stack_params(num_dec_blocks),
        "prompt_stack": stack_params(num_dec_blocks),
    }
    cfg = {"vocab_size": vocab_size, "d_model": d_model, "num_heads": num_heads}
    return params, cfg


if __name__ == "__main__":
    B, N, C, H = 2, 2, 3, 16            # image_size=16 -> H_enc=W_enc=2, num_slots=4
    vocab, d_model, num_heads, num_dec_blocks = 32, 64, 4, 2

    root = jax.random.PRNGKey(0)
    kp, ksup, kqry, kgum = jax.random.split(root, 4)
    params, cfg = init_params(kp, img_channels=C, image_size=H, vocab_size=vocab,
                              d_model=d_model, num_heads=num_heads,
                              num_dec_blocks=num_dec_blocks)

    support = jax.random.uniform(ksup, (B, N, 2, C, H, H), jnp.float32)  # (B,N,2,C,H,W)
    query = jax.random.uniform(kqry, (B, 2, C, H, H), jnp.float32)       # (B,2,C,H,W)

    fwd = jax.jit(functools.partial(patch_network_forward, cfg=cfg))
    recon, cross_entropy, mse = fwd(params, support, query, 1.0, kgum)
    jax.block_until_ready((recon, cross_entropy, mse))
    assert recon.shape == (B * (N + 1) * 2, C, H, H)
    assert cross_entropy.shape == () and mse.shape == ()
    print("KERNEL_OK")
</pallas_src>

<mosaic_0001>
module attributes {stable_mosaic.version = 11 : i64} {
  func.func @_dvae_encode_kernel(%arg0: i32, %arg1: memref<24x192xf32, #tpu.memory_space<vmem>>, %arg2: memref<192x128xbf16, #tpu.memory_space<vmem>>, %arg3: memref<1x128xf32, #tpu.memory_space<vmem>>, %arg4: memref<24x128xf32, #tpu.memory_space<vmem>>) attributes {dimension_semantics = [#tpu.dimension_semantics<parallel>], iteration_bounds = array<i64: 2>, scalar_prefetch = 0 : i64, scratch_operands = 0 : i64, tpu.core_type = #tpu.core_type<tc>, window_params = [{transform_indices = @transform_0, window_bounds = array<i64: 24, 192>}, {pipeline_mode = #tpu.pipeline_mode<synchronous>, transform_indices = @transform_1, window_bounds = array<i64: 192, 128>}, {pipeline_mode = #tpu.pipeline_mode<synchronous>, transform_indices = @transform_2, window_bounds = array<i64: 1, 128>}, {transform_indices = @transform_3, window_bounds = array<i64: 24, 128>}]} {
    %c0 = arith.constant 0 : index
    %c0_0 = arith.constant 0 : index
    %0 = vector.load %arg1[%c0, %c0_0] : memref<24x192xf32, #tpu.memory_space<vmem>>, vector<24x192xf32>
    %1 = arith.truncf %0 : vector<24x192xf32> to vector<24x192xbf16>
    %c0_1 = arith.constant 0 : index
    %c0_2 = arith.constant 0 : index
    %2 = vector.load %arg2[%c0_1, %c0_2] : memref<192x128xbf16, #tpu.memory_space<vmem>>, vector<192x128xbf16>
    %cst = arith.constant dense<0.000000e+00> : vector<24x128xf32>
    %3 = tpu.matmul %1, %2, %cst {dimension_numbers = #tpu.dot_dimension_numbers<[1], [0], [0], [1], [0, 0, 1, 1], [], []>} : vector<24x192xbf16>, vector<192x128xbf16>, vector<24x128xf32> -> vector<24x128xf32>
    %c0_3 = arith.constant 0 : index
    %c0_4 = arith.constant 0 : index
    %4 = vector.load %arg3[%c0_3, %c0_4] : memref<1x128xf32, #tpu.memory_space<vmem>>, vector<1x128xf32>
    %5 = vector.broadcast %4 : vector<1x128xf32> to vector<24x128xf32>
    %6 = arith.addf %3, %5 : vector<24x128xf32>
    %7 = tpu.iota {dimensions = array<i32: 1>} : vector<24x128xi32>
    %c32_i32 = arith.constant 32 : i32
    %8 = vector.broadcast %c32_i32 : i32 to vector<24x128xi32>
    %9 = arith.cmpi slt, %7, %8 : vector<24x128xi32>
    %cst_5 = arith.constant -1.000000e+30 : f32
    %10 = vector.broadcast %cst_5 : f32 to vector<24x128xf32>
    %11 = arith.select %9, %6, %10 : vector<24x128xi1>, vector<24x128xf32>
    %cst_6 = arith.constant dense<0xFF800000> : vector<24xf32>
    %12 = vector.multi_reduction <maximumf>, %11, %cst_6 [1] : vector<24x128xf32> to vector<24xf32>
    %13 = vector.shape_cast %12 : vector<24xf32> to vector<24x1xf32>
    %14 = vector.broadcast %13 : vector<24x1xf32> to vector<24x128xf32>
    %15 = arith.subf %11, %14 : vector<24x128xf32>
    %16 = math.exp %15 : vector<24x128xf32>
    %cst_7 = arith.constant dense<0.000000e+00> : vector<24xf32>
    %17 = vector.multi_reduction <add>, %16, %cst_7 [1] : vector<24x128xf32> to vector<24xf32>
    %18 = vector.shape_cast %17 : vector<24xf32> to vector<24x1xf32>
    %19 = math.log %18 : vector<24x1xf32>
    %20 = vector.broadcast %19 : vector<24x1xf32> to vector<24x128xf32>
    %21 = arith.subf %15, %20 : vector<24x128xf32>
    %c0_8 = arith.constant 0 : index
    %c0_9 = arith.constant 0 : index
    %22 = vector.load %arg4[%c0_8, %c0_9] : memref<24x128xf32, #tpu.memory_space<vmem>>, vector<24x128xf32>
    tpu.vector_store %arg4[%c0_8, %c0_9], %21 {strides = array<i32>} : memref<24x128xf32, #tpu.memory_space<vmem>>, vector<24x128xf32>,
    return
  }
  func.func @transform_0(%arg0: i32) -> (i32, i32) {
    %c0_i32 = arith.constant 0 : i32
    %c0_i32_0 = arith.constant 0 : i32
    return %arg0, %c0_i32 : i32, i32
  }
  func.func @transform_1(%arg0: i32) -> (i32, i32) {
    %c0_i32 = arith.constant 0 : i32
    %c0_i32_0 = arith.constant 0 : i32
    %c0_i32_1 = arith.constant 0 : i32
    return %c0_i32, %c0_i32_0 : i32, i32
  }
  func.func @transform_2(%arg0: i32) -> (i32, i32) {
    %c0_i32 = arith.constant 0 : i32
    %c0_i32_0 = arith.constant 0 : i32
    %c0_i32_1 = arith.constant 0 : i32
    return %c0_i32, %c0_i32_0 : i32, i32
  }
  func.func @transform_3(%arg0: i32) -> (i32, i32) {
    %c0_i32 = arith.constant 0 : i32
    %c0_i32_0 = arith.constant 0 : i32
    return %arg0, %c0_i32 : i32, i32
  }
}

module attributes {stable_mosaic.version = 11 : i64} {
  func.func @_dvae_decode_kernel(%arg0: i32, %arg1: memref<24x32xf32, #tpu.memory_space<vmem>>, %arg2: memref<32x192xbf16, #tpu.memory_space<vmem>>, %arg3: memref<1x192xf32, #tpu.memory_space<vmem>>, %arg4: memref<24x192xf32, #tpu.memory_space<vmem>>, %arg5: memref<24x192xf32, #tpu.memory_space<vmem>>, %arg6: memref<1x1x1xf32, #tpu.memory_space<vmem>>) attributes {dimension_semantics = [#tpu.dimension_semantics<parallel>], iteration_bounds = array<i64: 2>, scalar_prefetch = 0 : i64, scratch_operands = 0 : i64, tpu.core_type = #tpu.core_type<tc>, window_params = [{transform_indices = @transform_0, window_bounds = array<i64: 24, 32>}, {pipeline_mode = #tpu.pipeline_mode<synchronous>, transform_indices = @transform_1, window_bounds = array<i64: 32, 192>}, {pipeline_mode = #tpu.pipeline_mode<synchronous>, transform_indices = @transform_2, window_bounds = array<i64: 1, 192>}, {transform_indices = @transform_3, window_bounds = array<i64: 24, 192>}, {transform_indices = @transform_4, window_bounds = array<i64: 24, 192>}, {transform_indices = @transform_5, window_bounds = array<i64: 1, 1, 1>}]} {
    %c0 = arith.constant 0 : index
    %c0_0 = arith.constant 0 : index
    %0 = vector.load %arg1[%c0, %c0_0] : memref<24x32xf32, #tpu.memory_space<vmem>>, vector<24x32xf32>
    %1 = arith.truncf %0 : vector<24x32xf32> to vector<24x32xbf16>
    %c0_1 = arith.constant 0 : index
    %c0_2 = arith.constant 0 : index
    %2 = vector.load %arg2[%c0_1, %c0_2] : memref<32x192xbf16, #tpu.memory_space<vmem>>, vector<32x192xbf16>
    %cst = arith.constant dense<0.000000e+00> : vector<24x192xf32>
    %3 = tpu.matmul %1, %2, %cst {dimension_numbers = #tpu.dot_dimension_numbers<[1], [0], [0], [1], [0, 0, 1, 1], [], []>} : vector<24x32xbf16>, vector<32x192xbf16>, vector<24x192xf32> -> vector<24x192xf32>
    %c0_3 = arith.constant 0 : index
    %c0_4 = arith.constant 0 : index
    %4 = vector.load %arg3[%c0_3, %c0_4] : memref<1x192xf32, #tpu.memory_space<vmem>>, vector<1x192xf32>
    %5 = vector.broadcast %4 : vector<1x192xf32> to vector<24x192xf32>
    %6 = arith.addf %3, %5 : vector<24x192xf32>
    %c0_5 = arith.constant 0 : index
    %c0_6 = arith.constant 0 : index
    %7 = vector.load %arg5[%c0_5, %c0_6] : memref<24x192xf32, #tpu.memory_space<vmem>>, vector<24x192xf32>
    tpu.vector_store %arg5[%c0_5, %c0_6], %6 {strides = array<i32>} : memref<24x192xf32, #tpu.memory_space<vmem>>, vector<24x192xf32>,
    %c0_7 = arith.constant 0 : index
    %c0_8 = arith.constant 0 : index
    %8 = vector.load %arg4[%c0_7, %c0_8] : memref<24x192xf32, #tpu.memory_space<vmem>>, vector<24x192xf32>
    %9 = arith.subf %8, %6 : vector<24x192xf32>
    %10 = arith.mulf %9, %9 : vector<24x192xf32>
    %cst_9 = arith.constant dense<0.000000e+00> : vector<24xf32>
    %11 = vector.multi_reduction <add>, %10, %cst_9 [1] : vector<24x192xf32> to vector<24xf32>
    %12 = vector.shape_cast %11 : vector<24xf32> to vector<24x1xf32>
    %cst_10 = arith.constant dense<0.000000e+00> : vector<1xf32>
    %13 = vector.multi_reduction <add>, %12, %cst_10 [0] : vector<24x1xf32> to vector<1xf32>
    %14 = vector.shape_cast %13 : vector<1xf32> to vector<1x1xf32>
    %c0_11 = arith.constant 0 : index
    %c0_12 = arith.constant 0 : index
    %c0_13 = arith.constant 0 : index
    %15 = vector.load %arg6[%c0_11, %c0_12, %c0_13] : memref<1x1x1xf32, #tpu.memory_space<vmem>>, vector<1x1x1xf32>
    %16 = vector.shape_cast %15 : vector<1x1x1xf32> to vector<1x1xf32>
    %17 = vector.shape_cast %14 : vector<1x1xf32> to vector<1x1x1xf32>
    tpu.vector_store %arg6[%c0_11, %c0_12, %c0_13], %17 {strides = array<i32>} : memref<1x1x1xf32, #tpu.memory_space<vmem>>, vector<1x1x1xf32>,
    return
  }
  func.func @transform_0(%arg0: i32) -> (i32, i32) {
    %c0_i32 = arith.constant 0 : i32
    %c0_i32_0 = arith.constant 0 : i32
    return %arg0, %c0_i32 : i32, i32
  }
  func.func @transform_1(%arg0: i32) -> (i32, i32) {
    %c0_i32 = arith.constant 0 : i32
    %c0_i32_0 = arith.constant 0 : i32
    %c0_i32_1 = arith.constant 0 : i32
    return %c0_i32, %c0_i32_0 : i32, i32
  }
  func.func @transform_2(%arg0: i32) -> (i32, i32) {
    %c0_i32 = arith.constant 0 : i32
    %c0_i32_0 = arith.constant 0 : i32
    %c0_i32_1 = arith.constant 0 : i32
    return %c0_i32, %c0_i32_0 : i32, i32
  }
  func.func @transform_3(%arg0: i32) -> (i32, i32) {
    %c0_i32 = arith.constant 0 : i32
    %c0_i32_0 = arith.constant 0 : i32
    return %arg0, %c0_i32 : i32, i32
  }
  func.func @transform_4(%arg0: i32) -> (i32, i32) {
    %c0_i32 = arith.constant 0 : i32
    %c0_i32_0 = arith.constant 0 : i32
    return %arg0, %c0_i32 : i32, i32
  }
  func.func @transform_5(%arg0: i32) -> (i32, i32, i32) {
    %c0_i32 = arith.constant 0 : i32
    %c0_i32_0 = arith.constant 0 : i32
    %c0_i32_1 = arith.constant 0 : i32
    return %arg0, %c0_i32, %c0_i32_0 : i32, i32, i32
  }
}

module attributes {stable_mosaic.version = 11 : i64} {
  func.func @_emb_kernel(%arg0: memref<60x33xf32, #tpu.memory_space<vmem>>, %arg1: memref<33x64xbf16, #tpu.memory_space<vmem>>, %arg2: memref<60x64xf32, #tpu.memory_space<vmem>>, %arg3: memref<60x64xf32, #tpu.memory_space<vmem>>) attributes {dimension_semantics = [], scalar_prefetch = 0 : i64, scratch_operands = 0 : i64, tpu.core_type = #tpu.core_type<tc>} {
    %c0 = arith.constant 0 : index
    %c0_0 = arith.constant 0 : index
    %0 = vector.load %arg0[%c0, %c0_0] : memref<60x33xf32, #tpu.memory_space<vmem>>, vector<60x33xf32>
    %1 = arith.truncf %0 : vector<60x33xf32> to vector<60x33xbf16>
    %c0_1 = arith.constant 0 : index
    %c0_2 = arith.constant 0 : index
    %2 = vector.load %arg1[%c0_1, %c0_2] : memref<33x64xbf16, #tpu.memory_space<vmem>>, vector<33x64xbf16>
    %cst = arith.constant dense<0.000000e+00> : vector<60x64xf32>
    %3 = tpu.matmul %1, %2, %cst {dimension_numbers = #tpu.dot_dimension_numbers<[1], [0], [0], [1], [0, 0, 1, 1], [], []>} : vector<60x33xbf16>, vector<33x64xbf16>, vector<60x64xf32> -> vector<60x64xf32>
    %c0_3 = arith.constant 0 : index
    %c0_4 = arith.constant 0 : index
    %4 = vector.load %arg2[%c0_3, %c0_4] : memref<60x64xf32, #tpu.memory_space<vmem>>, vector<60x64xf32>
    %5 = arith.addf %3, %4 : vector<60x64xf32>
    %c0_5 = arith.constant 0 : index
    %c0_6 = arith.constant 0 : index
    %6 = vector.load %arg3[%c0_5, %c0_6] : memref<60x64xf32, #tpu.memory_space<vmem>>, vector<60x64xf32>
    tpu.vector_store %arg3[%c0_5, %c0_6], %5 {strides = array<i32>} : memref<60x64xf32, #tpu.memory_space<vmem>>, vector<60x64xf32>,
    return
  }
}

module attributes {stable_mosaic.version = 11 : i64} {
  func.func @_proj_kernel(%arg0: memref<32x64xf32, #tpu.memory_space<vmem>>, %arg1: memref<64x64xbf16, #tpu.memory_space<vmem>>, %arg2: memref<32x64xf32, #tpu.memory_space<vmem>>, %arg3: memref<8x64xf32, #tpu.memory_space<vmem>>, %arg4: memref<64x64xbf16, #tpu.memory_space<vmem>>, %arg5: memref<32x64xf32, #tpu.memory_space<vmem>>, %arg6: memref<8x64xf32, #tpu.memory_space<vmem>>) attributes {dimension_semantics = [], scalar_prefetch = 0 : i64, scratch_operands = 0 : i64, tpu.core_type = #tpu.core_type<tc>} {
    %c0 = arith.constant 0 : index
    %c0_0 = arith.constant 0 : index
    %0 = vector.load %arg0[%c0, %c0_0] : memref<32x64xf32, #tpu.memory_space<vmem>>, vector<32x64xf32>
    %1 = arith.truncf %0 : vector<32x64xf32> to vector<32x64xbf16>
    %c0_1 = arith.constant 0 : index
    %c0_2 = arith.constant 0 : index
    %2 = vector.load %arg1[%c0_1, %c0_2] : memref<64x64xbf16, #tpu.memory_space<vmem>>, vector<64x64xbf16>
    %cst = arith.constant dense<0.000000e+00> : vector<32x64xf32>
    %3 = tpu.matmul %1, %2, %cst {dimension_numbers = #tpu.dot_dimension_numbers<[1], [0], [0], [1], [0, 0, 1, 1], [], []>} : vector<32x64xbf16>, vector<64x64xbf16>, vector<32x64xf32> -> vector<32x64xf32>
    %c0_3 = arith.constant 0 : index
    %c0_4 = arith.constant 0 : index
    %4 = vector.load %arg2[%c0_3, %c0_4] : memref<32x64xf32, #tpu.memory_space<vmem>>, vector<32x64xf32>
    %5 = arith.addf %3, %4 : vector<32x64xf32>
    %c0_5 = arith.constant 0 : index
    %c0_6 = arith.constant 0 : index
    %6 = vector.load %arg5[%c0_5, %c0_6] : memref<32x64xf32, #tpu.memory_space<vmem>>, vector<32x64xf32>
    tpu.vector_store %arg5[%c0_5, %c0_6], %5 {strides = array<i32>} : memref<32x64xf32, #tpu.memory_space<vmem>>, vector<32x64xf32>,
    %c0_7 = arith.constant 0 : index
    %c0_8 = arith.constant 0 : index
    %7 = vector.load %arg3[%c0_7, %c0_8] : memref<8x64xf32, #tpu.memory_space<vmem>>, vector<8x64xf32>
    %8 = arith.truncf %7 : vector<8x64xf32> to vector<8x64xbf16>
    %c0_9 = arith.constant 0 : index
    %c0_10 = arith.constant 0 : index
    %9 = vector.load %arg4[%c0_9, %c0_10] : memref<64x64xbf16, #tpu.memory_space<vmem>>, vector<64x64xbf16>
    %cst_11 = arith.constant dense<0.000000e+00> : vector<8x64xf32>
    %10 = tpu.matmul %8, %9, %cst_11 {dimension_numbers = #tpu.dot_dimension_numbers<[1], [0], [0], [1], [0, 0, 1, 1], [], []>} : vector<8x64xbf16>, vector<64x64xbf16>, vector<8x64xf32> -> vector<8x64xf32>
    %c0_12 = arith.constant 0 : index
    %c0_13 = arith.constant 0 : index
    %11 = vector.load %arg6[%c0_12, %c0_13] : memref<8x64xf32, #tpu.memory_space<vmem>>, vector<8x64xf32>
    tpu.vector_store %arg6[%c0_12, %c0_13], %10 {strides = array<i32>} : memref<8x64xf32, #tpu.memory_space<vmem>>, vector<8x64xf32>,
    return
  }
}

module attributes {stable_mosaic.version = 11 : i64} {
  func.func @_stack_kernel(%arg0: i32, %arg1: memref<1x4x64xf32, #tpu.memory_space<vmem>>, %arg2: memref<1x4x64xf32, #tpu.memory_space<vmem>>, %arg3: memref<2x1x64xf32, #tpu.memory_space<vmem>>, %arg4: memref<2x1x64xf32, #tpu.memory_space<vmem>>, %arg5: memref<2x64x192xbf16, #tpu.memory_space<vmem>>, %arg6: memref<2x64x64xbf16, #tpu.memory_space<vmem>>, %arg7: memref<2x1x64xf32, #tpu.memory_space<vmem>>, %arg8: memref<2x1x64xf32, #tpu.memory_space<vmem>>, %arg9: memref<2x64x64xbf16, #tpu.memory_space<vmem>>, %arg10: memref<2x64x128xbf16, #tpu.memory_space<vmem>>, %arg11: memref<2x64x64xbf16, #tpu.memory_space<vmem>>, %arg12: memref<2x1x64xf32, #tpu.memory_space<vmem>>, %arg13: memref<2x1x64xf32, #tpu.memory_space<vmem>>, %arg14: memref<2x64x256xbf16, #tpu.memory_space<vmem>>, %arg15: memref<2x1x256xf32, #tpu.memory_space<vmem>>, %arg16: memref<2x256x64xbf16, #tpu.memory_space<vmem>>, %arg17: memref<2x1x64xf32, #tpu.memory_space<vmem>>, %arg18: memref<1x64xf32, #tpu.memory_space<vmem>>, %arg19: memref<1x64xf32, #tpu.memory_space<vmem>>, %arg20: memref<64x32xbf16, #tpu.memory_space<vmem>>, %arg21: memref<1x4x32xf32, #tpu.memory_space<vmem>>, %arg22: memref<1x1x1xf32, #tpu.memory_space<vmem>>) attributes {dimension_semantics = [#tpu.dimension_semantics<parallel>], iteration_bounds = array<i64: 2>, scalar_prefetch = 0 : i64, scratch_operands = 0 : i64, tpu.core_type = #tpu.core_type<tc>, window_params = [{transform_indices = @transform_0, window_bounds = array<i64: 1, 4, 64>}, {transform_indices = @transform_1, window_bounds = array<i64: 1, 4, 64>}, {pipeline_mode = #tpu.pipeline_mode<synchronous>, transform_indices = @transform_2, window_bounds = array<i64: 2, 1, 64>}, {pipeline_mode = #tpu.pipeline_mode<synchronous>, transform_indices = @transform_3, window_bounds = array<i64: 2, 1, 64>}, {pipeline_mode = #tpu.pipeline_mode<synchronous>, transform_indices = @transform_4, window_bounds = array<i64: 2, 64, 192>}, {pipeline_mode = #tpu.pipeline_mode<synchronous>, transform_indices = @transform_5, window_bounds = array<i64: 2, 64, 64>}, {pipeline_mode = #tpu.pipeline_mode<synchronous>, transform_indices = @transform_6, window_bounds = array<i64: 2, 1, 64>}, {pipeline_mode = #tpu.pipeline_mode<synchronous>, transform_indices = @transform_7, window_bounds = array<i64: 2, 1, 64>}, {pipeline_mode = #tpu.pipeline_mode<synchronous>, transform_indices = @transform_8, window_bounds = array<i64: 2, 64, 64>}, {pipeline_mode = #tpu.pipeline_mode<synchronous>, transform_indices = @transform_9, window_bounds = array<i64: 2, 64, 128>}, {pipeline_mode = #tpu.pipeline_mode<synchronous>, transform_indices = @transform_10, window_bounds = array<i64: 2, 64, 64>}, {pipeline_mode = #tpu.pipeline_mode<synchronous>, transform_indices = @transform_11, window_bounds = array<i64: 2, 1, 64>}, {pipeline_mode = #tpu.pipeline_mode<synchronous>, transform_indices = @transform_12, window_bounds = array<i64: 2, 1, 64>}, {pipeline_mode = #tpu.pipeline_mode<synchronous>, transform_indices = @transform_13, window_bounds = array<i64: 2, 64, 256>}, {pipeline_mode = #tpu.pipeline_mode<synchronous>, transform_indices = @transform_14, window_bounds = array<i64: 2, 1, 256>}, {pipeline_mode = #tpu.pipeline_mode<synchronous>, transform_indices = @transform_15, window_bounds = array<i64: 2, 256, 64>}, {pipeline_mode = #tpu.pipeline_mode<synchronous>, transform_indices = @transform_16, window_bounds = array<i64: 2, 1, 64>}, {pipeline_mode = #tpu.pipeline_mode<synchronous>, transform_indices = @transform_17, window_bounds = array<i64: 1, 64>}, {pipeline_mode = #tpu.pipeline_mode<synchronous>, transform_indices = @transform_18, window_bounds = array<i64: 1, 64>}, {pipeline_mode = #tpu.pipeline_mode<synchronous>, transform_indices = @transform_19, window_bounds = array<i64: 64, 32>}, {transform_indices = @transform_20, window_bounds = array<i64: 1, 4, 32>}, {transform_indices = @transform_21, window_bounds = array<i64: 1, 1, 1>}]} {
    %c0 = arith.constant 0 : index
    %c0_0 = arith.constant 0 : index
    %c0_1 = arith.constant 0 : index
    %0 = vector.load %arg1[%c0, %c0_0, %c0_1] : memref<1x4x64xf32, #tpu.memory_space<vmem>>, vector<1x4x64xf32>
    %1 = vector.shape_cast %0 : vector<1x4x64xf32> to vector<4x64xf32>
    %c0_2 = arith.constant 0 : index
    %c0_3 = arith.constant 0 : index
    %c0_4 = arith.constant 0 : index
    %2 = vector.load %arg2[%c0_2, %c0_3, %c0_4] : memref<1x4x64xf32, #tpu.memory_space<vmem>>, vector<1x4x64xf32>
    %3 = vector.shape_cast %2 : vector<1x4x64xf32> to vector<4x64xf32>
    %c0_5 = arith.constant 0 : index
    %c0_6 = arith.constant 0 : index
    %c0_7 = arith.constant 0 : index
    %4 = vector.load %arg3[%c0_5, %c0_6, %c0_7] : memref<2x1x64xf32, #tpu.memory_space<vmem>>, vector<1x1x64xf32>
    %5 = vector.shape_cast %4 : vector<1x1x64xf32> to vector<1x64xf32>
    %c0_8 = arith.constant 0 : index
    %c0_9 = arith.constant 0 : index
    %c0_10 = arith.constant 0 : index
    %6 = vector.load %arg4[%c0_8, %c0_9, %c0_10] : memref<2x1x64xf32, #tpu.memory_space<vmem>>, vector<1x1x64xf32>
    %7 = vector.shape_cast %6 : vector<1x1x64xf32> to vector<1x64xf32>
    %cst = arith.constant dense<0.000000e+00> : vector<4xf32>
    %8 = vector.multi_reduction <add>, %1, %cst [1] : vector<4x64xf32> to vector<4xf32>
    %9 = vector.shape_cast %8 : vector<4xf32> to vector<4x1xf32>
    %cst_11 = arith.constant 6.400000e+01 : f32
    %10 = vector.broadcast %cst_11 : f32 to vector<4x1xf32>
    %11 = arith.divf %9, %10 : vector<4x1xf32>
    %12 = vector.broadcast %11 : vector<4x1xf32> to vector<4x64xf32>
    %13 = arith.subf %1, %12 : vector<4x64xf32>
    %14 = arith.mulf %13, %13 : vector<4x64xf32>
    %cst_12 = arith.constant dense<0.000000e+00> : vector<4xf32>
    %15 = vector.multi_reduction <add>, %14, %cst_12 [1] : vector<4x64xf32> to vector<4xf32>
    %16 = vector.shape_cast %15 : vector<4xf32> to vector<4x1xf32>
    %cst_13 = arith.constant 6.400000e+01 : f32
    %17 = vector.broadcast %cst_13 : f32 to vector<4x1xf32>
    %18 = arith.divf %16, %17 : vector<4x1xf32>
    %19 = vector.broadcast %11 : vector<4x1xf32> to vector<4x64xf32>
    %20 = arith.subf %1, %19 : vector<4x64xf32>
    %cst_14 = arith.constant 9.99999974E-6 : f32
    %21 = vector.broadcast %cst_14 : f32 to vector<4x1xf32>
    %22 = arith.addf %18, %21 : vector<4x1xf32>
    %23 = math.rsqrt %22 : vector<4x1xf32>
    %24 = vector.broadcast %23 : vector<4x1xf32> to vector<4x64xf32>
    %25 = arith.mulf %20, %24 : vector<4x64xf32>
    %26 = vector.broadcast %5 : vector<1x64xf32> to vector<4x64xf32>
    %27 = arith.mulf %25, %26 : vector<4x64xf32>
    %28 = vector.broadcast %7 : vector<1x64xf32> to vector<4x64xf32>
    %29 = arith.addf %27, %28 : vector<4x64xf32>
    %c0_15 = arith.constant 0 : index
    %c0_16 = arith.constant 0 : index
    %c0_17 = arith.constant 0 : index
    %30 = vector.load %arg5[%c0_15, %c0_16, %c0_17] : memref<2x64x192xbf16, #tpu.memory_space<vmem>>, vector<1x64x192xbf16>
    %31 = vector.shape_cast %30 : vector<1x64x192xbf16> to vector<64x192xbf16>
    %32 = arith.truncf %29 : vector<4x64xf32> to vector<4x64xbf16>
    %cst_18 = arith.constant dense<0.000000e+00> : vector<4x192xf32>
    %33 = tpu.matmul %32, %31, %cst_18 {dimension_numbers = #tpu.dot_dimension_numbers<[1], [0], [0], [1], [0, 0, 1, 1], [], []>} : vector<4x64xbf16>, vector<64x192xbf16>, vector<4x192xf32> -> vector<4x192xf32>
    %34 = vector.extract_strided_slice %33 {offsets = [0, 0], sizes = [4, 64], strides = [1, 1]} : vector<4x192xf32> to vector<4x64xf32>
    %35 = vector.extract_strided_slice %33 {offsets = [0, 64], sizes = [4, 64], strides = [1, 1]} : vector<4x192xf32> to vector<4x64xf32>
    %36 = vector.extract_strided_slice %33 {offsets = [0, 128], sizes = [4, 64], strides = [1, 1]} : vector<4x192xf32> to vector<4x64xf32>
    %c0_19 = arith.constant 0 : index
    %c0_20 = arith.constant 0 : index
    %c0_21 = arith.constant 0 : index
    %37 = vector.load %arg6[%c0_19, %c0_20, %c0_21] : memref<2x64x64xbf16, #tpu.memory_space<vmem>>, vector<1x64x64xbf16>
    %38 = vector.shape_cast %37 : vector<1x64x64xbf16> to vector<64x64xbf16>
    %39 = vector.extract_strided_slice %34 {offsets = [0, 0], sizes = [4, 16], strides = [1, 1]} : vector<4x64xf32> to vector<4x16xf32>
    %40 = vector.extract_strided_slice %35 {offsets = [0, 0], sizes = [4, 16], strides = [1, 1]} : vector<4x64xf32> to vector<4x16xf32>
    %41 = vector.extract_strided_slice %36 {offsets = [0, 0], sizes = [4, 16], strides = [1, 1]} : vector<4x64xf32> to vector<4x16xf32>
    %42 = tpu.transpose %40, [1, 0] : vector<4x16xf32> -> vector<16x4xf32>
    %cst_22 = arith.constant dense<0.000000e+00> : vector<4x4xf32>
    %43 = tpu.matmul %39, %42, %cst_22 {dimension_numbers = #tpu.dot_dimension_numbers<[1], [0], [0], [1], [0, 0, 1, 1], [], []>} : vector<4x16xf32>, vector<16x4xf32>, vector<4x4xf32> -> vector<4x4xf32>
    %cst_23 = arith.constant 2.500000e-01 : f32
    %44 = vector.broadcast %cst_23 : f32 to vector<4x4xf32>
    %45 = arith.mulf %43, %44 : vector<4x4xf32>
    %46 = tpu.iota {dimensions = array<i32: 0>} : vector<4x4xi32>
    %47 = tpu.iota {dimensions = array<i32: 1>} : vector<4x4xi32>
    %48 = arith.cmpi sle, %47, %46 : vector<4x4xi32>
    %cst_24 = arith.constant -1.000000e+30 : f32
    %49 = vector.broadcast %cst_24 : f32 to vector<4x4xf32>
    %50 = arith.select %48, %45, %49 : vector<4x4xi1>, vector<4x4xf32>
    %cst_25 = arith.constant dense<0xFF800000> : vector<4xf32>
    %51 = vector.multi_reduction <maximumf>, %50, %cst_25 [1] : vector<4x4xf32> to vector<4xf32>
    %52 = vector.shape_cast %51 : vector<4xf32> to vector<4x1xf32>
    %53 = vector.broadcast %52 : vector<4x1xf32> to vector<4x4xf32>
    %54 = arith.subf %50, %53 : vector<4x4xf32>
    %55 = math.exp %54 : vector<4x4xf32>
    %cst_26 = arith.constant dense<0.000000e+00> : vector<4xf32>
    %56 = vector.multi_reduction <add>, %55, %cst_26 [1] : vector<4x4xf32> to vector<4xf32>
    %57 = vector.shape_cast %56 : vector<4xf32> to vector<4x1xf32>
    %58 = tpu.reciprocal %57 {approx = true} : vector<4x1xf32> -> vector<4x1xf32>
    %59 = vector.broadcast %58 : vector<4x1xf32> to vector<4x4xf32>
    %60 = arith.mulf %55, %59 : vector<4x4xf32>
    %cst_27 = arith.constant dense<0.000000e+00> : vector<4x16xf32>
    %61 = tpu.matmul %60, %41, %cst_27 {dimension_numbers = #tpu.dot_dimension_numbers<[1], [0], [0], [1], [0, 0, 1, 1], [], []>} : vector<4x4xf32>, vector<4x16xf32>, vector<4x16xf32> -> vector<4x16xf32>
    %62 = vector.extract_strided_slice %34 {offsets = [0, 16], sizes = [4, 16], strides = [1, 1]} : vector<4x64xf32> to vector<4x16xf32>
    %63 = vector.extract_strided_slice %35 {offsets = [0, 16], sizes = [4, 16], strides = [1, 1]} : vector<4x64xf32> to vector<4x16xf32>
    %64 = vector.extract_strided_slice %36 {offsets = [0, 16], sizes = [4, 16], strides = [1, 1]} : vector<4x64xf32> to vector<4x16xf32>
    %65 = tpu.transpose %63, [1, 0] : vector<4x16xf32> -> vector<16x4xf32>
    %cst_28 = arith.constant dense<0.000000e+00> : vector<4x4xf32>
    %66 = tpu.matmul %62, %65, %cst_28 {dimension_numbers = #tpu.dot_dimension_numbers<[1], [0], [0], [1], [0, 0, 1, 1], [], []>} : vector<4x16xf32>, vector<16x4xf32>, vector<4x4xf32> -> vector<4x4xf32>
    %cst_29 = arith.constant 2.500000e-01 : f32
    %67 = vector.broadcast %cst_29 : f32 to vector<4x4xf32>
    %68 = arith.mulf %66, %67 : vector<4x4xf32>
    %69 = tpu.iota {dimensions = array<i32: 0>} : vector<4x4xi32>
    %70 = tpu.iota {dimensions = array<i32: 1>} : vector<4x4xi32>
    %71 = arith.cmpi sle, %70, %69 : vector<4x4xi32>
    %cst_30 = arith.constant -1.000000e+30 : f32
    %72 = vector.broadcast %cst_30 : f32 to vector<4x4xf32>
    %73 = arith.select %71, %68, %72 : vector<4x4xi1>, vector<4x4xf32>
    %cst_31 = arith.constant dense<0xFF800000> : vector<4xf32>
    %74 = vector.multi_reduction <maximumf>, %73, %cst_31 [1] : vector<4x4xf32> to vector<4xf32>
    %75 = vector.shape_cast %74 : vector<4xf32> to vector<4x1xf32>
    %76 = vector.broadcast %75 : vector<4x1xf32> to vector<4x4xf32>
    %77 = arith.subf %73, %76 : vector<4x4xf32>
    %78 = math.exp %77 : vector<4x4xf32>
    %cst_32 = arith.constant dense<0.000000e+00> : vector<4xf32>
    %79 = vector.multi_reduction <add>, %78, %cst_32 [1] : vector<4x4xf32> to vector<4xf32>
    %80 = vector.shape_cast %79 : vector<4xf32> to vector<4x1xf32>
    %81 = tpu.reciprocal %80 {approx = true} : vector<4x1xf32> -> vector<4x1xf32>
    %82 = vector.broadcast %81 : vector<4x1xf32> to vector<4x4xf32>
    %83 = arith.mulf %78, %82 : vector<4x4xf32>
    %cst_33 = arith.constant dense<0.000000e+00> : vector<4x16xf32>
    %84 = tpu.matmul %83, %64, %cst_33 {dimension_numbers = #tpu.dot_dimension_numbers<[1], [0], [0], [1], [0, 0, 1, 1], [], []>} : vector<4x4xf32>, vector<4x16xf32>, vector<4x16xf32> -> vector<4x16xf32>
    %85 = vector.extract_strided_slice %34 {offsets = [0, 32], sizes = [4, 16], strides = [1, 1]} : vector<4x64xf32> to vector<4x16xf32>
    %86 = vector.extract_strided_slice %35 {offsets = [0, 32], sizes = [4, 16], strides = [1, 1]} : vector<4x64xf32> to vector<4x16xf32>
    %87 = vector.extract_strided_slice %36 {offsets = [0, 32], sizes = [4, 16], strides = [1, 1]} : vector<4x64xf32> to vector<4x16xf32>
    %88 = tpu.transpose %86, [1, 0] : vector<4x16xf32> -> vector<16x4xf32>
    %cst_34 = arith.constant dense<0.000000e+00> : vector<4x4xf32>
    %89 = tpu.matmul %85, %88, %cst_34 {dimension_numbers = #tpu.dot_dimension_numbers<[1], [0], [0], [1], [0, 0, 1, 1], [], []>} : vector<4x16xf32>, vector<16x4xf32>, vector<4x4xf32> -> vector<4x4xf32>
    %cst_35 = arith.constant 2.500000e-01 : f32
    %90 = vector.broadcast %cst_35 : f32 to vector<4x4xf32>
    %91 = arith.mulf %89, %90 : vector<4x4xf32>
    %92 = tpu.iota {dimensions = array<i32: 0>} : vector<4x4xi32>
    %93 = tpu.iota {dimensions = array<i32: 1>} : vector<4x4xi32>
    %94 = arith.cmpi sle, %93, %92 : vector<4x4xi32>
    %cst_36 = arith.constant -1.000000e+30 : f32
    %95 = vector.broadcast %cst_36 : f32 to vector<4x4xf32>
    %96 = arith.select %94, %91, %95 : vector<4x4xi1>, vector<4x4xf32>
    %cst_37 = arith.constant dense<0xFF800000> : vector<4xf32>
    %97 = vector.multi_reduction <maximumf>, %96, %cst_37 [1] : vector<4x4xf32> to vector<4xf32>
    %98 = vector.shape_cast %97 : vector<4xf32> to vector<4x1xf32>
    %99 = vector.broadcast %98 : vector<4x1xf32> to vector<4x4xf32>
    %100 = arith.subf %96, %99 : vector<4x4xf32>
    %101 = math.exp %100 : vector<4x4xf32>
    %cst_38 = arith.constant dense<0.000000e+00> : vector<4xf32>
    %102 = vector.multi_reduction <add>, %101, %cst_38 [1] : vector<4x4xf32> to vector<4xf32>
    %103 = vector.shape_cast %102 : vector<4xf32> to vector<4x1xf32>
    %104 = tpu.reciprocal %103 {approx = true} : vector<4x1xf32> -> vector<4x1xf32>
    %105 = vector.broadcast %104 : vector<4x1xf32> to vector<4x4xf32>
    %106 = arith.mulf %101, %105 : vector<4x4xf32>
    %cst_39 = arith.constant dense<0.000000e+00> : vector<4x16xf32>
    %107 = tpu.matmul %106, %87, %cst_39 {dimension_numbers = #tpu.dot_dimension_numbers<[1], [0], [0], [1], [0, 0, 1, 1], [], []>} : vector<4x4xf32>, vector<4x16xf32>, vector<4x16xf32> -> vector<4x16xf32>
    %108 = vector.extract_strided_slice %34 {offsets = [0, 48], sizes = [4, 16], strides = [1, 1]} : vector<4x64xf32> to vector<4x16xf32>
    %109 = vector.extract_strided_slice %35 {offsets = [0, 48], sizes = [4, 16], strides = [1, 1]} : vector<4x64xf32> to vector<4x16xf32>
    %110 = vector.extract_strided_slice %36 {offsets = [0, 48], sizes = [4, 16], strides = [1, 1]} : vector<4x64xf32> to vector<4x16xf32>
    %111 = tpu.transpose %109, [1, 0] : vector<4x16xf32> -> vector<16x4xf32>
    %cst_40 = arith.constant dense<0.000000e+00> : vector<4x4xf32>
    %112 = tpu.matmul %108, %111, %cst_40 {dimension_numbers = #tpu.dot_dimension_numbers<[1], [0], [0], [1], [0, 0, 1, 1], [], []>} : vector<4x16xf32>, vector<16x4xf32>, vector<4x4xf32> -> vector<4x4xf32>
    %cst_41 = arith.constant 2.500000e-01 : f32
    %113 = vector.broadcast %cst_41 : f32 to vector<4x4xf32>
    %114 = arith.mulf %112, %113 : vector<4x4xf32>
    %115 = tpu.iota {dimensions = array<i32: 0>} : vector<4x4xi32>
    %116 = tpu.iota {dimensions = array<i32: 1>} : vector<4x4xi32>
    %117 = arith.cmpi sle, %116, %115 : vector<4x4xi32>
    %cst_42 = arith.constant -1.000000e+30 : f32
    %118 = vector.broadcast %cst_42 : f32 to vector<4x4xf32>
    %119 = arith.select %117, %114, %118 : vector<4x4xi1>, vector<4x4xf32>
    %cst_43 = arith.constant dense<0xFF800000> : vector<4xf32>
    %120 = vector.multi_reduction <maximumf>, %119, %cst_43 [1] : vector<4x4xf32> to vector<4xf32>
    %121 = vector.shape_cast %120 : vector<4xf32> to vector<4x1xf32>
    %122 = vector.broadcast %121 : vector<4x1xf32> to vector<4x4xf32>
    %123 = arith.subf %119, %122 : vector<4x4xf32>
    %124 = math.exp %123 : vector<4x4xf32>
    %cst_44 = arith.constant dense<0.000000e+00> : vector<4xf32>
    %125 = vector.multi_reduction <add>, %124, %cst_44 [1] : vector<4x4xf32> to vector<4xf32>
    %126 = vector.shape_cast %125 : vector<4xf32> to vector<4x1xf32>
    %127 = tpu.reciprocal %126 {approx = true} : vector<4x1xf32> -> vector<4x1xf32>
    %128 = vector.broadcast %127 : vector<4x1xf32> to vector<4x4xf32>
    %129 = arith.mulf %124, %128 : vector<4x4xf32>
    %cst_45 = arith.constant dense<0.000000e+00> : vector<4x16xf32>
    %130 = tpu.matmul %129, %110, %cst_45 {dimension_numbers = #tpu.dot_dimension_numbers<[1], [0], [0], [1], [0, 0, 1, 1], [], []>} : vector<4x4xf32>, vector<4x16xf32>, vector<4x16xf32> -> vector<4x16xf32>
    %131 = tpu.concatenate %61, %84, %107, %130 in 1 : vector<4x16xf32>, vector<4x16xf32>, vector<4x16xf32>, vector<4x16xf32> -> vector<4x64xf32>
    %132 = arith.truncf %131 : vector<4x64xf32> to vector<4x64xbf16>
    %cst_46 = arith.constant dense<0.000000e+00> : vector<4x64xf32>
    %133 = tpu.matmul %132, %38, %cst_46 {dimension_numbers = #tpu.dot_dimension_numbers<[1], [0], [0], [1], [0, 0, 1, 1], [], []>} : vector<4x64xbf16>, vector<64x64xbf16>, vector<4x64xf32> -> vector<4x64xf32>
    %134 = arith.addf %1, %133 : vector<4x64xf32>
    %c0_47 = arith.constant 0 : index
    %c0_48 = arith.constant 0 : index
    %c0_49 = arith.constant 0 : index
    %135 = vector.load %arg7[%c0_47, %c0_48, %c0_49] : memref<2x1x64xf32, #tpu.memory_space<vmem>>, vector<1x1x64xf32>
    %136 = vector.shape_cast %135 : vector<1x1x64xf32> to vector<1x64xf32>
    %c0_50 = arith.constant 0 : index
    %c0_51 = arith.constant 0 : index
    %c0_52 = arith.constant 0 : index
    %137 = vector.load %arg8[%c0_50, %c0_51, %c0_52] : memref<2x1x64xf32, #tpu.memory_space<vmem>>, vector<1x1x64xf32>
    %138 = vector.shape_cast %137 : vector<1x1x64xf32> to vector<1x64xf32>
    %cst_53 = arith.constant dense<0.000000e+00> : vector<4xf32>
    %139 = vector.multi_reduction <add>, %134, %cst_53 [1] : vector<4x64xf32> to vector<4xf32>
    %140 = vector.shape_cast %139 : vector<4xf32> to vector<4x1xf32>
    %cst_54 = arith.constant 6.400000e+01 : f32
    %141 = vector.broadcast %cst_54 : f32 to vector<4x1xf32>
    %142 = arith.divf %140, %141 : vector<4x1xf32>
    %143 = vector.broadcast %142 : vector<4x1xf32> to vector<4x64xf32>
    %144 = arith.subf %134, %143 : vector<4x64xf32>
    %145 = arith.mulf %144, %144 : vector<4x64xf32>
    %cst_55 = arith.constant dense<0.000000e+00> : vector<4xf32>
    %146 = vector.multi_reduction <add>, %145, %cst_55 [1] : vector<4x64xf32> to vector<4xf32>
    %147 = vector.shape_cast %146 : vector<4xf32> to vector<4x1xf32>
    %cst_56 = arith.constant 6.400000e+01 : f32
    %148 = vector.broadcast %cst_56 : f32 to vector<4x1xf32>
    %149 = arith.divf %147, %148 : vector<4x1xf32>
    %150 = vector.broadcast %142 : vector<4x1xf32> to vector<4x64xf32>
    %151 = arith.subf %134, %150 : vector<4x64xf32>
    %cst_57 = arith.constant 9.99999974E-6 : f32
    %152 = vector.broadcast %cst_57 : f32 to vector<4x1xf32>
    %153 = arith.addf %149, %152 : vector<4x1xf32>
    %154 = math.rsqrt %153 : vector<4x1xf32>
    %155 = vector.broadcast %154 : vector<4x1xf32> to vector<4x64xf32>
    %156 = arith.mulf %151, %155 : vector<4x64xf32>
    %157 = vector.broadcast %136 : vector<1x64xf32> to vector<4x64xf32>
    %158 = arith.mulf %156, %157 : vector<4x64xf32>
    %159 = vector.broadcast %138 : vector<1x64xf32> to vector<4x64xf32>
    %160 = arith.addf %158, %159 : vector<4x64xf32>
    %c0_58 = arith.constant 0 : index
    %c0_59 = arith.constant 0 : index
    %c0_60 = arith.constant 0 : index
    %161 = vector.load %arg9[%c0_58, %c0_59, %c0_60] : memref<2x64x64xbf16, #tpu.memory_space<vmem>>, vector<1x64x64xbf16>
    %162 = vector.shape_cast %161 : vector<1x64x64xbf16> to vector<64x64xbf16>
    %163 = arith.truncf %160 : vector<4x64xf32> to vector<4x64xbf16>
    %cst_61 = arith.constant dense<0.000000e+00> : vector<4x64xf32>
    %164 = tpu.matmul %163, %162, %cst_61 {dimension_numbers = #tpu.dot_dimension_numbers<[1], [0], [0], [1], [0, 0, 1, 1], [], []>} : vector<4x64xbf16>, vector<64x64xbf16>, vector<4x64xf32> -> vector<4x64xf32>
    %c0_62 = arith.constant 0 : index
    %c0_63 = arith.constant 0 : index
    %c0_64 = arith.constant 0 : index
    %165 = vector.load %arg10[%c0_62, %c0_63, %c0_64] : memref<2x64x128xbf16, #tpu.memory_space<vmem>>, vector<1x64x128xbf16>
    %166 = vector.shape_cast %165 : vector<1x64x128xbf16> to vector<64x128xbf16>
    %167 = arith.truncf %3 : vector<4x64xf32> to vector<4x64xbf16>
    %cst_65 = arith.constant dense<0.000000e+00> : vector<4x128xf32>
    %168 = tpu.matmul %167, %166, %cst_65 {dimension_numbers = #tpu.dot_dimension_numbers<[1], [0], [0], [1], [0, 0, 1, 1], [], []>} : vector<4x64xbf16>, vector<64x128xbf16>, vector<4x128xf32> -> vector<4x128xf32>
    %169 = vector.extract_strided_slice %168 {offsets = [0, 0], sizes = [4, 64], strides = [1, 1]} : vector<4x128xf32> to vector<4x64xf32>
    %170 = vector.extract_strided_slice %168 {offsets = [0, 64], sizes = [4, 64], strides = [1, 1]} : vector<4x128xf32> to vector<4x64xf32>
    %c0_66 = arith.constant 0 : index
    %c0_67 = arith.constant 0 : index
    %c0_68 = arith.constant 0 : index
    %171 = vector.load %arg11[%c0_66, %c0_67, %c0_68] : memref<2x64x64xbf16, #tpu.memory_space<vmem>>, vector<1x64x64xbf16>
    %172 = vector.shape_cast %171 : vector<1x64x64xbf16> to vector<64x64xbf16>
    %173 = vector.extract_strided_slice %164 {offsets = [0, 0], sizes = [4, 16], strides = [1, 1]} : vector<4x64xf32> to vector<4x16xf32>
    %174 = vector.extract_strided_slice %169 {offsets = [0, 0], sizes = [4, 16], strides = [1, 1]} : vector<4x64xf32> to vector<4x16xf32>
    %175 = vector.extract_strided_slice %170 {offsets = [0, 0], sizes = [4, 16], strides = [1, 1]} : vector<4x64xf32> to vector<4x16xf32>
    %176 = tpu.transpose %174, [1, 0] : vector<4x16xf32> -> vector<16x4xf32>
    %cst_69 = arith.constant dense<0.000000e+00> : vector<4x4xf32>
    %177 = tpu.matmul %173, %176, %cst_69 {dimension_numbers = #tpu.dot_dimension_numbers<[1], [0], [0], [1], [0, 0, 1, 1], [], []>} : vector<4x16xf32>, vector<16x4xf32>, vector<4x4xf32> -> vector<4x4xf32>
    %cst_70 = arith.constant 2.500000e-01 : f32
    %178 = vector.broadcast %cst_70 : f32 to vector<4x4xf32>
    %179 = arith.mulf %177, %178 : vector<4x4xf32>
    %cst_71 = arith.constant dense<0xFF800000> : vector<4xf32>
    %180 = vector.multi_reduction <maximumf>, %179, %cst_71 [1] : vector<4x4xf32> to vector<4xf32>
    %181 = vector.shape_cast %180 : vector<4xf32> to vector<4x1xf32>
    %182 = vector.broadcast %181 : vector<4x1xf32> to vector<4x4xf32>
    %183 = arith.subf %179, %182 : vector<4x4xf32>
    %184 = math.exp %183 : vector<4x4xf32>
    %cst_72 = arith.constant dense<0.000000e+00> : vector<4xf32>
    %185 = vector.multi_reduction <add>, %184, %cst_72 [1] : vector<4x4xf32> to vector<4xf32>
    %186 = vector.shape_cast %185 : vector<4xf32> to vector<4x1xf32>
    %187 = tpu.reciprocal %186 {approx = true} : vector<4x1xf32> -> vector<4x1xf32>
    %188 = vector.broadcast %187 : vector<4x1xf32> to vector<4x4xf32>
    %189 = arith.mulf %184, %188 : vector<4x4xf32>
    %cst_73 = arith.constant dense<0.000000e+00> : vector<4x16xf32>
    %190 = tpu.matmul %189, %175, %cst_73 {dimension_numbers = #tpu.dot_dimension_numbers<[1], [0], [0], [1], [0, 0, 1, 1], [], []>} : vector<4x4xf32>, vector<4x16xf32>, vector<4x16xf32> -> vector<4x16xf32>
    %191 = vector.extract_strided_slice %164 {offsets = [0, 16], sizes = [4, 16], strides = [1, 1]} : vector<4x64xf32> to vector<4x16xf32>
    %192 = vector.extract_strided_slice %169 {offsets = [0, 16], sizes = [4, 16], strides = [1, 1]} : vector<4x64xf32> to vector<4x16xf32>
    %193 = vector.extract_strided_slice %170 {offsets = [0, 16], sizes = [4, 16], strides = [1, 1]} : vector<4x64xf32> to vector<4x16xf32>
    %194 = tpu.transpose %192, [1, 0] : vector<4x16xf32> -> vector<16x4xf32>
    %cst_74 = arith.constant dense<0.000000e+00> : vector<4x4xf32>
    %195 = tpu.matmul %191, %194, %cst_74 {dimension_numbers = #tpu.dot_dimension_numbers<[1], [0], [0], [1], [0, 0, 1, 1], [], []>} : vector<4x16xf32>, vector<16x4xf32>, vector<4x4xf32> -> vector<4x4xf32>
    %cst_75 = arith.constant 2.500000e-01 : f32
    %196 = vector.broadcast %cst_75 : f32 to vector<4x4xf32>
    %197 = arith.mulf %195, %196 : vector<4x4xf32>
    %cst_76 = arith.constant dense<0xFF800000> : vector<4xf32>
    %198 = vector.multi_reduction <maximumf>, %197, %cst_76 [1] : vector<4x4xf32> to vector<4xf32>
    %199 = vector.shape_cast %198 : vector<4xf32> to vector<4x1xf32>
    %200 = vector.broadcast %199 : vector<4x1xf32> to vector<4x4xf32>
    %201 = arith.subf %197, %200 : vector<4x4xf32>
    %202 = math.exp %201 : vector<4x4xf32>
    %cst_77 = arith.constant dense<0.000000e+00> : vector<4xf32>
    %203 = vector.multi_reduction <add>, %202, %cst_77 [1] : vector<4x4xf32> to vector<4xf32>
    %204 = vector.shape_cast %203 : vector<4xf32> to vector<4x1xf32>
    %205 = tpu.reciprocal %204 {approx = true} : vector<4x1xf32> -> vector<4x1xf32>
    %206 = vector.broadcast %205 : vector<4x1xf32> to vector<4x4xf32>
    %207 = arith.mulf %202, %206 : vector<4x4xf32>
    %cst_78 = arith.constant dense<0.000000e+00> : vector<4x16xf32>
    %208 = tpu.matmul %207, %193, %cst_78 {dimension_numbers = #tpu.dot_dimension_numbers<[1], [0], [0], [1], [0, 0, 1, 1], [], []>} : vector<4x4xf32>, vector<4x16xf32>, vector<4x16xf32> -> vector<4x16xf32>
    %209 = vector.extract_strided_slice %164 {offsets = [0, 32], sizes = [4, 16], strides = [1, 1]} : vector<4x64xf32> to vector<4x16xf32>
    %210 = vector.extract_strided_slice %169 {offsets = [0, 32], sizes = [4, 16], strides = [1, 1]} : vector<4x64xf32> to vector<4x16xf32>
    %211 = vector.extract_strided_slice %170 {offsets = [0, 32], sizes = [4, 16], strides = [1, 1]} : vector<4x64xf32> to vector<4x16xf32>
    %212 = tpu.transpose %210, [1, 0] : vector<4x16xf32> -> vector<16x4xf32>
    %cst_79 = arith.constant dense<0.000000e+00> : vector<4x4xf32>
    %213 = tpu.matmul %209, %212, %cst_79 {dimension_numbers = #tpu.dot_dimension_numbers<[1], [0], [0], [1], [0, 0, 1, 1], [], []>} : vector<4x16xf32>, vector<16x4xf32>, vector<4x4xf32> -> vector<4x4xf32>
    %cst_80 = arith.constant 2.500000e-01 : f32
    %214 = vector.broadcast %cst_80 : f32 to vector<4x4xf32>
    %215 = arith.mulf %213, %214 : vector<4x4xf32>
    %cst_81 = arith.constant dense<0xFF800000> : vector<4xf32>
    %216 = vector.multi_reduction <maximumf>, %215, %cst_81 [1] : vector<4x4xf32> to vector<4xf32>
    %217 = vector.shape_cast %216 : vector<4xf32> to vector<4x1xf32>
    %218 = vector.broadcast %217 : vector<4x1xf32> to vector<4x4xf32>
    %219 = arith.subf %215, %218 : vector<4x4xf32>
    %220 = math.exp %219 : vector<4x4xf32>
    %cst_82 = arith.constant dense<0.000000e+00> : vector<4xf32>
    %221 = vector.multi_reduction <add>, %220, %cst_82 [1] : vector<4x4xf32> to vector<4xf32>
    %222 = vector.shape_cast %221 : vector<4xf32> to vector<4x1xf32>
    %223 = tpu.reciprocal %222 {approx = true} : vector<4x1xf32> -> vector<4x1xf32>
    %224 = vector.broadcast %223 : vector<4x1xf32> to vector<4x4xf32>
    %225 = arith.mulf %220, %224 : vector<4x4xf32>
    %cst_83 = arith.constant dense<0.000000e+00> : vector<4x16xf32>
    %226 = tpu.matmul %225, %211, %cst_83 {dimension_numbers = #tpu.dot_dimension_numbers<[1], [0], [0], [1], [0, 0, 1, 1], [], []>} : vector<4x4xf32>, vector<4x16xf32>, vector<4x16xf32> -> vector<4x16xf32>
    %227 = vector.extract_strided_slice %164 {offsets = [0, 48], sizes = [4, 16], strides = [1, 1]} : vector<4x64xf32> to vector<4x16xf32>
    %228 = vector.extract_strided_slice %169 {offsets = [0, 48], sizes = [4, 16], strides = [1, 1]} : vector<4x64xf32> to vector<4x16xf32>
    %229 = vector.extract_strided_slice %170 {offsets = [0, 48], sizes = [4, 16], strides = [1, 1]} : vector<4x64xf32> to vector<4x16xf32>
    %230 = tpu.transpose %228, [1, 0] : vector<4x16xf32> -> vector<16x4xf32>
    %cst_84 = arith.constant dense<0.000000e+00> : vector<4x4xf32>
    %231 = tpu.matmul %227, %230, %cst_84 {dimension_numbers = #tpu.dot_dimension_numbers<[1], [0], [0], [1], [0, 0, 1, 1], [], []>} : vector<4x16xf32>, vector<16x4xf32>, vector<4x4xf32> -> vector<4x4xf32>
    %cst_85 = arith.constant 2.500000e-01 : f32
    %232 = vector.broadcast %cst_85 : f32 to vector<4x4xf32>
    %233 = arith.mulf %231, %232 : vector<4x4xf32>
    %cst_86 = arith.constant dense<0xFF800000> : vector<4xf32>
    %234 = vector.multi_reduction <maximumf>, %233, %cst_86 [1] : vector<4x4xf32> to vector<4xf32>
    %235 = vector.shape_cast %234 : vector<4xf32> to vector<4x1xf32>
    %236 = vector.broadcast %235 : vector<4x1xf32> to vector<4x4xf32>
    %237 = arith.subf %233, %236 : vector<4x4xf32>
    %238 = math.exp %237 : vector<4x4xf32>
    %cst_87 = arith.constant dense<0.000000e+00> : vector<4xf32>
    %239 = vector.multi_reduction <add>, %238, %cst_87 [1] : vector<4x4xf32> to vector<4xf32>
    %240 = vector.shape_cast %239 : vector<4xf32> to vector<4x1xf32>
    %241 = tpu.reciprocal %240 {approx = true} : vector<4x1xf32> -> vector<4x1xf32>
    %242 = vector.broadcast %241 : vector<4x1xf32> to vector<4x4xf32>
    %243 = arith.mulf %238, %242 : vector<4x4xf32>
    %cst_88 = arith.constant dense<0.000000e+00> : vector<4x16xf32>
    %244 = tpu.matmul %243, %229, %cst_88 {dimension_numbers = #tpu.dot_dimension_numbers<[1], [0], [0], [1], [0, 0, 1, 1], [], []>} : vector<4x4xf32>, vector<4x16xf32>, vector<4x16xf32> -> vector<4x16xf32>
    %245 = tpu.concatenate %190, %208, %226, %244 in 1 : vector<4x16xf32>, vector<4x16xf32>, vector<4x16xf32>, vector<4x16xf32> -> vector<4x64xf32>
    %246 = arith.truncf %245 : vector<4x64xf32> to vector<4x64xbf16>
    %cst_89 = arith.constant dense<0.000000e+00> : vector<4x64xf32>
    %247 = tpu.matmul %246, %172, %cst_89 {dimension_numbers = #tpu.dot_dimension_numbers<[1], [0], [0], [1], [0, 0, 1, 1], [], []>} : vector<4x64xbf16>, vector<64x64xbf16>, vector<4x64xf32> -> vector<4x64xf32>
    %248 = arith.addf %134, %247 : vector<4x64xf32>
    %c0_90 = arith.constant 0 : index
    %c0_91 = arith.constant 0 : index
    %c0_92 = arith.constant 0 : index
    %249 = vector.load %arg12[%c0_90, %c0_91, %c0_92] : memref<2x1x64xf32, #tpu.memory_space<vmem>>, vector<1x1x64xf32>
    %250 = vector.shape_cast %249 : vector<1x1x64xf32> to vector<1x64xf32>
    %c0_93 = arith.constant 0 : index
    %c0_94 = arith.constant 0 : index
    %c0_95 = arith.constant 0 : index
    %251 = vector.load %arg13[%c0_93, %c0_94, %c0_95] : memref<2x1x64xf32, #tpu.memory_space<vmem>>, vector<1x1x64xf32>
    %252 = vector.shape_cast %251 : vector<1x1x64xf32> to vector<1x64xf32>
    %cst_96 = arith.constant dense<0.000000e+00> : vector<4xf32>
    %253 = vector.multi_reduction <add>, %248, %cst_96 [1] : vector<4x64xf32> to vector<4xf32>
    %254 = vector.shape_cast %253 : vector<4xf32> to vector<4x1xf32>
    %cst_97 = arith.constant 6.400000e+01 : f32
    %255 = vector.broadcast %cst_97 : f32 to vector<4x1xf32>
    %256 = arith.divf %254, %255 : vector<4x1xf32>
    %257 = vector.broadcast %256 : vector<4x1xf32> to vector<4x64xf32>
    %258 = arith.subf %248, %257 : vector<4x64xf32>
    %259 = arith.mulf %258, %258 : vector<4x64xf32>
    %cst_98 = arith.constant dense<0.000000e+00> : vector<4xf32>
    %260 = vector.multi_reduction <add>, %259, %cst_98 [1] : vector<4x64xf32> to vector<4xf32>
    %261 = vector.shape_cast %260 : vector<4xf32> to vector<4x1xf32>
    %cst_99 = arith.constant 6.400000e+01 : f32
    %262 = vector.broadcast %cst_99 : f32 to vector<4x1xf32>
    %263 = arith.divf %261, %262 : vector<4x1xf32>
    %264 = vector.broadcast %256 : vector<4x1xf32> to vector<4x64xf32>
    %265 = arith.subf %248, %264 : vector<4x64xf32>
    %cst_100 = arith.constant 9.99999974E-6 : f32
    %266 = vector.broadcast %cst_100 : f32 to vector<4x1xf32>
    %267 = arith.addf %263, %266 : vector<4x1xf32>
    %268 = math.rsqrt %267 : vector<4x1xf32>
    %269 = vector.broadcast %268 : vector<4x1xf32> to vector<4x64xf32>
    %270 = arith.mulf %265, %269 : vector<4x64xf32>
    %271 = vector.broadcast %250 : vector<1x64xf32> to vector<4x64xf32>
    %272 = arith.mulf %270, %271 : vector<4x64xf32>
    %273 = vector.broadcast %252 : vector<1x64xf32> to vector<4x64xf32>
    %274 = arith.addf %272, %273 : vector<4x64xf32>
    %c0_101 = arith.constant 0 : index
    %c0_102 = arith.constant 0 : index
    %c0_103 = arith.constant 0 : index
    %275 = vector.load %arg14[%c0_101, %c0_102, %c0_103] : memref<2x64x256xbf16, #tpu.memory_space<vmem>>, vector<1x64x256xbf16>
    %276 = vector.shape_cast %275 : vector<1x64x256xbf16> to vector<64x256xbf16>
    %277 = arith.truncf %274 : vector<4x64xf32> to vector<4x64xbf16>
    %cst_104 = arith.constant dense<0.000000e+00> : vector<4x256xf32>
    %278 = tpu.matmul %277, %276, %cst_104 {dimension_numbers = #tpu.dot_dimension_numbers<[1], [0], [0], [1], [0, 0, 1, 1], [], []>} : vector<4x64xbf16>, vector<64x256xbf16>, vector<4x256xf32> -> vector<4x256xf32>
    %c0_105 = arith.constant 0 : index
    %c0_106 = arith.constant 0 : index
    %c0_107 = arith.constant 0 : index
    %279 = vector.load %arg15[%c0_105, %c0_106, %c0_107] : memref<2x1x256xf32, #tpu.memory_space<vmem>>, vector<1x1x256xf32>
    %280 = vector.shape_cast %279 : vector<1x1x256xf32> to vector<1x256xf32>
    %281 = vector.broadcast %280 : vector<1x256xf32> to vector<4x256xf32>
    %282 = arith.addf %278, %281 : vector<4x256xf32>
    %cst_108 = arith.constant 0.000000e+00 : f32
    %283 = vector.broadcast %cst_108 : f32 to vector<4x256xf32>
    %284 = arith.maximumf %282, %283 : vector<4x256xf32>
    %c0_109 = arith.constant 0 : index
    %c0_110 = arith.constant 0 : index
    %c0_111 = arith.constant 0 : index
    %285 = vector.load %arg16[%c0_109, %c0_110, %c0_111] : memref<2x256x64xbf16, #tpu.memory_space<vmem>>, vector<1x256x64xbf16>
    %286 = vector.shape_cast %285 : vector<1x256x64xbf16> to vector<256x64xbf16>
    %287 = arith.truncf %284 : vector<4x256xf32> to vector<4x256xbf16>
    %cst_112 = arith.constant dense<0.000000e+00> : vector<4x64xf32>
    %288 = tpu.matmul %287, %286, %cst_112 {dimension_numbers = #tpu.dot_dimension_numbers<[1], [0], [0], [1], [0, 0, 1, 1], [], []>} : vector<4x256xbf16>, vector<256x64xbf16>, vector<4x64xf32> -> vector<4x64xf32>
    %289 = arith.addf %248, %288 : vector<4x64xf32>
    %c0_113 = arith.constant 0 : index
    %c0_114 = arith.constant 0 : index
    %c0_115 = arith.constant 0 : index
    %290 = vector.load %arg17[%c0_113, %c0_114, %c0_115] : memref<2x1x64xf32, #tpu.memory_space<vmem>>, vector<1x1x64xf32>
    %291 = vector.shape_cast %290 : vector<1x1x64xf32> to vector<1x64xf32>
    %292 = vector.broadcast %291 : vector<1x64xf32> to vector<4x64xf32>
    %293 = arith.addf %289, %292 : vector<4x64xf32>
    %c1 = arith.constant 1 : index
    %c0_116 = arith.constant 0 : index
    %c0_117 = arith.constant 0 : index
    %294 = vector.load %arg3[%c1, %c0_116, %c0_117] : memref<2x1x64xf32, #tpu.memory_space<vmem>>, vector<1x1x64xf32>
    %295 = vector.shape_cast %294 : vector<1x1x64xf32> to vector<1x64xf32>
    %c1_118 = arith.constant 1 : index
    %c0_119 = arith.constant 0 : index
    %c0_120 = arith.constant 0 : index
    %296 = vector.load %arg4[%c1_118, %c0_119, %c0_120] : memref<2x1x64xf32, #tpu.memory_space<vmem>>, vector<1x1x64xf32>
    %297 = vector.shape_cast %296 : vector<1x1x64xf32> to vector<1x64xf32>
    %cst_121 = arith.constant dense<0.000000e+00> : vector<4xf32>
    %298 = vector.multi_reduction <add>, %293, %cst_121 [1] : vector<4x64xf32> to vector<4xf32>
    %299 = vector.shape_cast %298 : vector<4xf32> to vector<4x1xf32>
    %cst_122 = arith.constant 6.400000e+01 : f32
    %300 = vector.broadcast %cst_122 : f32 to vector<4x1xf32>
    %301 = arith.divf %299, %300 : vector<4x1xf32>
    %302 = vector.broadcast %301 : vector<4x1xf32> to vector<4x64xf32>
    %303 = arith.subf %293, %302 : vector<4x64xf32>
    %304 = arith.mulf %303, %303 : vector<4x64xf32>
    %cst_123 = arith.constant dense<0.000000e+00> : vector<4xf32>
    %305 = vector.multi_reduction <add>, %304, %cst_123 [1] : vector<4x64xf32> to vector<4xf32>
    %306 = vector.shape_cast %305 : vector<4xf32> to vector<4x1xf32>
    %cst_124 = arith.constant 6.400000e+01 : f32
    %307 = vector.broadcast %cst_124 : f32 to vector<4x1xf32>
    %308 = arith.divf %306, %307 : vector<4x1xf32>
    %309 = vector.broadcast %301 : vector<4x1xf32> to vector<4x64xf32>
    %310 = arith.subf %293, %309 : vector<4x64xf32>
    %cst_125 = arith.constant 9.99999974E-6 : f32
    %311 = vector.broadcast %cst_125 : f32 to vector<4x1xf32>
    %312 = arith.addf %308, %311 : vector<4x1xf32>
    %313 = math.rsqrt %312 : vector<4x1xf32>
    %314 = vector.broadcast %313 : vector<4x1xf32> to vector<4x64xf32>
    %315 = arith.mulf %310, %314 : vector<4x64xf32>
    %316 = vector.broadcast %295 : vector<1x64xf32> to vector<4x64xf32>
    %317 = arith.mulf %315, %316 : vector<4x64xf32>
    %318 = vector.broadcast %297 : vector<1x64xf32> to vector<4x64xf32>
    %319 = arith.addf %317, %318 : vector<4x64xf32>
    %c1_126 = arith.constant 1 : index
    %c0_127 = arith.constant 0 : index
    %c0_128 = arith.constant 0 : index
    %320 = vector.load %arg5[%c1_126, %c0_127, %c0_128] : memref<2x64x192xbf16, #tpu.memory_space<vmem>>, vector<1x64x192xbf16>
    %321 = vector.shape_cast %320 : vector<1x64x192xbf16> to vector<64x192xbf16>
    %322 = arith.truncf %319 : vector<4x64xf32> to vector<4x64xbf16>
    %cst_129 = arith.constant dense<0.000000e+00> : vector<4x192xf32>
    %323 = tpu.matmul %322, %321, %cst_129 {dimension_numbers = #tpu.dot_dimension_numbers<[1], [0], [0], [1], [0, 0, 1, 1], [], []>} : vector<4x64xbf16>, vector<64x192xbf16>, vector<4x192xf32> -> vector<4x192xf32>
    %324 = vector.extract_strided_slice %323 {offsets = [0, 0], sizes = [4, 64], strides = [1, 1]} : vector<4x192xf32> to vector<4x64xf32>
    %325 = vector.extract_strided_slice %323 {offsets = [0, 64], sizes = [4, 64], strides = [1, 1]} : vector<4x192xf32> to vector<4x64xf32>
    %326 = vector.extract_strided_slice %323 {offsets = [0, 128], sizes = [4, 64], strides = [1, 1]} : vector<4x192xf32> to vector<4x64xf32>
    %c1_130 = arith.constant 1 : index
    %c0_131 = arith.constant 0 : index
    %c0_132 = arith.constant 0 : index
    %327 = vector.load %arg6[%c1_130, %c0_131, %c0_132] : memref<2x64x64xbf16, #tpu.memory_space<vmem>>, vector<1x64x64xbf16>
    %328 = vector.shape_cast %327 : vector<1x64x64xbf16> to vector<64x64xbf16>
    %329 = vector.extract_strided_slice %324 {offsets = [0, 0], sizes = [4, 16], strides = [1, 1]} : vector<4x64xf32> to vector<4x16xf32>
    %330 = vector.extract_strided_slice %325 {offsets = [0, 0], sizes = [4, 16], strides = [1, 1]} : vector<4x64xf32> to vector<4x16xf32>
    %331 = vector.extract_strided_slice %326 {offsets = [0, 0], sizes = [4, 16], strides = [1, 1]} : vector<4x64xf32> to vector<4x16xf32>
    %332 = tpu.transpose %330, [1, 0] : vector<4x16xf32> -> vector<16x4xf32>
    %cst_133 = arith.constant dense<0.000000e+00> : vector<4x4xf32>
    %333 = tpu.matmul %329, %332, %cst_133 {dimension_numbers = #tpu.dot_dimension_numbers<[1], [0], [0], [1], [0, 0, 1, 1], [], []>} : vector<4x16xf32>, vector<16x4xf32>, vector<4x4xf32> -> vector<4x4xf32>
    %cst_134 = arith.constant 2.500000e-01 : f32
    %334 = vector.broadcast %cst_134 : f32 to vector<4x4xf32>
    %335 = arith.mulf %333, %334 : vector<4x4xf32>
    %336 = tpu.iota {dimensions = array<i32: 0>} : vector<4x4xi32>
    %337 = tpu.iota {dimensions = array<i32: 1>} : vector<4x4xi32>
    %338 = arith.cmpi sle, %337, %336 : vector<4x4xi32>
    %cst_135 = arith.constant -1.000000e+30 : f32
    %339 = vector.broadcast %cst_135 : f32 to vector<4x4xf32>
    %340 = arith.select %338, %335, %339 : vector<4x4xi1>, vector<4x4xf32>
    %cst_136 = arith.constant dense<0xFF800000> : vector<4xf32>
    %341 = vector.multi_reduction <maximumf>, %340, %cst_136 [1] : vector<4x4xf32> to vector<4xf32>
    %342 = vector.shape_cast %341 : vector<4xf32> to vector<4x1xf32>
    %343 = vector.broadcast %342 : vector<4x1xf32> to vector<4x4xf32>
    %344 = arith.subf %340, %343 : vector<4x4xf32>
    %345 = math.exp %344 : vector<4x4xf32>
    %cst_137 = arith.constant dense<0.000000e+00> : vector<4xf32>
    %346 = vector.multi_reduction <add>, %345, %cst_137 [1] : vector<4x4xf32> to vector<4xf32>
    %347 = vector.shape_cast %346 : vector<4xf32> to vector<4x1xf32>
    %348 = tpu.reciprocal %347 {approx = true} : vector<4x1xf32> -> vector<4x1xf32>
    %349 = vector.broadcast %348 : vector<4x1xf32> to vector<4x4xf32>
    %350 = arith.mulf %345, %349 : vector<4x4xf32>
    %cst_138 = arith.constant dense<0.000000e+00> : vector<4x16xf32>
    %351 = tpu.matmul %350, %331, %cst_138 {dimension_numbers = #tpu.dot_dimension_numbers<[1], [0], [0], [1], [0, 0, 1, 1], [], []>} : vector<4x4xf32>, vector<4x16xf32>, vector<4x16xf32> -> vector<4x16xf32>
    %352 = vector.extract_strided_slice %324 {offsets = [0, 16], sizes = [4, 16], strides = [1, 1]} : vector<4x64xf32> to vector<4x16xf32>
    %353 = vector.extract_strided_slice %325 {offsets = [0, 16], sizes = [4, 16], strides = [1, 1]} : vector<4x64xf32> to vector<4x16xf32>
    %354 = vector.extract_strided_slice %326 {offsets = [0, 16], sizes = [4, 16], strides = [1, 1]} : vector<4x64xf32> to vector<4x16xf32>
    %355 = tpu.transpose %353, [1, 0] : vector<4x16xf32> -> vector<16x4xf32>
    %cst_139 = arith.constant dense<0.000000e+00> : vector<4x4xf32>
    %356 = tpu.matmul %352, %355, %cst_139 {dimension_numbers = #tpu.dot_dimension_numbers<[1], [0], [0], [1], [0, 0, 1, 1], [], []>} : vector<4x16xf32>, vector<16x4xf32>, vector<4x4xf32> -> vector<4x4xf32>
    %cst_140 = arith.constant 2.500000e-01 : f32
    %357 = vector.broadcast %cst_140 : f32 to vector<4x4xf32>
    %358 = arith.mulf %356, %357 : vector<4x4xf32>
    %359 = tpu.iota {dimensions = array<i32: 0>} : vector<4x4xi32>
    %360 = tpu.iota {dimensions = array<i32: 1>} : vector<4x4xi32>
    %361 = arith.cmpi sle, %360, %359 : vector<4x4xi32>
    %cst_141 = arith.constant -1.000000e+30 : f32
    %362 = vector.broadcast %cst_141 : f32 to vector<4x4xf32>
    %363 = arith.select %361, %358, %362 : vector<4x4xi1>, vector<4x4xf32>
    %cst_142 = arith.constant dense<0xFF800000> : vector<4xf32>
    %364 = vector.multi_reduction <maximumf>, %363, %cst_142 [1] : vector<4x4xf32> to vector<4xf32>
    %365 = vector.shape_cast %364 : vector<4xf32> to vector<4x1xf32>
    %366 = vector.broadcast %365 : vector<4x1xf32> to vector<4x4xf32>
    %367 = arith.subf %363, %366 : vector<4x4xf32>
    %368 = math.exp %367 : vector<4x4xf32>
    %cst_143 = arith.constant dense<0.000000e+00> : vector<4xf32>
    %369 = vector.multi_reduction <add>, %368, %cst_143 [1] : vector<4x4xf32> to vector<4xf32>
    %370 = vector.shape_cast %369 : vector<4xf32> to vector<4x1xf32>
    %371 = tpu.reciprocal %370 {approx = true} : vector<4x1xf32> -> vector<4x1xf32>
    %372 = vector.broadcast %371 : vector<4x1xf32> to vector<4x4xf32>
    %373 = arith.mulf %368, %372 : vector<4x4xf32>
    %cst_144 = arith.constant dense<0.000000e+00> : vector<4x16xf32>
    %374 = tpu.matmul %373, %354, %cst_144 {dimension_numbers = #tpu.dot_dimension_numbers<[1], [0], [0], [1], [0, 0, 1, 1], [], []>} : vector<4x4xf32>, vector<4x16xf32>, vector<4x16xf32> -> vector<4x16xf32>
    %375 = vector.extract_strided_slice %324 {offsets = [0, 32], sizes = [4, 16], strides = [1, 1]} : vector<4x64xf32> to vector<4x16xf32>
    %376 = vector.extract_strided_slice %325 {offsets = [0, 32], sizes = [4, 16], strides = [1, 1]} : vector<4x64xf32> to vector<4x16xf32>
    %377 = vector.extract_strided_slice %326 {offsets = [0, 32], sizes = [4, 16], strides = [1, 1]} : vector<4x64xf32> to vector<4x16xf32>
    %378 = tpu.transpose %376, [1, 0] : vector<4x16xf32> -> vector<16x4xf32>
    %cst_145 = arith.constant dense<0.000000e+00> : vector<4x4xf32>
    %379 = tpu.matmul %375, %378, %cst_145 {dimension_numbers = #tpu.dot_dimension_numbers<[1], [0], [0], [1], [0, 0, 1, 1], [], []>} : vector<4x16xf32>, vector<16x4xf32>, vector<4x4xf32> -> vector<4x4xf32>
    %cst_146 = arith.constant 2.500000e-01 : f32
    %380 = vector.broadcast %cst_146 : f32 to vector<4x4xf32>
    %381 = arith.mulf %379, %380 : vector<4x4xf32>
    %382 = tpu.iota {dimensions = array<i32: 0>} : vector<4x4xi32>
    %383 = tpu.iota {dimensions = array<i32: 1>} : vector<4x4xi32>
    %384 = arith.cmpi sle, %383, %382 : vector<4x4xi32>
    %cst_147 = arith.constant -1.000000e+30 : f32
    %385 = vector.broadcast %cst_147 : f32 to vector<4x4xf32>
    %386 = arith.select %384, %381, %385 : vector<4x4xi1>, vector<4x4xf32>
    %cst_148 = arith.constant dense<0xFF800000> : vector<4xf32>
    %387 = vector.multi_reduction <maximumf>, %386, %cst_148 [1] : vector<4x4xf32> to vector<4xf32>
    %388 = vector.shape_cast %387 : vector<4xf32> to vector<4x1xf32>
    %389 = vector.broadcast %388 : vector<4x1xf32> to vector<4x4xf32>
    %390 = arith.subf %386, %389 : vector<4x4xf32>
    %391 = math.exp %390 : vector<4x4xf32>
    %cst_149 = arith.constant dense<0.000000e+00> : vector<4xf32>
    %392 = vector.multi_reduction <add>, %391, %cst_149 [1] : vector<4x4xf32> to vector<4xf32>
    %393 = vector.shape_cast %392 : vector<4xf32> to vector<4x1xf32>
    %394 = tpu.reciprocal %393 {approx = true} : vector<4x1xf32> -> vector<4x1xf32>
    %395 = vector.broadcast %394 : vector<4x1xf32> to vector<4x4xf32>
    %396 = arith.mulf %391, %395 : vector<4x4xf32>
    %cst_150 = arith.constant dense<0.000000e+00> : vector<4x16xf32>
    %397 = tpu.matmul %396, %377, %cst_150 {dimension_numbers = #tpu.dot_dimension_numbers<[1], [0], [0], [1], [0, 0, 1, 1], [], []>} : vector<4x4xf32>, vector<4x16xf32>, vector<4x16xf32> -> vector<4x16xf32>
    %398 = vector.extract_strided_slice %324 {offsets = [0, 48], sizes = [4, 16], strides = [1, 1]} : vector<4x64xf32> to vector<4x16xf32>
    %399 = vector.extract_strided_slice %325 {offsets = [0, 48], sizes = [4, 16], strides = [1, 1]} : vector<4x64xf32> to vector<4x16xf32>
    %400 = vector.extract_strided_slice %326 {offsets = [0, 48], sizes = [4, 16], strides = [1, 1]} : vector<4x64xf32> to vector<4x16xf32>
    %401 = tpu.transpose %399, [1, 0] : vector<4x16xf32> -> vector<16x4xf32>
    %cst_151 = arith.constant dense<0.000000e+00> : vector<4x4xf32>
    %402 = tpu.matmul %398, %401, %cst_151 {dimension_numbers = #tpu.dot_dimension_numbers<[1], [0], [0], [1], [0, 0, 1, 1], [], []>} : vector<4x16xf32>, vector<16x4xf32>, vector<4x4xf32> -> vector<4x4xf32>
    %cst_152 = arith.constant 2.500000e-01 : f32
    %403 = vector.broadcast %cst_152 : f32 to vector<4x4xf32>
    %404 = arith.mulf %402, %403 : vector<4x4xf32>
    %405 = tpu.iota {dimensions = array<i32: 0>} : vector<4x4xi32>
    %406 = tpu.iota {dimensions = array<i32: 1>} : vector<4x4xi32>
    %407 = arith.cmpi sle, %406, %405 : vector<4x4xi32>
    %cst_153 = arith.constant -1.000000e+30 : f32
    %408 = vector.broadcast %cst_153 : f32 to vector<4x4xf32>
    %409 = arith.select %407, %404, %408 : vector<4x4xi1>, vector<4x4xf32>
    %cst_154 = arith.constant dense<0xFF800000> : vector<4xf32>
    %410 = vector.multi_reduction <maximumf>, %409, %cst_154 [1] : vector<4x4xf32> to vector<4xf32>
    %411 = vector.shape_cast %410 : vector<4xf32> to vector<4x1xf32>
    %412 = vector.broadcast %411 : vector<4x1xf32> to vector<4x4xf32>
    %413 = arith.subf %409, %412 : vector<4x4xf32>
    %414 = math.exp %413 : vector<4x4xf32>
    %cst_155 = arith.constant dense<0.000000e+00> : vector<4xf32>
    %415 = vector.multi_reduction <add>, %414, %cst_155 [1] : vector<4x4xf32> to vector<4xf32>
    %416 = vector.shape_cast %415 : vector<4xf32> to vector<4x1xf32>
    %417 = tpu.reciprocal %416 {approx = true} : vector<4x1xf32> -> vector<4x1xf32>
    %418 = vector.broadcast %417 : vector<4x1xf32> to vector<4x4xf32>
    %419 = arith.mulf %414, %418 : vector<4x4xf32>
    %cst_156 = arith.constant dense<0.000000e+00> : vector<4x16xf32>
    %420 = tpu.matmul %419, %400, %cst_156 {dimension_numbers = #tpu.dot_dimension_numbers<[1], [0], [0], [1], [0, 0, 1, 1], [], []>} : vector<4x4xf32>, vector<4x16xf32>, vector<4x16xf32> -> vector<4x16xf32>
    %421 = tpu.concatenate %351, %374, %397, %420 in 1 : vector<4x16xf32>, vector<4x16xf32>, vector<4x16xf32>, vector<4x16xf32> -> vector<4x64xf32>
    %422 = arith.truncf %421 : vector<4x64xf32> to vector<4x64xbf16>
    %cst_157 = arith.constant dense<0.000000e+00> : vector<4x64xf32>
    %423 = tpu.matmul %422, %328, %cst_157 {dimension_numbers = #tpu.dot_dimension_numbers<[1], [0], [0], [1], [0, 0, 1, 1], [], []>} : vector<4x64xbf16>, vector<64x64xbf16>, vector<4x64xf32> -> vector<4x64xf32>
    %424 = arith.addf %293, %423 : vector<4x64xf32>
    %c1_158 = arith.constant 1 : index
    %c0_159 = arith.constant 0 : index
    %c0_160 = arith.constant 0 : index
    %425 = vector.load %arg7[%c1_158, %c0_159, %c0_160] : memref<2x1x64xf32, #tpu.memory_space<vmem>>, vector<1x1x64xf32>
    %426 = vector.shape_cast %425 : vector<1x1x64xf32> to vector<1x64xf32>
    %c1_161 = arith.constant 1 : index
    %c0_162 = arith.constant 0 : index
    %c0_163 = arith.constant 0 : index
    %427 = vector.load %arg8[%c1_161, %c0_162, %c0_163] : memref<2x1x64xf32, #tpu.memory_space<vmem>>, vector<1x1x64xf32>
    %428 = vector.shape_cast %427 : vector<1x1x64xf32> to vector<1x64xf32>
    %cst_164 = arith.constant dense<0.000000e+00> : vector<4xf32>
    %429 = vector.multi_reduction <add>, %424, %cst_164 [1] : vector<4x64xf32> to vector<4xf32>
    %430 = vector.shape_cast %429 : vector<4xf32> to vector<4x1xf32>
    %cst_165 = arith.constant 6.400000e+01 : f32
    %431 = vector.broadcast %cst_165 : f32 to vector<4x1xf32>
    %432 = arith.divf %430, %431 : vector<4x1xf32>
    %433 = vector.broadcast %432 : vector<4x1xf32> to vector<4x64xf32>
    %434 = arith.subf %424, %433 : vector<4x64xf32>
    %435 = arith.mulf %434, %434 : vector<4x64xf32>
    %cst_166 = arith.constant dense<0.000000e+00> : vector<4xf32>
    %436 = vector.multi_reduction <add>, %435, %cst_166 [1] : vector<4x64xf32> to vector<4xf32>
    %437 = vector.shape_cast %436 : vector<4xf32> to vector<4x1xf32>
    %cst_167 = arith.constant 6.400000e+01 : f32
    %438 = vector.broadcast %cst_167 : f32 to vector<4x1xf32>
    %439 = arith.divf %437, %438 : vector<4x1xf32>
    %440 = vector.broadcast %432 : vector<4x1xf32> to vector<4x64xf32>
    %441 = arith.subf %424, %440 : vector<4x64xf32>
    %cst_168 = arith.constant 9.99999974E-6 : f32
    %442 = vector.broadcast %cst_168 : f32 to vector<4x1xf32>
    %443 = arith.addf %439, %442 : vector<4x1xf32>
    %444 = math.rsqrt %443 : vector<4x1xf32>
    %445 = vector.broadcast %444 : vector<4x1xf32> to vector<4x64xf32>
    %446 = arith.mulf %441, %445 : vector<4x64xf32>
    %447 = vector.broadcast %426 : vector<1x64xf32> to vector<4x64xf32>
    %448 = arith.mulf %446, %447 : vector<4x64xf32>
    %449 = vector.broadcast %428 : vector<1x64xf32> to vector<4x64xf32>
    %450 = arith.addf %448, %449 : vector<4x64xf32>
    %c1_169 = arith.constant 1 : index
    %c0_170 = arith.constant 0 : index
    %c0_171 = arith.constant 0 : index
    %451 = vector.load %arg9[%c1_169, %c0_170, %c0_171] : memref<2x64x64xbf16, #tpu.memory_space<vmem>>, vector<1x64x64xbf16>
    %452 = vector.shape_cast %451 : vector<1x64x64xbf16> to vector<64x64xbf16>
    %453 = arith.truncf %450 : vector<4x64xf32> to vector<4x64xbf16>
    %cst_172 = arith.constant dense<0.000000e+00> : vector<4x64xf32>
    %454 = tpu.matmul %453, %452, %cst_172 {dimension_numbers = #tpu.dot_dimension_numbers<[1], [0], [0], [1], [0, 0, 1, 1], [], []>} : vector<4x64xbf16>, vector<64x64xbf16>, vector<4x64xf32> -> vector<4x64xf32>
    %c1_173 = arith.constant 1 : index
    %c0_174 = arith.constant 0 : index
    %c0_175 = arith.constant 0 : index
    %455 = vector.load %arg10[%c1_173, %c0_174, %c0_175] : memref<2x64x128xbf16, #tpu.memory_space<vmem>>, vector<1x64x128xbf16>
    %456 = vector.shape_cast %455 : vector<1x64x128xbf16> to vector<64x128xbf16>
    %457 = arith.truncf %3 : vector<4x64xf32> to vector<4x64xbf16>
    %cst_176 = arith.constant dense<0.000000e+00> : vector<4x128xf32>
    %458 = tpu.matmul %457, %456, %cst_176 {dimension_numbers = #tpu.dot_dimension_numbers<[1], [0], [0], [1], [0, 0, 1, 1], [], []>} : vector<4x64xbf16>, vector<64x128xbf16>, vector<4x128xf32> -> vector<4x128xf32>
    %459 = vector.extract_strided_slice %458 {offsets = [0, 0], sizes = [4, 64], strides = [1, 1]} : vector<4x128xf32> to vector<4x64xf32>
    %460 = vector.extract_strided_slice %458 {offsets = [0, 64], sizes = [4, 64], strides = [1, 1]} : vector<4x128xf32> to vector<4x64xf32>
    %c1_177 = arith.constant 1 : index
    %c0_178 = arith.constant 0 : index
    %c0_179 = arith.constant 0 : index
    %461 = vector.load %arg11[%c1_177, %c0_178, %c0_179] : memref<2x64x64xbf16, #tpu.memory_space<vmem>>, vector<1x64x64xbf16>
    %462 = vector.shape_cast %461 : vector<1x64x64xbf16> to vector<64x64xbf16>
    %463 = vector.extract_strided_slice %454 {offsets = [0, 0], sizes = [4, 16], strides = [1, 1]} : vector<4x64xf32> to vector<4x16xf32>
    %464 = vector.extract_strided_slice %459 {offsets = [0, 0], sizes = [4, 16], strides = [1, 1]} : vector<4x64xf32> to vector<4x16xf32>
    %465 = vector.extract_strided_slice %460 {offsets = [0, 0], sizes = [4, 16], strides = [1, 1]} : vector<4x64xf32> to vector<4x16xf32>
    %466 = tpu.transpose %464, [1, 0] : vector<4x16xf32> -> vector<16x4xf32>
    %cst_180 = arith.constant dense<0.000000e+00> : vector<4x4xf32>
    %467 = tpu.matmul %463, %466, %cst_180 {dimension_numbers = #tpu.dot_dimension_numbers<[1], [0], [0], [1], [0, 0, 1, 1], [], []>} : vector<4x16xf32>, vector<16x4xf32>, vector<4x4xf32> -> vector<4x4xf32>
    %cst_181 = arith.constant 2.500000e-01 : f32
    %468 = vector.broadcast %cst_181 : f32 to vector<4x4xf32>
    %469 = arith.mulf %467, %468 : vector<4x4xf32>
    %cst_182 = arith.constant dense<0xFF800000> : vector<4xf32>
    %470 = vector.multi_reduction <maximumf>, %469, %cst_182 [1] : vector<4x4xf32> to vector<4xf32>
    %471 = vector.shape_cast %470 : vector<4xf32> to vector<4x1xf32>
    %472 = vector.broadcast %471 : vector<4x1xf32> to vector<4x4xf32>
    %473 = arith.subf %469, %472 : vector<4x4xf32>
    %474 = math.exp %473 : vector<4x4xf32>
    %cst_183 = arith.constant dense<0.000000e+00> : vector<4xf32>
    %475 = vector.multi_reduction <add>, %474, %cst_183 [1] : vector<4x4xf32> to vector<4xf32>
    %476 = vector.shape_cast %475 : vector<4xf32> to vector<4x1xf32>
    %477 = tpu.reciprocal %476 {approx = true} : vector<4x1xf32> -> vector<4x1xf32>
    %478 = vector.broadcast %477 : vector<4x1xf32> to vector<4x4xf32>
    %479 = arith.mulf %474, %478 : vector<4x4xf32>
    %cst_184 = arith.constant dense<0.000000e+00> : vector<4x16xf32>
    %480 = tpu.matmul %479, %465, %cst_184 {dimension_numbers = #tpu.dot_dimension_numbers<[1], [0], [0], [1], [0, 0, 1, 1], [], []>} : vector<4x4xf32>, vector<4x16xf32>, vector<4x16xf32> -> vector<4x16xf32>
    %481 = vector.extract_strided_slice %454 {offsets = [0, 16], sizes = [4, 16], strides = [1, 1]} : vector<4x64xf32> to vector<4x16xf32>
    %482 = vector.extract_strided_slice %459 {offsets = [0, 16], sizes = [4, 16], strides = [1, 1]} : vector<4x64xf32> to vector<4x16xf32>
    %483 = vector.extract_strided_slice %460 {offsets = [0, 16], sizes = [4, 16], strides = [1, 1]} : vector<4x64xf32> to vector<4x16xf32>
    %484 = tpu.transpose %482, [1, 0] : vector<4x16xf32> -> vector<16x4xf32>
    %cst_185 = arith.constant dense<0.000000e+00> : vector<4x4xf32>
    %485 = tpu.matmul %481, %484, %cst_185 {dimension_numbers = #tpu.dot_dimension_numbers<[1], [0], [0], [1], [0, 0, 1, 1], [], []>} : vector<4x16xf32>, vector<16x4xf32>, vector<4x4xf32> -> vector<4x4xf32>
    %cst_186 = arith.constant 2.500000e-01 : f32
    %486 = vector.broadcast %cst_186 : f32 to vector<4x4xf32>
    %487 = arith.mulf %485, %486 : vector<4x4xf32>
    %cst_187 = arith.constant dense<0xFF800000> : vector<4xf32>
    %488 = vector.multi_reduction <maximumf>, %487, %cst_187 [1] : vector<4x4xf32> to vector<4xf32>
    %489 = vector.shape_cast %488 : vector<4xf32> to vector<4x1xf32>
    %490 = vector.broadcast %489 : vector<4x1xf32> to vector<4x4xf32>
    %491 = arith.subf %487, %490 : vector<4x4xf32>
    %492 = math.exp %491 : vector<4x4xf32>
    %cst_188 = arith.constant dense<0.000000e+00> : vector<4xf32>
    %493 = vector.multi_reduction <add>, %492, %cst_188 [1] : vector<4x4xf32> to vector<4xf32>
    %494 = vector.shape_cast %493 : vector<4xf32> to vector<4x1xf32>
    %495 = tpu.reciprocal %494 {approx = true} : vector<4x1xf32> -> vector<4x1xf32>
    %496 = vector.broadcast %495 : vector<4x1xf32> to vector<4x4xf32>
    %497 = arith.mulf %492, %496 : vector<4x4xf32>
    %cst_189 = arith.constant dense<0.000000e+00> : vector<4x16xf32>
    %498 = tpu.matmul %497, %483, %cst_189 {dimension_numbers = #tpu.dot_dimension_numbers<[1], [0], [0], [1], [0, 0, 1, 1], [], []>} : vector<4x4xf32>, vector<4x16xf32>, vector<4x16xf32> -> vector<4x16xf32>
    %499 = vector.extract_strided_slice %454 {offsets = [0, 32], sizes = [4, 16], strides = [1, 1]} : vector<4x64xf32> to vector<4x16xf32>
    %500 = vector.extract_strided_slice %459 {offsets = [0, 32], sizes = [4, 16], strides = [1, 1]} : vector<4x64xf32> to vector<4x16xf32>
    %501 = vector.extract_strided_slice %460 {offsets = [0, 32], sizes = [4, 16], strides = [1, 1]} : vector<4x64xf32> to vector<4x16xf32>
    %502 = tpu.transpose %500, [1, 0] : vector<4x16xf32> -> vector<16x4xf32>
    %cst_190 = arith.constant dense<0.000000e+00> : vector<4x4xf32>
    %503 = tpu.matmul %499, %502, %cst_190 {dimension_numbers = #tpu.dot_dimension_numbers<[1], [0], [0], [1], [0, 0, 1, 1], [], []>} : vector<4x16xf32>, vector<16x4xf32>, vector<4x4xf32> -> vector<4x4xf32>
    %cst_191 = arith.constant 2.500000e-01 : f32
    %504 = vector.broadcast %cst_191 : f32 to vector<4x4xf32>
    %505 = arith.mulf %503, %504 : vector<4x4xf32>
    %cst_192 = arith.constant dense<0xFF800000> : vector<4xf32>
    %506 = vector.multi_reduction <maximumf>, %505, %cst_192 [1] : vector<4x4xf32> to vector<4xf32>
    %507 = vector.shape_cast %506 : vector<4xf32> to vector<4x1xf32>
    %508 = vector.broadcast %507 : vector<4x1xf32> to vector<4x4xf32>
    %509 = arith.subf %505, %508 : vector<4x4xf32>
    %510 = math.exp %509 : vector<4x4xf32>
    %cst_193 = arith.constant dense<0.000000e+00> : vector<4xf32>
    %511 = vector.multi_reduction <add>, %510, %cst_193 [1] : vector<4x4xf32> to vector<4xf32>
    %512 = vector.shape_cast %511 : vector<4xf32> to vector<4x1xf32>
    %513 = tpu.reciprocal %512 {approx = true} : vector<4x1xf32> -> vector<4x1xf32>
    %514 = vector.broadcast %513 : vector<4x1xf32> to vector<4x4xf32>
    %515 = arith.mulf %510, %514 : vector<4x4xf32>
    %cst_194 = arith.constant dense<0.000000e+00> : vector<4x16xf32>
    %516 = tpu.matmul %515, %501, %cst_194 {dimension_numbers = #tpu.dot_dimension_numbers<[1], [0], [0], [1], [0, 0, 1, 1], [], []>} : vector<4x4xf32>, vector<4x16xf32>, vector<4x16xf32> -> vector<4x16xf32>
    %517 = vector.extract_strided_slice %454 {offsets = [0, 48], sizes = [4, 16], strides = [1, 1]} : vector<4x64xf32> to vector<4x16xf32>
    %518 = vector.extract_strided_slice %459 {offsets = [0, 48], sizes = [4, 16], strides = [1, 1]} : vector<4x64xf32> to vector<4x16xf32>
    %519 = vector.extract_strided_slice %460 {offsets = [0, 48], sizes = [4, 16], strides = [1, 1]} : vector<4x64xf32> to vector<4x16xf32>
    %520 = tpu.transpose %518, [1, 0] : vector<4x16xf32> -> vector<16x4xf32>
    %cst_195 = arith.constant dense<0.000000e+00> : vector<4x4xf32>
    %521 = tpu.matmul %517, %520, %cst_195 {dimension_numbers = #tpu.dot_dimension_numbers<[1], [0], [0], [1], [0, 0, 1, 1], [], []>} : vector<4x16xf32>, vector<16x4xf32>, vector<4x4xf32> -> vector<4x4xf32>
    %cst_196 = arith.constant 2.500000e-01 : f32
    %522 = vector.broadcast %cst_196 : f32 to vector<4x4xf32>
    %523 = arith.mulf %521, %522 : vector<4x4xf32>
    %cst_197 = arith.constant dense<0xFF800000> : vector<4xf32>
    %524 = vector.multi_reduction <maximumf>, %523, %cst_197 [1] : vector<4x4xf32> to vector<4xf32>
    %525 = vector.shape_cast %524 : vector<4xf32> to vector<4x1xf32>
    %526 = vector.broadcast %525 : vector<4x1xf32> to vector<4x4xf32>
    %527 = arith.subf %523, %526 : vector<4x4xf32>
    %528 = math.exp %527 : vector<4x4xf32>
    %cst_198 = arith.constant dense<0.000000e+00> : vector<4xf32>
    %529 = vector.multi_reduction <add>, %528, %cst_198 [1] : vector<4x4xf32> to vector<4xf32>
    %530 = vector.shape_cast %529 : vector<4xf32> to vector<4x1xf32>
    %531 = tpu.reciprocal %530 {approx = true} : vector<4x1xf32> -> vector<4x1xf32>
    %532 = vector.broadcast %531 : vector<4x1xf32> to vector<4x4xf32>
    %533 = arith.mulf %528, %532 : vector<4x4xf32>
    %cst_199 = arith.constant dense<0.000000e+00> : vector<4x16xf32>
    %534 = tpu.matmul %533, %519, %cst_199 {dimension_numbers = #tpu.dot_dimension_numbers<[1], [0], [0], [1], [0, 0, 1, 1], [], []>} : vector<4x4xf32>, vector<4x16xf32>, vector<4x16xf32> -> vector<4x16xf32>
    %535 = tpu.concatenate %480, %498, %516, %534 in 1 : vector<4x16xf32>, vector<4x16xf32>, vector<4x16xf32>, vector<4x16xf32> -> vector<4x64xf32>
    %536 = arith.truncf %535 : vector<4x64xf32> to vector<4x64xbf16>
    %cst_200 = arith.constant dense<0.000000e+00> : vector<4x64xf32>
    %537 = tpu.matmul %536, %462, %cst_200 {dimension_numbers = #tpu.dot_dimension_numbers<[1], [0], [0], [1], [0, 0, 1, 1], [], []>} : vector<4x64xbf16>, vector<64x64xbf16>, vector<4x64xf32> -> vector<4x64xf32>
    %538 = arith.addf %424, %537 : vector<4x64xf32>
    %c1_201 = arith.constant 1 : index
    %c0_202 = arith.constant 0 : index
    %c0_203 = arith.constant 0 : index
    %539 = vector.load %arg12[%c1_201, %c0_202, %c0_203] : memref<2x1x64xf32, #tpu.memory_space<vmem>>, vector<1x1x64xf32>
    %540 = vector.shape_cast %539 : vector<1x1x64xf32> to vector<1x64xf32>
    %c1_204 = arith.constant 1 : index
    %c0_205 = arith.constant 0 : index
    %c0_206 = arith.constant 0 : index
    %541 = vector.load %arg13[%c1_204, %c0_205, %c0_206] : memref<2x1x64xf32, #tpu.memory_space<vmem>>, vector<1x1x64xf32>
    %542 = vector.shape_cast %541 : vector<1x1x64xf32> to vector<1x64xf32>
    %cst_207 = arith.constant dense<0.000000e+00> : vector<4xf32>
    %543 = vector.multi_reduction <add>, %538, %cst_207 [1] : vector<4x64xf32> to vector<4xf32>
    %544 = vector.shape_cast %543 : vector<4xf32> to vector<4x1xf32>
    %cst_208 = arith.constant 6.400000e+01 : f32
    %545 = vector.broadcast %cst_208 : f32 to vector<4x1xf32>
    %546 = arith.divf %544, %545 : vector<4x1xf32>
    %547 = vector.broadcast %546 : vector<4x1xf32> to vector<4x64xf32>
    %548 = arith.subf %538, %547 : vector<4x64xf32>
    %549 = arith.mulf %548, %548 : vector<4x64xf32>
    %cst_209 = arith.constant dense<0.000000e+00> : vector<4xf32>
    %550 = vector.multi_reduction <add>, %549, %cst_209 [1] : vector<4x64xf32> to vector<4xf32>
    %551 = vector.shape_cast %550 : vector<4xf32> to vector<4x1xf32>
    %cst_210 = arith.constant 6.400000e+01 : f32
    %552 = vector.broadcast %cst_210 : f32 to vector<4x1xf32>
    %553 = arith.divf %551, %552 : vector<4x1xf32>
    %554 = vector.broadcast %546 : vector<4x1xf32> to vector<4x64xf32>
    %555 = arith.subf %538, %554 : vector<4x64xf32>
    %cst_211 = arith.constant 9.99999974E-6 : f32
    %556 = vector.broadcast %cst_211 : f32 to vector<4x1xf32>
    %557 = arith.addf %553, %556 : vector<4x1xf32>
    %558 = math.rsqrt %557 : vector<4x1xf32>
    %559 = vector.broadcast %558 : vector<4x1xf32> to vector<4x64xf32>
    %560 = arith.mulf %555, %559 : vector<4x64xf32>
    %561 = vector.broadcast %540 : vector<1x64xf32> to vector<4x64xf32>
    %562 = arith.mulf %560, %561 : vector<4x64xf32>
    %563 = vector.broadcast %542 : vector<1x64xf32> to vector<4x64xf32>
    %564 = arith.addf %562, %563 : vector<4x64xf32>
    %c1_212 = arith.constant 1 : index
    %c0_213 = arith.constant 0 : index
    %c0_214 = arith.constant 0 : index
    %565 = vector.load %arg14[%c1_212, %c0_213, %c0_214] : memref<2x64x256xbf16, #tpu.memory_space<vmem>>, vector<1x64x256xbf16>
    %566 = vector.shape_cast %565 : vector<1x64x256xbf16> to vector<64x256xbf16>
    %567 = arith.truncf %564 : vector<4x64xf32> to vector<4x64xbf16>
    %cst_215 = arith.constant dense<0.000000e+00> : vector<4x256xf32>
    %568 = tpu.matmul %567, %566, %cst_215 {dimension_numbers = #tpu.dot_dimension_numbers<[1], [0], [0], [1], [0, 0, 1, 1], [], []>} : vector<4x64xbf16>, vector<64x256xbf16>, vector<4x256xf32> -> vector<4x256xf32>
    %c1_216 = arith.constant 1 : index
    %c0_217 = arith.constant 0 : index
    %c0_218 = arith.constant 0 : index
    %569 = vector.load %arg15[%c1_216, %c0_217, %c0_218] : memref<2x1x256xf32, #tpu.memory_space<vmem>>, vector<1x1x256xf32>
    %570 = vector.shape_cast %569 : vector<1x1x256xf32> to vector<1x256xf32>
    %571 = vector.broadcast %570 : vector<1x256xf32> to vector<4x256xf32>
    %572 = arith.addf %568, %571 : vector<4x256xf32>
    %cst_219 = arith.constant 0.000000e+00 : f32
    %573 = vector.broadcast %cst_219 : f32 to vector<4x256xf32>
    %574 = arith.maximumf %572, %573 : vector<4x256xf32>
    %c1_220 = arith.constant 1 : index
    %c0_221 = arith.constant 0 : index
    %c0_222 = arith.constant 0 : index
    %575 = vector.load %arg16[%c1_220, %c0_221, %c0_222] : memref<2x256x64xbf16, #tpu.memory_space<vmem>>, vector<1x256x64xbf16>
    %576 = vector.shape_cast %575 : vector<1x256x64xbf16> to vector<256x64xbf16>
    %577 = arith.truncf %574 : vector<4x256xf32> to vector<4x256xbf16>
    %cst_223 = arith.constant dense<0.000000e+00> : vector<4x64xf32>
    %578 = tpu.matmul %577, %576, %cst_223 {dimension_numbers = #tpu.dot_dimension_numbers<[1], [0], [0], [1], [0, 0, 1, 1], [], []>} : vector<4x256xbf16>, vector<256x64xbf16>, vector<4x64xf32> -> vector<4x64xf32>
    %579 = arith.addf %538, %578 : vector<4x64xf32>
    %c1_224 = arith.constant 1 : index
    %c0_225 = arith.constant 0 : index
    %c0_226 = arith.constant 0 : index
    %580 = vector.load %arg17[%c1_224, %c0_225, %c0_226] : memref<2x1x64xf32, #tpu.memory_space<vmem>>, vector<1x1x64xf32>
    %581 = vector.shape_cast %580 : vector<1x1x64xf32> to vector<1x64xf32>
    %582 = vector.broadcast %581 : vector<1x64xf32> to vector<4x64xf32>
    %583 = arith.addf %579, %582 : vector<4x64xf32>
    %c0_227 = arith.constant 0 : index
    %c0_228 = arith.constant 0 : index
    %584 = vector.load %arg18[%c0_227, %c0_228] : memref<1x64xf32, #tpu.memory_space<vmem>>, vector<1x64xf32>
    %c0_229 = arith.constant 0 : index
    %c0_230 = arith.constant 0 : index
    %585 = vector.load %arg19[%c0_229, %c0_230] : memref<1x64xf32, #tpu.memory_space<vmem>>, vector<1x64xf32>
    %cst_231 = arith.constant dense<0.000000e+00> : vector<4xf32>
    %586 = vector.multi_reduction <add>, %583, %cst_231 [1] : vector<4x64xf32> to vector<4xf32>
    %587 = vector.shape_cast %586 : vector<4xf32> to vector<4x1xf32>
    %cst_232 = arith.constant 6.400000e+01 : f32
    %588 = vector.broadcast %cst_232 : f32 to vector<4x1xf32>
    %589 = arith.divf %587, %588 : vector<4x1xf32>
    %590 = vector.broadcast %589 : vector<4x1xf32> to vector<4x64xf32>
    %591 = arith.subf %583, %590 : vector<4x64xf32>
    %592 = arith.mulf %591, %591 : vector<4x64xf32>
    %cst_233 = arith.constant dense<0.000000e+00> : vector<4xf32>
    %593 = vector.multi_reduction <add>, %592, %cst_233 [1] : vector<4x64xf32> to vector<4xf32>
    %594 = vector.shape_cast %593 : vector<4xf32> to vector<4x1xf32>
    %cst_234 = arith.constant 6.400000e+01 : f32
    %595 = vector.broadcast %cst_234 : f32 to vector<4x1xf32>
    %596 = arith.divf %594, %595 : vector<4x1xf32>
    %597 = vector.broadcast %589 : vector<4x1xf32> to vector<4x64xf32>
    %598 = arith.subf %583, %597 : vector<4x64xf32>
    %cst_235 = arith.constant 9.99999974E-6 : f32
    %599 = vector.broadcast %cst_235 : f32 to vector<4x1xf32>
    %600 = arith.addf %596, %599 : vector<4x1xf32>
    %601 = math.rsqrt %600 : vector<4x1xf32>
    %602 = vector.broadcast %601 : vector<4x1xf32> to vector<4x64xf32>
    %603 = arith.mulf %598, %602 : vector<4x64xf32>
    %604 = vector.broadcast %584 : vector<1x64xf32> to vector<4x64xf32>
    %605 = arith.mulf %603, %604 : vector<4x64xf32>
    %606 = vector.broadcast %585 : vector<1x64xf32> to vector<4x64xf32>
    %607 = arith.addf %605, %606 : vector<4x64xf32>
    %c0_236 = arith.constant 0 : index
    %c0_237 = arith.constant 0 : index
    %608 = vector.load %arg20[%c0_236, %c0_237] : memref<64x32xbf16, #tpu.memory_space<vmem>>, vector<64x32xbf16>
    %609 = arith.truncf %607 : vector<4x64xf32> to vector<4x64xbf16>
    %cst_238 = arith.constant dense<0.000000e+00> : vector<4x32xf32>
    %610 = tpu.matmul %609, %608, %cst_238 {dimension_numbers = #tpu.dot_dimension_numbers<[1], [0], [0], [1], [0, 0, 1, 1], [], []>} : vector<4x64xbf16>, vector<64x32xbf16>, vector<4x32xf32> -> vector<4x32xf32>
    %cst_239 = arith.constant dense<0xFF800000> : vector<4xf32>
    %611 = vector.multi_reduction <maximumf>, %610, %cst_239 [1] : vector<4x32xf32> to vector<4xf32>
    %612 = vector.shape_cast %611 : vector<4xf32> to vector<4x1xf32>
    %613 = vector.broadcast %612 : vector<4x1xf32> to vector<4x32xf32>
    %614 = arith.subf %610, %613 : vector<4x32xf32>
    %615 = math.exp %614 : vector<4x32xf32>
    %cst_240 = arith.constant dense<0.000000e+00> : vector<4xf32>
    %616 = vector.multi_reduction <add>, %615, %cst_240 [1] : vector<4x32xf32> to vector<4xf32>
    %617 = vector.shape_cast %616 : vector<4xf32> to vector<4x1xf32>
    %618 = math.log %617 : vector<4x1xf32>
    %619 = vector.broadcast %618 : vector<4x1xf32> to vector<4x32xf32>
    %620 = arith.subf %614, %619 : vector<4x32xf32>
    %c0_241 = arith.constant 0 : index
    %c0_242 = arith.constant 0 : index
    %c0_243 = arith.constant 0 : index
    %621 = vector.load %arg21[%c0_241, %c0_242, %c0_243] : memref<1x4x32xf32, #tpu.memory_space<vmem>>, vector<1x4x32xf32>
    %622 = vector.shape_cast %621 : vector<1x4x32xf32> to vector<4x32xf32>
    %623 = arith.mulf %622, %620 : vector<4x32xf32>
    %cst_244 = arith.constant dense<0.000000e+00> : vector<4xf32>
    %624 = vector.multi_reduction <add>, %623, %cst_244 [1] : vector<4x32xf32> to vector<4xf32>
    %625 = vector.shape_cast %624 : vector<4xf32> to vector<4x1xf32>
    %cst_245 = arith.constant 0.000000e+00 : f32
    %626 = vector.broadcast %cst_245 : f32 to vector<4x1xf32>
    %627 = arith.subf %626, %625 : vector<4x1xf32>
    %cst_246 = arith.constant dense<0.000000e+00> : vector<1xf32>
    %628 = vector.multi_reduction <add>, %627, %cst_246 [0] : vector<4x1xf32> to vector<1xf32>
    %629 = vector.shape_cast %628 : vector<1xf32> to vector<1x1xf32>
    %c0_247 = arith.constant 0 : index
    %c0_248 = arith.constant 0 : index
    %c0_249 = arith.constant 0 : index
    %630 = vector.load %arg22[%c0_247, %c0_248, %c0_249] : memref<1x1x1xf32, #tpu.memory_space<vmem>>, vector<1x1x1xf32>
    %631 = vector.shape_cast %630 : vector<1x1x1xf32> to vector<1x1xf32>
    %632 = vector.shape_cast %629 : vector<1x1xf32> to vector<1x1x1xf32>
    tpu.vector_store %arg22[%c0_247, %c0_248, %c0_249], %632 {strides = array<i32>} : memref<1x1x1xf32, #tpu.memory_space<vmem>>, vector<1x1x1xf32>,
    return
  }
  func.func @transform_0(%arg0: i32) -> (i32, i32, i32) {
    %c0_i32 = arith.constant 0 : i32
    %c0_i32_0 = arith.constant 0 : i32
    %c0_i32_1 = arith.constant 0 : i32
    return %arg0, %c0_i32, %c0_i32_0 : i32, i32, i32
  }
  func.func @transform_1(%arg0: i32) -> (i32, i32, i32) {
    %c0_i32 = arith.constant 0 : i32
    %c0_i32_0 = arith.constant 0 : i32
    %c0_i32_1 = arith.constant 0 : i32
    return %arg0, %c0_i32, %c0_i32_0 : i32, i32, i32
  }
  func.func @transform_2(%arg0: i32) -> (i32, i32, i32) {
    %c0_i32 = arith.constant 0 : i32
    %c0_i32_0 = arith.constant 0 : i32
    %c0_i32_1 = arith.constant 0 : i32
    %c0_i32_2 = arith.constant 0 : i32
    return %c0_i32, %c0_i32_0, %c0_i32_1 : i32, i32, i32
  }
  func.func @transform_3(%arg0: i32) -> (i32, i32, i32) {
    %c0_i32 = arith.constant 0 : i32
    %c0_i32_0 = arith.constant 0 : i32
    %c0_i32_1 = arith.constant 0 : i32
    %c0_i32_2 = arith.constant 0 : i32
    return %c0_i32, %c0_i32_0, %c0_i32_1 : i32, i32, i32
  }
  func.func @transform_4(%arg0: i32) -> (i32, i32, i32) {
    %c0_i32 = arith.constant 0 : i32
    %c0_i32_0 = arith.constant 0 : i32
    %c0_i32_1 = arith.constant 0 : i32
    %c0_i32_2 = arith.constant 0 : i32
    return %c0_i32, %c0_i32_0, %c0_i32_1 : i32, i32, i32
  }
  func.func @transform_5(%arg0: i32) -> (i32, i32, i32) {
    %c0_i32 = arith.constant 0 : i32
    %c0_i32_0 = arith.constant 0 : i32
    %c0_i32_1 = arith.constant 0 : i32
    %c0_i32_2 = arith.constant 0 : i32
    return %c0_i32, %c0_i32_0, %c0_i32_1 : i32, i32, i32
  }
  func.func @transform_6(%arg0: i32) -> (i32, i32, i32) {
    %c0_i32 = arith.constant 0 : i32
    %c0_i32_0 = arith.constant 0 : i32
    %c0_i32_1 = arith.constant 0 : i32
    %c0_i32_2 = arith.constant 0 : i32
    return %c0_i32, %c0_i32_0, %c0_i32_1 : i32, i32, i32
  }
  func.func @transform_7(%arg0: i32) -> (i32, i32, i32) {
    %c0_i32 = arith.constant 0 : i32
    %c0_i32_0 = arith.constant 0 : i32
    %c0_i32_1 = arith.constant 0 : i32
    %c0_i32_2 = arith.constant 0 : i32
    return %c0_i32, %c0_i32_0, %c0_i32_1 : i32, i32, i32
  }
  func.func @transform_8(%arg0: i32) -> (i32, i32, i32) {
    %c0_i32 = arith.constant 0 : i32
    %c0_i32_0 = arith.constant 0 : i32
    %c0_i32_1 = arith.constant 0 : i32
    %c0_i32_2 = arith.constant 0 : i32
    return %c0_i32, %c0_i32_0, %c0_i32_1 : i32, i32, i32
  }
  func.func @transform_9(%arg0: i32) -> (i32, i32, i32) {
    %c0_i32 = arith.constant 0 : i32
    %c0_i32_0 = arith.constant 0 : i32
    %c0_i32_1 = arith.constant 0 : i32
    %c0_i32_2 = arith.constant 0 : i32
    return %c0_i32, %c0_i32_0, %c0_i32_1 : i32, i32, i32
  }
  func.func @transform_10(%arg0: i32) -> (i32, i32, i32) {
    %c0_i32 = arith.constant 0 : i32
    %c0_i32_0 = arith.constant 0 : i32
    %c0_i32_1 = arith.constant 0 : i32
    %c0_i32_2 = arith.constant 0 : i32
    return %c0_i32, %c0_i32_0, %c0_i32_1 : i32, i32, i32
  }
  func.func @transform_11(%arg0: i32) -> (i32, i32, i32) {
    %c0_i32 = arith.constant 0 : i32
    %c0_i32_0 = arith.constant 0 : i32
    %c0_i32_1 = arith.constant 0 : i32
    %c0_i32_2 = arith.constant 0 : i32
    return %c0_i32, %c0_i32_0, %c0_i32_1 : i32, i32, i32
  }
  func.func @transform_12(%arg0: i32) -> (i32, i32, i32) {
    %c0_i32 = arith.constant 0 : i32
    %c0_i32_0 = arith.constant 0 : i32
    %c0_i32_1 = arith.constant 0 : i32
    %c0_i32_2 = arith.constant 0 : i32
    return %c0_i32, %c0_i32_0, %c0_i32_1 : i32, i32, i32
  }
  func.func @transform_13(%arg0: i32) -> (i32, i32, i32) {
    %c0_i32 = arith.constant 0 : i32
    %c0_i32_0 = arith.constant 0 : i32
    %c0_i32_1 = arith.constant 0 : i32
    %c0_i32_2 = arith.constant 0 : i32
    return %c0_i32, %c0_i32_0, %c0_i32_1 : i32, i32, i32
  }
  func.func @transform_14(%arg0: i32) -> (i32, i32, i32) {
    %c0_i32 = arith.constant 0 : i32
    %c0_i32_0 = arith.constant 0 : i32
    %c0_i32_1 = arith.constant 0 : i32
    %c0_i32_2 = arith.constant 0 : i32
    return %c0_i32, %c0_i32_0, %c0_i32_1 : i32, i32, i32
  }
  func.func @transform_15(%arg0: i32) -> (i32, i32, i32) {
    %c0_i32 = arith.constant 0 : i32
    %c0_i32_0 = arith.constant 0 : i32
    %c0_i32_1 = arith.constant 0 : i32
    %c0_i32_2 = arith.constant 0 : i32
    return %c0_i32, %c0_i32_0, %c0_i32_1 : i32, i32, i32
  }
  func.func @transform_16(%arg0: i32) -> (i32, i32, i32) {
    %c0_i32 = arith.constant 0 : i32
    %c0_i32_0 = arith.constant 0 : i32
    %c0_i32_1 = arith.constant 0 : i32
    %c0_i32_2 = arith.constant 0 : i32
    return %c0_i32, %c0_i32_0, %c0_i32_1 : i32, i32, i32
  }
  func.func @transform_17(%arg0: i32) -> (i32, i32) {
    %c0_i32 = arith.constant 0 : i32
    %c0_i32_0 = arith.constant 0 : i32
    %c0_i32_1 = arith.constant 0 : i32
    return %c0_i32, %c0_i32_0 : i32, i32
  }
  func.func @transform_18(%arg0: i32) -> (i32, i32) {
    %c0_i32 = arith.constant 0 : i32
    %c0_i32_0 = arith.constant 0 : i32
    %c0_i32_1 = arith.constant 0 : i32
    return %c0_i32, %c0_i32_0 : i32, i32
  }
  func.func @transform_19(%arg0: i32) -> (i32, i32) {
    %c0_i32 = arith.constant 0 : i32
    %c0_i32_0 = arith.constant 0 : i32
    %c0_i32_1 = arith.constant 0 : i32
    return %c0_i32, %c0_i32_0 : i32, i32
  }
  func.func @transform_20(%arg0: i32) -> (i32, i32, i32) {
    %c0_i32 = arith.constant 0 : i32
    %c0_i32_0 = arith.constant 0 : i32
    %c0_i32_1 = arith.constant 0 : i32
    return %arg0, %c0_i32, %c0_i32_0 : i32, i32, i32
  }
  func.func @transform_21(%arg0: i32) -> (i32, i32, i32) {
    %c0_i32 = arith.constant 0 : i32
    %c0_i32_0 = arith.constant 0 : i32
    %c0_i32_1 = arith.constant 0 : i32
    return %arg0, %c0_i32, %c0_i32_0 : i32, i32, i32
  }
}

module attributes {stable_mosaic.version = 11 : i64} {
  func.func @_stack_kernel(%arg0: i32, %arg1: memref<1x4x64xf32, #tpu.memory_space<vmem>>, %arg2: memref<1x16x64xf32, #tpu.memory_space<vmem>>, %arg3: memref<2x1x64xf32, #tpu.memory_space<vmem>>, %arg4: memref<2x1x64xf32, #tpu.memory_space<vmem>>, %arg5: memref<2x64x192xbf16, #tpu.memory_space<vmem>>, %arg6: memref<2x64x64xbf16, #tpu.memory_space<vmem>>, %arg7: memref<2x1x64xf32, #tpu.memory_space<vmem>>, %arg8: memref<2x1x64xf32, #tpu.memory_space<vmem>>, %arg9: memref<2x64x64xbf16, #tpu.memory_space<vmem>>, %arg10: memref<2x64x128xbf16, #tpu.memory_space<vmem>>, %arg11: memref<2x64x64xbf16, #tpu.memory_space<vmem>>, %arg12: memref<2x1x64xf32, #tpu.memory_space<vmem>>, %arg13: memref<2x1x64xf32, #tpu.memory_space<vmem>>, %arg14: memref<2x64x256xbf16, #tpu.memory_space<vmem>>, %arg15: memref<2x1x256xf32, #tpu.memory_space<vmem>>, %arg16: memref<2x256x64xbf16, #tpu.memory_space<vmem>>, %arg17: memref<2x1x64xf32, #tpu.memory_space<vmem>>, %arg18: memref<1x64xf32, #tpu.memory_space<vmem>>, %arg19: memref<1x64xf32, #tpu.memory_space<vmem>>, %arg20: memref<1x4x64xf32, #tpu.memory_space<vmem>>) attributes {dimension_semantics = [#tpu.dimension_semantics<parallel>], iteration_bounds = array<i64: 2>, scalar_prefetch = 0 : i64, scratch_operands = 0 : i64, tpu.core_type = #tpu.core_type<tc>, window_params = [{transform_indices = @transform_0, window_bounds = array<i64: 1, 4, 64>}, {transform_indices = @transform_1, window_bounds = array<i64: 1, 16, 64>}, {pipeline_mode = #tpu.pipeline_mode<synchronous>, transform_indices = @transform_2, window_bounds = array<i64: 2, 1, 64>}, {pipeline_mode = #tpu.pipeline_mode<synchronous>, transform_indices = @transform_3, window_bounds = array<i64: 2, 1, 64>}, {pipeline_mode = #tpu.pipeline_mode<synchronous>, transform_indices = @transform_4, window_bounds = array<i64: 2, 64, 192>}, {pipeline_mode = #tpu.pipeline_mode<synchronous>, transform_indices = @transform_5, window_bounds = array<i64: 2, 64, 64>}, {pipeline_mode = #tpu.pipeline_mode<synchronous>, transform_indices = @transform_6, window_bounds = array<i64: 2, 1, 64>}, {pipeline_mode = #tpu.pipeline_mode<synchronous>, transform_indices = @transform_7, window_bounds = array<i64: 2, 1, 64>}, {pipeline_mode = #tpu.pipeline_mode<synchronous>, transform_indices = @transform_8, window_bounds = array<i64: 2, 64, 64>}, {pipeline_mode = #tpu.pipeline_mode<synchronous>, transform_indices = @transform_9, window_bounds = array<i64: 2, 64, 128>}, {pipeline_mode = #tpu.pipeline_mode<synchronous>, transform_indices = @transform_10, window_bounds = array<i64: 2, 64, 64>}, {pipeline_mode = #tpu.pipeline_mode<synchronous>, transform_indices = @transform_11, window_bounds = array<i64: 2, 1, 64>}, {pipeline_mode = #tpu.pipeline_mode<synchronous>, transform_indices = @transform_12, window_bounds = array<i64: 2, 1, 64>}, {pipeline_mode = #tpu.pipeline_mode<synchronous>, transform_indices = @transform_13, window_bounds = array<i64: 2, 64, 256>}, {pipeline_mode = #tpu.pipeline_mode<synchronous>, transform_indices = @transform_14, window_bounds = array<i64: 2, 1, 256>}, {pipeline_mode = #tpu.pipeline_mode<synchronous>, transform_indices = @transform_15, window_bounds = array<i64: 2, 256, 64>}, {pipeline_mode = #tpu.pipeline_mode<synchronous>, transform_indices = @transform_16, window_bounds = array<i64: 2, 1, 64>}, {pipeline_mode = #tpu.pipeline_mode<synchronous>, transform_indices = @transform_17, window_bounds = array<i64: 1, 64>}, {pipeline_mode = #tpu.pipeline_mode<synchronous>, transform_indices = @transform_18, window_bounds = array<i64: 1, 64>}, {transform_indices = @transform_19, window_bounds = array<i64: 1, 4, 64>}]} {
    %c0 = arith.constant 0 : index
    %c0_0 = arith.constant 0 : index
    %c0_1 = arith.constant 0 : index
    %0 = vector.load %arg1[%c0, %c0_0, %c0_1] : memref<1x4x64xf32, #tpu.memory_space<vmem>>, vector<1x4x64xf32>
    %1 = vector.shape_cast %0 : vector<1x4x64xf32> to vector<4x64xf32>
    %c0_2 = arith.constant 0 : index
    %c0_3 = arith.constant 0 : index
    %c0_4 = arith.constant 0 : index
    %2 = vector.load %arg2[%c0_2, %c0_3, %c0_4] : memref<1x16x64xf32, #tpu.memory_space<vmem>>, vector<1x16x64xf32>
    %3 = vector.shape_cast %2 : vector<1x16x64xf32> to vector<16x64xf32>
    %c0_5 = arith.constant 0 : index
    %c0_6 = arith.constant 0 : index
    %c0_7 = arith.constant 0 : index
    %4 = vector.load %arg3[%c0_5, %c0_6, %c0_7] : memref<2x1x64xf32, #tpu.memory_space<vmem>>, vector<1x1x64xf32>
    %5 = vector.shape_cast %4 : vector<1x1x64xf32> to vector<1x64xf32>
    %c0_8 = arith.constant 0 : index
    %c0_9 = arith.constant 0 : index
    %c0_10 = arith.constant 0 : index
    %6 = vector.load %arg4[%c0_8, %c0_9, %c0_10] : memref<2x1x64xf32, #tpu.memory_space<vmem>>, vector<1x1x64xf32>
    %7 = vector.shape_cast %6 : vector<1x1x64xf32> to vector<1x64xf32>
    %cst = arith.constant dense<0.000000e+00> : vector<4xf32>
    %8 = vector.multi_reduction <add>, %1, %cst [1] : vector<4x64xf32> to vector<4xf32>
    %9 = vector.shape_cast %8 : vector<4xf32> to vector<4x1xf32>
    %cst_11 = arith.constant 6.400000e+01 : f32
    %10 = vector.broadcast %cst_11 : f32 to vector<4x1xf32>
    %11 = arith.divf %9, %10 : vector<4x1xf32>
    %12 = vector.broadcast %11 : vector<4x1xf32> to vector<4x64xf32>
    %13 = arith.subf %1, %12 : vector<4x64xf32>
    %14 = arith.mulf %13, %13 : vector<4x64xf32>
    %cst_12 = arith.constant dense<0.000000e+00> : vector<4xf32>
    %15 = vector.multi_reduction <add>, %14, %cst_12 [1] : vector<4x64xf32> to vector<4xf32>
    %16 = vector.shape_cast %15 : vector<4xf32> to vector<4x1xf32>
    %cst_13 = arith.constant 6.400000e+01 : f32
    %17 = vector.broadcast %cst_13 : f32 to vector<4x1xf32>
    %18 = arith.divf %16, %17 : vector<4x1xf32>
    %19 = vector.broadcast %11 : vector<4x1xf32> to vector<4x64xf32>
    %20 = arith.subf %1, %19 : vector<4x64xf32>
    %cst_14 = arith.constant 9.99999974E-6 : f32
    %21 = vector.broadcast %cst_14 : f32 to vector<4x1xf32>
    %22 = arith.addf %18, %21 : vector<4x1xf32>
    %23 = math.rsqrt %22 : vector<4x1xf32>
    %24 = vector.broadcast %23 : vector<4x1xf32> to vector<4x64xf32>
    %25 = arith.mulf %20, %24 : vector<4x64xf32>
    %26 = vector.broadcast %5 : vector<1x64xf32> to vector<4x64xf32>
    %27 = arith.mulf %25, %26 : vector<4x64xf32>
    %28 = vector.broadcast %7 : vector<1x64xf32> to vector<4x64xf32>
    %29 = arith.addf %27, %28 : vector<4x64xf32>
    %c0_15 = arith.constant 0 : index
    %c0_16 = arith.constant 0 : index
    %c0_17 = arith.constant 0 : index
    %30 = vector.load %arg5[%c0_15, %c0_16, %c0_17] : memref<2x64x192xbf16, #tpu.memory_space<vmem>>, vector<1x64x192xbf16>
    %31 = vector.shape_cast %30 : vector<1x64x192xbf16> to vector<64x192xbf16>
    %32 = arith.truncf %29 : vector<4x64xf32> to vector<4x64xbf16>
    %cst_18 = arith.constant dense<0.000000e+00> : vector<4x192xf32>
    %33 = tpu.matmul %32, %31, %cst_18 {dimension_numbers = #tpu.dot_dimension_numbers<[1], [0], [0], [1], [0, 0, 1, 1], [], []>} : vector<4x64xbf16>, vector<64x192xbf16>, vector<4x192xf32> -> vector<4x192xf32>
    %34 = vector.extract_strided_slice %33 {offsets = [0, 0], sizes = [4, 64], strides = [1, 1]} : vector<4x192xf32> to vector<4x64xf32>
    %35 = vector.extract_strided_slice %33 {offsets = [0, 64], sizes = [4, 64], strides = [1, 1]} : vector<4x192xf32> to vector<4x64xf32>
    %36 = vector.extract_strided_slice %33 {offsets = [0, 128], sizes = [4, 64], strides = [1, 1]} : vector<4x192xf32> to vector<4x64xf32>
    %c0_19 = arith.constant 0 : index
    %c0_20 = arith.constant 0 : index
    %c0_21 = arith.constant 0 : index
    %37 = vector.load %arg6[%c0_19, %c0_20, %c0_21] : memref<2x64x64xbf16, #tpu.memory_space<vmem>>, vector<1x64x64xbf16>
    %38 = vector.shape_cast %37 : vector<1x64x64xbf16> to vector<64x64xbf16>
    %39 = vector.extract_strided_slice %34 {offsets = [0, 0], sizes = [4, 16], strides = [1, 1]} : vector<4x64xf32> to vector<4x16xf32>
    %40 = vector.extract_strided_slice %35 {offsets = [0, 0], sizes = [4, 16], strides = [1, 1]} : vector<4x64xf32> to vector<4x16xf32>
    %41 = vector.extract_strided_slice %36 {offsets = [0, 0], sizes = [4, 16], strides = [1, 1]} : vector<4x64xf32> to vector<4x16xf32>
    %42 = tpu.transpose %40, [1, 0] : vector<4x16xf32> -> vector<16x4xf32>
    %cst_22 = arith.constant dense<0.000000e+00> : vector<4x4xf32>
    %43 = tpu.matmul %39, %42, %cst_22 {dimension_numbers = #tpu.dot_dimension_numbers<[1], [0], [0], [1], [0, 0, 1, 1], [], []>} : vector<4x16xf32>, vector<16x4xf32>, vector<4x4xf32> -> vector<4x4xf32>
    %cst_23 = arith.constant 2.500000e-01 : f32
    %44 = vector.broadcast %cst_23 : f32 to vector<4x4xf32>
    %45 = arith.mulf %43, %44 : vector<4x4xf32>
    %cst_24 = arith.constant dense<0xFF800000> : vector<4xf32>
    %46 = vector.multi_reduction <maximumf>, %45, %cst_24 [1] : vector<4x4xf32> to vector<4xf32>
    %47 = vector.shape_cast %46 : vector<4xf32> to vector<4x1xf32>
    %48 = vector.broadcast %47 : vector<4x1xf32> to vector<4x4xf32>
    %49 = arith.subf %45, %48 : vector<4x4xf32>
    %50 = math.exp %49 : vector<4x4xf32>
    %cst_25 = arith.constant dense<0.000000e+00> : vector<4xf32>
    %51 = vector.multi_reduction <add>, %50, %cst_25 [1] : vector<4x4xf32> to vector<4xf32>
    %52 = vector.shape_cast %51 : vector<4xf32> to vector<4x1xf32>
    %53 = tpu.reciprocal %52 {approx = true} : vector<4x1xf32> -> vector<4x1xf32>
    %54 = vector.broadcast %53 : vector<4x1xf32> to vector<4x4xf32>
    %55 = arith.mulf %50, %54 : vector<4x4xf32>
    %cst_26 = arith.constant dense<0.000000e+00> : vector<4x16xf32>
    %56 = tpu.matmul %55, %41, %cst_26 {dimension_numbers = #tpu.dot_dimension_numbers<[1], [0], [0], [1], [0, 0, 1, 1], [], []>} : vector<4x4xf32>, vector<4x16xf32>, vector<4x16xf32> -> vector<4x16xf32>
    %57 = vector.extract_strided_slice %34 {offsets = [0, 16], sizes = [4, 16], strides = [1, 1]} : vector<4x64xf32> to vector<4x16xf32>
    %58 = vector.extract_strided_slice %35 {offsets = [0, 16], sizes = [4, 16], strides = [1, 1]} : vector<4x64xf32> to vector<4x16xf32>
    %59 = vector.extract_strided_slice %36 {offsets = [0, 16], sizes = [4, 16], strides = [1, 1]} : vector<4x64xf32> to vector<4x16xf32>
    %60 = tpu.transpose %58, [1, 0] : vector<4x16xf32> -> vector<16x4xf32>
    %cst_27 = arith.constant dense<0.000000e+00> : vector<4x4xf32>
    %61 = tpu.matmul %57, %60, %cst_27 {dimension_numbers = #tpu.dot_dimension_numbers<[1], [0], [0], [1], [0, 0, 1, 1], [], []>} : vector<4x16xf32>, vector<16x4xf32>, vector<4x4xf32> -> vector<4x4xf32>
    %cst_28 = arith.constant 2.500000e-01 : f32
    %62 = vector.broadcast %cst_28 : f32 to vector<4x4xf32>
    %63 = arith.mulf %61, %62 : vector<4x4xf32>
    %cst_29 = arith.constant dense<0xFF800000> : vector<4xf32>
    %64 = vector.multi_reduction <maximumf>, %63, %cst_29 [1] : vector<4x4xf32> to vector<4xf32>
    %65 = vector.shape_cast %64 : vector<4xf32> to vector<4x1xf32>
    %66 = vector.broadcast %65 : vector<4x1xf32> to vector<4x4xf32>
    %67 = arith.subf %63, %66 : vector<4x4xf32>
    %68 = math.exp %67 : vector<4x4xf32>
    %cst_30 = arith.constant dense<0.000000e+00> : vector<4xf32>
    %69 = vector.multi_reduction <add>, %68, %cst_30 [1] : vector<4x4xf32> to vector<4xf32>
    %70 = vector.shape_cast %69 : vector<4xf32> to vector<4x1xf32>
    %71 = tpu.reciprocal %70 {approx = true} : vector<4x1xf32> -> vector<4x1xf32>
    %72 = vector.broadcast %71 : vector<4x1xf32> to vector<4x4xf32>
    %73 = arith.mulf %68, %72 : vector<4x4xf32>
    %cst_31 = arith.constant dense<0.000000e+00> : vector<4x16xf32>
    %74 = tpu.matmul %73, %59, %cst_31 {dimension_numbers = #tpu.dot_dimension_numbers<[1], [0], [0], [1], [0, 0, 1, 1], [], []>} : vector<4x4xf32>, vector<4x16xf32>, vector<4x16xf32> -> vector<4x16xf32>
    %75 = vector.extract_strided_slice %34 {offsets = [0, 32], sizes = [4, 16], strides = [1, 1]} : vector<4x64xf32> to vector<4x16xf32>
    %76 = vector.extract_strided_slice %35 {offsets = [0, 32], sizes = [4, 16], strides = [1, 1]} : vector<4x64xf32> to vector<4x16xf32>
    %77 = vector.extract_strided_slice %36 {offsets = [0, 32], sizes = [4, 16], strides = [1, 1]} : vector<4x64xf32> to vector<4x16xf32>
    %78 = tpu.transpose %76, [1, 0] : vector<4x16xf32> -> vector<16x4xf32>
    %cst_32 = arith.constant dense<0.000000e+00> : vector<4x4xf32>
    %79 = tpu.matmul %75, %78, %cst_32 {dimension_numbers = #tpu.dot_dimension_numbers<[1], [0], [0], [1], [0, 0, 1, 1], [], []>} : vector<4x16xf32>, vector<16x4xf32>, vector<4x4xf32> -> vector<4x4xf32>
    %cst_33 = arith.constant 2.500000e-01 : f32
    %80 = vector.broadcast %cst_33 : f32 to vector<4x4xf32>
    %81 = arith.mulf %79, %80 : vector<4x4xf32>
    %cst_34 = arith.constant dense<0xFF800000> : vector<4xf32>
    %82 = vector.multi_reduction <maximumf>, %81, %cst_34 [1] : vector<4x4xf32> to vector<4xf32>
    %83 = vector.shape_cast %82 : vector<4xf32> to vector<4x1xf32>
    %84 = vector.broadcast %83 : vector<4x1xf32> to vector<4x4xf32>
    %85 = arith.subf %81, %84 : vector<4x4xf32>
    %86 = math.exp %85 : vector<4x4xf32>
    %cst_35 = arith.constant dense<0.000000e+00> : vector<4xf32>
    %87 = vector.multi_reduction <add>, %86, %cst_35 [1] : vector<4x4xf32> to vector<4xf32>
    %88 = vector.shape_cast %87 : vector<4xf32> to vector<4x1xf32>
    %89 = tpu.reciprocal %88 {approx = true} : vector<4x1xf32> -> vector<4x1xf32>
    %90 = vector.broadcast %89 : vector<4x1xf32> to vector<4x4xf32>
    %91 = arith.mulf %86, %90 : vector<4x4xf32>
    %cst_36 = arith.constant dense<0.000000e+00> : vector<4x16xf32>
    %92 = tpu.matmul %91, %77, %cst_36 {dimension_numbers = #tpu.dot_dimension_numbers<[1], [0], [0], [1], [0, 0, 1, 1], [], []>} : vector<4x4xf32>, vector<4x16xf32>, vector<4x16xf32> -> vector<4x16xf32>
    %93 = vector.extract_strided_slice %34 {offsets = [0, 48], sizes = [4, 16], strides = [1, 1]} : vector<4x64xf32> to vector<4x16xf32>
    %94 = vector.extract_strided_slice %35 {offsets = [0, 48], sizes = [4, 16], strides = [1, 1]} : vector<4x64xf32> to vector<4x16xf32>
    %95 = vector.extract_strided_slice %36 {offsets = [0, 48], sizes = [4, 16], strides = [1, 1]} : vector<4x64xf32> to vector<4x16xf32>
    %96 = tpu.transpose %94, [1, 0] : vector<4x16xf32> -> vector<16x4xf32>
    %cst_37 = arith.constant dense<0.000000e+00> : vector<4x4xf32>
    %97 = tpu.matmul %93, %96, %cst_37 {dimension_numbers = #tpu.dot_dimension_numbers<[1], [0], [0], [1], [0, 0, 1, 1], [], []>} : vector<4x16xf32>, vector<16x4xf32>, vector<4x4xf32> -> vector<4x4xf32>
    %cst_38 = arith.constant 2.500000e-01 : f32
    %98 = vector.broadcast %cst_38 : f32 to vector<4x4xf32>
    %99 = arith.mulf %97, %98 : vector<4x4xf32>
    %cst_39 = arith.constant dense<0xFF800000> : vector<4xf32>
    %100 = vector.multi_reduction <maximumf>, %99, %cst_39 [1] : vector<4x4xf32> to vector<4xf32>
    %101 = vector.shape_cast %100 : vector<4xf32> to vector<4x1xf32>
    %102 = vector.broadcast %101 : vector<4x1xf32> to vector<4x4xf32>
    %103 = arith.subf %99, %102 : vector<4x4xf32>
    %104 = math.exp %103 : vector<4x4xf32>
    %cst_40 = arith.constant dense<0.000000e+00> : vector<4xf32>
    %105 = vector.multi_reduction <add>, %104, %cst_40 [1] : vector<4x4xf32> to vector<4xf32>
    %106 = vector.shape_cast %105 : vector<4xf32> to vector<4x1xf32>
    %107 = tpu.reciprocal %106 {approx = true} : vector<4x1xf32> -> vector<4x1xf32>
    %108 = vector.broadcast %107 : vector<4x1xf32> to vector<4x4xf32>
    %109 = arith.mulf %104, %108 : vector<4x4xf32>
    %cst_41 = arith.constant dense<0.000000e+00> : vector<4x16xf32>
    %110 = tpu.matmul %109, %95, %cst_41 {dimension_numbers = #tpu.dot_dimension_numbers<[1], [0], [0], [1], [0, 0, 1, 1], [], []>} : vector<4x4xf32>, vector<4x16xf32>, vector<4x16xf32> -> vector<4x16xf32>
    %111 = tpu.concatenate %56, %74, %92, %110 in 1 : vector<4x16xf32>, vector<4x16xf32>, vector<4x16xf32>, vector<4x16xf32> -> vector<4x64xf32>
    %112 = arith.truncf %111 : vector<4x64xf32> to vector<4x64xbf16>
    %cst_42 = arith.constant dense<0.000000e+00> : vector<4x64xf32>
    %113 = tpu.matmul %112, %38, %cst_42 {dimension_numbers = #tpu.dot_dimension_numbers<[1], [0], [0], [1], [0, 0, 1, 1], [], []>} : vector<4x64xbf16>, vector<64x64xbf16>, vector<4x64xf32> -> vector<4x64xf32>
    %114 = arith.addf %1, %113 : vector<4x64xf32>
    %c0_43 = arith.constant 0 : index
    %c0_44 = arith.constant 0 : index
    %c0_45 = arith.constant 0 : index
    %115 = vector.load %arg7[%c0_43, %c0_44, %c0_45] : memref<2x1x64xf32, #tpu.memory_space<vmem>>, vector<1x1x64xf32>
    %116 = vector.shape_cast %115 : vector<1x1x64xf32> to vector<1x64xf32>
    %c0_46 = arith.constant 0 : index
    %c0_47 = arith.constant 0 : index
    %c0_48 = arith.constant 0 : index
    %117 = vector.load %arg8[%c0_46, %c0_47, %c0_48] : memref<2x1x64xf32, #tpu.memory_space<vmem>>, vector<1x1x64xf32>
    %118 = vector.shape_cast %117 : vector<1x1x64xf32> to vector<1x64xf32>
    %cst_49 = arith.constant dense<0.000000e+00> : vector<4xf32>
    %119 = vector.multi_reduction <add>, %114, %cst_49 [1] : vector<4x64xf32> to vector<4xf32>
    %120 = vector.shape_cast %119 : vector<4xf32> to vector<4x1xf32>
    %cst_50 = arith.constant 6.400000e+01 : f32
    %121 = vector.broadcast %cst_50 : f32 to vector<4x1xf32>
    %122 = arith.divf %120, %121 : vector<4x1xf32>
    %123 = vector.broadcast %122 : vector<4x1xf32> to vector<4x64xf32>
    %124 = arith.subf %114, %123 : vector<4x64xf32>
    %125 = arith.mulf %124, %124 : vector<4x64xf32>
    %cst_51 = arith.constant dense<0.000000e+00> : vector<4xf32>
    %126 = vector.multi_reduction <add>, %125, %cst_51 [1] : vector<4x64xf32> to vector<4xf32>
    %127 = vector.shape_cast %126 : vector<4xf32> to vector<4x1xf32>
    %cst_52 = arith.constant 6.400000e+01 : f32
    %128 = vector.broadcast %cst_52 : f32 to vector<4x1xf32>
    %129 = arith.divf %127, %128 : vector<4x1xf32>
    %130 = vector.broadcast %122 : vector<4x1xf32> to vector<4x64xf32>
    %131 = arith.subf %114, %130 : vector<4x64xf32>
    %cst_53 = arith.constant 9.99999974E-6 : f32
    %132 = vector.broadcast %cst_53 : f32 to vector<4x1xf32>
    %133 = arith.addf %129, %132 : vector<4x1xf32>
    %134 = math.rsqrt %133 : vector<4x1xf32>
    %135 = vector.broadcast %134 : vector<4x1xf32> to vector<4x64xf32>
    %136 = arith.mulf %131, %135 : vector<4x64xf32>
    %137 = vector.broadcast %116 : vector<1x64xf32> to vector<4x64xf32>
    %138 = arith.mulf %136, %137 : vector<4x64xf32>
    %139 = vector.broadcast %118 : vector<1x64xf32> to vector<4x64xf32>
    %140 = arith.addf %138, %139 : vector<4x64xf32>
    %c0_54 = arith.constant 0 : index
    %c0_55 = arith.constant 0 : index
    %c0_56 = arith.constant 0 : index
    %141 = vector.load %arg9[%c0_54, %c0_55, %c0_56] : memref<2x64x64xbf16, #tpu.memory_space<vmem>>, vector<1x64x64xbf16>
    %142 = vector.shape_cast %141 : vector<1x64x64xbf16> to vector<64x64xbf16>
    %143 = arith.truncf %140 : vector<4x64xf32> to vector<4x64xbf16>
    %cst_57 = arith.constant dense<0.000000e+00> : vector<4x64xf32>
    %144 = tpu.matmul %143, %142, %cst_57 {dimension_numbers = #tpu.dot_dimension_numbers<[1], [0], [0], [1], [0, 0, 1, 1], [], []>} : vector<4x64xbf16>, vector<64x64xbf16>, vector<4x64xf32> -> vector<4x64xf32>
    %c0_58 = arith.constant 0 : index
    %c0_59 = arith.constant 0 : index
    %c0_60 = arith.constant 0 : index
    %145 = vector.load %arg10[%c0_58, %c0_59, %c0_60] : memref<2x64x128xbf16, #tpu.memory_space<vmem>>, vector<1x64x128xbf16>
    %146 = vector.shape_cast %145 : vector<1x64x128xbf16> to vector<64x128xbf16>
    %147 = arith.truncf %3 : vector<16x64xf32> to vector<16x64xbf16>
    %cst_61 = arith.constant dense<0.000000e+00> : vector<16x128xf32>
    %148 = tpu.matmul %147, %146, %cst_61 {dimension_numbers = #tpu.dot_dimension_numbers<[1], [0], [0], [1], [0, 0, 1, 1], [], []>} : vector<16x64xbf16>, vector<64x128xbf16>, vector<16x128xf32> -> vector<16x128xf32>
    %149 = vector.extract_strided_slice %148 {offsets = [0, 0], sizes = [16, 64], strides = [1, 1]} : vector<16x128xf32> to vector<16x64xf32>
    %150 = vector.extract_strided_slice %148 {offsets = [0, 64], sizes = [16, 64], strides = [1, 1]} : vector<16x128xf32> to vector<16x64xf32>
    %c0_62 = arith.constant 0 : index
    %c0_63 = arith.constant 0 : index
    %c0_64 = arith.constant 0 : index
    %151 = vector.load %arg11[%c0_62, %c0_63, %c0_64] : memref<2x64x64xbf16, #tpu.memory_space<vmem>>, vector<1x64x64xbf16>
    %152 = vector.shape_cast %151 : vector<1x64x64xbf16> to vector<64x64xbf16>
    %153 = vector.extract_strided_slice %144 {offsets = [0, 0], sizes = [4, 16], strides = [1, 1]} : vector<4x64xf32> to vector<4x16xf32>
    %154 = vector.extract_strided_slice %149 {offsets = [0, 0], sizes = [16, 16], strides = [1, 1]} : vector<16x64xf32> to vector<16x16xf32>
    %155 = vector.extract_strided_slice %150 {offsets = [0, 0], sizes = [16, 16], strides = [1, 1]} : vector<16x64xf32> to vector<16x16xf32>
    %156 = tpu.transpose %154, [1, 0] : vector<16x16xf32> -> vector<16x16xf32>
    %cst_65 = arith.constant dense<0.000000e+00> : vector<4x16xf32>
    %157 = tpu.matmul %153, %156, %cst_65 {dimension_numbers = #tpu.dot_dimension_numbers<[1], [0], [0], [1], [0, 0, 1, 1], [], []>} : vector<4x16xf32>, vector<16x16xf32>, vector<4x16xf32> -> vector<4x16xf32>
    %cst_66 = arith.constant 2.500000e-01 : f32
    %158 = vector.broadcast %cst_66 : f32 to vector<4x16xf32>
    %159 = arith.mulf %157, %158 : vector<4x16xf32>
    %cst_67 = arith.constant dense<0xFF800000> : vector<4xf32>
    %160 = vector.multi_reduction <maximumf>, %159, %cst_67 [1] : vector<4x16xf32> to vector<4xf32>
    %161 = vector.shape_cast %160 : vector<4xf32> to vector<4x1xf32>
    %162 = vector.broadcast %161 : vector<4x1xf32> to vector<4x16xf32>
    %163 = arith.subf %159, %162 : vector<4x16xf32>
    %164 = math.exp %163 : vector<4x16xf32>
    %cst_68 = arith.constant dense<0.000000e+00> : vector<4xf32>
    %165 = vector.multi_reduction <add>, %164, %cst_68 [1] : vector<4x16xf32> to vector<4xf32>
    %166 = vector.shape_cast %165 : vector<4xf32> to vector<4x1xf32>
    %167 = tpu.reciprocal %166 {approx = true} : vector<4x1xf32> -> vector<4x1xf32>
    %168 = vector.broadcast %167 : vector<4x1xf32> to vector<4x16xf32>
    %169 = arith.mulf %164, %168 : vector<4x16xf32>
    %cst_69 = arith.constant dense<0.000000e+00> : vector<4x16xf32>
    %170 = tpu.matmul %169, %155, %cst_69 {dimension_numbers = #tpu.dot_dimension_numbers<[1], [0], [0], [1], [0, 0, 1, 1], [], []>} : vector<4x16xf32>, vector<16x16xf32>, vector<4x16xf32> -> vector<4x16xf32>
    %171 = vector.extract_strided_slice %144 {offsets = [0, 16], sizes = [4, 16], strides = [1, 1]} : vector<4x64xf32> to vector<4x16xf32>
    %172 = vector.extract_strided_slice %149 {offsets = [0, 16], sizes = [16, 16], strides = [1, 1]} : vector<16x64xf32> to vector<16x16xf32>
    %173 = vector.extract_strided_slice %150 {offsets = [0, 16], sizes = [16, 16], strides = [1, 1]} : vector<16x64xf32> to vector<16x16xf32>
    %174 = tpu.transpose %172, [1, 0] : vector<16x16xf32> -> vector<16x16xf32>
    %cst_70 = arith.constant dense<0.000000e+00> : vector<4x16xf32>
    %175 = tpu.matmul %171, %174, %cst_70 {dimension_numbers = #tpu.dot_dimension_numbers<[1], [0], [0], [1], [0, 0, 1, 1], [], []>} : vector<4x16xf32>, vector<16x16xf32>, vector<4x16xf32> -> vector<4x16xf32>
    %cst_71 = arith.constant 2.500000e-01 : f32
    %176 = vector.broadcast %cst_71 : f32 to vector<4x16xf32>
    %177 = arith.mulf %175, %176 : vector<4x16xf32>
    %cst_72 = arith.constant dense<0xFF800000> : vector<4xf32>
    %178 = vector.multi_reduction <maximumf>, %177, %cst_72 [1] : vector<4x16xf32> to vector<4xf32>
    %179 = vector.shape_cast %178 : vector<4xf32> to vector<4x1xf32>
    %180 = vector.broadcast %179 : vector<4x1xf32> to vector<4x16xf32>
    %181 = arith.subf %177, %180 : vector<4x16xf32>
    %182 = math.exp %181 : vector<4x16xf32>
    %cst_73 = arith.constant dense<0.000000e+00> : vector<4xf32>
    %183 = vector.multi_reduction <add>, %182, %cst_73 [1] : vector<4x16xf32> to vector<4xf32>
    %184 = vector.shape_cast %183 : vector<4xf32> to vector<4x1xf32>
    %185 = tpu.reciprocal %184 {approx = true} : vector<4x1xf32> -> vector<4x1xf32>
    %186 = vector.broadcast %185 : vector<4x1xf32> to vector<4x16xf32>
    %187 = arith.mulf %182, %186 : vector<4x16xf32>
    %cst_74 = arith.constant dense<0.000000e+00> : vector<4x16xf32>
    %188 = tpu.matmul %187, %173, %cst_74 {dimension_numbers = #tpu.dot_dimension_numbers<[1], [0], [0], [1], [0, 0, 1, 1], [], []>} : vector<4x16xf32>, vector<16x16xf32>, vector<4x16xf32> -> vector<4x16xf32>
    %189 = vector.extract_strided_slice %144 {offsets = [0, 32], sizes = [4, 16], strides = [1, 1]} : vector<4x64xf32> to vector<4x16xf32>
    %190 = vector.extract_strided_slice %149 {offsets = [0, 32], sizes = [16, 16], strides = [1, 1]} : vector<16x64xf32> to vector<16x16xf32>
    %191 = vector.extract_strided_slice %150 {offsets = [0, 32], sizes = [16, 16], strides = [1, 1]} : vector<16x64xf32> to vector<16x16xf32>
    %192 = tpu.transpose %190, [1, 0] : vector<16x16xf32> -> vector<16x16xf32>
    %cst_75 = arith.constant dense<0.000000e+00> : vector<4x16xf32>
    %193 = tpu.matmul %189, %192, %cst_75 {dimension_numbers = #tpu.dot_dimension_numbers<[1], [0], [0], [1], [0, 0, 1, 1], [], []>} : vector<4x16xf32>, vector<16x16xf32>, vector<4x16xf32> -> vector<4x16xf32>
    %cst_76 = arith.constant 2.500000e-01 : f32
    %194 = vector.broadcast %cst_76 : f32 to vector<4x16xf32>
    %195 = arith.mulf %193, %194 : vector<4x16xf32>
    %cst_77 = arith.constant dense<0xFF800000> : vector<4xf32>
    %196 = vector.multi_reduction <maximumf>, %195, %cst_77 [1] : vector<4x16xf32> to vector<4xf32>
    %197 = vector.shape_cast %196 : vector<4xf32> to vector<4x1xf32>
    %198 = vector.broadcast %197 : vector<4x1xf32> to vector<4x16xf32>
    %199 = arith.subf %195, %198 : vector<4x16xf32>
    %200 = math.exp %199 : vector<4x16xf32>
    %cst_78 = arith.constant dense<0.000000e+00> : vector<4xf32>
    %201 = vector.multi_reduction <add>, %200, %cst_78 [1] : vector<4x16xf32> to vector<4xf32>
    %202 = vector.shape_cast %201 : vector<4xf32> to vector<4x1xf32>
    %203 = tpu.reciprocal %202 {approx = true} : vector<4x1xf32> -> vector<4x1xf32>
    %204 = vector.broadcast %203 : vector<4x1xf32> to vector<4x16xf32>
    %205 = arith.mulf %200, %204 : vector<4x16xf32>
    %cst_79 = arith.constant dense<0.000000e+00> : vector<4x16xf32>
    %206 = tpu.matmul %205, %191, %cst_79 {dimension_numbers = #tpu.dot_dimension_numbers<[1], [0], [0], [1], [0, 0, 1, 1], [], []>} : vector<4x16xf32>, vector<16x16xf32>, vector<4x16xf32> -> vector<4x16xf32>
    %207 = vector.extract_strided_slice %144 {offsets = [0, 48], sizes = [4, 16], strides = [1, 1]} : vector<4x64xf32> to vector<4x16xf32>
    %208 = vector.extract_strided_slice %149 {offsets = [0, 48], sizes = [16, 16], strides = [1, 1]} : vector<16x64xf32> to vector<16x16xf32>
    %209 = vector.extract_strided_slice %150 {offsets = [0, 48], sizes = [16, 16], strides = [1, 1]} : vector<16x64xf32> to vector<16x16xf32>
    %210 = tpu.transpose %208, [1, 0] : vector<16x16xf32> -> vector<16x16xf32>
    %cst_80 = arith.constant dense<0.000000e+00> : vector<4x16xf32>
    %211 = tpu.matmul %207, %210, %cst_80 {dimension_numbers = #tpu.dot_dimension_numbers<[1], [0], [0], [1], [0, 0, 1, 1], [], []>} : vector<4x16xf32>, vector<16x16xf32>, vector<4x16xf32> -> vector<4x16xf32>
    %cst_81 = arith.constant 2.500000e-01 : f32
    %212 = vector.broadcast %cst_81 : f32 to vector<4x16xf32>
    %213 = arith.mulf %211, %212 : vector<4x16xf32>
    %cst_82 = arith.constant dense<0xFF800000> : vector<4xf32>
    %214 = vector.multi_reduction <maximumf>, %213, %cst_82 [1] : vector<4x16xf32> to vector<4xf32>
    %215 = vector.shape_cast %214 : vector<4xf32> to vector<4x1xf32>
    %216 = vector.broadcast %215 : vector<4x1xf32> to vector<4x16xf32>
    %217 = arith.subf %213, %216 : vector<4x16xf32>
    %218 = math.exp %217 : vector<4x16xf32>
    %cst_83 = arith.constant dense<0.000000e+00> : vector<4xf32>
    %219 = vector.multi_reduction <add>, %218, %cst_83 [1] : vector<4x16xf32> to vector<4xf32>
    %220 = vector.shape_cast %219 : vector<4xf32> to vector<4x1xf32>
    %221 = tpu.reciprocal %220 {approx = true} : vector<4x1xf32> -> vector<4x1xf32>
    %222 = vector.broadcast %221 : vector<4x1xf32> to vector<4x16xf32>
    %223 = arith.mulf %218, %222 : vector<4x16xf32>
    %cst_84 = arith.constant dense<0.000000e+00> : vector<4x16xf32>
    %224 = tpu.matmul %223, %209, %cst_84 {dimension_numbers = #tpu.dot_dimension_numbers<[1], [0], [0], [1], [0, 0, 1, 1], [], []>} : vector<4x16xf32>, vector<16x16xf32>, vector<4x16xf32> -> vector<4x16xf32>
    %225 = tpu.concatenate %170, %188, %206, %224 in 1 : vector<4x16xf32>, vector<4x16xf32>, vector<4x16xf32>, vector<4x16xf32> -> vector<4x64xf32>
    %226 = arith.truncf %225 : vector<4x64xf32> to vector<4x64xbf16>
    %cst_85 = arith.constant dense<0.000000e+00> : vector<4x64xf32>
    %227 = tpu.matmul %226, %152, %cst_85 {dimension_numbers = #tpu.dot_dimension_numbers<[1], [0], [0], [1], [0, 0, 1, 1], [], []>} : vector<4x64xbf16>, vector<64x64xbf16>, vector<4x64xf32> -> vector<4x64xf32>
    %228 = arith.addf %114, %227 : vector<4x64xf32>
    %c0_86 = arith.constant 0 : index
    %c0_87 = arith.constant 0 : index
    %c0_88 = arith.constant 0 : index
    %229 = vector.load %arg12[%c0_86, %c0_87, %c0_88] : memref<2x1x64xf32, #tpu.memory_space<vmem>>, vector<1x1x64xf32>
    %230 = vector.shape_cast %229 : vector<1x1x64xf32> to vector<1x64xf32>
    %c0_89 = arith.constant 0 : index
    %c0_90 = arith.constant 0 : index
    %c0_91 = arith.constant 0 : index
    %231 = vector.load %arg13[%c0_89, %c0_90, %c0_91] : memref<2x1x64xf32, #tpu.memory_space<vmem>>, vector<1x1x64xf32>
    %232 = vector.shape_cast %231 : vector<1x1x64xf32> to vector<1x64xf32>
    %cst_92 = arith.constant dense<0.000000e+00> : vector<4xf32>
    %233 = vector.multi_reduction <add>, %228, %cst_92 [1] : vector<4x64xf32> to vector<4xf32>
    %234 = vector.shape_cast %233 : vector<4xf32> to vector<4x1xf32>
    %cst_93 = arith.constant 6.400000e+01 : f32
    %235 = vector.broadcast %cst_93 : f32 to vector<4x1xf32>
    %236 = arith.divf %234, %235 : vector<4x1xf32>
    %237 = vector.broadcast %236 : vector<4x1xf32> to vector<4x64xf32>
    %238 = arith.subf %228, %237 : vector<4x64xf32>
    %239 = arith.mulf %238, %238 : vector<4x64xf32>
    %cst_94 = arith.constant dense<0.000000e+00> : vector<4xf32>
    %240 = vector.multi_reduction <add>, %239, %cst_94 [1] : vector<4x64xf32> to vector<4xf32>
    %241 = vector.shape_cast %240 : vector<4xf32> to vector<4x1xf32>
    %cst_95 = arith.constant 6.400000e+01 : f32
    %242 = vector.broadcast %cst_95 : f32 to vector<4x1xf32>
    %243 = arith.divf %241, %242 : vector<4x1xf32>
    %244 = vector.broadcast %236 : vector<4x1xf32> to vector<4x64xf32>
    %245 = arith.subf %228, %244 : vector<4x64xf32>
    %cst_96 = arith.constant 9.99999974E-6 : f32
    %246 = vector.broadcast %cst_96 : f32 to vector<4x1xf32>
    %247 = arith.addf %243, %246 : vector<4x1xf32>
    %248 = math.rsqrt %247 : vector<4x1xf32>
    %249 = vector.broadcast %248 : vector<4x1xf32> to vector<4x64xf32>
    %250 = arith.mulf %245, %249 : vector<4x64xf32>
    %251 = vector.broadcast %230 : vector<1x64xf32> to vector<4x64xf32>
    %252 = arith.mulf %250, %251 : vector<4x64xf32>
    %253 = vector.broadcast %232 : vector<1x64xf32> to vector<4x64xf32>
    %254 = arith.addf %252, %253 : vector<4x64xf32>
    %c0_97 = arith.constant 0 : index
    %c0_98 = arith.constant 0 : index
    %c0_99 = arith.constant 0 : index
    %255 = vector.load %arg14[%c0_97, %c0_98, %c0_99] : memref<2x64x256xbf16, #tpu.memory_space<vmem>>, vector<1x64x256xbf16>
    %256 = vector.shape_cast %255 : vector<1x64x256xbf16> to vector<64x256xbf16>
    %257 = arith.truncf %254 : vector<4x64xf32> to vector<4x64xbf16>
    %cst_100 = arith.constant dense<0.000000e+00> : vector<4x256xf32>
    %258 = tpu.matmul %257, %256, %cst_100 {dimension_numbers = #tpu.dot_dimension_numbers<[1], [0], [0], [1], [0, 0, 1, 1], [], []>} : vector<4x64xbf16>, vector<64x256xbf16>, vector<4x256xf32> -> vector<4x256xf32>
    %c0_101 = arith.constant 0 : index
    %c0_102 = arith.constant 0 : index
    %c0_103 = arith.constant 0 : index
    %259 = vector.load %arg15[%c0_101, %c0_102, %c0_103] : memref<2x1x256xf32, #tpu.memory_space<vmem>>, vector<1x1x256xf32>
    %260 = vector.shape_cast %259 : vector<1x1x256xf32> to vector<1x256xf32>
    %261 = vector.broadcast %260 : vector<1x256xf32> to vector<4x256xf32>
    %262 = arith.addf %258, %261 : vector<4x256xf32>
    %cst_104 = arith.constant 0.000000e+00 : f32
    %263 = vector.broadcast %cst_104 : f32 to vector<4x256xf32>
    %264 = arith.maximumf %262, %263 : vector<4x256xf32>
    %c0_105 = arith.constant 0 : index
    %c0_106 = arith.constant 0 : index
    %c0_107 = arith.constant 0 : index
    %265 = vector.load %arg16[%c0_105, %c0_106, %c0_107] : memref<2x256x64xbf16, #tpu.memory_space<vmem>>, vector<1x256x64xbf16>
    %266 = vector.shape_cast %265 : vector<1x256x64xbf16> to vector<256x64xbf16>
    %267 = arith.truncf %264 : vector<4x256xf32> to vector<4x256xbf16>
    %cst_108 = arith.constant dense<0.000000e+00> : vector<4x64xf32>
    %268 = tpu.matmul %267, %266, %cst_108 {dimension_numbers = #tpu.dot_dimension_numbers<[1], [0], [0], [1], [0, 0, 1, 1], [], []>} : vector<4x256xbf16>, vector<256x64xbf16>, vector<4x64xf32> -> vector<4x64xf32>
    %269 = arith.addf %228, %268 : vector<4x64xf32>
    %c0_109 = arith.constant 0 : index
    %c0_110 = arith.constant 0 : index
    %c0_111 = arith.constant 0 : index
    %270 = vector.load %arg17[%c0_109, %c0_110, %c0_111] : memref<2x1x64xf32, #tpu.memory_space<vmem>>, vector<1x1x64xf32>
    %271 = vector.shape_cast %270 : vector<1x1x64xf32> to vector<1x64xf32>
    %272 = vector.broadcast %271 : vector<1x64xf32> to vector<4x64xf32>
    %273 = arith.addf %269, %272 : vector<4x64xf32>
    %c1 = arith.constant 1 : index
    %c0_112 = arith.constant 0 : index
    %c0_113 = arith.constant 0 : index
    %274 = vector.load %arg3[%c1, %c0_112, %c0_113] : memref<2x1x64xf32, #tpu.memory_space<vmem>>, vector<1x1x64xf32>
    %275 = vector.shape_cast %274 : vector<1x1x64xf32> to vector<1x64xf32>
    %c1_114 = arith.constant 1 : index
    %c0_115 = arith.constant 0 : index
    %c0_116 = arith.constant 0 : index
    %276 = vector.load %arg4[%c1_114, %c0_115, %c0_116] : memref<2x1x64xf32, #tpu.memory_space<vmem>>, vector<1x1x64xf32>
    %277 = vector.shape_cast %276 : vector<1x1x64xf32> to vector<1x64xf32>
    %cst_117 = arith.constant dense<0.000000e+00> : vector<4xf32>
    %278 = vector.multi_reduction <add>, %273, %cst_117 [1] : vector<4x64xf32> to vector<4xf32>
    %279 = vector.shape_cast %278 : vector<4xf32> to vector<4x1xf32>
    %cst_118 = arith.constant 6.400000e+01 : f32
    %280 = vector.broadcast %cst_118 : f32 to vector<4x1xf32>
    %281 = arith.divf %279, %280 : vector<4x1xf32>
    %282 = vector.broadcast %281 : vector<4x1xf32> to vector<4x64xf32>
    %283 = arith.subf %273, %282 : vector<4x64xf32>
    %284 = arith.mulf %283, %283 : vector<4x64xf32>
    %cst_119 = arith.constant dense<0.000000e+00> : vector<4xf32>
    %285 = vector.multi_reduction <add>, %284, %cst_119 [1] : vector<4x64xf32> to vector<4xf32>
    %286 = vector.shape_cast %285 : vector<4xf32> to vector<4x1xf32>
    %cst_120 = arith.constant 6.400000e+01 : f32
    %287 = vector.broadcast %cst_120 : f32 to vector<4x1xf32>
    %288 = arith.divf %286, %287 : vector<4x1xf32>
    %289 = vector.broadcast %281 : vector<4x1xf32> to vector<4x64xf32>
    %290 = arith.subf %273, %289 : vector<4x64xf32>
    %cst_121 = arith.constant 9.99999974E-6 : f32
    %291 = vector.broadcast %cst_121 : f32 to vector<4x1xf32>
    %292 = arith.addf %288, %291 : vector<4x1xf32>
    %293 = math.rsqrt %292 : vector<4x1xf32>
    %294 = vector.broadcast %293 : vector<4x1xf32> to vector<4x64xf32>
    %295 = arith.mulf %290, %294 : vector<4x64xf32>
    %296 = vector.broadcast %275 : vector<1x64xf32> to vector<4x64xf32>
    %297 = arith.mulf %295, %296 : vector<4x64xf32>
    %298 = vector.broadcast %277 : vector<1x64xf32> to vector<4x64xf32>
    %299 = arith.addf %297, %298 : vector<4x64xf32>
    %c1_122 = arith.constant 1 : index
    %c0_123 = arith.constant 0 : index
    %c0_124 = arith.constant 0 : index
    %300 = vector.load %arg5[%c1_122, %c0_123, %c0_124] : memref<2x64x192xbf16, #tpu.memory_space<vmem>>, vector<1x64x192xbf16>
    %301 = vector.shape_cast %300 : vector<1x64x192xbf16> to vector<64x192xbf16>
    %302 = arith.truncf %299 : vector<4x64xf32> to vector<4x64xbf16>
    %cst_125 = arith.constant dense<0.000000e+00> : vector<4x192xf32>
    %303 = tpu.matmul %302, %301, %cst_125 {dimension_numbers = #tpu.dot_dimension_numbers<[1], [0], [0], [1], [0, 0, 1, 1], [], []>} : vector<4x64xbf16>, vector<64x192xbf16>, vector<4x192xf32> -> vector<4x192xf32>
    %304 = vector.extract_strided_slice %303 {offsets = [0, 0], sizes = [4, 64], strides = [1, 1]} : vector<4x192xf32> to vector<4x64xf32>
    %305 = vector.extract_strided_slice %303 {offsets = [0, 64], sizes = [4, 64], strides = [1, 1]} : vector<4x192xf32> to vector<4x64xf32>
    %306 = vector.extract_strided_slice %303 {offsets = [0, 128], sizes = [4, 64], strides = [1, 1]} : vector<4x192xf32> to vector<4x64xf32>
    %c1_126 = arith.constant 1 : index
    %c0_127 = arith.constant 0 : index
    %c0_128 = arith.constant 0 : index
    %307 = vector.load %arg6[%c1_126, %c0_127, %c0_128] : memref<2x64x64xbf16, #tpu.memory_space<vmem>>, vector<1x64x64xbf16>
    %308 = vector.shape_cast %307 : vector<1x64x64xbf16> to vector<64x64xbf16>
    %309 = vector.extract_strided_slice %304 {offsets = [0, 0], sizes = [4, 16], strides = [1, 1]} : vector<4x64xf32> to vector<4x16xf32>
    %310 = vector.extract_strided_slice %305 {offsets = [0, 0], sizes = [4, 16], strides = [1, 1]} : vector<4x64xf32> to vector<4x16xf32>
    %311 = vector.extract_strided_slice %306 {offsets = [0, 0], sizes = [4, 16], strides = [1, 1]} : vector<4x64xf32> to vector<4x16xf32>
    %312 = tpu.transpose %310, [1, 0] : vector<4x16xf32> -> vector<16x4xf32>
    %cst_129 = arith.constant dense<0.000000e+00> : vector<4x4xf32>
    %313 = tpu.matmul %309, %312, %cst_129 {dimension_numbers = #tpu.dot_dimension_numbers<[1], [0], [0], [1], [0, 0, 1, 1], [], []>} : vector<4x16xf32>, vector<16x4xf32>, vector<4x4xf32> -> vector<4x4xf32>
    %cst_130 = arith.constant 2.500000e-01 : f32
    %314 = vector.broadcast %cst_130 : f32 to vector<4x4xf32>
    %315 = arith.mulf %313, %314 : vector<4x4xf32>
    %cst_131 = arith.constant dense<0xFF800000> : vector<4xf32>
    %316 = vector.multi_reduction <maximumf>, %315, %cst_131 [1] : vector<4x4xf32> to vector<4xf32>
    %317 = vector.shape_cast %316 : vector<4xf32> to vector<4x1xf32>
    %318 = vector.broadcast %317 : vector<4x1xf32> to vector<4x4xf32>
    %319 = arith.subf %315, %318 : vector<4x4xf32>
    %320 = math.exp %319 : vector<4x4xf32>
    %cst_132 = arith.constant dense<0.000000e+00> : vector<4xf32>
    %321 = vector.multi_reduction <add>, %320, %cst_132 [1] : vector<4x4xf32> to vector<4xf32>
    %322 = vector.shape_cast %321 : vector<4xf32> to vector<4x1xf32>
    %323 = tpu.reciprocal %322 {approx = true} : vector<4x1xf32> -> vector<4x1xf32>
    %324 = vector.broadcast %323 : vector<4x1xf32> to vector<4x4xf32>
    %325 = arith.mulf %320, %324 : vector<4x4xf32>
    %cst_133 = arith.constant dense<0.000000e+00> : vector<4x16xf32>
    %326 = tpu.matmul %325, %311, %cst_133 {dimension_numbers = #tpu.dot_dimension_numbers<[1], [0], [0], [1], [0, 0, 1, 1], [], []>} : vector<4x4xf32>, vector<4x16xf32>, vector<4x16xf32> -> vector<4x16xf32>
    %327 = vector.extract_strided_slice %304 {offsets = [0, 16], sizes = [4, 16], strides = [1, 1]} : vector<4x64xf32> to vector<4x16xf32>
    %328 = vector.extract_strided_slice %305 {offsets = [0, 16], sizes = [4, 16], strides = [1, 1]} : vector<4x64xf32> to vector<4x16xf32>
    %329 = vector.extract_strided_slice %306 {offsets = [0, 16], sizes = [4, 16], strides = [1, 1]} : vector<4x64xf32> to vector<4x16xf32>
    %330 = tpu.transpose %328, [1, 0] : vector<4x16xf32> -> vector<16x4xf32>
    %cst_134 = arith.constant dense<0.000000e+00> : vector<4x4xf32>
    %331 = tpu.matmul %327, %330, %cst_134 {dimension_numbers = #tpu.dot_dimension_numbers<[1], [0], [0], [1], [0, 0, 1, 1], [], []>} : vector<4x16xf32>, vector<16x4xf32>, vector<4x4xf32> -> vector<4x4xf32>
    %cst_135 = arith.constant 2.500000e-01 : f32
    %332 = vector.broadcast %cst_135 : f32 to vector<4x4xf32>
    %333 = arith.mulf %331, %332 : vector<4x4xf32>
    %cst_136 = arith.constant dense<0xFF800000> : vector<4xf32>
    %334 = vector.multi_reduction <maximumf>, %333, %cst_136 [1] : vector<4x4xf32> to vector<4xf32>
    %335 = vector.shape_cast %334 : vector<4xf32> to vector<4x1xf32>
    %336 = vector.broadcast %335 : vector<4x1xf32> to vector<4x4xf32>
    %337 = arith.subf %333, %336 : vector<4x4xf32>
    %338 = math.exp %337 : vector<4x4xf32>
    %cst_137 = arith.constant dense<0.000000e+00> : vector<4xf32>
    %339 = vector.multi_reduction <add>, %338, %cst_137 [1] : vector<4x4xf32> to vector<4xf32>
    %340 = vector.shape_cast %339 : vector<4xf32> to vector<4x1xf32>
    %341 = tpu.reciprocal %340 {approx = true} : vector<4x1xf32> -> vector<4x1xf32>
    %342 = vector.broadcast %341 : vector<4x1xf32> to vector<4x4xf32>
    %343 = arith.mulf %338, %342 : vector<4x4xf32>
    %cst_138 = arith.constant dense<0.000000e+00> : vector<4x16xf32>
    %344 = tpu.matmul %343, %329, %cst_138 {dimension_numbers = #tpu.dot_dimension_numbers<[1], [0], [0], [1], [0, 0, 1, 1], [], []>} : vector<4x4xf32>, vector<4x16xf32>, vector<4x16xf32> -> vector<4x16xf32>
    %345 = vector.extract_strided_slice %304 {offsets = [0, 32], sizes = [4, 16], strides = [1, 1]} : vector<4x64xf32> to vector<4x16xf32>
    %346 = vector.extract_strided_slice %305 {offsets = [0, 32], sizes = [4, 16], strides = [1, 1]} : vector<4x64xf32> to vector<4x16xf32>
    %347 = vector.extract_strided_slice %306 {offsets = [0, 32], sizes = [4, 16], strides = [1, 1]} : vector<4x64xf32> to vector<4x16xf32>
    %348 = tpu.transpose %346, [1, 0] : vector<4x16xf32> -> vector<16x4xf32>
    %cst_139 = arith.constant dense<0.000000e+00> : vector<4x4xf32>
    %349 = tpu.matmul %345, %348, %cst_139 {dimension_numbers = #tpu.dot_dimension_numbers<[1], [0], [0], [1], [0, 0, 1, 1], [], []>} : vector<4x16xf32>, vector<16x4xf32>, vector<4x4xf32> -> vector<4x4xf32>
    %cst_140 = arith.constant 2.500000e-01 : f32
    %350 = vector.broadcast %cst_140 : f32 to vector<4x4xf32>
    %351 = arith.mulf %349, %350 : vector<4x4xf32>
    %cst_141 = arith.constant dense<0xFF800000> : vector<4xf32>
    %352 = vector.multi_reduction <maximumf>, %351, %cst_141 [1] : vector<4x4xf32> to vector<4xf32>
    %353 = vector.shape_cast %352 : vector<4xf32> to vector<4x1xf32>
    %354 = vector.broadcast %353 : vector<4x1xf32> to vector<4x4xf32>
    %355 = arith.subf %351, %354 : vector<4x4xf32>
    %356 = math.exp %355 : vector<4x4xf32>
    %cst_142 = arith.constant dense<0.000000e+00> : vector<4xf32>
    %357 = vector.multi_reduction <add>, %356, %cst_142 [1] : vector<4x4xf32> to vector<4xf32>
    %358 = vector.shape_cast %357 : vector<4xf32> to vector<4x1xf32>
    %359 = tpu.reciprocal %358 {approx = true} : vector<4x1xf32> -> vector<4x1xf32>
    %360 = vector.broadcast %359 : vector<4x1xf32> to vector<4x4xf32>
    %361 = arith.mulf %356, %360 : vector<4x4xf32>
    %cst_143 = arith.constant dense<0.000000e+00> : vector<4x16xf32>
    %362 = tpu.matmul %361, %347, %cst_143 {dimension_numbers = #tpu.dot_dimension_numbers<[1], [0], [0], [1], [0, 0, 1, 1], [], []>} : vector<4x4xf32>, vector<4x16xf32>, vector<4x16xf32> -> vector<4x16xf32>
    %363 = vector.extract_strided_slice %304 {offsets = [0, 48], sizes = [4, 16], strides = [1, 1]} : vector<4x64xf32> to vector<4x16xf32>
    %364 = vector.extract_strided_slice %305 {offsets = [0, 48], sizes = [4, 16], strides = [1, 1]} : vector<4x64xf32> to vector<4x16xf32>
    %365 = vector.extract_strided_slice %306 {offsets = [0, 48], sizes = [4, 16], strides = [1, 1]} : vector<4x64xf32> to vector<4x16xf32>
    %366 = tpu.transpose %364, [1, 0] : vector<4x16xf32> -> vector<16x4xf32>
    %cst_144 = arith.constant dense<0.000000e+00> : vector<4x4xf32>
    %367 = tpu.matmul %363, %366, %cst_144 {dimension_numbers = #tpu.dot_dimension_numbers<[1], [0], [0], [1], [0, 0, 1, 1], [], []>} : vector<4x16xf32>, vector<16x4xf32>, vector<4x4xf32> -> vector<4x4xf32>
    %cst_145 = arith.constant 2.500000e-01 : f32
    %368 = vector.broadcast %cst_145 : f32 to vector<4x4xf32>
    %369 = arith.mulf %367, %368 : vector<4x4xf32>
    %cst_146 = arith.constant dense<0xFF800000> : vector<4xf32>
    %370 = vector.multi_reduction <maximumf>, %369, %cst_146 [1] : vector<4x4xf32> to vector<4xf32>
    %371 = vector.shape_cast %370 : vector<4xf32> to vector<4x1xf32>
    %372 = vector.broadcast %371 : vector<4x1xf32> to vector<4x4xf32>
    %373 = arith.subf %369, %372 : vector<4x4xf32>
    %374 = math.exp %373 : vector<4x4xf32>
    %cst_147 = arith.constant dense<0.000000e+00> : vector<4xf32>
    %375 = vector.multi_reduction <add>, %374, %cst_147 [1] : vector<4x4xf32> to vector<4xf32>
    %376 = vector.shape_cast %375 : vector<4xf32> to vector<4x1xf32>
    %377 = tpu.reciprocal %376 {approx = true} : vector<4x1xf32> -> vector<4x1xf32>
    %378 = vector.broadcast %377 : vector<4x1xf32> to vector<4x4xf32>
    %379 = arith.mulf %374, %378 : vector<4x4xf32>
    %cst_148 = arith.constant dense<0.000000e+00> : vector<4x16xf32>
    %380 = tpu.matmul %379, %365, %cst_148 {dimension_numbers = #tpu.dot_dimension_numbers<[1], [0], [0], [1], [0, 0, 1, 1], [], []>} : vector<4x4xf32>, vector<4x16xf32>, vector<4x16xf32> -> vector<4x16xf32>
    %381 = tpu.concatenate %326, %344, %362, %380 in 1 : vector<4x16xf32>, vector<4x16xf32>, vector<4x16xf32>, vector<4x16xf32> -> vector<4x64xf32>
    %382 = arith.truncf %381 : vector<4x64xf32> to vector<4x64xbf16>
    %cst_149 = arith.constant dense<0.000000e+00> : vector<4x64xf32>
    %383 = tpu.matmul %382, %308, %cst_149 {dimension_numbers = #tpu.dot_dimension_numbers<[1], [0], [0], [1], [0, 0, 1, 1], [], []>} : vector<4x64xbf16>, vector<64x64xbf16>, vector<4x64xf32> -> vector<4x64xf32>
    %384 = arith.addf %273, %383 : vector<4x64xf32>
    %c1_150 = arith.constant 1 : index
    %c0_151 = arith.constant 0 : index
    %c0_152 = arith.constant 0 : index
    %385 = vector.load %arg7[%c1_150, %c0_151, %c0_152] : memref<2x1x64xf32, #tpu.memory_space<vmem>>, vector<1x1x64xf32>
    %386 = vector.shape_cast %385 : vector<1x1x64xf32> to vector<1x64xf32>
    %c1_153 = arith.constant 1 : index
    %c0_154 = arith.constant 0 : index
    %c0_155 = arith.constant 0 : index
    %387 = vector.load %arg8[%c1_153, %c0_154, %c0_155] : memref<2x1x64xf32, #tpu.memory_space<vmem>>, vector<1x1x64xf32>
    %388 = vector.shape_cast %387 : vector<1x1x64xf32> to vector<1x64xf32>
    %cst_156 = arith.constant dense<0.000000e+00> : vector<4xf32>
    %389 = vector.multi_reduction <add>, %384, %cst_156 [1] : vector<4x64xf32> to vector<4xf32>
    %390 = vector.shape_cast %389 : vector<4xf32> to vector<4x1xf32>
    %cst_157 = arith.constant 6.400000e+01 : f32
    %391 = vector.broadcast %cst_157 : f32 to vector<4x1xf32>
    %392 = arith.divf %390, %391 : vector<4x1xf32>
    %393 = vector.broadcast %392 : vector<4x1xf32> to vector<4x64xf32>
    %394 = arith.subf %384, %393 : vector<4x64xf32>
    %395 = arith.mulf %394, %394 : vector<4x64xf32>
    %cst_158 = arith.constant dense<0.000000e+00> : vector<4xf32>
    %396 = vector.multi_reduction <add>, %395, %cst_158 [1] : vector<4x64xf32> to vector<4xf32>
    %397 = vector.shape_cast %396 : vector<4xf32> to vector<4x1xf32>
    %cst_159 = arith.constant 6.400000e+01 : f32
    %398 = vector.broadcast %cst_159 : f32 to vector<4x1xf32>
    %399 = arith.divf %397, %398 : vector<4x1xf32>
    %400 = vector.broadcast %392 : vector<4x1xf32> to vector<4x64xf32>
    %401 = arith.subf %384, %400 : vector<4x64xf32>
    %cst_160 = arith.constant 9.99999974E-6 : f32
    %402 = vector.broadcast %cst_160 : f32 to vector<4x1xf32>
    %403 = arith.addf %399, %402 : vector<4x1xf32>
    %404 = math.rsqrt %403 : vector<4x1xf32>
    %405 = vector.broadcast %404 : vector<4x1xf32> to vector<4x64xf32>
    %406 = arith.mulf %401, %405 : vector<4x64xf32>
    %407 = vector.broadcast %386 : vector<1x64xf32> to vector<4x64xf32>
    %408 = arith.mulf %406, %407 : vector<4x64xf32>
    %409 = vector.broadcast %388 : vector<1x64xf32> to vector<4x64xf32>
    %410 = arith.addf %408, %409 : vector<4x64xf32>
    %c1_161 = arith.constant 1 : index
    %c0_162 = arith.constant 0 : index
    %c0_163 = arith.constant 0 : index
    %411 = vector.load %arg9[%c1_161, %c0_162, %c0_163] : memref<2x64x64xbf16, #tpu.memory_space<vmem>>, vector<1x64x64xbf16>
    %412 = vector.shape_cast %411 : vector<1x64x64xbf16> to vector<64x64xbf16>
    %413 = arith.truncf %410 : vector<4x64xf32> to vector<4x64xbf16>
    %cst_164 = arith.constant dense<0.000000e+00> : vector<4x64xf32>
    %414 = tpu.matmul %413, %412, %cst_164 {dimension_numbers = #tpu.dot_dimension_numbers<[1], [0], [0], [1], [0, 0, 1, 1], [], []>} : vector<4x64xbf16>, vector<64x64xbf16>, vector<4x64xf32> -> vector<4x64xf32>
    %c1_165 = arith.constant 1 : index
    %c0_166 = arith.constant 0 : index
    %c0_167 = arith.constant 0 : index
    %415 = vector.load %arg10[%c1_165, %c0_166, %c0_167] : memref<2x64x128xbf16, #tpu.memory_space<vmem>>, vector<1x64x128xbf16>
    %416 = vector.shape_cast %415 : vector<1x64x128xbf16> to vector<64x128xbf16>
    %417 = arith.truncf %3 : vector<16x64xf32> to vector<16x64xbf16>
    %cst_168 = arith.constant dense<0.000000e+00> : vector<16x128xf32>
    %418 = tpu.matmul %417, %416, %cst_168 {dimension_numbers = #tpu.dot_dimension_numbers<[1], [0], [0], [1], [0, 0, 1, 1], [], []>} : vector<16x64xbf16>, vector<64x128xbf16>, vector<16x128xf32> -> vector<16x128xf32>
    %419 = vector.extract_strided_slice %418 {offsets = [0, 0], sizes = [16, 64], strides = [1, 1]} : vector<16x128xf32> to vector<16x64xf32>
    %420 = vector.extract_strided_slice %418 {offsets = [0, 64], sizes = [16, 64], strides = [1, 1]} : vector<16x128xf32> to vector<16x64xf32>
    %c1_169 = arith.constant 1 : index
    %c0_170 = arith.constant 0 : index
    %c0_171 = arith.constant 0 : index
    %421 = vector.load %arg11[%c1_169, %c0_170, %c0_171] : memref<2x64x64xbf16, #tpu.memory_space<vmem>>, vector<1x64x64xbf16>
    %422 = vector.shape_cast %421 : vector<1x64x64xbf16> to vector<64x64xbf16>
    %423 = vector.extract_strided_slice %414 {offsets = [0, 0], sizes = [4, 16], strides = [1, 1]} : vector<4x64xf32> to vector<4x16xf32>
    %424 = vector.extract_strided_slice %419 {offsets = [0, 0], sizes = [16, 16], strides = [1, 1]} : vector<16x64xf32> to vector<16x16xf32>
    %425 = vector.extract_strided_slice %420 {offsets = [0, 0], sizes = [16, 16], strides = [1, 1]} : vector<16x64xf32> to vector<16x16xf32>
    %426 = tpu.transpose %424, [1, 0] : vector<16x16xf32> -> vector<16x16xf32>
    %cst_172 = arith.constant dense<0.000000e+00> : vector<4x16xf32>
    %427 = tpu.matmul %423, %426, %cst_172 {dimension_numbers = #tpu.dot_dimension_numbers<[1], [0], [0], [1], [0, 0, 1, 1], [], []>} : vector<4x16xf32>, vector<16x16xf32>, vector<4x16xf32> -> vector<4x16xf32>
    %cst_173 = arith.constant 2.500000e-01 : f32
    %428 = vector.broadcast %cst_173 : f32 to vector<4x16xf32>
    %429 = arith.mulf %427, %428 : vector<4x16xf32>
    %cst_174 = arith.constant dense<0xFF800000> : vector<4xf32>
    %430 = vector.multi_reduction <maximumf>, %429, %cst_174 [1] : vector<4x16xf32> to vector<4xf32>
    %431 = vector.shape_cast %430 : vector<4xf32> to vector<4x1xf32>
    %432 = vector.broadcast %431 : vector<4x1xf32> to vector<4x16xf32>
    %433 = arith.subf %429, %432 : vector<4x16xf32>
    %434 = math.exp %433 : vector<4x16xf32>
    %cst_175 = arith.constant dense<0.000000e+00> : vector<4xf32>
    %435 = vector.multi_reduction <add>, %434, %cst_175 [1] : vector<4x16xf32> to vector<4xf32>
    %436 = vector.shape_cast %435 : vector<4xf32> to vector<4x1xf32>
    %437 = tpu.reciprocal %436 {approx = true} : vector<4x1xf32> -> vector<4x1xf32>
    %438 = vector.broadcast %437 : vector<4x1xf32> to vector<4x16xf32>
    %439 = arith.mulf %434, %438 : vector<4x16xf32>
    %cst_176 = arith.constant dense<0.000000e+00> : vector<4x16xf32>
    %440 = tpu.matmul %439, %425, %cst_176 {dimension_numbers = #tpu.dot_dimension_numbers<[1], [0], [0], [1], [0, 0, 1, 1], [], []>} : vector<4x16xf32>, vector<16x16xf32>, vector<4x16xf32> -> vector<4x16xf32>
    %441 = vector.extract_strided_slice %414 {offsets = [0, 16], sizes = [4, 16], strides = [1, 1]} : vector<4x64xf32> to vector<4x16xf32>
    %442 = vector.extract_strided_slice %419 {offsets = [0, 16], sizes = [16, 16], strides = [1, 1]} : vector<16x64xf32> to vector<16x16xf32>
    %443 = vector.extract_strided_slice %420 {offsets = [0, 16], sizes = [16, 16], strides = [1, 1]} : vector<16x64xf32> to vector<16x16xf32>
    %444 = tpu.transpose %442, [1, 0] : vector<16x16xf32> -> vector<16x16xf32>
    %cst_177 = arith.constant dense<0.000000e+00> : vector<4x16xf32>
    %445 = tpu.matmul %441, %444, %cst_177 {dimension_numbers = #tpu.dot_dimension_numbers<[1], [0], [0], [1], [0, 0, 1, 1], [], []>} : vector<4x16xf32>, vector<16x16xf32>, vector<4x16xf32> -> vector<4x16xf32>
    %cst_178 = arith.constant 2.500000e-01 : f32
    %446 = vector.broadcast %cst_178 : f32 to vector<4x16xf32>
    %447 = arith.mulf %445, %446 : vector<4x16xf32>
    %cst_179 = arith.constant dense<0xFF800000> : vector<4xf32>
    %448 = vector.multi_reduction <maximumf>, %447, %cst_179 [1] : vector<4x16xf32> to vector<4xf32>
    %449 = vector.shape_cast %448 : vector<4xf32> to vector<4x1xf32>
    %450 = vector.broadcast %449 : vector<4x1xf32> to vector<4x16xf32>
    %451 = arith.subf %447, %450 : vector<4x16xf32>
    %452 = math.exp %451 : vector<4x16xf32>
    %cst_180 = arith.constant dense<0.000000e+00> : vector<4xf32>
    %453 = vector.multi_reduction <add>, %452, %cst_180 [1] : vector<4x16xf32> to vector<4xf32>
    %454 = vector.shape_cast %453 : vector<4xf32> to vector<4x1xf32>
    %455 = tpu.reciprocal %454 {approx = true} : vector<4x1xf32> -> vector<4x1xf32>
    %456 = vector.broadcast %455 : vector<4x1xf32> to vector<4x16xf32>
    %457 = arith.mulf %452, %456 : vector<4x16xf32>
    %cst_181 = arith.constant dense<0.000000e+00> : vector<4x16xf32>
    %458 = tpu.matmul %457, %443, %cst_181 {dimension_numbers = #tpu.dot_dimension_numbers<[1], [0], [0], [1], [0, 0, 1, 1], [], []>} : vector<4x16xf32>, vector<16x16xf32>, vector<4x16xf32> -> vector<4x16xf32>
    %459 = vector.extract_strided_slice %414 {offsets = [0, 32], sizes = [4, 16], strides = [1, 1]} : vector<4x64xf32> to vector<4x16xf32>
    %460 = vector.extract_strided_slice %419 {offsets = [0, 32], sizes = [16, 16], strides = [1, 1]} : vector<16x64xf32> to vector<16x16xf32>
    %461 = vector.extract_strided_slice %420 {offsets = [0, 32], sizes = [16, 16], strides = [1, 1]} : vector<16x64xf32> to vector<16x16xf32>
    %462 = tpu.transpose %460, [1, 0] : vector<16x16xf32> -> vector<16x16xf32>
    %cst_182 = arith.constant dense<0.000000e+00> : vector<4x16xf32>
    %463 = tpu.matmul %459, %462, %cst_182 {dimension_numbers = #tpu.dot_dimension_numbers<[1], [0], [0], [1], [0, 0, 1, 1], [], []>} : vector<4x16xf32>, vector<16x16xf32>, vector<4x16xf32> -> vector<4x16xf32>
    %cst_183 = arith.constant 2.500000e-01 : f32
    %464 = vector.broadcast %cst_183 : f32 to vector<4x16xf32>
    %465 = arith.mulf %463, %464 : vector<4x16xf32>
    %cst_184 = arith.constant dense<0xFF800000> : vector<4xf32>
    %466 = vector.multi_reduction <maximumf>, %465, %cst_184 [1] : vector<4x16xf32> to vector<4xf32>
    %467 = vector.shape_cast %466 : vector<4xf32> to vector<4x1xf32>
    %468 = vector.broadcast %467 : vector<4x1xf32> to vector<4x16xf32>
    %469 = arith.subf %465, %468 : vector<4x16xf32>
    %470 = math.exp %469 : vector<4x16xf32>
    %cst_185 = arith.constant dense<0.000000e+00> : vector<4xf32>
    %471 = vector.multi_reduction <add>, %470, %cst_185 [1] : vector<4x16xf32> to vector<4xf32>
    %472 = vector.shape_cast %471 : vector<4xf32> to vector<4x1xf32>
    %473 = tpu.reciprocal %472 {approx = true} : vector<4x1xf32> -> vector<4x1xf32>
    %474 = vector.broadcast %473 : vector<4x1xf32> to vector<4x16xf32>
    %475 = arith.mulf %470, %474 : vector<4x16xf32>
    %cst_186 = arith.constant dense<0.000000e+00> : vector<4x16xf32>
    %476 = tpu.matmul %475, %461, %cst_186 {dimension_numbers = #tpu.dot_dimension_numbers<[1], [0], [0], [1], [0, 0, 1, 1], [], []>} : vector<4x16xf32>, vector<16x16xf32>, vector<4x16xf32> -> vector<4x16xf32>
    %477 = vector.extract_strided_slice %414 {offsets = [0, 48], sizes = [4, 16], strides = [1, 1]} : vector<4x64xf32> to vector<4x16xf32>
    %478 = vector.extract_strided_slice %419 {offsets = [0, 48], sizes = [16, 16], strides = [1, 1]} : vector<16x64xf32> to vector<16x16xf32>
    %479 = vector.extract_strided_slice %420 {offsets = [0, 48], sizes = [16, 16], strides = [1, 1]} : vector<16x64xf32> to vector<16x16xf32>
    %480 = tpu.transpose %478, [1, 0] : vector<16x16xf32> -> vector<16x16xf32>
    %cst_187 = arith.constant dense<0.000000e+00> : vector<4x16xf32>
    %481 = tpu.matmul %477, %480, %cst_187 {dimension_numbers = #tpu.dot_dimension_numbers<[1], [0], [0], [1], [0, 0, 1, 1], [], []>} : vector<4x16xf32>, vector<16x16xf32>, vector<4x16xf32> -> vector<4x16xf32>
    %cst_188 = arith.constant 2.500000e-01 : f32
    %482 = vector.broadcast %cst_188 : f32 to vector<4x16xf32>
    %483 = arith.mulf %481, %482 : vector<4x16xf32>
    %cst_189 = arith.constant dense<0xFF800000> : vector<4xf32>
    %484 = vector.multi_reduction <maximumf>, %483, %cst_189 [1] : vector<4x16xf32> to vector<4xf32>
    %485 = vector.shape_cast %484 : vector<4xf32> to vector<4x1xf32>
    %486 = vector.broadcast %485 : vector<4x1xf32> to vector<4x16xf32>
    %487 = arith.subf %483, %486 : vector<4x16xf32>
    %488 = math.exp %487 : vector<4x16xf32>
    %cst_190 = arith.constant dense<0.000000e+00> : vector<4xf32>
    %489 = vector.multi_reduction <add>, %488, %cst_190 [1] : vector<4x16xf32> to vector<4xf32>
    %490 = vector.shape_cast %489 : vector<4xf32> to vector<4x1xf32>
    %491 = tpu.reciprocal %490 {approx = true} : vector<4x1xf32> -> vector<4x1xf32>
    %492 = vector.broadcast %491 : vector<4x1xf32> to vector<4x16xf32>
    %493 = arith.mulf %488, %492 : vector<4x16xf32>
    %cst_191 = arith.constant dense<0.000000e+00> : vector<4x16xf32>
    %494 = tpu.matmul %493, %479, %cst_191 {dimension_numbers = #tpu.dot_dimension_numbers<[1], [0], [0], [1], [0, 0, 1, 1], [], []>} : vector<4x16xf32>, vector<16x16xf32>, vector<4x16xf32> -> vector<4x16xf32>
    %495 = tpu.concatenate %440, %458, %476, %494 in 1 : vector<4x16xf32>, vector<4x16xf32>, vector<4x16xf32>, vector<4x16xf32> -> vector<4x64xf32>
    %496 = arith.truncf %495 : vector<4x64xf32> to vector<4x64xbf16>
    %cst_192 = arith.constant dense<0.000000e+00> : vector<4x64xf32>
    %497 = tpu.matmul %496, %422, %cst_192 {dimension_numbers = #tpu.dot_dimension_numbers<[1], [0], [0], [1], [0, 0, 1, 1], [], []>} : vector<4x64xbf16>, vector<64x64xbf16>, vector<4x64xf32> -> vector<4x64xf32>
    %498 = arith.addf %384, %497 : vector<4x64xf32>
    %c1_193 = arith.constant 1 : index
    %c0_194 = arith.constant 0 : index
    %c0_195 = arith.constant 0 : index
    %499 = vector.load %arg12[%c1_193, %c0_194, %c0_195] : memref<2x1x64xf32, #tpu.memory_space<vmem>>, vector<1x1x64xf32>
    %500 = vector.shape_cast %499 : vector<1x1x64xf32> to vector<1x64xf32>
    %c1_196 = arith.constant 1 : index
    %c0_197 = arith.constant 0 : index
    %c0_198 = arith.constant 0 : index
    %501 = vector.load %arg13[%c1_196, %c0_197, %c0_198] : memref<2x1x64xf32, #tpu.memory_space<vmem>>, vector<1x1x64xf32>
    %502 = vector.shape_cast %501 : vector<1x1x64xf32> to vector<1x64xf32>
    %cst_199 = arith.constant dense<0.000000e+00> : vector<4xf32>
    %503 = vector.multi_reduction <add>, %498, %cst_199 [1] : vector<4x64xf32> to vector<4xf32>
    %504 = vector.shape_cast %503 : vector<4xf32> to vector<4x1xf32>
    %cst_200 = arith.constant 6.400000e+01 : f32
    %505 = vector.broadcast %cst_200 : f32 to vector<4x1xf32>
    %506 = arith.divf %504, %505 : vector<4x1xf32>
    %507 = vector.broadcast %506 : vector<4x1xf32> to vector<4x64xf32>
    %508 = arith.subf %498, %507 : vector<4x64xf32>
    %509 = arith.mulf %508, %508 : vector<4x64xf32>
    %cst_201 = arith.constant dense<0.000000e+00> : vector<4xf32>
    %510 = vector.multi_reduction <add>, %509, %cst_201 [1] : vector<4x64xf32> to vector<4xf32>
    %511 = vector.shape_cast %510 : vector<4xf32> to vector<4x1xf32>
    %cst_202 = arith.constant 6.400000e+01 : f32
    %512 = vector.broadcast %cst_202 : f32 to vector<4x1xf32>
    %513 = arith.divf %511, %512 : vector<4x1xf32>
    %514 = vector.broadcast %506 : vector<4x1xf32> to vector<4x64xf32>
    %515 = arith.subf %498, %514 : vector<4x64xf32>
    %cst_203 = arith.constant 9.99999974E-6 : f32
    %516 = vector.broadcast %cst_203 : f32 to vector<4x1xf32>
    %517 = arith.addf %513, %516 : vector<4x1xf32>
    %518 = math.rsqrt %517 : vector<4x1xf32>
    %519 = vector.broadcast %518 : vector<4x1xf32> to vector<4x64xf32>
    %520 = arith.mulf %515, %519 : vector<4x64xf32>
    %521 = vector.broadcast %500 : vector<1x64xf32> to vector<4x64xf32>
    %522 = arith.mulf %520, %521 : vector<4x64xf32>
    %523 = vector.broadcast %502 : vector<1x64xf32> to vector<4x64xf32>
    %524 = arith.addf %522, %523 : vector<4x64xf32>
    %c1_204 = arith.constant 1 : index
    %c0_205 = arith.constant 0 : index
    %c0_206 = arith.constant 0 : index
    %525 = vector.load %arg14[%c1_204, %c0_205, %c0_206] : memref<2x64x256xbf16, #tpu.memory_space<vmem>>, vector<1x64x256xbf16>
    %526 = vector.shape_cast %525 : vector<1x64x256xbf16> to vector<64x256xbf16>
    %527 = arith.truncf %524 : vector<4x64xf32> to vector<4x64xbf16>
    %cst_207 = arith.constant dense<0.000000e+00> : vector<4x256xf32>
    %528 = tpu.matmul %527, %526, %cst_207 {dimension_numbers = #tpu.dot_dimension_numbers<[1], [0], [0], [1], [0, 0, 1, 1], [], []>} : vector<4x64xbf16>, vector<64x256xbf16>, vector<4x256xf32> -> vector<4x256xf32>
    %c1_208 = arith.constant 1 : index
    %c0_209 = arith.constant 0 : index
    %c0_210 = arith.constant 0 : index
    %529 = vector.load %arg15[%c1_208, %c0_209, %c0_210] : memref<2x1x256xf32, #tpu.memory_space<vmem>>, vector<1x1x256xf32>
    %530 = vector.shape_cast %529 : vector<1x1x256xf32> to vector<1x256xf32>
    %531 = vector.broadcast %530 : vector<1x256xf32> to vector<4x256xf32>
    %532 = arith.addf %528, %531 : vector<4x256xf32>
    %cst_211 = arith.constant 0.000000e+00 : f32
    %533 = vector.broadcast %cst_211 : f32 to vector<4x256xf32>
    %534 = arith.maximumf %532, %533 : vector<4x256xf32>
    %c1_212 = arith.constant 1 : index
    %c0_213 = arith.constant 0 : index
    %c0_214 = arith.constant 0 : index
    %535 = vector.load %arg16[%c1_212, %c0_213, %c0_214] : memref<2x256x64xbf16, #tpu.memory_space<vmem>>, vector<1x256x64xbf16>
    %536 = vector.shape_cast %535 : vector<1x256x64xbf16> to vector<256x64xbf16>
    %537 = arith.truncf %534 : vector<4x256xf32> to vector<4x256xbf16>
    %cst_215 = arith.constant dense<0.000000e+00> : vector<4x64xf32>
    %538 = tpu.matmul %537, %536, %cst_215 {dimension_numbers = #tpu.dot_dimension_numbers<[1], [0], [0], [1], [0, 0, 1, 1], [], []>} : vector<4x256xbf16>, vector<256x64xbf16>, vector<4x64xf32> -> vector<4x64xf32>
    %539 = arith.addf %498, %538 : vector<4x64xf32>
    %c1_216 = arith.constant 1 : index
    %c0_217 = arith.constant 0 : index
    %c0_218 = arith.constant 0 : index
    %540 = vector.load %arg17[%c1_216, %c0_217, %c0_218] : memref<2x1x64xf32, #tpu.memory_space<vmem>>, vector<1x1x64xf32>
    %541 = vector.shape_cast %540 : vector<1x1x64xf32> to vector<1x64xf32>
    %542 = vector.broadcast %541 : vector<1x64xf32> to vector<4x64xf32>
    %543 = arith.addf %539, %542 : vector<4x64xf32>
    %c0_219 = arith.constant 0 : index
    %c0_220 = arith.constant 0 : index
    %544 = vector.load %arg18[%c0_219, %c0_220] : memref<1x64xf32, #tpu.memory_space<vmem>>, vector<1x64xf32>
    %c0_221 = arith.constant 0 : index
    %c0_222 = arith.constant 0 : index
    %545 = vector.load %arg19[%c0_221, %c0_222] : memref<1x64xf32, #tpu.memory_space<vmem>>, vector<1x64xf32>
    %cst_223 = arith.constant dense<0.000000e+00> : vector<4xf32>
    %546 = vector.multi_reduction <add>, %543, %cst_223 [1] : vector<4x64xf32> to vector<4xf32>
    %547 = vector.shape_cast %546 : vector<4xf32> to vector<4x1xf32>
    %cst_224 = arith.constant 6.400000e+01 : f32
    %548 = vector.broadcast %cst_224 : f32 to vector<4x1xf32>
    %549 = arith.divf %547, %548 : vector<4x1xf32>
    %550 = vector.broadcast %549 : vector<4x1xf32> to vector<4x64xf32>
    %551 = arith.subf %543, %550 : vector<4x64xf32>
    %552 = arith.mulf %551, %551 : vector<4x64xf32>
    %cst_225 = arith.constant dense<0.000000e+00> : vector<4xf32>
    %553 = vector.multi_reduction <add>, %552, %cst_225 [1] : vector<4x64xf32> to vector<4xf32>
    %554 = vector.shape_cast %553 : vector<4xf32> to vector<4x1xf32>
    %cst_226 = arith.constant 6.400000e+01 : f32
    %555 = vector.broadcast %cst_226 : f32 to vector<4x1xf32>
    %556 = arith.divf %554, %555 : vector<4x1xf32>
    %557 = vector.broadcast %549 : vector<4x1xf32> to vector<4x64xf32>
    %558 = arith.subf %543, %557 : vector<4x64xf32>
    %cst_227 = arith.constant 9.99999974E-6 : f32
    %559 = vector.broadcast %cst_227 : f32 to vector<4x1xf32>
    %560 = arith.addf %556, %559 : vector<4x1xf32>
    %561 = math.rsqrt %560 : vector<4x1xf32>
    %562 = vector.broadcast %561 : vector<4x1xf32> to vector<4x64xf32>
    %563 = arith.mulf %558, %562 : vector<4x64xf32>
    %564 = vector.broadcast %544 : vector<1x64xf32> to vector<4x64xf32>
    %565 = arith.mulf %563, %564 : vector<4x64xf32>
    %566 = vector.broadcast %545 : vector<1x64xf32> to vector<4x64xf32>
    %567 = arith.addf %565, %566 : vector<4x64xf32>
    %c0_228 = arith.constant 0 : index
    %c0_229 = arith.constant 0 : index
    %c0_230 = arith.constant 0 : index
    %568 = vector.load %arg20[%c0_228, %c0_229, %c0_230] : memref<1x4x64xf32, #tpu.memory_space<vmem>>, vector<1x4x64xf32>
    %569 = vector.shape_cast %568 : vector<1x4x64xf32> to vector<4x64xf32>
    %570 = vector.shape_cast %567 : vector<4x64xf32> to vector<1x4x64xf32>
    tpu.vector_store %arg20[%c0_228, %c0_229, %c0_230], %570 {strides = array<i32>} : memref<1x4x64xf32, #tpu.memory_space<vmem>>, vector<1x4x64xf32>,
    return
  }
  func.func @transform_0(%arg0: i32) -> (i32, i32, i32) {
    %c0_i32 = arith.constant 0 : i32
    %c0_i32_0 = arith.constant 0 : i32
    %c0_i32_1 = arith.constant 0 : i32
    return %arg0, %c0_i32, %c0_i32_0 : i32, i32, i32
  }
  func.func @transform_1(%arg0: i32) -> (i32, i32, i32) {
    %c0_i32 = arith.constant 0 : i32
    %c0_i32_0 = arith.constant 0 : i32
    %c0_i32_1 = arith.constant 0 : i32
    return %arg0, %c0_i32, %c0_i32_0 : i32, i32, i32
  }
  func.func @transform_2(%arg0: i32) -> (i32, i32, i32) {
    %c0_i32 = arith.constant 0 : i32
    %c0_i32_0 = arith.constant 0 : i32
    %c0_i32_1 = arith.constant 0 : i32
    %c0_i32_2 = arith.constant 0 : i32
    return %c0_i32, %c0_i32_0, %c0_i32_1 : i32, i32, i32
  }
  func.func @transform_3(%arg0: i32) -> (i32, i32, i32) {
    %c0_i32 = arith.constant 0 : i32
    %c0_i32_0 = arith.constant 0 : i32
    %c0_i32_1 = arith.constant 0 : i32
    %c0_i32_2 = arith.constant 0 : i32
    return %c0_i32, %c0_i32_0, %c0_i32_1 : i32, i32, i32
  }
  func.func @transform_4(%arg0: i32) -> (i32, i32, i32) {
    %c0_i32 = arith.constant 0 : i32
    %c0_i32_0 = arith.constant 0 : i32
    %c0_i32_1 = arith.constant 0 : i32
    %c0_i32_2 = arith.constant 0 : i32
    return %c0_i32, %c0_i32_0, %c0_i32_1 : i32, i32, i32
  }
  func.func @transform_5(%arg0: i32) -> (i32, i32, i32) {
    %c0_i32 = arith.constant 0 : i32
    %c0_i32_0 = arith.constant 0 : i32
    %c0_i32_1 = arith.constant 0 : i32
    %c0_i32_2 = arith.constant 0 : i32
    return %c0_i32, %c0_i32_0, %c0_i32_1 : i32, i32, i32
  }
  func.func @transform_6(%arg0: i32) -> (i32, i32, i32) {
    %c0_i32 = arith.constant 0 : i32
    %c0_i32_0 = arith.constant 0 : i32
    %c0_i32_1 = arith.constant 0 : i32
    %c0_i32_2 = arith.constant 0 : i32
    return %c0_i32, %c0_i32_0, %c0_i32_1 : i32, i32, i32
  }
  func.func @transform_7(%arg0: i32) -> (i32, i32, i32) {
    %c0_i32 = arith.constant 0 : i32
    %c0_i32_0 = arith.constant 0 : i32
    %c0_i32_1 = arith.constant 0 : i32
    %c0_i32_2 = arith.constant 0 : i32
    return %c0_i32, %c0_i32_0, %c0_i32_1 : i32, i32, i32
  }
  func.func @transform_8(%arg0: i32) -> (i32, i32, i32) {
    %c0_i32 = arith.constant 0 : i32
    %c0_i32_0 = arith.constant 0 : i32
    %c0_i32_1 = arith.constant 0 : i32
    %c0_i32_2 = arith.constant 0 : i32
    return %c0_i32, %c0_i32_0, %c0_i32_1 : i32, i32, i32
  }
  func.func @transform_9(%arg0: i32) -> (i32, i32, i32) {
    %c0_i32 = arith.constant 0 : i32
    %c0_i32_0 = arith.constant 0 : i32
    %c0_i32_1 = arith.constant 0 : i32
    %c0_i32_2 = arith.constant 0 : i32
    return %c0_i32, %c0_i32_0, %c0_i32_1 : i32, i32, i32
  }
  func.func @transform_10(%arg0: i32) -> (i32, i32, i32) {
    %c0_i32 = arith.constant 0 : i32
    %c0_i32_0 = arith.constant 0 : i32
    %c0_i32_1 = arith.constant 0 : i32
    %c0_i32_2 = arith.constant 0 : i32
    return %c0_i32, %c0_i32_0, %c0_i32_1 : i32, i32, i32
  }
  func.func @transform_11(%arg0: i32) -> (i32, i32, i32) {
    %c0_i32 = arith.constant 0 : i32
    %c0_i32_0 = arith.constant 0 : i32
    %c0_i32_1 = arith.constant 0 : i32
    %c0_i32_2 = arith.constant 0 : i32
    return %c0_i32, %c0_i32_0, %c0_i32_1 : i32, i32, i32
  }
  func.func @transform_12(%arg0: i32) -> (i32, i32, i32) {
    %c0_i32 = arith.constant 0 : i32
    %c0_i32_0 = arith.constant 0 : i32
    %c0_i32_1 = arith.constant 0 : i32
    %c0_i32_2 = arith.constant 0 : i32
    return %c0_i32, %c0_i32_0, %c0_i32_1 : i32, i32, i32
  }
  func.func @transform_13(%arg0: i32) -> (i32, i32, i32) {
    %c0_i32 = arith.constant 0 : i32
    %c0_i32_0 = arith.constant 0 : i32
    %c0_i32_1 = arith.constant 0 : i32
    %c0_i32_2 = arith.constant 0 : i32
    return %c0_i32, %c0_i32_0, %c0_i32_1 : i32, i32, i32
  }
  func.func @transform_14(%arg0: i32) -> (i32, i32, i32) {
    %c0_i32 = arith.constant 0 : i32
    %c0_i32_0 = arith.constant 0 : i32
    %c0_i32_1 = arith.constant 0 : i32
    %c0_i32_2 = arith.constant 0 : i32
    return %c0_i32, %c0_i32_0, %c0_i32_1 : i32, i32, i32
  }
  func.func @transform_15(%arg0: i32) -> (i32, i32, i32) {
    %c0_i32 = arith.constant 0 : i32
    %c0_i32_0 = arith.constant 0 : i32
    %c0_i32_1 = arith.constant 0 : i32
    %c0_i32_2 = arith.constant 0 : i32
    return %c0_i32, %c0_i32_0, %c0_i32_1 : i32, i32, i32
  }
  func.func @transform_16(%arg0: i32) -> (i32, i32, i32) {
    %c0_i32 = arith.constant 0 : i32
    %c0_i32_0 = arith.constant 0 : i32
    %c0_i32_1 = arith.constant 0 : i32
    %c0_i32_2 = arith.constant 0 : i32
    return %c0_i32, %c0_i32_0, %c0_i32_1 : i32, i32, i32
  }
  func.func @transform_17(%arg0: i32) -> (i32, i32) {
    %c0_i32 = arith.constant 0 : i32
    %c0_i32_0 = arith.constant 0 : i32
    %c0_i32_1 = arith.constant 0 : i32
    return %c0_i32, %c0_i32_0 : i32, i32
  }
  func.func @transform_18(%arg0: i32) -> (i32, i32) {
    %c0_i32 = arith.constant 0 : i32
    %c0_i32_0 = arith.constant 0 : i32
    %c0_i32_1 = arith.constant 0 : i32
    return %c0_i32, %c0_i32_0 : i32, i32
  }
  func.func @transform_19(%arg0: i32) -> (i32, i32, i32) {
    %c0_i32 = arith.constant 0 : i32
    %c0_i32_0 = arith.constant 0 : i32
    %c0_i32_1 = arith.constant 0 : i32
    return %arg0, %c0_i32, %c0_i32_0 : i32, i32, i32
  }
}

</mosaic_0001>

<bundles_post_ra>
// kernel: patch_network_forward.8
= control target key start
LH: loop header
LB: loop body
LE: loop exit
PB: predicated region body
PF: predicated region fallthrough
CT: control target
= control target key end

     0   :  { %s553_s12 = smov 0   ;;  %s645_s0 = inlined_call_operand.vmem [shape: f32[48,192], index: 0, kind: input, shape index: {}]   ;;  %s646_s1 = inlined_call_operand.vmem [shape: bf16[192,128], index: 1, kind: input, shape index: {}]   ;;  %s647_s2 = inlined_call_operand.vmem [shape: f32[1,128], index: 2, kind: input, shape index: {}]   ;;  %s648_s3 = inlined_call_operand.vmem [shape: f32[48,128], index: 3, kind: output, shape index: {}]  }
   0x1 LB: > { %s441_s13 = sadd.s32 4294967295, %s530_s12   ;;  %p445_p0 = scmp.ge.s32.totalorder %s530_s12, 1  ;;  %s530_s12 = sphi %s553_s12, %s13_s12  }
   0x2   : > { %p139_p1 = scmp.lt.s32.totalorder %s530_s12, 3 }
   0x4   : > { %p140_p2 = pnand %p445_p0, %p139_p1 }
   0x5   : > { %v500_v0 = vld [vmem:[%s646_s1] sm:$0xff] (!%p140_p2)   ;;  %v532_v1 = vmov (!%p140_p2), 0   ;;  %s164_s16 = smul.u32 (!%p140_p2), 3, %s441_s13  ;;  %v501_v2 = vld [vmem:[%s646_s1 + $0x8] sm:$0xff] (!%p140_p2)   ;;  %v502_v3 = vld [vmem:[%s646_s1 + $0x10] sm:$0xff] (!%p140_p2)   ;;  %vm291_vm0 = vcmask (!%p140_p2), 523264   ;;  %v346_v23 = vlaneseq (!%p140_p2) }
   0x6   : > { %143 = sbr.rel (%p140_p2) target bundleno = 589 (0x24d), region = 32  ;;  %298 = vmatprep.subr.bf16.mxu0 (!%p140_p2), %v532_v1  ;;  %467 = vmatprep.subr.bf16.mxu1 (!%p140_p2), %v532_v1  ;;  %v503_v4 = vld [vmem:[%s646_s1 + $0x18] sm:$0xff] (!%p140_p2)   ;;  %v504_v10 = vld [vmem:[%s646_s1 + $0x20] sm:$0xff] (!%p140_p2)   ;;  %v505_v11 = vld [vmem:[%s646_s1 + $0x28] sm:$0xff] (!%p140_p2)  }
   0x7   : > { %299 = vmatpush1.bf16.msra.mxu0 (!%p140_p2), %v500_v0  ;;  %479 = vmatpush1.bf16.msra.mxu1 (!%p140_p2), %v500_v0  ;;  %p165_p3 = scmp.lt.s32.totalorder (!%p140_p2), %s164_s16, 5  ;;  %v506_v12 = vld [vmem:[%s646_s1 + $0x30] sm:$0xff] (!%p140_p2)   ;;  %v507_v13 = vld [vmem:[%s646_s1 + $0x38] sm:$0xff] (!%p140_p2)   ;;  %v508_v14 = vld [vmem:[%s646_s1 + $0x40] sm:$0xff] (!%p140_p2)   ;;  %v347_v24 = vand.u32 (!%p140_p2), 127, %v346_v23 }
   0x8   : > { %300 = vmatprep.subr.bf16.mxu0 (!%p140_p2), %v532_v1  ;;  %468 = vmatprep.subr.bf16.mxu1 (!%p140_p2), %v532_v1  ;;  %v509_v15 = vld [vmem:[%s646_s1 + $0x48] sm:$0xff] (!%p140_p2)   ;;  %v510_v16 = vld [vmem:[%s646_s1 + $0x50] sm:$0xff] (!%p140_p2)   ;;  %v511_v17 = vld [vmem:[%s646_s1 + $0x58] sm:$0xff] (!%p140_p2)  }
   0x9   : > { %v449_v25 = vld [vmem:[%s647_s2] ss:$0 sm:$0xff] (!%p140_p2)  ;;  %vm348_vm1 = vcmp.lt.s32.totalorder (!%p140_p2), %v347_v24, 32 }
   0xb   : > { %301 = vmatpush1.bf16.msra.mxu0 (!%p140_p2), %v501_v2  ;;  %480 = vmatpush1.bf16.msra.mxu1 (!%p140_p2), %v501_v2 }
   0xc   : > { %302 = vmatprep.subr.bf16.mxu0 (!%p140_p2), %v532_v1  ;;  %469 = vmatprep.subr.bf16.mxu1 (!%p140_p2), %v532_v1 }
   0xd   : > { %s650_s16 = smov (!%p165_p3, %s164_s16), 5 }
   0xe   : > { %s466_s21 = sshll.u32 %s650_s16, 4  ;;  %s448_s20 = sshll.u32 %s650_s16, 3 }
   0xf   : > { %s582_s24 = scalar_lea.vmem %s645_s0, %s466_s21  ;;  %303 = vmatpush1.bf16.msra.mxu0 %v502_v3  ;;  %481 = vmatpush1.bf16.msra.mxu1 %v502_v3  ;;  %s175_s23 = scalar_lea.vmem %s648_s3, %s448_s20 }
  0x10   : > { %304 = vmatprep.subr.bf16.mxu0 %v532_v1  ;;  %470 = vmatprep.subr.bf16.mxu1 %v532_v1  ;;  %v179_v5 = vld [vmem:[%s582_s24 + $0x8] sm:$0xff]  ;;  %v181_v6 = vld [vmem:[%s582_s24 + $0x18] sm:$0xff]  ;;  %v178_v18 = vld [vmem:[%s582_s24] sm:$0xff] }
  0x11   : > { %v183_v7 = vld [vmem:[%s582_s24 + $0x28] sm:$0xff]  ;;  %v185_v8 = vpack.c.bf16 %v181_v6, %v179_v5  ;;  %v180_v19 = vld [vmem:[%s582_s24 + $0x10] sm:$0xff]  ;;  %v182_v20 = vld [vmem:[%s582_s24 + $0x20] sm:$0xff] }
  0x12   : > { %v187_v9 = vpack.c.bf16 %v183_v7, %v183_v7  ;;  %v184_v21 = vpack.c.bf16 %v180_v19, %v178_v18  ;;  %v186_v22 = vpack.c.bf16 %v182_v20, %v182_v20 }
  0x13   : > { %305 = vmatpush1.bf16.msra.mxu0 %v503_v4  ;;  %482 = vmatpush1.bf16.msra.mxu1 %v503_v4 }
  0x14   : > { %306 = vmatprep.subr.bf16.mxu0 %v532_v1  ;;  %471 = vmatprep.subr.bf16.mxu1 %v532_v1 }
  0x15   : > { %462 = vmatprep.mubr.msk.bf16.mxu0 %vm291_vm0, %v185_v8  ;;  %463 = vmatprep.mubr.msk.bf16.mxu1 %vm291_vm0, %v187_v9 }
  0x17   : > { %307 = vmatpush1.bf16.msra.mxu0 %v504_v10  ;;  %483 = vmatpush1.bf16.msra.mxu1 %v504_v10 }
  0x18   : > { %308 = vmatprep.subr.bf16.mxu0 %v532_v1  ;;  %472 = vmatprep.subr.bf16.mxu1 %v532_v1 }
  0x1b   : > { %309 = vmatpush1.bf16.msra.mxu0 %v505_v11  ;;  %484 = vmatpush1.bf16.msra.mxu1 %v505_v11 }
  0x1c   : > { %310 = vmatprep.subr.bf16.mxu0 %v532_v1  ;;  %473 = vmatprep.subr.bf16.mxu1 %v532_v1 }
  0x1f   : > { %311 = vmatpush1.bf16.msra.mxu0 %v506_v12  ;;  %485 = vmatpush1.bf16.msra.mxu1 %v506_v12 }
  0x20   : > { %312 = vmatprep.subr.bf16.mxu0 %v532_v1  ;;  %474 = vmatprep.subr.bf16.mxu1 %v532_v1 }
  0x23   : > { %313 = vmatpush1.bf16.msra.mxu0 %v507_v13  ;;  %486 = vmatpush1.bf16.msra.mxu1 %v507_v13 }
  0x24   : > { %314 = vmatprep.subr.bf16.mxu0 %v532_v1  ;;  %475 = vmatprep.subr.bf16.mxu1 %v532_v1 }
  0x27   : > { %315 = vmatpush1.bf16.msra.mxu0 %v508_v14  ;;  %487 = vmatpush1.bf16.msra.mxu1 %v508_v14 }
  0x28   : > { %316 = vmatprep.subr.bf16.mxu0 %v532_v1  ;;  %476 = vmatprep.subr.bf16.mxu1 %v532_v1 }
  0x2b   : > { %317 = vmatpush1.bf16.msra.mxu0 %v509_v15  ;;  %488 = vmatpush1.bf16.msra.mxu1 %v509_v15 }
  0x2c   : > { %318 = vmatprep.subr.bf16.mxu0 %v532_v1  ;;  %477 = vmatprep.subr.bf16.mxu1 %v532_v1 }
  0x2f   : > { %319 = vmatpush1.bf16.msra.mxu0 %v510_v16  ;;  %489 = vmatpush1.bf16.msra.mxu1 %v510_v16 }
  0x30   : > { %320 = vmatprep.subr.bf16.mxu0 %v532_v1  ;;  %478 = vmatprep.subr.bf16.mxu1 %v532_v1 }
  0x33   : > { %321 = vmatpush1.bf16.msra.mxu0 %v511_v17  ;;  %490 = vmatpush1.bf16.msra.mxu1 %v511_v17 }
  0x36   : > { %331 = vmatmul.mubr.bf16.vlgmr.msra.gmra.mrb[0].mxu0 %v184_v21  ;;  %339 = vmatmul.mubr.bf16.vlgmr.msra.gmra.mrb[0].mxu1 %v186_v22 }
 0x109   : > { %v332_v26 = vpop.f32.mrb[0].mxu0  ;;  %v340_v27 = vpop.f32.mrb[0].mxu1 }
 0x10a   : > { %v333_v28 = vadd.f32 %v449_v25, %v332_v26  ;;  %v341_v29 = vadd.f32 %v449_v25, %v340_v27  ;;  %v334_v30 = vpop.f32.mrb[1].mxu0  ;;  %v342_v31 = vpop.f32.mrb[1].mxu1 }
 0x10b   : > { %v335_v32 = vpop.f32.mrb[2].mxu0  ;;  %v343_v33 = vpop.f32.mrb[2].mxu1 }
 0x10c   : > { %v336_v34 = vadd.f32 %v449_v25, %v335_v32  ;;  %v337_v35 = vpop.f32.mrb[3].mxu0  ;;  %v344_v36 = vpop.f32.mrb[3].mxu1  ;;  %v351_v37 = vsel %vm348_vm1, %v341_v29, -1e+30  ;;  %v349_v38 = vsel %vm348_vm1, %v333_v28, -1e+30 }
 0x10d   : > { %356 = vmax.xlane.f32.xlu1 %v351_v37  ;;  %352 = vmax.xlane.f32.xlu0 %v349_v38 }
 0x10e   : > { %v350_v39 = vsel %vm348_vm1, %v336_v34, -1e+30 }
 0x111   : > { %354 = vmax.xlane.f32.xlu0 %v350_v39 }
 0x19a   : > { %v357_v40 = vpop.xlane.xlu1 %356  ;;  %v353_v41 = vpop.xlane.xlu0 %352 }
 0x19b   : > { %v358_v42 = vsub.f32 %v349_v38, %v353_v41  ;;  %v360_v43 = vsub.f32 %v351_v37, %v357_v40 }
 0x19d   : > { %v361_v44 = vmul.f32 1.442695, %v358_v42  ;;  %v365_v47 = vmul.f32 1.442695, %v360_v43 }
 0x19e   : > { %v355_v45 = vpop.xlane.xlu0 %354 }
 0x19f   : > { %v359_v46 = vsub.f32 %v350_v39, %v355_v45  ;;  %512 = vpow2.f32 %v361_v44 }
 0x1a1   : > { %v363_v48 = vmul.f32 1.442695, %v359_v46 }
 0x1a3   : > { %514 = vpow2.f32 %v363_v48 }
 0x1a4   : > { %516 = vpow2.f32 %v365_v47 }
 0x1a9   : > { %v513_v49 = vpop.eup %512 }
 0x1aa   : > { %367 = vadd.xlane.f32.xlu1 %v513_v49 }
 0x1ad   : > { %v515_v50 = vpop.eup %514 }
 0x1ae   : > { %v517_v51 = vpop.eup %516  ;;  %369 = vadd.xlane.f32.xlu0 %v515_v50 }
 0x1af   : > { %371 = vadd.xlane.f32.xlu1 %v517_v51 }
 0x237   : > { %v368_v52 = vpop.xlane.xlu1 %367 }
 0x238   : > { %518 = vlog2.f32 %v368_v52 }
 0x23b   : > { %v370_v53 = vpop.xlane.xlu0 %369 }
 0x23c   : > { %v372_v54 = vpop.xlane.xlu1 %371  ;;  %520 = vlog2.f32 %v370_v53 }
 0x23d   : > { %522 = vlog2.f32 %v372_v54 }
 0x242   : > { %v519_v55 = vpop.eup %518 }
 0x243   : > { %v374_v56 = vmul.f32 0.6931472, %v519_v55 }
 0x245   : > { %v379_v58 = vsub.f32 %v358_v42, %v374_v56 }
 0x246   : > { %v521_v57 = vpop.eup %520 }
 0x247   : > { %v523_v59 = vpop.eup %522  ;;  %v376_v60 = vmul.f32 0.6931472, %v521_v57  ;;  %382 = vst [vmem:[%s175_s23] sm:$0xff] %v379_v58 }
 0x248   : > { %v378_v61 = vmul.f32 0.6931472, %v523_v59 }
 0x249   : > { %v380_v62 = vsub.f32 %v359_v46, %v376_v60 }
 0x24a   : > { %v381_v63 = vsub.f32 %v360_v43, %v378_v61 }
 0x24b   : > { %383 = vst [vmem:[%s175_s23 + $0x8] sm:$0xff] %v380_v62 }
 0x24c   : > { %384 = vst [vmem:[%s175_s23 + $0x10] sm:$0xff] %v381_v63 }
 0x24d PF: > { %s13_s12 = sadd.s32 1, %s530_s12  }
 0x24e   : > { %p10_p4 = scmp.ge.s32.totalorder %s13_s12, 4  }
 0x250   :  { %12 = sbr.rel (!%p10_p4) target bundleno = 1 (0x1), region = 62 }

// kernel: patch_network_forward.9
= control target key start
LH: loop header
LB: loop body
LE: loop exit
PB: predicated region body
PF: predicated region fallthrough
CT: control target
= control target key end

     0   :  { %s584_s18 = smov 0   ;;  %s641_s0 = inlined_call_operand.vmem [shape: f32[48,32], index: 0, kind: input, shape index: {}]   ;;  %s642_s1 = inlined_call_operand.vmem [shape: bf16[32,192], index: 1, kind: input, shape index: {}]   ;;  %s643_s2 = inlined_call_operand.vmem [shape: f32[1,192], index: 2, kind: input, shape index: {}]   ;;  %s644_s3 = inlined_call_operand.vmem [shape: f32[48,192], index: 3, kind: input, shape index: {}]   ;;  %s645_s4 = inlined_call_operand.vmem [shape: f32[48,192], index: 4, kind: output, shape index: {0}]   ;;  %s646_s5 = inlined_call_operand.vmem [shape: f32[2,1,1], index: 5, kind: output, shape index: {1}]  }
   0x1 LB: > { %s590_s19 = sadd.s32 4294967295, %s551_s18   ;;  %p510_p0 = scmp.ge.s32.totalorder %s551_s18, 1  ;;  %s551_s18 = sphi %s584_s18, %s16_s18  }
   0x2   : > { %p203_p1 = scmp.lt.s32.totalorder %s551_s18, 3 }
   0x4   : > { %p204_p2 = pnand %p510_p0, %p203_p1 }
   0x5   : > { %v539_v0 = vld [vmem:[%s642_s1 + $0x4] ss:$8 sps:$4 sm:$0xff] (!%p204_p2)   ;;  %s241_s22 = smul.u32 (!%p204_p2), 3, %s590_s19  ;;  %v541_v1 = vld [vmem:[%s642_s1] ss:$8 sps:$4 sm:$0xff] (!%p204_p2)   ;;  %v553_v2 = vmov (!%p204_p2), 0   ;;  %v276_v10 = vlaneseq (!%p204_p2) }
   0x6   : > { %207 = sbr.rel (%p204_p2) target bundleno = 404 (0x194), region = 36  ;;  %345 = vmatprep.mubr.bf16.mxu0 (!%p204_p2), %v553_v2  ;;  %355 = vmatprep.mubr.bf16.mxu1 (!%p204_p2), %v553_v2  ;;  %v542_v3 = vld [vmem:[%s642_s1 + $0x14] ss:$8 sps:$4 sm:$0xff] (!%p204_p2)   ;;  %v544_v4 = vld [vmem:[%s642_s1 + $0x10] ss:$8 sps:$4 sm:$0xff] (!%p204_p2)   ;;  %vm306_vm0 = vcmask (!%p204_p2), 261120  }
   0x7   : > { %313 = vmatprep.subr.bf16.mxu0 (!%p204_p2), %v539_v0  ;;  %526 = vmatprep.subr.bf16.mxu1 (!%p204_p2), %v539_v0  ;;  %p242_p3 = scmp.lt.s32.totalorder (!%p204_p2), %s241_s22, 5  ;;  %v277_v11 = vshrl.u32 (!%p204_p2), %v276_v10, 7  ;;  %v274_v13 = vld [vmem:[%s643_s2] sm:$0x3] (!%p204_p2)  ;;  %vm365_vm1 = vcmask (!%p204_p2), 523264   ;;  %p261_p4 = scmp.lt.s32.totalorder (!%p204_p2), %s590_s19, 1 }
   0x8   : > { %314 = vmatpush1.bf16.msra.mxu0 (!%p204_p2), %v541_v1  ;;  %528 = vmatpush1.bf16.msra.mxu1 (!%p204_p2), %v541_v1  ;;  %vm409_vm2 = vcmask (!%p204_p2), 0  }
   0x9   : > { %315 = vmatprep.subr.bf16.mxu0 (!%p204_p2), %v542_v3  ;;  %527 = vmatprep.subr.bf16.mxu1 (!%p204_p2), %v542_v3  ;;  %v278_v12 = vsub.s32 (!%p204_p2), 0, %v277_v11  ;;  %v282_v14 = vsub.s32 (!%p204_p2), 1, %v277_v11 }
   0xb   : > { %v279_v15 = vrot.slane (!%p204_p2), %v274_v13, %v278_v12  ;;  %v283_v16 = vrot.slane (!%p204_p2), %v274_v13, %v282_v14 }
   0xc   : > { %316 = vmatpush1.bf16.msra.mxu0 (!%p204_p2), %v544_v4  ;;  %529 = vmatpush1.bf16.msra.mxu1 (!%p204_p2), %v544_v4 }
   0xd   : > { %s648_s22 = smov (!%p242_p3, %s241_s22), 5  ;;  %s650_s19 = smov (!%p261_p4, %s590_s19), 1 }
   0xe   : > { %s511_s29 = sshll.u32 %s648_s22, 3  ;;  %s524_s8 = sshll.u32 %s648_s22, 4 }
   0xf   : > { %s245_s7 = scalar_lea.vmem %s641_s0, %s511_s29  ;;  %s252_s13 = scalar_lea.vmem %s644_s3, %s524_s8 }
  0x10   : > { %v265_v5 = vld [vmem:[%s245_s7] sm:$0xff]  ;;  %v266_v6 = vld [vmem:[%s245_s7 + $0x8] sm:$0xff]  ;;  %v267_v7 = vld [vmem:[%s245_s7 + $0x10] sm:$0xff]  ;;  %s619_s16 = scalar_lea.vmem %s645_s4, %s524_s8  ;;  %s263_s21 = scalar_lea.vmem %s646_s5, %s650_s19 }
  0x11   : > { %v268_v8 = vpack.c.bf16 %v266_v6, %v265_v5  ;;  %v269_v9 = vpack.c.bf16 %v267_v7, %v267_v7  ;;  %v371_v19 = vld [vmem:[%s252_s13] sm:$0xff]  ;;  %v372_v23 = vld [vmem:[%s252_s13 + $0x8] sm:$0xff]  ;;  %v373_v29 = vld [vmem:[%s252_s13 + $0x10] sm:$0xff] }
  0x12   : > { %v375_v20 = vld [vmem:[%s252_s13 + $0x20] sm:$0xff]  ;;  %v376_v26 = vld [vmem:[%s252_s13 + $0x28] sm:$0xff]  ;;  %v374_v34 = vld [vmem:[%s252_s13 + $0x18] sm:$0xff] }
  0x13   : > { %520 = vmatmul.mubr.msk.bf16.vlgmr.msra.gmra.mrb[0].mxu0 %vm306_vm0, %v268_v8  ;;  %521 = vmatmul.mubr.msk.bf16.vlgmr.msra.gmra.mrb[0].mxu1 %vm306_vm0, %v269_v9 }
  0xe6   : > { %v347_v17 = vpop.f32.mrb[0].mxu0  ;;  %v357_v18 = vpop.f32.mrb[0].mxu1 }
  0xe7   : > { %v348_v21 = vadd.f32 %v347_v17, %v279_v15  ;;  %v349_v22 = vpop.f32.mrb[1].mxu0  ;;  %v358_v24 = vadd.f32 %v357_v18, %v279_v15  ;;  %v359_v25 = vpop.f32.mrb[1].mxu1 }
  0xe8   : > { %v350_v27 = vadd.f32 %v349_v22, %v283_v16  ;;  %v351_v28 = vpop.f32.mrb[2].mxu0  ;;  %v360_v30 = vadd.f32 %v359_v25, %v283_v16  ;;  %v361_v31 = vpop.f32.mrb[2].mxu1 }
  0xe9   : > { %364 = vst [vmem:[%s619_s16] sm:$0xff] %v348_v21  ;;  %v352_v32 = vadd.f32 %v351_v28, %v279_v15  ;;  %v353_v33 = vpop.f32.mrb[3].mxu0  ;;  %369 = vst [vmem:[%s619_s16 + $0x20] sm:$0xff] %v358_v24  ;;  %v362_v35 = vpop.f32.mrb[3].mxu1  ;;  %v377_v36 = vsub.f32 %v371_v19, %v348_v21  ;;  %v381_v37 = vsub.f32 %v375_v20, %v358_v24 }
  0xea   : > { %366 = vst.msk [vmem:[%s619_s16 + $0x8] sm:$0xff] %vm365_vm1, %v350_v27  ;;  %v378_v38 = vsub.f32 %v372_v23, %v350_v27  ;;  %v354_v39 = vadd.f32 %v353_v33, %v283_v16  ;;  %370 = vst.msk [vmem:[%s619_s16 + $0x28] sm:$0xff] %vm365_vm1, %v360_v30  ;;  %v382_v40 = vsub.f32 %v376_v26, %v360_v30 }
  0xeb   : > { %367 = vst [vmem:[%s619_s16 + $0x10] sm:$0xff] %v352_v32  ;;  %v379_v41 = vsub.f32 %v373_v29, %v352_v32  ;;  %v387_v42 = vmul.f32 %v381_v37, %v381_v37  ;;  %v383_v46 = vmul.f32 %v377_v36, %v377_v36 }
  0xec   : > { %368 = vst.msk [vmem:[%s619_s16 + $0x18] sm:$0xff] %vm365_vm1, %v354_v39  ;;  %v380_v43 = vsub.f32 %v374_v34, %v354_v39  ;;  %v384_v44 = vmul.f32 %v378_v38, %v378_v38  ;;  %v388_v45 = vmul.f32 %v382_v40, %v382_v40 }
  0xed   : > { %v385_v50 = vmul.f32 %v379_v41, %v379_v41 }
  0xee   : > { %v386_v47 = vmul.f32 %v380_v43, %v380_v43  ;;  %v389_v48 = vsel %vm365_vm1, %v384_v44, 0.0  ;;  %v397_v49 = vsel %vm365_vm1, %v388_v45, 0.0 }
  0xef   : > { %v390_v51 = vadd.f32 %v389_v48, %v383_v46  ;;  %v398_v52 = vadd.f32 %v397_v49, %v387_v42 }
  0xf0   : > { %v393_v53 = vsel %vm365_vm1, %v386_v47, 0.0 }
  0xf1   : > { %391 = vadd.xlane.f32.xlu0 %v390_v51  ;;  %399 = vadd.xlane.f32.xlu1 %v398_v52  ;;  %v394_v54 = vadd.f32 %v393_v53, %v385_v50 }
  0xf5   : > { %395 = vadd.xlane.f32.xlu0 %v394_v54 }
 0x17e   : > { %v392_v55 = vpop.xlane.xlu0 %391  ;;  %v400_v58 = vpop.xlane.xlu1 %399 }
 0x182   : > { %v396_v56 = vpop.xlane.xlu0 %395 }
 0x183   : > { %v401_v57 = vadd.f32 %v396_v56, %v392_v55 }
 0x185   : > { %v402_v59 = vadd.f32 %v401_v57, %v400_v58 }
 0x187   : > { %v403_v60 = vrot.slane %v402_v59, 4 }
 0x189   : > { %v404_v61 = vadd.f32 %v403_v60, %v402_v59 }
 0x18b   : > { %v405_v62 = vrot.slane %v404_v61, 2 }
 0x18d   : > { %v406_v63 = vadd.f32 %v405_v62, %v404_v61 }
 0x18f   : > { %v407_v0 = vrot.slane %v406_v63, 1 }
 0x191   : > { %v408_v1 = vadd.f32 %v407_v0, %v406_v63 }
 0x193   : > { %410 = vst.msk [vmem:[%s263_s21] sm:$0x1] %vm409_vm2, %v408_v1 }
 0x194 PF: > { %s16_s18 = sadd.s32 1, %s551_s18  }
 0x195   : > { %p13_p5 = scmp.ge.s32.totalorder %s16_s18, 4  }
 0x197   :  { %15 = sbr.rel (!%p13_p5) target bundleno = 1 (0x1), region = 81 }

// kernel: patch_network_forward.10
= control target key start
LH: loop header
LB: loop body
LE: loop exit
PB: predicated region body
PF: predicated region fallthrough
CT: control target
= control target key end

     0   :  { %vm68_vm0 = vcmask 1040384   ;;  %v191_v2 = vmov 0   ;;  %vm55_vm1 = vcmask 269312   ;;  %vm139_vm2 = vcmask 523264   ;;  %s304_s1 = inlined_call_operand.vmem [shape: bf16[33,64], index: 1, kind: input, shape index: {}]   ;;  %s305_s0 = inlined_call_operand.vmem [shape: f32[60,33], index: 0, kind: input, shape index: {}]   ;;  %s306_s2 = inlined_call_operand.vmem [shape: f32[60,64], index: 2, kind: input, shape index: {}]   ;;  %s307_s3 = inlined_call_operand.vmem [shape: f32[60,64], index: 3, kind: output, shape index: {}]  }
   0x1   :  { %v188_v0 = vld [vmem:[%s304_s1] sm:$0xff]   ;;  %v189_v1 = vld [vmem:[%s304_s1 + $0x8] sm:$0xff]   ;;  %v70_v3 = vsel %vm68_vm0, 65535, %v191_v2  ;;  %v190_v4 = vld [vmem:[%s304_s1 + $0x10] ss:$0 sps:$4 sm:$0x11]  }
   0x2   :  { %167 = vmatprep.subr.bf16.mxu0 %v188_v0  ;;  %181 = vmatprep.subr.bf16.mxu1 %v188_v0  ;;  %v15_v5 = vld [vmem:[%s305_s0] sm:$0xff]  ;;  %v16_v6 = vld [vmem:[%s305_s0 + $0x8] sm:$0xff]  ;;  %v72_v9 = vand.u32 %v190_v4, %v70_v3  ;;  %v17_v12 = vld [vmem:[%s305_s0 + $0x10] sm:$0xff]  ;;  %vm147_vm3 = vcmask 519168  }
   0x3   :  { %168 = vmatpush3.bf16.msra.mxu0 %v188_v0  ;;  %184 = vmatpush3.bf16.msra.mxu1 %v188_v0  ;;  %v19_v7 = vld [vmem:[%s305_s0 + $0x20] sm:$0xff]  ;;  %v20_v8 = vld [vmem:[%s305_s0 + $0x28] sm:$0xff]  ;;  %v23_v10 = vpack.c.bf16 %v16_v6, %v15_v5  ;;  %v18_v13 = vld [vmem:[%s305_s0 + $0x18] sm:$0xff] }
   0x4   :  { %169 = vmatprep.subr.bf16.mxu0 %v189_v1  ;;  %182 = vmatprep.subr.bf16.mxu1 %v189_v1  ;;  %v25_v11 = vpack.c.bf16 %v20_v8, %v19_v7  ;;  %v21_v14 = vld [vmem:[%s305_s0 + $0x30] sm:$0xff]  ;;  %v22_v15 = vld [vmem:[%s305_s0 + $0x38] sm:$0xf]  ;;  %v24_v16 = vpack.c.bf16 %v18_v13, %v17_v12  ;;  %v32_v20 = vld [vmem:[%s306_s2] sm:$0xff] }
   0x5   :  { %173 = vmatprep.mubr.msk.bf16.mxu0 %vm55_vm1, %v23_v10  ;;  %v26_v17 = vpack.c.bf16 %v22_v15, %v21_v14  ;;  %v34_v18 = vld [vmem:[%s306_s2 + $0x10] sm:$0xff]  ;;  %v36_v21 = vld [vmem:[%s306_s2 + $0x20] sm:$0xff]  ;;  %v35_v24 = vld [vmem:[%s306_s2 + $0x18] sm:$0xff] }
   0x6   :  { %177 = vmatprep.mubr.msk.bf16.mxu1 %vm55_vm1, %v25_v11  ;;  %v38_v19 = vld [vmem:[%s306_s2 + $0x30] sm:$0xff]  ;;  %v39_v25 = vld [vmem:[%s306_s2 + $0x38] sm:$0xf]  ;;  %v33_v30 = vld [vmem:[%s306_s2 + $0x8] sm:$0xff] }
   0x7   :  { %170 = vmatpush3.bf16.msra.mxu0 %v189_v1  ;;  %185 = vmatpush3.bf16.msra.mxu1 %v189_v1  ;;  %v37_v31 = vld [vmem:[%s306_s2 + $0x28] sm:$0xff] }
   0x8   :  { %171 = vmatprep.subr.bf16.mxu0 %v72_v9  ;;  %183 = vmatprep.subr.bf16.mxu1 %v72_v9 }
   0xb   :  { %172 = vmatpush3.bf16.msra.mxu0 %v72_v9  ;;  %186 = vmatpush3.bf16.msra.mxu1 %v72_v9 }
   0xe   :  { %174 = vmatmul.mubr.msk.bf16.vlgmr.msra.gmra.mrb[0].mxu0 %vm55_vm1, %v24_v16  ;;  %178 = vmatmul.mubr.msk.bf16.vlgmr.msra.gmra.mrb[0].mxu1 %vm55_vm1, %v26_v17 }
  0xe1   :  { %v175_v22 = vpop.f32.mrb[0].mxu0  ;;  %v179_v23 = vpop.f32.mrb[0].mxu1 }
  0xe2   :  { %v117_v26 = vadd.f32 %v175_v22, %v34_v18  ;;  %v133_v27 = vadd.f32 %v179_v23, %v38_v19  ;;  %v108_v28 = vpop.f32.mrb[1].mxu0  ;;  %v124_v29 = vpop.f32.mrb[1].mxu1 }
  0xe3   :  { %v109_v32 = vadd.f32 %v108_v28, %v32_v20  ;;  %v125_v33 = vadd.f32 %v124_v29, %v36_v21  ;;  %v176_v34 = vpop.f32.mrb[2].mxu0  ;;  %v180_v35 = vpop.f32.mrb[2].mxu1 }
  0xe4   :  { %142 = vst.msk [vmem:[%s307_s3 + $0x10] sm:$0xff] %vm139_vm2, %v117_v26  ;;  %146 = vst.msk [vmem:[%s307_s3 + $0x30] sm:$0xff] %vm139_vm2, %v133_v27  ;;  %v120_v36 = vadd.f32 %v176_v34, %v35_v24  ;;  %v136_v37 = vadd.f32 %v180_v35, %v39_v25  ;;  %v111_v38 = vpop.f32.mrb[3].mxu0  ;;  %v127_v39 = vpop.f32.mrb[3].mxu1 }
  0xe5   :  { %140 = vst.msk [vmem:[%s307_s3] sm:$0xff] %vm139_vm2, %v109_v32  ;;  %144 = vst.msk [vmem:[%s307_s3 + $0x20] sm:$0xff] %vm139_vm2, %v125_v33  ;;  %v112_v40 = vadd.f32 %v111_v38, %v33_v30  ;;  %v128_v41 = vadd.f32 %v127_v39, %v37_v31 }
  0xe6   :  { %143 = vst.msk [vmem:[%s307_s3 + $0x18] sm:$0xff] %vm139_vm2, %v120_v36 }
  0xe7   :  { %148 = vst.msk [vmem:[%s307_s3 + $0x38] sm:$0xf] %vm147_vm3, %v136_v37 }
  0xe8   :  { %141 = vst.msk [vmem:[%s307_s3 + $0x8] sm:$0xff] %vm139_vm2, %v112_v40  ;;  %145 = vst.msk [vmem:[%s307_s3 + $0x28] sm:$0xff] %vm139_vm2, %v128_v41 }

// kernel: patch_network_forward.11
= control target key start
LH: loop header
LB: loop body
LE: loop exit
PB: predicated region body
PF: predicated region fallthrough
CT: control target
= control target key end

     0   :  { %v267_v1 = vmov 0.0   ;;  %vm268_vm0 = vmmov 0   ;;  %vm65_vm1 = vcmask 523264   ;;  %s378_s1 = inlined_call_operand.vmem [shape: bf16[64,64], index: 1, kind: input, shape index: {}]   ;;  %s379_s4 = inlined_call_operand.vmem [shape: bf16[64,64], index: 4, kind: input, shape index: {}]   ;;  %s380_s0 = inlined_call_operand.vmem [shape: f32[32,64], index: 0, kind: input, shape index: {}]   ;;  %s381_s3 = inlined_call_operand.vmem [shape: f32[8,64], index: 3, kind: input, shape index: {}]   ;;  %s382_s2 = inlined_call_operand.vmem [shape: f32[32,64], index: 2, kind: input, shape index: {}]   ;;  %s383_s6 = inlined_call_operand.vmem [shape: f32[8,64], index: 6, kind: output, shape index: {1}]   ;;  %s384_s5 = inlined_call_operand.vmem [shape: f32[32,64], index: 5, kind: output, shape index: {0}]  }
   0x1   :  { %v259_v0 = vld [vmem:[%s378_s1] sm:$0xff]   ;;  %245 = vmatprep.subr.bf16.mxu1 %v267_v1  ;;  %253 = vmatprep.mubr.msk.bf16.mxu1 %vm268_vm0, %v267_v1  ;;  %v261_v3 = vld [vmem:[%s378_s1 + $0x8] sm:$0xff]   ;;  %v263_v5 = vld [vmem:[%s378_s1 + $0x10] sm:$0xff]  }
   0x2   :  { %v260_v2 = vld [vmem:[%s379_s4] sm:$0xff]   ;;  %233 = vmatprep.subr.bf16.mxu0 %v259_v0  ;;  %v262_v4 = vld [vmem:[%s379_s4 + $0x8] sm:$0xff]   ;;  %v264_v6 = vld [vmem:[%s379_s4 + $0x10] sm:$0xff]  }
   0x3   :  { %234 = vmatpush3.bf16.msra.mxu0 %v259_v0  ;;  %246 = vmatpush3.bf16.msra.mxu1 %v260_v2  ;;  %v265_v7 = vld [vmem:[%s378_s1 + $0x18] sm:$0xff]   ;;  %v23_v8 = vld [vmem:[%s380_s0] sm:$0xff]  ;;  %v24_v9 = vld [vmem:[%s380_s0 + $0x8] sm:$0xff] }
   0x4   :  { %235 = vmatprep.subr.bf16.mxu0 %v261_v3  ;;  %247 = vmatprep.subr.bf16.mxu1 %v267_v1  ;;  %v27_v10 = vpack.c.bf16 %v24_v9, %v23_v8  ;;  %v266_v11 = vld [vmem:[%s379_s4 + $0x18] sm:$0xff]   ;;  %v25_v12 = vld [vmem:[%s380_s0 + $0x10] sm:$0xff]  ;;  %v125_v14 = vld [vmem:[%s381_s3] sm:$0xff] }
   0x5   :  { %v26_v13 = vld [vmem:[%s380_s0 + $0x18] sm:$0xff]  ;;  %v126_v16 = vpack.c.bf16 %v125_v14, %v125_v14  ;;  %v39_v17 = vld [vmem:[%s382_s2 + $0x10] sm:$0xff]  ;;  %v37_v18 = vld [vmem:[%s382_s2] sm:$0xff] }
   0x6   :  { %241 = vmatprep.mubr.msk.bf16.mxu0 %vm65_vm1, %v27_v10  ;;  %v28_v15 = vpack.c.bf16 %v26_v13, %v25_v12  ;;  %v40_v21 = vld [vmem:[%s382_s2 + $0x18] sm:$0xff]  ;;  %v38_v25 = vld [vmem:[%s382_s2 + $0x8] sm:$0xff] }
   0x7   :  { %236 = vmatpush3.bf16.msra.mxu0 %v261_v3  ;;  %248 = vmatpush3.bf16.msra.mxu1 %v262_v4 }
   0x8   :  { %237 = vmatprep.subr.bf16.mxu0 %v263_v5  ;;  %249 = vmatprep.subr.bf16.mxu1 %v267_v1 }
   0xb   :  { %238 = vmatpush3.bf16.msra.mxu0 %v263_v5  ;;  %250 = vmatpush3.bf16.msra.mxu1 %v264_v6 }
   0xc   :  { %239 = vmatprep.subr.bf16.mxu0 %v265_v7  ;;  %251 = vmatprep.subr.bf16.mxu1 %v267_v1 }
   0xf   :  { %240 = vmatpush3.bf16.msra.mxu0 %v265_v7  ;;  %252 = vmatpush3.bf16.msra.mxu1 %v266_v11 }
  0x12   :  { %242 = vmatmul.mubr.msk.bf16.vlgmr.msra.gmra.mrb[0].mxu0 %vm65_vm1, %v28_v15  ;;  %254 = vmatmul.mubr.msk.bf16.vlgmr.msra.gmra.mrb[0].mxu1 %vm65_vm1, %v126_v16 }
  0xe5   :  { %v243_v19 = vpop.f32.mrb[0].mxu0  ;;  %v196_v20 = vpop.f32.mrb[0].mxu1 }
  0xe6   :  { %v115_v22 = vadd.f32 %v243_v19, %v39_v17  ;;  %202 = vst.msk [vmem:[%s383_s6] sm:$0xff] %vm65_vm1, %v196_v20  ;;  %v106_v23 = vpop.f32.mrb[1].mxu0  ;;  %v255_v24 = vpop.f32.mrb[1].mxu1 }
  0xe7   :  { %v107_v26 = vadd.f32 %v106_v23, %v37_v18  ;;  %v244_v27 = vpop.f32.mrb[2].mxu0  ;;  %v199_v28 = vpop.f32.mrb[2].mxu1 }
  0xe8   :  { %123 = vst.msk [vmem:[%s384_s5 + $0x10] sm:$0xff] %vm65_vm1, %v115_v22  ;;  %v118_v29 = vadd.f32 %v244_v27, %v40_v21  ;;  %v109_v30 = vpop.f32.mrb[3].mxu0  ;;  %v256_v31 = vpop.f32.mrb[3].mxu1 }
  0xe9   :  { %121 = vst.msk [vmem:[%s384_s5] sm:$0xff] %vm65_vm1, %v107_v26  ;;  %v110_v32 = vadd.f32 %v109_v30, %v38_v25 }
  0xea   :  { %124 = vst.msk [vmem:[%s384_s5 + $0x18] sm:$0xff] %vm65_vm1, %v118_v29 }
  0xeb   :  { %122 = vst.msk [vmem:[%s384_s5 + $0x8] sm:$0xff] %vm65_vm1, %v110_v32 }

// kernel: patch_network_forward.13
= control target key start
LH: loop header
LB: loop body
LE: loop exit
PB: predicated region body
PF: predicated region fallthrough
CT: control target
= control target key end

     0   :  { %s7100_s0 = inlined_call_operand.vmem [shape: f32[2,4,64], index: 0, kind: input, shape index: {}]   ;;  %s7101_s1 = inlined_call_operand.vmem [shape: f32[2,4,64], index: 1, kind: input, shape index: {}]   ;;  %s7102_s2 = inlined_call_operand.vmem [shape: f32[2,1,64], index: 2, kind: input, shape index: {}]   ;;  %s7103_s3 = inlined_call_operand.vmem [shape: f32[2,1,64], index: 3, kind: input, shape index: {}]   ;;  %s7104_s4 = inlined_call_operand.vmem [shape: bf16[2,64,192], index: 4, kind: input, shape index: {}]   ;;  %s7105_s5 = inlined_call_operand.vmem [shape: bf16[2,64,64], index: 5, kind: input, shape index: {}]   ;;  %s7106_s6 = inlined_call_operand.vmem [shape: f32[2,1,64], index: 6, kind: input, shape index: {}]   ;;  %s7107_s7 = inlined_call_operand.vmem [shape: f32[2,1,64], index: 7, kind: input, shape index: {}]   ;;  %s7108_s8 = inlined_call_operand.vmem [shape: bf16[2,64,64], index: 8, kind: input, shape index: {}]   ;;  %s7109_s9 = inlined_call_operand.vmem [shape: bf16[2,64,128], index: 9, kind: input, shape index: {}]   ;;  %s7110_s10 = inlined_call_operand.vmem [shape: bf16[2,64,64], index: 10, kind: input, shape index: {}]   ;;  %s7111_s11 = inlined_call_operand.vmem [shape: f32[2,1,64], index: 11, kind: input, shape index: {}]   ;;  %s7112_s12 = inlined_call_operand.vmem [shape: f32[2,1,64], index: 12, kind: input, shape index: {}]   ;;  %s7113_s13 = inlined_call_operand.vmem [shape: bf16[2,64,256], index: 13, kind: input, shape index: {}]   ;;  %s7114_s14 = inlined_call_operand.vmem [shape: f32[2,1,256], index: 14, kind: input, shape index: {}]   ;;  %s7115_s15 = inlined_call_operand.vmem [shape: bf16[2,256,64], index: 15, kind: input, shape index: {}]   ;;  %s7116_s16 = inlined_call_operand.vmem [shape: f32[2,1,64], index: 16, kind: input, shape index: {}]   ;;  %s7117_s17 = inlined_call_operand.vmem [shape: f32[1,64], index: 17, kind: input, shape index: {}]   ;;  %s7118_s18 = inlined_call_operand.vmem [shape: f32[1,64], index: 18, kind: input, shape index: {}]   ;;  %s7119_s19 = inlined_call_operand.vmem [shape: bf16[64,32], index: 19, kind: input, shape index: {}]   ;;  %s7120_s20 = inlined_call_operand.vmem [shape: f32[2,4,32], index: 20, kind: input, shape index: {}]   ;;  %s7121_s21 = inlined_call_operand.vmem [shape: f32[2,1,1], index: 21, kind: output, shape index: {}]  }
   0x1   :  { %7145 = sst [smem:[#allocation5_spill]] %s7100_s0 }
   0x2   :  { %7146 = sst [smem:[#allocation6_spill]] %s7101_s1 }
   0x3   :  { %7147 = sst [smem:[#allocation7_spill]] %s7102_s2  ;;  %s6248_s2 = smov 0  }
   0x4   :  { %7148 = sst [smem:[#allocation8_spill]] %s7103_s3 }
   0x5   :  { %7149 = sst [smem:[#allocation9_spill]] %s7104_s4 }
   0x6   :  { %7150 = sst [smem:[#allocation10_spill]] %s7105_s5 }
   0x7   :  { %7151 = sst [smem:[#allocation11_spill]] %s7110_s10 }
   0x8   :  { %7152 = sst [smem:[#allocation12_spill]] %s7117_s17 }
   0x9   :  { %7153 = sst [smem:[#allocation13_spill]] %s7118_s18 }
   0xa   :  { %7154 = sst [smem:[#allocation14_spill]] %s7119_s19 }
   0xb   :  { %7155 = sst [smem:[#allocation15_spill]] %s7120_s20 }
   0xc   :  { %7156 = sst [smem:[#allocation16_spill]] %s7121_s21 }
   0xd LB: > { %7157 = sst [smem:[#allocation2_spill]] %s6126_s2  ;;  %s5192_s25 = sadd.s32 4294967295, %s6126_s2   ;;  %s6126_s2 = sphi %s6248_s2, %s31_s2  }
   0xe   : > { %p5196_p0 = scmp.ge.s32.totalorder %s6126_s2, 1  ;;  %p604_p1 = scmp.lt.s32.totalorder %s6126_s2, 3 }
  0x10   : > { %p605_p2 = pnand %p5196_p0, %p604_p1 }
  0x12   : > { %608 = sbr.rel (%p605_p2) target bundleno = 11974 (0x2ec6), region = 104 }
  0x19   : > { %p669_p3 = scmp.lt.s32.totalorder %s5192_s25, 1  ;;  %vm689_vm0 = vcmask 519168   ;;  %s7160_s28 = sld [smem:[#allocation5_spill]]  ;;  %v6128_v11 = vmov 0   ;;  %vm767_vm1 = vcmask 523264   ;;  %v6129_v26 = vmov 0.0  }
  0x1a   : > { %s7161_s30 = sld [smem:[#allocation9_spill]]  ;;  %803 = vmatprep.mubr.bf16.mxu0 %v6128_v11  ;;  %s7162_s27 = sld [smem:[#allocation7_spill]]  ;;  %5641 = vmatprep.subr.mxu1 %v6129_v26  ;;  %vm6130_vm2 = vmmov 0   ;;  %vm921_vm3 = vcmask 1043456   ;;  %vm823_vm4 = vcmask 130048   ;;  %v899_v32 = vlaneseq }
  0x1b   : > { %s7186_s25 = smov (!%p669_p3, %s5192_s25), 1  ;;  %5643 = vmatprep.mubr.msk.f32.mxu1 %vm6130_vm2, %v6129_v26  ;;  %s7136_s0 = smov 48   ;;  %vm905_vm6 = vcmask 27648   ;;  %vm917_vm7 = vcmask 31744   ;;  %vm1512_vm8 = vcmask 261120   ;;  %vm1514_vm9 = vcmask 392192  }
  0x1c   : > { %7158 = sst [smem:[#allocation3_spill]] %s7186_s25  ;;  %s6259_s26 = sshll.u32 %s7186_s25, 2  ;;  %v6326_v33 = vshrl.u32 %v899_v32, 7  ;;  %v902_v34 = vand.u32 127, %v899_v32  ;;  %vm5093_vm10 = vcmask 257024   ;;  %vm5119_vm11 = vcmask 0  }
  0x1d   : > { %7159 = sst [smem:[#allocation4_spill]] %s6259_s26  ;;  %s7134_s4 = smov 64  }
  0x1e   : > { %vm6329_vm5 = vcmp.le.s32.totalorder %v902_v34, %v6326_v33  ;;  %s7132_s5 = smov 112   ;;  %s7138_s22 = smov 32  }
  0x1f   : > { %s672_s29 = scalar_lea.vmem %s7160_s28, %s6259_s26  ;;  %s7130_s23 = smov 96  }
  0x20   : > { %v6265_v0 = vld [vmem:[%s672_s29] sm:$0xf]  ;;  %v5922_v7 = vld [vmem:[%s7161_s30 + $0x4] ss:$8 sps:$4 sm:$0xff]   ;;  %v5925_v9 = vld [vmem:[%s7161_s30 + $0x14] ss:$8 sps:$4 sm:$0xff]  }
  0x21   : > { %v690_v1 = vsel %vm689_vm0, %v6265_v0, 0.0  ;;  %v5924_v8 = vld [vmem:[%s7161_s30] ss:$8 sps:$4 sm:$0xff]   ;;  %771 = vmatprep.subr.bf16.mxu0 %v5922_v7  ;;  %v5927_v10 = vld [vmem:[%s7161_s30 + $0x10] ss:$8 sps:$4 sm:$0xff]   ;;  %s7163_s29 = sld [smem:[#allocation8_spill]] }
  0x22   : > { %691 = vadd.xlane.f32.xlu0 %v690_v1  ;;  %772 = vmatpush1.bf16.msra.mxu0 %v5924_v8  ;;  %v5928_v12 = vld [vmem:[%s7161_s30 + $0x24] ss:$8 sps:$4 sm:$0xff]   ;;  %v5930_v13 = vld [vmem:[%s7161_s30 + $0x20] ss:$8 sps:$4 sm:$0xff]   ;;  %v5931_v14 = vld [vmem:[%s7161_s30 + $0x34] ss:$8 sps:$4 sm:$0xff]  }
  0x23   : > { %773 = vmatprep.subr.bf16.mxu0 %v5925_v9  ;;  %v5933_v15 = vld [vmem:[%s7161_s30 + $0x30] ss:$8 sps:$4 sm:$0xff]   ;;  %v5200_v20 = vld [vmem:[%s7162_s27] ss:$0 sm:$0xff]  ;;  %s7126_s1 = smov 16   ;;  %s7128_s24 = smov 80  }
  0x24   : > { %s7168_s21 = sld [smem:[#allocation6_spill]]  ;;  %s7169_s2 = smov 64  }
  0x25   : > { %s7172_s28 = smov 80   ;;  %s7174_s3 = smov 16  }
  0x26   : > { %774 = vmatpush1.bf16.msra.mxu0 %v5927_v10  ;;  %s7175_s10 = sld [smem:[#allocation11_spill]]  ;;  %s7180_s19 = sld [smem:[#allocation4_spill]] }
  0x27   : > { %775 = vmatprep.subr.bf16.mxu0 %v5928_v12  ;;  %v5201_v22 = vld [vmem:[%s7163_s29] ss:$0 sm:$0xff] }
  0x2a   : > { %776 = vmatpush1.bf16.msra.mxu0 %v5930_v13  ;;  %s676_s25 = scalar_lea.vmem %s7168_s21, %s6259_s26  ;;  %s7170_s21 = smov 112  }
  0x2b   : > { %777 = vmatprep.subr.bf16.mxu0 %v5931_v14  ;;  %s7181_s26 = sld [smem:[#allocation15_spill]] }
  0x2e   : > { %778 = vmatpush1.bf16.msra.mxu0 %v5933_v15 }
  0x2f   : > { %5636 = vmatprep.subr.mxu0 %v6129_v26 }
  0xaf   : > { %v692_v2 = vpop.xlane.xlu0 %691 }
  0xb0   : > { %v694_v3 = vmul.f32 0.015625, %v692_v2 }
  0xb2   : > { %v695_v4 = vsub.f32 %v6265_v0, %v694_v3 }
  0xb4   : > { %v696_v5 = vmul.f32 %v695_v4, %v695_v4 }
  0xb6   : > { %v697_v6 = vsel %vm689_vm0, %v696_v5, 0.0 }
  0xb7   : > { %698 = vadd.xlane.f32.xlu0 %v697_v6 }
 0x144   : > { %v699_v16 = vpop.xlane.xlu0 %698 }
 0x145   : > { %v700_v17 = vmul.f32 0.015625, %v699_v16 }
 0x147   : > { %v701_v18 = vadd.f32 1e-05, %v700_v17 }
 0x149   : > { %6038 = vrsqrt.f32 %v701_v18 }
 0x153   : > { %v6039_v19 = vpop.eup %6038 }
 0x154   : > { %v703_v21 = vmul.f32 %v6039_v19, %v695_v4 }
 0x156   : > { %v710_v23 = vmul.f32 %v5200_v20, %v703_v21 }
 0x158   : > { %v717_v24 = vadd.f32 %v5201_v22, %v710_v23 }
 0x15a   : > { %v726_v25 = vpack.c.bf16 %v717_v24, %v717_v24 }
 0x15c   : > { %5210 = vmatmul.mubr.msk.bf16.vlgmr.msra.gmra.mrb[0].mxu0 %vm767_vm1, %v726_v25 }
 0x15d   : > { %5638 = vmatprep.mubr.msk.f32.mxu0 %vm6130_vm2, %v6129_v26 }
 0x22f   : > { %v6309_v27 = vpop.f32.mrb[0].mxu0 }
 0x230   : > { %997 = vrot.lane.b32.xlu0 %v6309_v27, %s7136_s0  ;;  %821 = vrot.lane.b32.xlu1 %v6309_v27, %s7134_s4  ;;  %v6315_v28 = vpop.f32.mrb[1].mxu0  ;;  %s7177_s4 = sld [smem:[#allocation14_spill]] }
 0x231   : > { %v809_v29 = vpop.f32.mrb[2].mxu0  ;;  %5642 = vmatpush3.msk.msra.mxu1 %vm921_vm3, %v6315_v28 }
 0x232   : > { %v810_v30 = vpop.f32.mrb[3].mxu0  ;;  %5646 = vmatprep.subr.mxu1 %v6129_v26 }
 0x2a2   : > { %v822_v31 = vpop.permute.xlu1 %821  ;;  %v998_v46 = vpop.permute.xlu0 %997 }
 0x2a3   : > { %5637 = vmatpush3.xpose.msk.msra.mxu0 %vm823_vm4, %v822_v31 }
 0x2a4   : > { %5661 = vmatprep.subr.mxu0 %v6129_v26 }
 0x2a6   : > { %5639 = vmatmul.mubr.msk.f32.vlgmr.msra.gmra.mrb[4].mxu0 %vm823_vm4, %v6309_v27 }
 0x2a7   : > { %5663 = vmatprep.mubr.msk.f32.mxu0 %vm6130_vm2, %v6129_v26 }
 0x379   : > { %v894_v35 = vpop.f32.mrb[4].mxu0 }
 0x37a   : > { %v898_v37 = vmul.f32 0.25, %v894_v35  ;;  %v5640_v38 = vpop.f32.mrb[5].mxu0 }
 0x37c   : > { %v904_v39 = vsel %vm6329_vm5, %v898_v37, -1e+30 }
 0x37d   : > { %v906_v40 = vsel %vm905_vm6, %v904_v39, -inf }
 0x37e   : > { %907 = vmax.xlane.f32.xlu1 %v906_v40 }
 0x38f   : > { %1086 = vrot.lane.b32.xlu1 %v6315_v28, %s7132_s5 }
 0x393   : > { %1165 = vrot.lane.b32.xlu1 %v6309_v27, %s7138_s22 }
 0x397   : > { %1163 = vrot.lane.b32.xlu1 %v6309_v27, %s7130_s23 }
 0x40b   : > { %v908_v41 = vpop.xlane.xlu1 %907 }
 0x40c   : > { %v909_v42 = vsub.f32 %v904_v39, %v908_v41 }
 0x40e   : > { %v910_v43 = vmul.f32 1.442695, %v909_v42 }
 0x40f   : > { %v1087_v51 = vpop.permute.xlu1 %1086 }
 0x410   : > { %6040 = vpow2.f32 %v910_v43 }
 0x413   : > { %v1166_v1 = vpop.permute.xlu1 %1165 }
 0x417   : > { %v1164_v2 = vpop.permute.xlu1 %1163 }
 0x41a   : > { %v6041_v44 = vpop.eup %6040 }
 0x41b   : > { %v912_v45 = vsel %vm905_vm6, %v6041_v44, 0.0 }
 0x41c   : > { %913 = vadd.xlane.f32.xlu0 %v912_v45 }
 0x432   : > { %995 = vrot.lane.b32.xlu0 %v6309_v27, %s7132_s5  ;;  %s7183_s5 = sld [smem:[#allocation16_spill]] }
 0x4a9   : > { %v914_v47 = vpop.xlane.xlu0 %913 }
 0x4aa   : > { %6042 = vrcp.f32 %v914_v47 }
 0x4ad   : > { %v996_v50 = vpop.permute.xlu0 %995 }
 0x4b4   : > { %v6043_v48 = vpop.eup %6042 }
 0x4b5   : > { %v916_v49 = vmul.f32 %v6043_v48, %v6041_v44 }
 0x4b7   : > { %5644 = vmatmul.mubr.msk.f32.vlgmr.msra.gmra.mrb[0].mxu1 %vm917_vm7, %v916_v49 }
 0x4b8   : > { %5647 = vmatpush3.xpose.msk.msra.mxu1 %vm823_vm4, %v998_v46  ;;  %5648 = vmatprep.mubr.msk.f32.mxu1 %vm6130_vm2, %v6129_v26 }
 0x4b9   : > { %5651 = vmatprep.subr.mxu1 %v6129_v26 }
 0x4bb   : > { %5649 = vmatmul.mubr.msk.f32.vlgmr.msra.gmra.mrb[2].mxu1 %vm823_vm4, %v996_v50 }
 0x4bc   : > { %5652 = vmatpush3.msk.msra.mxu1 %vm921_vm3, %v1087_v51  ;;  %5653 = vmatprep.mubr.msk.f32.mxu1 %vm6130_vm2, %v6129_v26 }
 0x4bd   : > { %5656 = vmatprep.subr.mxu1 %v6129_v26 }
 0x58a   : > { %v6355_v52 = vpop.f32.mrb[0].mxu1 }
 0x58b   : > { %v5645_v53 = vpop.f32.mrb[1].mxu1 }
 0x58e   : > { %v1069_v54 = vpop.f32.mrb[2].mxu1 }
 0x58f   : > { %v1073_v55 = vmul.f32 0.25, %v1069_v54  ;;  %v5650_v56 = vpop.f32.mrb[3].mxu1 }
 0x591   : > { %v1074_v57 = vsel %vm6329_vm5, %v1073_v55, -1e+30 }
 0x592   : > { %v1075_v58 = vsel %vm905_vm6, %v1074_v57, -inf }
 0x593   : > { %1076 = vmax.xlane.f32.xlu0 %v1075_v58 }
 0x5a9   : > { %1333 = vrot.lane.b32.xlu0 %v6309_v27, %s7126_s1 }
 0x620   : > { %v1077_v59 = vpop.xlane.xlu0 %1076 }
 0x621   : > { %v1078_v60 = vsub.f32 %v1074_v57, %v1077_v59 }
 0x623   : > { %v1079_v61 = vmul.f32 1.442695, %v1078_v60 }
 0x624   : > { %v1334_v6 = vpop.permute.xlu0 %1333 }
 0x625   : > { %6044 = vpow2.f32 %v1079_v61 }
 0x62f   : > { %v6045_v62 = vpop.eup %6044 }
 0x630   : > { %v1081_v63 = vsel %vm905_vm6, %v6045_v62, 0.0 }
 0x631   : > { %1082 = vadd.xlane.f32.xlu1 %v1081_v63 }
 0x642   : > { %1331 = vrot.lane.b32.xlu1 %v6309_v27, %s7128_s24 }
 0x6be   : > { %v1083_v3 = vpop.xlane.xlu1 %1082 }
 0x6bf   : > { %6046 = vrcp.f32 %v1083_v3 }
 0x6c2   : > { %v1332_v7 = vpop.permute.xlu1 %1331 }
 0x6c9   : > { %v6047_v4 = vpop.eup %6046 }
 0x6ca   : > { %v1085_v5 = vmul.f32 %v6047_v4, %v6045_v62 }
 0x6cc   : > { %5654 = vmatmul.mubr.msk.f32.vlgmr.msra.gmra.mrb[4].mxu1 %vm917_vm7, %v1085_v5  ;;  %v5939_v5 = vld [vmem:[%s7109_s9 + $0x8] sm:$0xff]  }
 0x6cd   : > { %5657 = vmatpush3.xpose.msk.msra.mxu1 %vm823_vm4, %v1166_v1  ;;  %5658 = vmatprep.mubr.msk.f32.mxu1 %vm6130_vm2, %v6129_v26 }
 0x6ce   : > { %5666 = vmatprep.subr.mxu1 %v6129_v26 }
 0x6d0   : > { %5659 = vmatmul.mubr.msk.f32.vlgmr.msra.gmra.mrb[6].mxu1 %vm823_vm4, %v1164_v2 }
 0x6d1   : > { %5667 = vmatpush3.xpose.msk.msra.mxu1 %vm823_vm4, %v1334_v6  ;;  %5668 = vmatprep.mubr.msk.f32.mxu1 %vm6130_vm2, %v6129_v26  ;;  %v5940_v6 = vld [vmem:[%s7108_s8] sm:$0xff]  }
 0x6d2   : > { %5676 = vmatprep.subr.bf16.mxu1 %v6129_v26 }
 0x6d4   : > { %5669 = vmatmul.mubr.msk.f32.vlgmr.msra.gmra.mrb[8].mxu1 %vm823_vm4, %v1332_v7  ;;  %v5941_v7 = vld [vmem:[%s7109_s9 + $0x10] sm:$0xff]  }
 0x6d5   : > { %5684 = vmatprep.mubr.msk.bf16.mxu1 %vm6130_vm2, %v6129_v26 }
 0x79f   : > { %v1159_v8 = vpop.f32.mrb[4].mxu1 }
 0x7a0   : > { %v5655_v9 = vpop.f32.mrb[5].mxu1 }
 0x7a1   : > { %v5942_v9 = vld [vmem:[%s7108_s8 + $0x8] sm:$0xff]  }
 0x7a3   : > { %v1237_v10 = vpop.f32.mrb[6].mxu1 }
 0x7a4   : > { %v1241_v12 = vmul.f32 0.25, %v1237_v10  ;;  %v5660_v13 = vpop.f32.mrb[7].mxu1  ;;  %v5943_v10 = vld [vmem:[%s7109_s9 + $0x18] sm:$0xff]  }
 0x7a5   : > { %v5944_v13 = vld [vmem:[%s7108_s8 + $0x10] sm:$0xff]  }
 0x7a6   : > { %v1242_v14 = vsel %vm6329_vm5, %v1241_v12, -1e+30 }
 0x7a7   : > { %v1405_v15 = vpop.f32.mrb[8].mxu1  ;;  %v1243_v16 = vsel %vm905_vm6, %v1242_v14, -inf }
 0x7a8   : > { %v1409_v17 = vmul.f32 0.25, %v1405_v15  ;;  %1244 = vmax.xlane.f32.xlu1 %v1243_v16  ;;  %v5670_v18 = vpop.f32.mrb[9].mxu1 }
 0x7aa   : > { %v1410_v19 = vsel %vm6329_vm5, %v1409_v17, -1e+30 }
 0x7ab   : > { %v1411_v20 = vsel %vm905_vm6, %v1410_v19, -inf }
 0x7ac   : > { %1412 = vmax.xlane.f32.xlu0 %v1411_v20 }
 0x7c2   : > { %1422 = vrot.lane.b32.xlu0 %v6315_v28, %s7128_s24 }
 0x835   : > { %v1245_v21 = vpop.xlane.xlu1 %1244 }
 0x836   : > { %v1246_v22 = vsub.f32 %v1242_v14, %v1245_v21  ;;  %v5945_v14 = vld [vmem:[%s7108_s8 + $0x18] sm:$0xff]   ;;  %v5233_v21 = vld [vmem:[%s7107_s7] ss:$0 sm:$0xff] }
 0x838   : > { %v1247_v23 = vmul.f32 1.442695, %v1246_v22 }
 0x839   : > { %v1413_v24 = vpop.xlane.xlu0 %1412 }
 0x83a   : > { %6048 = vpow2.f32 %v1247_v23  ;;  %v1414_v25 = vsub.f32 %v1410_v19, %v1413_v24  ;;  %v5232_v19 = vld [vmem:[%s7106_s6] ss:$0 sm:$0xff] }
 0x83c   : > { %v1415_v27 = vmul.f32 1.442695, %v1414_v25 }
 0x83d   : > { %v1423_v40 = vpop.permute.xlu0 %1422 }
 0x83e   : > { %6050 = vpow2.f32 %v1415_v27 }
 0x844   : > { %v6049_v29 = vpop.eup %6048 }
 0x845   : > { %v1249_v30 = vsel %vm905_vm6, %v6049_v29, 0.0 }
 0x846   : > { %1250 = vadd.xlane.f32.xlu1 %v1249_v30 }
 0x848   : > { %v6051_v31 = vpop.eup %6050 }
 0x849   : > { %v1417_v32 = vsel %vm905_vm6, %v6051_v31, 0.0 }
 0x84a   : > { %1418 = vadd.xlane.f32.xlu1 %v1417_v32 }
 0x85b   : > { %1254 = vrot.lane.b32.xlu1 %v6315_v28, %s7130_s23  ;;  %s7167_s23 = smov 48  }
 0x85f   : > { %1500 = vrot.lane.b32.xlu1 %v1159_v8, %s7126_s1  ;;  %s7166_s1 = sld [smem:[#allocation10_spill]]  ;;  %v686_v8 = vld [vmem:[%s676_s25] sm:$0xf]  ;;  %s7173_s25 = smov 32  }
 0x860   : > { %v6459_v12 = vpack.c.bf16 %v686_v8, %v686_v8 }
 0x865   : > { %v5934_v42 = vld [vmem:[%s7166_s1] sm:$0xff]   ;;  %v5935_v43 = vld [vmem:[%s7166_s1 + $0x8] sm:$0xff]   ;;  %v5936_v44 = vld [vmem:[%s7166_s1 + $0x10] sm:$0xff]  }
 0x866   : > { %5677 = vmatpush3.bf16.msra.mxu1 %v5934_v42  ;;  %v5937_v45 = vld [vmem:[%s7166_s1 + $0x18] sm:$0xff]  }
 0x867   : > { %5678 = vmatprep.subr.bf16.mxu1 %v6129_v26 }
 0x86a   : > { %5679 = vmatpush3.bf16.msra.mxu1 %v5935_v43 }
 0x86b   : > { %5680 = vmatprep.subr.bf16.mxu1 %v6129_v26 }
 0x86e   : > { %5681 = vmatpush3.bf16.msra.mxu1 %v5936_v44 }
 0x86f   : > { %5682 = vmatprep.subr.bf16.mxu1 %v6129_v26 }
 0x872   : > { %5683 = vmatpush3.bf16.msra.mxu1 %v5937_v45 }
 0x873   : > { %5700 = vmatprep.subr.bf16.mxu1 %v6129_v26 }
 0x8d3   : > { %v1251_v34 = vpop.xlane.xlu1 %1250 }
 0x8d4   : > { %6052 = vrcp.f32 %v1251_v34 }
 0x8d7   : > { %v1419_v35 = vpop.xlane.xlu1 %1418 }
 0x8d8   : > { %6054 = vrcp.f32 %v1419_v35 }
 0x8db   : > { %v1255_v37 = vpop.permute.xlu1 %1254 }
 0x8dc   : > { %5662 = vmatpush3.msk.msra.mxu0 %vm921_vm3, %v1255_v37 }
 0x8dd   : > { %5671 = vmatprep.subr.mxu0 %v6129_v26 }
 0x8de   : > { %v6053_v38 = vpop.eup %6052 }
 0x8df   : > { %v1253_v39 = vmul.f32 %v6053_v38, %v6049_v29  ;;  %v1501_v50 = vpop.permute.xlu1 %1500 }
 0x8e0   : > { %v1511_v53 = vsel %vm823_vm4, %v6355_v52, %v1501_v50 }
 0x8e1   : > { %5664 = vmatmul.mubr.msk.f32.vlgmr.msra.gmra.mrb[6].mxu0 %vm917_vm7, %v1253_v39 }
 0x8e2   : > { %v6055_v41 = vpop.eup %6054  ;;  %5672 = vmatpush3.msk.msra.mxu0 %vm921_vm3, %v1423_v40  ;;  %5673 = vmatprep.mubr.msk.f32.mxu0 %vm6130_vm2, %v6129_v26 }
 0x8e3   : > { %v1421_v28 = vmul.f32 %v6055_v41, %v6051_v31  ;;  %5688 = vmatprep.subr.bf16.mxu0 %v6129_v26 }
 0x8e5   : > { %5674 = vmatmul.mubr.msk.f32.vlgmr.msra.gmra.mrb[8].mxu0 %vm917_vm7, %v1421_v28 }
 0x8e6   : > { %5696 = vmatprep.mubr.msk.bf16.mxu0 %vm6130_vm2, %v6129_v26  ;;  %5689 = vmatpush3.bf16.msra.mxu0 %v5940_v6 }
 0x8e7   : > { %5690 = vmatprep.subr.bf16.mxu0 %v6129_v26 }
 0x8ea   : > { %5691 = vmatpush3.bf16.msra.mxu0 %v5942_v9 }
 0x8eb   : > { %5692 = vmatprep.subr.bf16.mxu0 %v6129_v26 }
 0x8ee   : > { %5693 = vmatpush3.bf16.msra.mxu0 %v5944_v13 }
 0x8ef   : > { %5694 = vmatprep.subr.bf16.mxu0 %v6129_v26 }
 0x8f2   : > { %5695 = vmatpush3.bf16.msra.mxu0 %v5945_v14 }
 0x8f3   : > { %5712 = vmatprep.subr.mxu0 %v6129_v26 }
 0x9b4   : > { %v1327_v46 = vpop.f32.mrb[6].mxu0 }
 0x9b5   : > { %1504 = vrot.lane.b32.xlu1 %v1327_v46, %s7138_s22  ;;  %v5665_v47 = vpop.f32.mrb[7].mxu0  ;;  %s7171_s22 = smov 96  }
 0x9b8   : > { %v1495_v48 = vpop.f32.mrb[8].mxu0 }
 0x9b9   : > { %1508 = vrot.lane.b32.xlu1 %v1495_v48, %s7167_s23  ;;  %v5675_v49 = vpop.f32.mrb[9].mxu0 }
 0xa27   : > { %v1505_v51 = vpop.permute.xlu1 %1504 }
 0xa28   : > { %v1513_v54 = vsel %vm1512_vm8, %v1511_v53, %v1505_v51 }
 0xa2b   : > { %v1509_v55 = vpop.permute.xlu1 %1508 }
 0xa2c   : > { %v1515_v56 = vsel %vm1514_vm9, %v1513_v54, %v1509_v55 }
 0xa2d   : > { %v1516_v57 = vpack.c.bf16 %v1515_v56, %v1515_v56 }
 0xa2f   : > { %5685 = vmatmul.mubr.msk.bf16.vlgmr.msra.gmra.mrb[12].mxu1 %vm767_vm1, %v1516_v57 }
 0xa30   : > { %5708 = vmatprep.mubr.msk.bf16.mxu1 %vm6130_vm2, %v6129_v26 }
 0xb02   : > { %v1578_v58 = vpop.f32.mrb[12].mxu1 }
 0xb03   : > { %v6427_v59 = vadd.f32 %v1578_v58, %v6265_v0  ;;  %v5686_v60 = vpop.f32.mrb[13].mxu1  ;;  %v5938_v0 = vld [vmem:[%s7109_s9] sm:$0xff]  }
 0xb04   : > { %v1581_v61 = vpop.f32.mrb[14].mxu1  ;;  %5701 = vmatpush3.bf16.msra.mxu1 %v5938_v0 }
 0xb05   : > { %v5687_v62 = vpop.f32.mrb[15].mxu1  ;;  %v1587_v52 = vsel %vm689_vm0, %v6427_v59, 0.0  ;;  %5702 = vmatprep.subr.bf16.mxu1 %v6129_v26 }
 0xb06   : > { %1588 = vadd.xlane.f32.xlu0 %v1587_v52 }
 0xb08   : > { %5703 = vmatpush3.bf16.msra.mxu1 %v5939_v5 }
 0xb09   : > { %5704 = vmatprep.subr.bf16.mxu1 %v6129_v26 }
 0xb0c   : > { %5705 = vmatpush3.bf16.msra.mxu1 %v5941_v7 }
 0xb0d   : > { %5706 = vmatprep.subr.bf16.mxu1 %v6129_v26 }
 0xb10   : > { %5707 = vmatpush3.bf16.msra.mxu1 %v5943_v10 }
 0xb11   : > { %5732 = vmatprep.subr.mxu1 %v6129_v26 }
 0xb13   : > { %5709 = vmatmul.mubr.msk.bf16.vlgmr.msra.gmra.mrb[16].mxu1 %vm767_vm1, %v6459_v12 }
 0xb14   : > { %5734 = vmatprep.mubr.msk.f32.mxu1 %vm6130_vm2, %v6129_v26 }
 0xb93   : > { %v1589_v63 = vpop.xlane.xlu0 %1588 }
 0xb94   : > { %v1590_v1 = vmul.f32 0.015625, %v1589_v63 }
 0xb96   : > { %v1591_v2 = vsub.f32 %v6427_v59, %v1590_v1 }
 0xb98   : > { %v1592_v3 = vmul.f32 %v1591_v2, %v1591_v2 }
 0xb9a   : > { %v1593_v4 = vsel %vm689_vm0, %v1592_v3, 0.0 }
 0xb9b   : > { %1594 = vadd.xlane.f32.xlu1 %v1593_v4 }
 0xbe6   : > { %v6484_v25 = vpop.f32.mrb[16].mxu1 }
 0xbe7   : > { %v5710_v27 = vpop.f32.mrb[17].mxu1  ;;  %1862 = vrot.lane.b32.xlu1 %v6484_v25, %s7169_s2 }
 0xbe8   : > { %v1763_v29 = vpop.f32.mrb[18].mxu1 }
 0xbe9   : > { %v5711_v30 = vpop.f32.mrb[19].mxu1 }
 0xc28   : > { %v1595_v15 = vpop.xlane.xlu1 %1594 }
 0xc29   : > { %v1596_v16 = vmul.f32 0.015625, %v1595_v15 }
 0xc2b   : > { %v1597_v17 = vadd.f32 1e-05, %v1596_v16 }
 0xc2d   : > { %6056 = vrsqrt.f32 %v1597_v17 }
 0xc37   : > { %v6057_v18 = vpop.eup %6056 }
 0xc38   : > { %v1599_v20 = vmul.f32 %v6057_v18, %v1591_v2 }
 0xc3a   : > { %v1606_v22 = vmul.f32 %v5232_v19, %v1599_v20 }
 0xc3c   : > { %v1613_v23 = vadd.f32 %v5233_v21, %v1606_v22 }
 0xc3e   : > { %v1622_v24 = vpack.c.bf16 %v1613_v23, %v1613_v23 }
 0xc40   : > { %5697 = vmatmul.mubr.msk.bf16.vlgmr.msra.gmra.mrb[12].mxu0 %vm767_vm1, %v1622_v24 }
 0xc41   : > { %5714 = vmatprep.mubr.msk.f32.mxu0 %vm6130_vm2, %v6129_v26  ;;  %5713 = vmatpush3.xpose.msk.msra.mxu0 %vm823_vm4, %v6484_v25 }
 0xc42   : > { %5717 = vmatprep.subr.mxu0 %v6129_v26 }
 0xc59   : > { %v1863_v31 = vpop.permute.xlu1 %1862 }
 0xd13   : > { %v1684_v32 = vpop.f32.mrb[12].mxu0 }
 0xd14   : > { %1939 = vrot.lane.b32.xlu1 %v1684_v32, %s7170_s21  ;;  %v5698_v34 = vpop.f32.mrb[13].mxu0  ;;  %5715 = vmatmul.mubr.msk.f32.vlgmr.msra.gmra.mrb[10].mxu0 %vm823_vm4, %v1684_v32 }
 0xd15   : > { %v1687_v35 = vpop.f32.mrb[14].mxu0  ;;  %5718 = vmatpush3.msk.msra.mxu0 %vm921_vm3, %v1863_v31  ;;  %5719 = vmatprep.mubr.msk.f32.mxu0 %vm6130_vm2, %v6129_v26 }
 0xd16   : > { %v5699_v37 = vpop.f32.mrb[15].mxu0  ;;  %5722 = vmatprep.subr.mxu0 %v6129_v26 }
 0xd18   : > { %2108 = vrot.lane.b32.xlu1 %v6484_v25, %s7171_s22 }
 0xd1c   : > { %2275 = vrot.lane.b32.xlu1 %v6484_v25, %s7172_s28 }
 0xd86   : > { %v1940_v38 = vpop.permute.xlu1 %1939 }
 0xd8a   : > { %v2109_v39 = vpop.permute.xlu1 %2108 }
 0xd8b   : > { %5733 = vmatpush3.xpose.msk.msra.mxu1 %vm823_vm4, %v2109_v39  ;;  %v5946_v39 = vld [vmem:[%s7175_s10] sm:$0xff]  }
 0xd8c   : > { %5742 = vmatprep.subr.mxu1 %v6129_v26 }
 0xd8e   : > { %v2276_v51 = vpop.permute.xlu1 %2275 }
 0xde7   : > { %v1846_v40 = vpop.f32.mrb[10].mxu0 }
 0xde8   : > { %v1850_v41 = vmul.f32 0.25, %v1846_v40  ;;  %v5716_v28 = vpop.f32.mrb[11].mxu0  ;;  %v5947_v40 = vld [vmem:[%s7175_s10 + $0x8] sm:$0xff]  }
 0xde9   : > { %v5949_v28 = vld [vmem:[%s7175_s10 + $0x18] sm:$0xff]  }
 0xdea   : > { %v1851_v42 = vsel %vm905_vm6, %v1850_v41, -inf }
 0xdeb   : > { %1852 = vmax.xlane.f32.xlu0 %v1851_v42 }
 0xe78   : > { %v1853_v43 = vpop.xlane.xlu0 %1852 }
 0xe79   : > { %v1854_v44 = vsub.f32 %v1850_v41, %v1853_v43  ;;  %v5948_v41 = vld [vmem:[%s7175_s10 + $0x10] sm:$0xff]   ;;  %s7178_s10 = sld [smem:[#allocation12_spill]] }
 0xe7b   : > { %v1855_v45 = vmul.f32 1.442695, %v1854_v44 }
 0xe7d   : > { %6058 = vpow2.f32 %v1855_v45 }
 0xe87   : > { %v6059_v46 = vpop.eup %6058 }
 0xe88   : > { %v1857_v47 = vsel %vm905_vm6, %v6059_v46, 0.0 }
 0xe89   : > { %1858 = vadd.xlane.f32.xlu0 %v1857_v47 }
 0xe9f   : > { %1941 = vrot.lane.b32.xlu0 %v6484_v25, %s7170_s21 }
 0xea3   : > { %2106 = vrot.lane.b32.xlu0 %v1684_v32, %s7171_s22 }
 0xea7   : > { %2273 = vrot.lane.b32.xlu0 %v1684_v32, %s7172_s28 }
 0xf16   : > { %v1859_v48 = vpop.xlane.xlu0 %1858 }
 0xf17   : > { %6060 = vrcp.f32 %v1859_v48 }
 0xf1a   : > { %v1942_v49 = vpop.permute.xlu0 %1941 }
 0xf1e   : > { %v2107_v50 = vpop.permute.xlu0 %2106 }
 0xf1f   : > { %5735 = vmatmul.mubr.msk.f32.vlgmr.msra.gmra.mrb[10].mxu1 %vm823_vm4, %v2107_v50 }
 0xf20   : > { %5743 = vmatpush3.xpose.msk.msra.mxu1 %vm823_vm4, %v2276_v51  ;;  %5744 = vmatprep.mubr.msk.f32.mxu1 %vm6130_vm2, %v6129_v26 }
 0xf21   : > { %v6061_v53 = vpop.eup %6060  ;;  %5752 = vmatprep.subr.bf16.mxu1 %v6129_v26 }
 0xf22   : > { %v1861_v54 = vmul.f32 %v6061_v53, %v6059_v46  ;;  %v2274_v55 = vpop.permute.xlu0 %2273 }
 0xf23   : > { %5745 = vmatmul.mubr.msk.f32.vlgmr.msra.gmra.mrb[20].mxu1 %vm823_vm4, %v2274_v55 }
 0xf24   : > { %5720 = vmatmul.mubr.msk.f32.vlgmr.msra.gmra.mrb[16].mxu0 %vm917_vm7, %v1861_v54  ;;  %5760 = vmatprep.mubr.msk.bf16.mxu1 %vm6130_vm2, %v6129_v26 }
 0xf25   : > { %5723 = vmatpush3.xpose.msk.msra.mxu0 %vm823_vm4, %v1942_v49  ;;  %5724 = vmatprep.mubr.msk.f32.mxu0 %vm6130_vm2, %v6129_v26 }
 0xf26   : > { %5727 = vmatprep.subr.mxu0 %v6129_v26  ;;  %5753 = vmatpush3.bf16.msra.mxu1 %v5946_v39  ;;  %v5975_v39 = vld [vmem:[%s7115_s15 + $0x30] sm:$0xff]  }
 0xf27   : > { %5754 = vmatprep.subr.bf16.mxu1 %v6129_v26 }
 0xf28   : > { %5725 = vmatmul.mubr.msk.f32.vlgmr.msra.gmra.mrb[18].mxu0 %vm823_vm4, %v1940_v38 }
 0xf29   : > { %5729 = vmatprep.mubr.msk.f32.mxu0 %vm6130_vm2, %v6129_v26 }
 0xf2a   : > { %5755 = vmatpush3.bf16.msra.mxu1 %v5947_v40  ;;  %v5976_v40 = vld [vmem:[%s7115_s15 + $0x78] sm:$0xff]  }
 0xf2b   : > { %5756 = vmatprep.subr.bf16.mxu1 %v6129_v26 }
 0xf2e   : > { %5757 = vmatpush3.bf16.msra.mxu1 %v5948_v41  ;;  %v5977_v41 = vld [vmem:[%s7115_s15 + $0x38] sm:$0xff]  }
 0xf2f   : > { %5758 = vmatprep.subr.bf16.mxu1 %v6129_v26 }
 0xf32   : > { %5759 = vmatpush3.bf16.msra.mxu1 %v5949_v28  ;;  %v2566_v28 = vsub.s32 0, %v6326_v33 }
 0xff2   : > { %v2180_v56 = vpop.f32.mrb[10].mxu1 }
 0xff3   : > { %v2184_v57 = vmul.f32 0.25, %v2180_v56  ;;  %v5736_v58 = vpop.f32.mrb[11].mxu1 }
 0xff5   : > { %v2185_v60 = vsel %vm905_vm6, %v2184_v57, -inf }
 0xff6   : > { %2186 = vmax.xlane.f32.xlu0 %v2185_v60  ;;  %v2347_v61 = vpop.f32.mrb[20].mxu1 }
 0xff7   : > { %v2351_v62 = vmul.f32 0.25, %v2347_v61  ;;  %v6526_v52 = vpop.f32.mrb[16].mxu0  ;;  %v5746_v63 = vpop.f32.mrb[21].mxu1 }
 0xff8   : > { %v5721_v1 = vpop.f32.mrb[17].mxu0 }
 0xff9   : > { %v2352_v2 = vsel %vm905_vm6, %v2351_v62, -inf }
 0xffa   : > { %2353 = vmax.xlane.f32.xlu0 %v2352_v2 }
 0xffb   : > { %v2013_v3 = vpop.f32.mrb[18].mxu0 }
 0xffc   : > { %v2017_v4 = vmul.f32 0.25, %v2013_v3  ;;  %v5726_v0 = vpop.f32.mrb[19].mxu0 }
 0xffd   : > { %v5955_v0 = vld [vmem:[%s7113_s13 + $0x14] ss:$8 sps:$4 sm:$0xff]  }
 0xffe   : > { %v2018_v5 = vsel %vm905_vm6, %v2017_v4, -inf }
 0xfff   : > { %2019 = vmax.xlane.f32.xlu1 %v2018_v5  ;;  %v5953_v5 = vld [vmem:[%s7113_s13 + $0x10] ss:$8 sps:$4 sm:$0xff]  }
0x1083   : > { %v2187_v6 = vpop.xlane.xlu0 %2186 }
0x1084   : > { %v2188_v7 = vsub.f32 %v2184_v57, %v2187_v6  ;;  %v5958_v6 = vld [vmem:[%s7113_s13 + $0x24] ss:$8 sps:$4 sm:$0xff]  }
0x1086   : > { %v2189_v8 = vmul.f32 1.442695, %v2188_v7  ;;  %v5956_v7 = vld [vmem:[%s7113_s13 + $0x20] ss:$8 sps:$4 sm:$0xff]  }
0x1087   : > { %v2354_v9 = vpop.xlane.xlu0 %2353 }
0x1088   : > { %6062 = vpow2.f32 %v2189_v8  ;;  %v2355_v10 = vsub.f32 %v2351_v62, %v2354_v9  ;;  %v5961_v8 = vld [vmem:[%s7113_s13 + $0x34] ss:$8 sps:$4 sm:$0xff]   ;;  %v5959_v9 = vld [vmem:[%s7113_s13 + $0x30] ss:$8 sps:$4 sm:$0xff]  }
0x108a   : > { %v2356_v13 = vmul.f32 1.442695, %v2355_v10  ;;  %v5962_v10 = vld [vmem:[%s7115_s15 + $0x40] sm:$0xff]  }
0x108b   : > { %5535 = vmatprep.subr.bf16.mxu1 %v5962_v10  ;;  %v5986_v10 = vld [vmem:[%s7161_s30 + $0x64] ss:$8 sps:$4 sm:$0xff]  }
0x108c   : > { %6064 = vpow2.f32 %v2356_v13  ;;  %v2020_v18 = vpop.xlane.xlu1 %2019  ;;  %v5963_v13 = vld [vmem:[%s7115_s15] sm:$0xff]  }
0x108d   : > { %v2021_v19 = vsub.f32 %v2017_v4, %v2020_v18  ;;  %v5950_v4 = vld [vmem:[%s7113_s13] ss:$8 sps:$4 sm:$0xff]   ;;  %v5968_v18 = vld [vmem:[%s7115_s15 + $0x58] sm:$0xff]  }
0x108f   : > { %v2022_v20 = vmul.f32 1.442695, %v2021_v19  ;;  %v5969_v19 = vld [vmem:[%s7115_s15 + $0x18] sm:$0xff]  }
0x1091   : > { %6066 = vpow2.f32 %v2022_v20  ;;  %v5970_v20 = vld [vmem:[%s7115_s15 + $0x60] sm:$0xff]  }
0x1092   : > { %v6063_v14 = vpop.eup %6062 }
0x1093   : > { %v2191_v15 = vsel %vm905_vm6, %v6063_v14, 0.0 }
0x1094   : > { %2192 = vadd.xlane.f32.xlu0 %v2191_v15  ;;  %v5965_v15 = vld [vmem:[%s7115_s15 + $0x8] sm:$0xff]  }
0x1096   : > { %v6065_v16 = vpop.eup %6064 }
0x1097   : > { %v2358_v17 = vsel %vm905_vm6, %v6065_v16, 0.0 }
0x1098   : > { %2359 = vadd.xlane.f32.xlu1 %v2358_v17  ;;  %v5967_v17 = vld [vmem:[%s7115_s15 + $0x10] sm:$0xff]  }
0x109b   : > { %v6067_v21 = vpop.eup %6066 }
0x109c   : > { %v2024_v22 = vsel %vm905_vm6, %v6067_v21, 0.0 }
0x10a9   : > { %2196 = vrot.lane.b32.xlu1 %v6484_v25, %s7173_s25 }
0x10aa   : > { %2029 = vrot.lane.b32.xlu0 %v6484_v25, %s7167_s23 }
0x10cd   : > { %2025 = vadd.xlane.f32.xlu1 %v2024_v22  ;;  %v5972_v22 = vld [vmem:[%s7115_s15 + $0x68] sm:$0xff]  }
0x10de   : > { %2363 = vrot.lane.b32.xlu1 %v6484_v25, %s7174_s3 }
0x1121   : > { %v2193_v23 = vpop.xlane.xlu0 %2192 }
0x1125   : > { %v2030_v24 = vpop.permute.xlu0 %2029  ;;  %v2360_v27 = vpop.xlane.xlu1 %2359 }
0x1126   : > { %5728 = vmatpush3.msk.msra.mxu0 %vm921_vm3, %v2030_v24 }
0x1127   : > { %5737 = vmatprep.subr.mxu0 %v6129_v26 }
0x1129   : > { %v2197_v29 = vpop.permute.xlu1 %2196 }
0x115a   : > { %v2026_v30 = vpop.xlane.xlu1 %2025 }
0x115b   : > { %6068 = vrcp.f32 %v2026_v30 }
0x115c   : > { %6070 = vrcp.f32 %v2193_v23  ;;  %v5973_v23 = vld [vmem:[%s7115_s15 + $0x28] sm:$0xff]  }
0x115d   : > { %6072 = vrcp.f32 %v2360_v27 }
0x115e   : > { %v2364_v37 = vpop.permute.xlu1 %2363 }
0x1165   : > { %v6069_v31 = vpop.eup %6068 }
0x1166   : > { %v2028_v32 = vmul.f32 %v6069_v31, %v6067_v21  ;;  %v6071_v34 = vpop.eup %6070  ;;  %v5971_v21 = vld [vmem:[%s7115_s15 + $0x20] sm:$0xff]  }
0x1167   : > { %v2195_v25 = vmul.f32 %v6071_v34, %v6063_v14  ;;  %v6073_v35 = vpop.eup %6072  ;;  %v5964_v14 = vld [vmem:[%s7115_s15 + $0x48] sm:$0xff]   ;;  %v5265_v31 = vld [vmem:[%s7111_s11] ss:$0 sm:$0xff] }
0x1168   : > { %5730 = vmatmul.mubr.msk.f32.vlgmr.msra.gmra.mrb[20].mxu0 %vm917_vm7, %v2028_v32  ;;  %v2362_v38 = vmul.f32 %v6073_v35, %v6065_v16  ;;  %v5966_v16 = vld [vmem:[%s7115_s15 + $0x50] sm:$0xff]   ;;  %v5266_v34 = vld [vmem:[%s7112_s12] ss:$0 sm:$0xff] }
0x1169   : > { %5738 = vmatpush3.msk.msra.mxu0 %vm921_vm3, %v2197_v29  ;;  %5739 = vmatprep.mubr.msk.f32.mxu0 %vm6130_vm2, %v6129_v26 }
0x116a   : > { %5747 = vmatprep.subr.mxu0 %v6129_v26 }
0x116c   : > { %5740 = vmatmul.mubr.msk.f32.vlgmr.msra.gmra.mrb[22].mxu0 %vm917_vm7, %v2195_v25 }
0x116d   : > { %5748 = vmatpush3.msk.msra.mxu0 %vm921_vm3, %v2364_v37  ;;  %5749 = vmatprep.mubr.msk.f32.mxu0 %vm6130_vm2, %v6129_v26 }
0x1170   : > { %5750 = vmatmul.mubr.msk.f32.vlgmr.msra.gmra.mrb[24].mxu0 %vm917_vm7, %v2362_v38  ;;  %v5974_v38 = vld [vmem:[%s7115_s15 + $0x70] sm:$0xff]  }
0x1171   : > { %2649 = vmatprep.mubr.bf16.mxu0 %v6128_v11 }
0x123b   : > { %v2102_v42 = vpop.f32.mrb[20].mxu0 }
0x123c   : > { %2441 = vrot.lane.b32.xlu0 %v2102_v42, %s7174_s3  ;;  %v5731_v43 = vpop.f32.mrb[21].mxu0  ;;  %v2562_v42 = vld [vmem:[%s7114_s14] sm:$0x3] }
0x123d   : > { %v2570_v43 = vsub.s32 1, %v6326_v33  ;;  %v5473_v33 = vld [vmem:[%s7116_s16 + $0x1] ss:$0 sm:$0xff] }
0x123f   : > { %v2269_v44 = vpop.f32.mrb[22].mxu0 }
0x1240   : > { %2445 = vrot.lane.b32.xlu1 %v2269_v44, %s7173_s25  ;;  %v5741_v45 = vpop.f32.mrb[23].mxu0  ;;  %v2567_v44 = vrot.slane %v2562_v42, %v2566_v28 }
0x1241   : > { %v2571_v45 = vrot.slane %v2562_v42, %v2570_v43 }
0x1243   : > { %v2436_v46 = vpop.f32.mrb[24].mxu0 }
0x1244   : > { %2449 = vrot.lane.b32.xlu0 %v2436_v46, %s7167_s23  ;;  %v5751_v47 = vpop.f32.mrb[25].mxu0 }
0x12ae   : > { %v2442_v48 = vpop.permute.xlu0 %2441 }
0x12af   : > { %v2452_v50 = vsel %vm823_vm4, %v6526_v52, %v2442_v48 }
0x12b2   : > { %v2446_v49 = vpop.permute.xlu1 %2445 }
0x12b3   : > { %v2453_v51 = vsel %vm1512_vm8, %v2452_v50, %v2446_v49 }
0x12b6   : > { %v2450_v53 = vpop.permute.xlu0 %2449 }
0x12b7   : > { %v2454_v54 = vsel %vm1514_vm9, %v2453_v51, %v2450_v53 }
0x12b8   : > { %v2455_v55 = vpack.c.bf16 %v2454_v54, %v2454_v54 }
0x12ba   : > { %5761 = vmatmul.mubr.msk.bf16.vlgmr.msra.gmra.mrb[24].mxu1 %vm767_vm1, %v2455_v55 }
0x12bb   : > { %5536 = vmatpush3.bf16.msra.mxu1 %v5963_v13  ;;  %v5984_v13 = vld [vmem:[%s7161_s30 + $0x60] ss:$8 sps:$4 sm:$0xff]  }
0x12bc   : > { %5537 = vmatprep.subr.bf16.mxu1 %v5964_v14  ;;  %v5989_v14 = vld [vmem:[%s7161_s30 + $0x74] ss:$8 sps:$4 sm:$0xff]  }
0x12bf   : > { %5538 = vmatpush3.bf16.msra.mxu1 %v5965_v15  ;;  %v5987_v15 = vld [vmem:[%s7161_s30 + $0x70] ss:$8 sps:$4 sm:$0xff]  }
0x12c0   : > { %5539 = vmatprep.subr.bf16.mxu1 %v5966_v16 }
0x12c3   : > { %5540 = vmatpush3.bf16.msra.mxu1 %v5967_v17 }
0x12c4   : > { %5541 = vmatprep.subr.bf16.mxu1 %v5968_v18 }
0x12c7   : > { %5542 = vmatpush3.bf16.msra.mxu1 %v5969_v19 }
0x12c8   : > { %5543 = vmatprep.subr.bf16.mxu1 %v5970_v20  ;;  %v5295_v20 = vld [vmem:[%s7162_s27 + $0x1] ss:$0 sm:$0xff] }
0x12cb   : > { %5544 = vmatpush3.bf16.msra.mxu1 %v5971_v21 }
0x12cc   : > { %5545 = vmatprep.subr.bf16.mxu1 %v5972_v22  ;;  %v5296_v22 = vld [vmem:[%s7163_s29 + $0x1] ss:$0 sm:$0xff] }
0x12cf   : > { %5546 = vmatpush3.bf16.msra.mxu1 %v5973_v23 }
0x12d0   : > { %5547 = vmatprep.subr.bf16.mxu1 %v5974_v38 }
0x12d3   : > { %5548 = vmatpush3.bf16.msra.mxu1 %v5975_v39 }
0x12d4   : > { %5549 = vmatprep.subr.bf16.mxu1 %v5976_v40 }
0x12d7   : > { %5550 = vmatpush3.bf16.msra.mxu1 %v5977_v41 }
0x12d8   : > { %5784 = vmatprep.subr.mxu1 %v6129_v26 }
0x138d   : > { %v2517_v56 = vpop.f32.mrb[24].mxu1 }
0x138e   : > { %v6576_v57 = vadd.f32 %v2517_v56, %v6427_v59  ;;  %v5762_v58 = vpop.f32.mrb[25].mxu1  ;;  %v5952_v59 = vld [vmem:[%s7113_s13 + $0x4] ss:$8 sps:$4 sm:$0xff]  }
0x138f   : > { %v2520_v60 = vpop.f32.mrb[26].mxu1  ;;  %2617 = vmatprep.subr.bf16.mxu0 %v5952_v59 }
0x1390   : > { %v5763_v61 = vpop.f32.mrb[27].mxu1  ;;  %v2526_v62 = vsel %vm689_vm0, %v6576_v57, 0.0  ;;  %2618 = vmatpush1.bf16.msra.mxu0 %v5950_v4 }
0x1391   : > { %2527 = vadd.xlane.f32.xlu1 %v2526_v62  ;;  %2619 = vmatprep.subr.bf16.mxu0 %v5955_v0 }
0x1394   : > { %2620 = vmatpush1.bf16.msra.mxu0 %v5953_v5 }
0x1395   : > { %2621 = vmatprep.subr.bf16.mxu0 %v5958_v6 }
0x1398   : > { %2622 = vmatpush1.bf16.msra.mxu0 %v5956_v7  ;;  %v5980_v7 = vld [vmem:[%s7161_s30 + $0x44] ss:$8 sps:$4 sm:$0xff]  }
0x1399   : > { %2623 = vmatprep.subr.bf16.mxu0 %v5961_v8  ;;  %v5983_v8 = vld [vmem:[%s7161_s30 + $0x54] ss:$8 sps:$4 sm:$0xff]  }
0x139c   : > { %2624 = vmatpush1.bf16.msra.mxu0 %v5959_v9  ;;  %v5981_v9 = vld [vmem:[%s7161_s30 + $0x50] ss:$8 sps:$4 sm:$0xff]  }
0x139d   : > { %2923 = vmatprep.subr.bf16.mxu0 %v5980_v7 }
0x141e   : > { %v2528_v52 = vpop.xlane.xlu1 %2527 }
0x141f   : > { %v2529_v63 = vmul.f32 0.015625, %v2528_v52  ;;  %v5292_v52 = vld [vmem:[%s7116_s16] ss:$0 sm:$0xff] }
0x1421   : > { %v2530_v1 = vsub.f32 %v6576_v57, %v2529_v63 }
0x1423   : > { %v2531_v2 = vmul.f32 %v2530_v1, %v2530_v1 }
0x1425   : > { %v2532_v3 = vsel %vm689_vm0, %v2531_v2, 0.0 }
0x1426   : > { %2533 = vadd.xlane.f32.xlu0 %v2532_v3 }
0x14b3   : > { %v2534_v24 = vpop.xlane.xlu0 %2533 }
0x14b4   : > { %v2535_v27 = vmul.f32 0.015625, %v2534_v24 }
0x14b6   : > { %v2536_v29 = vadd.f32 1e-05, %v2535_v27 }
0x14b8   : > { %6074 = vrsqrt.f32 %v2536_v29 }
0x14c2   : > { %v6075_v30 = vpop.eup %6074 }
0x14c3   : > { %v2538_v32 = vmul.f32 %v6075_v30, %v2530_v1 }
0x14c5   : > { %v2545_v25 = vmul.f32 %v5265_v31, %v2538_v32 }
0x14c7   : > { %v2552_v35 = vadd.f32 %v5266_v34, %v2545_v25 }
0x14c9   : > { %v2561_v37 = vpack.c.bf16 %v2552_v35, %v2552_v35 }
0x14cb   : > { %5275 = vmatmul.mubr.msk.bf16.vlgmr.msra.gmra.mrb[28].mxu0 %vm767_vm1, %v2561_v37 }
0x14cc   : > { %2955 = vmatprep.mubr.bf16.mxu0 %v6128_v11 }
0x159e   : > { %v2651_v46 = vpop.f32.mrb[28].mxu0 }
0x159f   : > { %v2652_v47 = vadd.f32 %v2651_v46, %v2567_v44  ;;  %v2653_v48 = vpop.f32.mrb[29].mxu0 }
0x15a0   : > { %v2654_v49 = vadd.f32 %v2653_v48, %v2571_v45  ;;  %v2655_v50 = vpop.f32.mrb[30].mxu0 }
0x15a1   : > { %v2658_v51 = vmax.f32 %v2652_v47, 0.0  ;;  %v2656_v53 = vpop.f32.mrb[31].mxu0 }
0x15a2   : > { %v2659_v54 = vmax.f32 %v2654_v49, 0.0 }
0x15a3   : > { %v2692_v56 = vpack.c.bf16 %v2658_v51, %v2658_v51 }
0x15a4   : > { %v2693_v55 = vpack.c.bf16 %v2659_v54, %v2659_v54 }
0x15a6   : > { %2822 = vmatprep.mubr.bf16.mxu1 %v2693_v55 }
0x15a7   : > { %2823 = vmatmul.mubr.bf16.vlgmr.msra.gmra.mrb[28].mxu1 %v2692_v56 }
0x15a8   : > { %5786 = vmatprep.mubr.msk.f32.mxu1 %vm6130_vm2, %v6129_v26 }
0x167a   : > { %v5551_v58 = vpop.f32.mrb[28].mxu1 }
0x167b   : > { %v5552_v60 = vpop.f32.mrb[29].mxu1 }
0x167c   : > { %v5553_v61 = vadd.f32 %v5552_v60, %v5551_v58  ;;  %v5554_v62 = vpop.f32.mrb[30].mxu1 }
0x167d   : > { %v5555_v63 = vpop.f32.mrb[31].mxu1 }
0x167e   : > { %v2830_v1 = vadd.f32 %v5553_v61, %v6576_v57  ;;  %v5978_v57 = vld [vmem:[%s7161_s30 + $0x40] ss:$8 sps:$4 sm:$0xff]  }
0x167f   : > { %2924 = vmatpush1.bf16.msra.mxu0 %v5978_v57 }
0x1680   : > { %v6678_v2 = vadd.f32 %v5292_v52, %v2830_v1  ;;  %2925 = vmatprep.subr.bf16.mxu0 %v5983_v8 }
0x1682   : > { %v2843_v3 = vsel %vm689_vm0, %v6678_v2, 0.0 }
0x1683   : > { %2844 = vadd.xlane.f32.xlu0 %v2843_v3  ;;  %2926 = vmatpush1.bf16.msra.mxu0 %v5981_v9 }
0x1684   : > { %2927 = vmatprep.subr.bf16.mxu0 %v5986_v10 }
0x1687   : > { %2928 = vmatpush1.bf16.msra.mxu0 %v5984_v13 }
0x1688   : > { %2929 = vmatprep.subr.bf16.mxu0 %v5989_v14 }
0x168b   : > { %2930 = vmatpush1.bf16.msra.mxu0 %v5987_v15 }
0x168c   : > { %5764 = vmatprep.subr.mxu0 %v6129_v26 }
0x1710   : > { %v2845_v59 = vpop.xlane.xlu0 %2844 }
0x1711   : > { %v2846_v4 = vmul.f32 0.015625, %v2845_v59 }
0x1713   : > { %v2847_v0 = vsub.f32 %v6678_v2, %v2846_v4 }
0x1715   : > { %v2848_v5 = vmul.f32 %v2847_v0, %v2847_v0 }
0x1717   : > { %v2849_v6 = vsel %vm689_vm0, %v2848_v5, 0.0 }
0x1718   : > { %2850 = vadd.xlane.f32.xlu1 %v2849_v6 }
0x17a5   : > { %v2851_v16 = vpop.xlane.xlu1 %2850 }
0x17a6   : > { %v2852_v17 = vmul.f32 0.015625, %v2851_v16 }
0x17a8   : > { %v2853_v18 = vadd.f32 1e-05, %v2852_v17 }
0x17aa   : > { %6076 = vrsqrt.f32 %v2853_v18 }
0x17b4   : > { %v6077_v19 = vpop.eup %6076 }
0x17b5   : > { %v2855_v21 = vmul.f32 %v6077_v19, %v2847_v0 }
0x17b7   : > { %v2862_v23 = vmul.f32 %v5295_v20, %v2855_v21 }
0x17b9   : > { %v2869_v24 = vadd.f32 %v5296_v22, %v2862_v23 }
0x17bb   : > { %v2879_v27 = vpack.c.bf16 %v2869_v24, %v2869_v24 }
0x17bd   : > { %5313 = vmatmul.mubr.msk.bf16.vlgmr.msra.gmra.mrb[32].mxu0 %vm767_vm1, %v2879_v27 }
0x17be   : > { %5766 = vmatprep.mubr.msk.f32.mxu0 %vm6130_vm2, %v6129_v26 }
0x1890   : > { %v2957_v29 = vpop.f32.mrb[32].mxu0 }
0x1891   : > { %2974 = vrot.lane.b32.xlu0 %v2957_v29, %s7169_s2  ;;  %v6719_v30 = vpop.f32.mrb[33].mxu0 }
0x1892   : > { %v2961_v31 = vpop.f32.mrb[34].mxu0 }
0x1893   : > { %v2962_v32 = vpop.f32.mrb[35].mxu0 }
0x1895   : > { %3139 = vrot.lane.b32.xlu0 %v2957_v29, %s7170_s21 }
0x1899   : > { %3309 = vrot.lane.b32.xlu0 %v2957_v29, %s7173_s25 }
0x189d   : > { %3477 = vrot.lane.b32.xlu0 %v2957_v29, %s7174_s3 }
0x1903   : > { %v2975_v34 = vpop.permute.xlu0 %2974 }
0x1904   : > { %5765 = vmatpush3.xpose.msk.msra.mxu0 %vm823_vm4, %v2975_v34 }
0x1905   : > { %5769 = vmatprep.subr.mxu0 %v6129_v26 }
0x1907   : > { %5767 = vmatmul.mubr.msk.f32.vlgmr.msra.gmra.mrb[26].mxu0 %vm823_vm4, %v2957_v29  ;;  %v3140_v25 = vpop.permute.xlu0 %3139 }
0x1908   : > { %5770 = vmatpush3.msk.msra.mxu0 %vm921_vm3, %v6719_v30  ;;  %5771 = vmatprep.mubr.msk.f32.mxu0 %vm6130_vm2, %v6129_v26 }
0x1909   : > { %5774 = vmatprep.subr.mxu0 %v6129_v26 }
0x190b   : > { %v3310_v35 = vpop.permute.xlu0 %3309 }
0x190c   : > { %5785 = vmatpush3.xpose.msk.msra.mxu1 %vm823_vm4, %v3310_v35 }
0x190d   : > { %5794 = vmatprep.subr.mxu1 %v6129_v26 }
0x190f   : > { %v3478_v51 = vpop.permute.xlu0 %3477 }
0x19da   : > { %v3046_v37 = vpop.f32.mrb[26].mxu0 }
0x19db   : > { %v3050_v38 = vmul.f32 0.25, %v3046_v37  ;;  %v5768_v39 = vpop.f32.mrb[27].mxu0 }
0x19dd   : > { %v3051_v40 = vsel %vm6329_vm5, %v3050_v38, -1e+30 }
0x19de   : > { %v3052_v41 = vsel %vm905_vm6, %v3051_v40, -inf }
0x19df   : > { %3053 = vmax.xlane.f32.xlu1 %v3052_v41  ;;  %v5990_v41 = vld [vmem:[%s7166_s1 + $0x20] sm:$0xff]  }
0x19f0   : > { %3141 = vrot.lane.b32.xlu1 %v2957_v29, %s7167_s23 }
0x1a6c   : > { %v3054_v42 = vpop.xlane.xlu1 %3053 }
0x1a6d   : > { %v3055_v44 = vsub.f32 %v3051_v40, %v3054_v42  ;;  %v5991_v42 = vld [vmem:[%s7166_s1 + $0x28] sm:$0xff]  }
0x1a6f   : > { %v3056_v45 = vmul.f32 1.442695, %v3055_v44  ;;  %v5992_v44 = vld [vmem:[%s7166_s1 + $0x30] sm:$0xff]  }
0x1a70   : > { %v3142_v48 = vpop.permute.xlu1 %3141 }
0x1a71   : > { %6078 = vpow2.f32 %v3056_v45  ;;  %v5993_v45 = vld [vmem:[%s7166_s1 + $0x38] sm:$0xff]  }
0x1a7b   : > { %v6079_v46 = vpop.eup %6078 }
0x1a7c   : > { %v3058_v47 = vsel %vm905_vm6, %v6079_v46, 0.0 }
0x1a7d   : > { %3059 = vadd.xlane.f32.xlu1 %v3058_v47 }
0x1a8e   : > { %3307 = vrot.lane.b32.xlu1 %v2957_v29, %s7171_s22 }
0x1a92   : > { %3475 = vrot.lane.b32.xlu1 %v2957_v29, %s7172_s28 }
0x1b0a   : > { %v3060_v49 = vpop.xlane.xlu1 %3059 }
0x1b0b   : > { %6080 = vrcp.f32 %v3060_v49 }
0x1b0e   : > { %v3308_v50 = vpop.permute.xlu1 %3307 }
0x1b0f   : > { %5787 = vmatmul.mubr.msk.f32.vlgmr.msra.gmra.mrb[22].mxu1 %vm823_vm4, %v3308_v50 }
0x1b10   : > { %5795 = vmatpush3.xpose.msk.msra.mxu1 %vm823_vm4, %v3478_v51  ;;  %5796 = vmatprep.mubr.msk.f32.mxu1 %vm6130_vm2, %v6129_v26 }
0x1b11   : > { %5804 = vmatprep.subr.bf16.mxu1 %v6129_v26 }
0x1b12   : > { %v3476_v53 = vpop.permute.xlu1 %3475 }
0x1b13   : > { %5797 = vmatmul.mubr.msk.f32.vlgmr.msra.gmra.mrb[32].mxu1 %vm823_vm4, %v3476_v53 }
0x1b14   : > { %5812 = vmatprep.mubr.msk.bf16.mxu1 %vm6130_vm2, %v6129_v26  ;;  %5805 = vmatpush3.bf16.msra.mxu1 %v5990_v41 }
0x1b15   : > { %v6081_v54 = vpop.eup %6080  ;;  %5806 = vmatprep.subr.bf16.mxu1 %v6129_v26 }
0x1b16   : > { %v3062_v55 = vmul.f32 %v6081_v54, %v6079_v46 }
0x1b18   : > { %5772 = vmatmul.mubr.msk.f32.vlgmr.msra.gmra.mrb[36].mxu0 %vm917_vm7, %v3062_v55  ;;  %5807 = vmatpush3.bf16.msra.mxu1 %v5991_v42 }
0x1b19   : > { %5775 = vmatpush3.xpose.msk.msra.mxu0 %vm823_vm4, %v3142_v48  ;;  %5776 = vmatprep.mubr.msk.f32.mxu0 %vm6130_vm2, %v6129_v26 }
0x1b1a   : > { %5779 = vmatprep.subr.mxu0 %v6129_v26  ;;  %5808 = vmatprep.subr.bf16.mxu1 %v6129_v26 }
0x1b1c   : > { %5777 = vmatmul.mubr.msk.f32.vlgmr.msra.gmra.mrb[38].mxu0 %vm823_vm4, %v3140_v25  ;;  %5809 = vmatpush3.bf16.msra.mxu1 %v5992_v44 }
0x1b1d   : > { %5781 = vmatprep.mubr.msk.f32.mxu0 %vm6130_vm2, %v6129_v26  ;;  %5810 = vmatprep.subr.bf16.mxu1 %v6129_v26 }
0x1b20   : > { %5811 = vmatpush3.bf16.msra.mxu1 %v5993_v45 }
0x1b21   : > { %5828 = vmatprep.subr.bf16.mxu1 %v6129_v26 }
0x1be2   : > { %v3381_v56 = vpop.f32.mrb[22].mxu1 }
0x1be3   : > { %v3385_v58 = vmul.f32 0.25, %v3381_v56  ;;  %v5788_v60 = vpop.f32.mrb[23].mxu1 }
0x1be5   : > { %v3386_v61 = vsel %vm6329_vm5, %v3385_v58, -1e+30 }
0x1be6   : > { %v3549_v62 = vpop.f32.mrb[32].mxu1  ;;  %v3387_v52 = vsel %vm905_vm6, %v3386_v61, -inf }
0x1be7   : > { %3388 = vmax.xlane.f32.xlu1 %v3387_v52  ;;  %v5798_v63 = vpop.f32.mrb[33].mxu1  ;;  %v3553_v4 = vmul.f32 0.25, %v3549_v62 }
0x1be9   : > { %v3554_v57 = vsel %vm6329_vm5, %v3553_v4, -1e+30 }
0x1bea   : > { %v3555_v8 = vsel %vm905_vm6, %v3554_v57, -inf }
0x1beb   : > { %v6760_v1 = vpop.f32.mrb[36].mxu0 }
0x1bec   : > { %v5773_v3 = vpop.f32.mrb[37].mxu0 }
0x1bef   : > { %v3213_v59 = vpop.f32.mrb[38].mxu0 }
0x1bf0   : > { %v3217_v0 = vmul.f32 0.25, %v3213_v59  ;;  %v5778_v5 = vpop.f32.mrb[39].mxu0 }
0x1bf2   : > { %v3218_v6 = vsel %vm6329_vm5, %v3217_v0, -1e+30 }
0x1bf3   : > { %v3219_v7 = vsel %vm905_vm6, %v3218_v6, -inf }
0x1bf4   : > { %3220 = vmax.xlane.f32.xlu0 %v3219_v7 }
0x1bf8   : > { %3556 = vmax.xlane.f32.xlu0 %v3555_v8  ;;  %v5996_v8 = vld [vmem:[%s7108_s8 + $0x20] sm:$0xff]  }
0x1c74   : > { %v3389_v9 = vpop.xlane.xlu1 %3388 }
0x1c75   : > { %v3390_v10 = vsub.f32 %v3386_v61, %v3389_v9  ;;  %v5997_v9 = vld [vmem:[%s7109_s9 + $0x30] sm:$0xff]  }
0x1c77   : > { %v3391_v13 = vmul.f32 1.442695, %v3390_v10  ;;  %v5998_v10 = vld [vmem:[%s7108_s8 + $0x28] sm:$0xff]  }
0x1c79   : > { %6082 = vpow2.f32 %v3391_v13  ;;  %v5999_v13 = vld [vmem:[%s7109_s9 + $0x38] sm:$0xff]  }
0x1c81   : > { %v3221_v14 = vpop.xlane.xlu0 %3220 }
0x1c82   : > { %v3222_v16 = vsub.f32 %v3218_v6, %v3221_v14  ;;  %v6000_v14 = vld [vmem:[%s7108_s8 + $0x30] sm:$0xff]  }
0x1c83   : > { %v6083_v15 = vpop.eup %6082 }
0x1c84   : > { %v3393_v17 = vsel %vm905_vm6, %v6083_v15, 0.0  ;;  %v3223_v20 = vmul.f32 1.442695, %v3222_v16 }
0x1c85   : > { %3394 = vadd.xlane.f32.xlu1 %v3393_v17  ;;  %v3557_v18 = vpop.xlane.xlu0 %3556 }
0x1c86   : > { %v3558_v19 = vsub.f32 %v3554_v57, %v3557_v18  ;;  %v5995_v57 = vld [vmem:[%s7109_s9 + $0x28] sm:$0xff]  }
0x1c88   : > { %v3559_v21 = vmul.f32 1.442695, %v3558_v19 }
0x1c8a   : > { %6084 = vpow2.f32 %v3559_v21 }
0x1c8b   : > { %6086 = vpow2.f32 %v3223_v20  ;;  %v5345_v20 = vld [vmem:[%s7106_s6 + $0x1] ss:$0 sm:$0xff] }
0x1c94   : > { %v6085_v36 = vpop.eup %6084 }
0x1c95   : > { %v3561_v22 = vsel %vm905_vm6, %v6085_v36, 0.0  ;;  %v6087_v23 = vpop.eup %6086 }
0x1c96   : > { %3230 = vrot.lane.b32.xlu1 %v6719_v30, %s7170_s21  ;;  %3562 = vadd.xlane.f32.xlu0 %v3561_v22  ;;  %v3225_v24 = vsel %vm905_vm6, %v6087_v23, 0.0 }
0x1c9a   : > { %3566 = vrot.lane.b32.xlu1 %v6719_v30, %s7172_s28  ;;  %3226 = vadd.xlane.f32.xlu0 %v3225_v24 }
0x1cb0   : > { %3398 = vrot.lane.b32.xlu0 %v6719_v30, %s7171_s22 }
0x1d12   : > { %v3395_v27 = vpop.xlane.xlu1 %3394 }
0x1d16   : > { %v3231_v29 = vpop.permute.xlu1 %3230 }
0x1d17   : > { %5780 = vmatpush3.msk.msra.mxu0 %vm921_vm3, %v3231_v29 }
0x1d18   : > { %5789 = vmatprep.subr.mxu0 %v6129_v26 }
0x1d1a   : > { %v3567_v39 = vpop.permute.xlu1 %3566 }
0x1d23   : > { %v3563_v31 = vpop.xlane.xlu0 %3562 }
0x1d27   : > { %v3227_v32 = vpop.xlane.xlu0 %3226 }
0x1d28   : > { %6088 = vrcp.f32 %v3227_v32 }
0x1d29   : > { %6090 = vrcp.f32 %v3395_v27 }
0x1d2a   : > { %6092 = vrcp.f32 %v3563_v31 }
0x1d2b   : > { %v3399_v37 = vpop.permute.xlu0 %3398 }
0x1d32   : > { %v6089_v34 = vpop.eup %6088 }
0x1d33   : > { %v3229_v25 = vmul.f32 %v6089_v34, %v6087_v23  ;;  %v6091_v35 = vpop.eup %6090 }
0x1d34   : > { %v3397_v30 = vmul.f32 %v6091_v35, %v6083_v15  ;;  %v6093_v38 = vpop.eup %6092  ;;  %v6001_v15 = vld [vmem:[%s7108_s8 + $0x38] sm:$0xff]  }
0x1d35   : > { %5782 = vmatmul.mubr.msk.f32.vlgmr.msra.gmra.mrb[40].mxu0 %vm917_vm7, %v3229_v25  ;;  %v3565_v40 = vmul.f32 %v6093_v38, %v6085_v36 }
0x1d36   : > { %5790 = vmatpush3.msk.msra.mxu0 %vm921_vm3, %v3399_v37  ;;  %5791 = vmatprep.mubr.msk.f32.mxu0 %vm6130_vm2, %v6129_v26 }
0x1d37   : > { %5799 = vmatprep.subr.mxu0 %v6129_v26 }
0x1d39   : > { %5792 = vmatmul.mubr.msk.f32.vlgmr.msra.gmra.mrb[42].mxu0 %vm917_vm7, %v3397_v30 }
0x1d3a   : > { %5800 = vmatpush3.msk.msra.mxu0 %vm921_vm3, %v3567_v39  ;;  %5801 = vmatprep.mubr.msk.f32.mxu0 %vm6130_vm2, %v6129_v26 }
0x1d3b   : > { %5816 = vmatprep.subr.bf16.mxu0 %v6129_v26 }
0x1d3d   : > { %5802 = vmatmul.mubr.msk.f32.vlgmr.msra.gmra.mrb[44].mxu0 %vm917_vm7, %v3565_v40 }
0x1d3e   : > { %5824 = vmatprep.mubr.msk.bf16.mxu0 %vm6130_vm2, %v6129_v26  ;;  %5817 = vmatpush3.bf16.msra.mxu0 %v5996_v8 }
0x1d3f   : > { %5818 = vmatprep.subr.bf16.mxu0 %v6129_v26 }
0x1d42   : > { %5819 = vmatpush3.bf16.msra.mxu0 %v5998_v10 }
0x1d43   : > { %5820 = vmatprep.subr.bf16.mxu0 %v6129_v26 }
0x1d46   : > { %5821 = vmatpush3.bf16.msra.mxu0 %v6000_v14 }
0x1d47   : > { %5822 = vmatprep.subr.bf16.mxu0 %v6129_v26 }
0x1d4a   : > { %5823 = vmatpush3.bf16.msra.mxu0 %v6001_v15 }
0x1d4b   : > { %5840 = vmatprep.subr.mxu0 %v6129_v26 }
0x1e08   : > { %v3303_v46 = vpop.f32.mrb[40].mxu0 }
0x1e09   : > { %3644 = vrot.lane.b32.xlu1 %v3303_v46, %s7174_s3  ;;  %v5783_v47 = vpop.f32.mrb[41].mxu0 }
0x1e0c   : > { %v3471_v48 = vpop.f32.mrb[42].mxu0 }
0x1e0d   : > { %3648 = vrot.lane.b32.xlu0 %v3471_v48, %s7173_s25  ;;  %v5793_v49 = vpop.f32.mrb[43].mxu0 }
0x1e10   : > { %v3639_v50 = vpop.f32.mrb[44].mxu0 }
0x1e11   : > { %3652 = vrot.lane.b32.xlu1 %v3639_v50, %s7167_s23  ;;  %v5803_v51 = vpop.f32.mrb[45].mxu0 }
0x1e7b   : > { %v3645_v53 = vpop.permute.xlu1 %3644 }
0x1e7c   : > { %v3655_v55 = vsel %vm823_vm4, %v6760_v1, %v3645_v53 }
0x1e7f   : > { %v3649_v54 = vpop.permute.xlu0 %3648 }
0x1e80   : > { %v3656_v56 = vsel %vm1512_vm8, %v3655_v55, %v3649_v54 }
0x1e83   : > { %v3653_v58 = vpop.permute.xlu1 %3652 }
0x1e84   : > { %v3657_v60 = vsel %vm1514_vm9, %v3656_v56, %v3653_v58 }
0x1e85   : > { %v3658_v61 = vpack.c.bf16 %v3657_v60, %v3657_v60 }
0x1e87   : > { %5813 = vmatmul.mubr.msk.bf16.vlgmr.msra.gmra.mrb[36].mxu1 %vm767_vm1, %v3658_v61 }
0x1e88   : > { %5836 = vmatprep.mubr.msk.bf16.mxu1 %vm6130_vm2, %v6129_v26 }
0x1f5a   : > { %v3720_v62 = vpop.f32.mrb[36].mxu1 }
0x1f5b   : > { %v6819_v52 = vadd.f32 %v3720_v62, %v6678_v2  ;;  %v5814_v63 = vpop.f32.mrb[37].mxu1  ;;  %v5994_v2 = vld [vmem:[%s7109_s9 + $0x20] sm:$0xff]  }
0x1f5c   : > { %v3723_v3 = vpop.f32.mrb[38].mxu1  ;;  %5829 = vmatpush3.bf16.msra.mxu1 %v5994_v2 }
0x1f5d   : > { %v5815_v59 = vpop.f32.mrb[39].mxu1  ;;  %v3731_v1 = vsel %vm689_vm0, %v6819_v52, 0.0  ;;  %5830 = vmatprep.subr.bf16.mxu1 %v6129_v26 }
0x1f5e   : > { %3732 = vadd.xlane.f32.xlu0 %v3731_v1 }
0x1f60   : > { %5831 = vmatpush3.bf16.msra.mxu1 %v5995_v57 }
0x1f61   : > { %5832 = vmatprep.subr.bf16.mxu1 %v6129_v26 }
0x1f64   : > { %5833 = vmatpush3.bf16.msra.mxu1 %v5997_v9 }
0x1f65   : > { %5834 = vmatprep.subr.bf16.mxu1 %v6129_v26 }
0x1f68   : > { %5835 = vmatpush3.bf16.msra.mxu1 %v5999_v13 }
0x1f69   : > { %5860 = vmatprep.subr.mxu1 %v6129_v26 }
0x1f6b   : > { %5837 = vmatmul.mubr.msk.bf16.vlgmr.msra.gmra.mrb[40].mxu1 %vm767_vm1, %v6459_v12  ;;  %v5346_v12 = vld [vmem:[%s7107_s7 + $0x1] ss:$0 sm:$0xff] }
0x1f6c   : > { %5862 = vmatprep.mubr.msk.f32.mxu1 %vm6130_vm2, %v6129_v26 }
0x1feb   : > { %v3733_v4 = vpop.xlane.xlu0 %3732 }
0x1fec   : > { %v3734_v0 = vmul.f32 0.015625, %v3733_v4 }
0x1fee   : > { %v3735_v5 = vsub.f32 %v6819_v52, %v3734_v0 }
0x1ff0   : > { %v3736_v6 = vmul.f32 %v3735_v5, %v3735_v5 }
0x1ff2   : > { %v3737_v7 = vsel %vm689_vm0, %v3736_v6, 0.0 }
0x1ff3   : > { %3738 = vadd.xlane.f32.xlu1 %v3737_v7 }
0x203e   : > { %v6870_v24 = vpop.f32.mrb[40].mxu1 }
0x203f   : > { %v5838_v27 = vpop.f32.mrb[41].mxu1  ;;  %4005 = vrot.lane.b32.xlu1 %v6870_v24, %s7169_s2  ;;  %s680_s2 = scalar_lea.vmem %s7181_s26, %s7180_s19 }
0x2040   : > { %v3905_v29 = vpop.f32.mrb[42].mxu1 }
0x2041   : > { %v5839_v31 = vpop.f32.mrb[43].mxu1 }
0x2080   : > { %v3739_v16 = vpop.xlane.xlu1 %3738 }
0x2081   : > { %v3740_v17 = vmul.f32 0.015625, %v3739_v16 }
0x2083   : > { %v3741_v18 = vadd.f32 1e-05, %v3740_v17 }
0x2085   : > { %6094 = vrsqrt.f32 %v3741_v18 }
0x208f   : > { %v6095_v19 = vpop.eup %6094 }
0x2090   : > { %v3743_v21 = vmul.f32 %v6095_v19, %v3735_v5 }
0x2092   : > { %v3750_v36 = vmul.f32 %v5345_v20, %v3743_v21 }
0x2094   : > { %v3757_v22 = vadd.f32 %v5346_v12, %v3750_v36 }
0x2096   : > { %v3767_v23 = vpack.c.bf16 %v3757_v22, %v3757_v22 }
0x2098   : > { %5825 = vmatmul.mubr.msk.bf16.vlgmr.msra.gmra.mrb[48].mxu0 %vm767_vm1, %v3767_v23 }
0x2099   : > { %5842 = vmatprep.mubr.msk.f32.mxu0 %vm6130_vm2, %v6129_v26  ;;  %5841 = vmatpush3.xpose.msk.msra.mxu0 %vm823_vm4, %v6870_v24 }
0x209a   : > { %5845 = vmatprep.subr.mxu0 %v6129_v26 }
0x20b1   : > { %v4006_v32 = vpop.permute.xlu1 %4005 }
0x216b   : > { %v3829_v34 = vpop.f32.mrb[48].mxu0 }
0x216c   : > { %4082 = vrot.lane.b32.xlu1 %v3829_v34, %s7170_s21  ;;  %v5826_v25 = vpop.f32.mrb[49].mxu0  ;;  %5843 = vmatmul.mubr.msk.f32.vlgmr.msra.gmra.mrb[46].mxu0 %vm823_vm4, %v3829_v34 }
0x216d   : > { %v3832_v35 = vpop.f32.mrb[50].mxu0  ;;  %5846 = vmatpush3.msk.msra.mxu0 %vm921_vm3, %v4006_v32  ;;  %5847 = vmatprep.mubr.msk.f32.mxu0 %vm6130_vm2, %v6129_v26 }
0x216e   : > { %v5827_v37 = vpop.f32.mrb[51].mxu0  ;;  %5850 = vmatprep.subr.mxu0 %v6129_v26 }
0x2170   : > { %4251 = vrot.lane.b32.xlu1 %v6870_v24, %s7171_s22 }
0x2174   : > { %4418 = vrot.lane.b32.xlu1 %v6870_v24, %s7172_s28 }
0x21de   : > { %v4083_v30 = vpop.permute.xlu1 %4082 }
0x21e2   : > { %v4252_v38 = vpop.permute.xlu1 %4251 }
0x21e3   : > { %5861 = vmatpush3.xpose.msk.msra.mxu1 %vm823_vm4, %v4252_v38 }
0x21e4   : > { %5870 = vmatprep.subr.mxu1 %v6129_v26 }
0x21e6   : > { %v4419_v53 = vpop.permute.xlu1 %4418 }
0x223f   : > { %v3989_v39 = vpop.f32.mrb[46].mxu0 }
0x2240   : > { %v3993_v40 = vmul.f32 0.25, %v3989_v39  ;;  %v5844_v41 = vpop.f32.mrb[47].mxu0 }
0x2242   : > { %v3994_v42 = vsel %vm905_vm6, %v3993_v40, -inf }
0x2243   : > { %3995 = vmax.xlane.f32.xlu0 %v3994_v42 }
0x22d0   : > { %v3996_v44 = vpop.xlane.xlu0 %3995 }
0x22d1   : > { %v3997_v45 = vsub.f32 %v3993_v40, %v3996_v44 }
0x22d3   : > { %v3998_v46 = vmul.f32 1.442695, %v3997_v45 }
0x22d5   : > { %6096 = vpow2.f32 %v3998_v46 }
0x22df   : > { %v6097_v47 = vpop.eup %6096 }
0x22e0   : > { %v4000_v48 = vsel %vm905_vm6, %v6097_v47, 0.0 }
0x22e1   : > { %4001 = vadd.xlane.f32.xlu0 %v4000_v48 }
0x22f7   : > { %4084 = vrot.lane.b32.xlu0 %v6870_v24, %s7170_s21  ;;  %s7182_s21 = sld [smem:[#allocation3_spill]] }
0x22fb   : > { %4249 = vrot.lane.b32.xlu0 %v3829_v34, %s7171_s22  ;;  %s7176_s22 = sld [smem:[#allocation11_spill]] }
0x22fd   : > { %s683_s24 = scalar_lea.vmem %s7183_s5, %s7182_s21 }
0x22ff   : > { %4416 = vrot.lane.b32.xlu0 %v3829_v34, %s7172_s28 }
0x2301   : > { %v6002_v38 = vld [vmem:[%s7176_s22 + $0x20] sm:$0xff]   ;;  %v6003_v39 = vld [vmem:[%s7176_s22 + $0x28] sm:$0xff]   ;;  %v6004_v40 = vld [vmem:[%s7176_s22 + $0x30] sm:$0xff]  }
0x236e   : > { %v4002_v49 = vpop.xlane.xlu0 %4001 }
0x236f   : > { %6098 = vrcp.f32 %v4002_v49 }
0x2372   : > { %v4085_v50 = vpop.permute.xlu0 %4084 }
0x2376   : > { %v4250_v51 = vpop.permute.xlu0 %4249 }
0x2377   : > { %5863 = vmatmul.mubr.msk.f32.vlgmr.msra.gmra.mrb[34].mxu1 %vm823_vm4, %v4250_v51 }
0x2378   : > { %5871 = vmatpush3.xpose.msk.msra.mxu1 %vm823_vm4, %v4419_v53  ;;  %5872 = vmatprep.mubr.msk.f32.mxu1 %vm6130_vm2, %v6129_v26 }
0x2379   : > { %v6099_v54 = vpop.eup %6098  ;;  %5880 = vmatprep.subr.bf16.mxu1 %v6129_v26 }
0x237a   : > { %v4004_v55 = vmul.f32 %v6099_v54, %v6097_v47  ;;  %v4417_v56 = vpop.permute.xlu0 %4416 }
0x237b   : > { %5873 = vmatmul.mubr.msk.f32.vlgmr.msra.gmra.mrb[44].mxu1 %vm823_vm4, %v4417_v56 }
0x237c   : > { %5848 = vmatmul.mubr.msk.f32.vlgmr.msra.gmra.mrb[52].mxu0 %vm917_vm7, %v4004_v55  ;;  %5888 = vmatprep.mubr.msk.bf16.mxu1 %vm6130_vm2, %v6129_v26 }
0x237d   : > { %5851 = vmatpush3.xpose.msk.msra.mxu0 %vm823_vm4, %v4085_v50  ;;  %5852 = vmatprep.mubr.msk.f32.mxu0 %vm6130_vm2, %v6129_v26 }
0x237e   : > { %5855 = vmatprep.subr.mxu0 %v6129_v26  ;;  %5881 = vmatpush3.bf16.msra.mxu1 %v6002_v38  ;;  %v6032_v38 = vld [vmem:[%s7115_s15 + $0xf8] sm:$0xff]  }
0x237f   : > { %5882 = vmatprep.subr.bf16.mxu1 %v6129_v26 }
0x2380   : > { %5853 = vmatmul.mubr.msk.f32.vlgmr.msra.gmra.mrb[54].mxu0 %vm823_vm4, %v4083_v30 }
0x2381   : > { %5857 = vmatprep.mubr.msk.f32.mxu0 %vm6130_vm2, %v6129_v26 }
0x2382   : > { %5883 = vmatpush3.bf16.msra.mxu1 %v6003_v39  ;;  %v6033_v39 = vld [vmem:[%s7115_s15 + $0xb8] sm:$0xff]  }
0x2383   : > { %5884 = vmatprep.subr.bf16.mxu1 %v6129_v26 }
0x2386   : > { %5885 = vmatpush3.bf16.msra.mxu1 %v6004_v40  ;;  %v5414_v40 = vld [vmem:[%s7114_s14 + $0x2] sm:$0x3] }
0x2387   : > { %5886 = vmatprep.subr.bf16.mxu1 %v6129_v26 }
0x244a   : > { %v4323_v58 = vpop.f32.mrb[34].mxu1 }
0x244b   : > { %v4327_v60 = vmul.f32 0.25, %v4323_v58  ;;  %v5864_v61 = vpop.f32.mrb[35].mxu1 }
0x244d   : > { %v4328_v62 = vsel %vm905_vm6, %v4327_v60, -inf }
0x244e   : > { %4329 = vmax.xlane.f32.xlu0 %v4328_v62  ;;  %v4490_v63 = vpop.f32.mrb[44].mxu1 }
0x244f   : > { %v4494_v3 = vmul.f32 0.25, %v4490_v63  ;;  %v6912_v59 = vpop.f32.mrb[52].mxu0  ;;  %v5874_v1 = vpop.f32.mrb[45].mxu1 }
0x2450   : > { %v5849_v4 = vpop.f32.mrb[53].mxu0 }
0x2451   : > { %v4495_v0 = vsel %vm905_vm6, %v4494_v3, -inf }
0x2452   : > { %4496 = vmax.xlane.f32.xlu0 %v4495_v0 }
0x2453   : > { %v4156_v5 = vpop.f32.mrb[54].mxu0 }
0x2454   : > { %v4160_v6 = vmul.f32 0.25, %v4156_v5  ;;  %v5854_v7 = vpop.f32.mrb[55].mxu0  ;;  %v6006_v5 = vld [vmem:[%s7113_s13 + $0x40] ss:$8 sps:$4 sm:$0xff]  }
0x2455   : > { %v6009_v7 = vld [vmem:[%s7113_s13 + $0x50] ss:$8 sps:$4 sm:$0xff]  }
0x2456   : > { %v4161_v2 = vsel %vm905_vm6, %v4160_v6, -inf }
0x2457   : > { %4162 = vmax.xlane.f32.xlu1 %v4161_v2  ;;  %v6014_v2 = vld [vmem:[%s7113_s13 + $0x64] ss:$8 sps:$4 sm:$0xff]  }
0x24db   : > { %v4330_v57 = vpop.xlane.xlu0 %4329 }
0x24dc   : > { %v4331_v8 = vsub.f32 %v4327_v60, %v4330_v57  ;;  %v6012_v57 = vld [vmem:[%s7113_s13 + $0x60] ss:$8 sps:$4 sm:$0xff]  }
0x24de   : > { %v4332_v9 = vmul.f32 1.442695, %v4331_v8  ;;  %v6017_v8 = vld [vmem:[%s7113_s13 + $0x74] ss:$8 sps:$4 sm:$0xff]  }
0x24df   : > { %v4497_v10 = vpop.xlane.xlu0 %4496 }
0x24e0   : > { %6100 = vpow2.f32 %v4332_v9  ;;  %v4498_v13 = vsub.f32 %v4494_v3, %v4497_v10  ;;  %v6015_v9 = vld [vmem:[%s7113_s13 + $0x70] ss:$8 sps:$4 sm:$0xff]   ;;  %v6018_v10 = vld [vmem:[%s7115_s15 + $0xc0] sm:$0xff]  }
0x24e2   : > { %v4499_v14 = vmul.f32 1.442695, %v4498_v13  ;;  %v6019_v13 = vld [vmem:[%s7115_s15 + $0x80] sm:$0xff]  }
0x24e4   : > { %6102 = vpow2.f32 %v4499_v14  ;;  %v4163_v19 = vpop.xlane.xlu1 %4162  ;;  %v6020_v14 = vld [vmem:[%s7115_s15 + $0xc8] sm:$0xff]  }
0x24e5   : > { %v4164_v20 = vsub.f32 %v4160_v6, %v4163_v19  ;;  %v6011_v6 = vld [vmem:[%s7113_s13 + $0x54] ss:$8 sps:$4 sm:$0xff]  }
0x24e6   : > { %v6025_v19 = vld [vmem:[%s7115_s15 + $0x98] sm:$0xff]  }
0x24e7   : > { %v4165_v21 = vmul.f32 1.442695, %v4164_v20  ;;  %v6026_v20 = vld [vmem:[%s7115_s15 + $0xe0] sm:$0xff]  }
0x24e9   : > { %6104 = vpow2.f32 %v4165_v21  ;;  %v6027_v21 = vld [vmem:[%s7115_s15 + $0xa0] sm:$0xff]  }
0x24ea   : > { %v6101_v15 = vpop.eup %6100 }
0x24eb   : > { %v4334_v16 = vsel %vm905_vm6, %v6101_v15, 0.0 }
0x24ec   : > { %4335 = vadd.xlane.f32.xlu0 %v4334_v16  ;;  %v6022_v16 = vld [vmem:[%s7115_s15 + $0xd0] sm:$0xff]  }
0x24ee   : > { %v6103_v17 = vpop.eup %6102 }
0x24ef   : > { %v4501_v18 = vsel %vm905_vm6, %v6103_v17, 0.0 }
0x24f0   : > { %4502 = vadd.xlane.f32.xlu1 %v4501_v18  ;;  %v6024_v18 = vld [vmem:[%s7115_s15 + $0xd8] sm:$0xff]  }
0x24f3   : > { %v6105_v12 = vpop.eup %6104 }
0x24f4   : > { %v4167_v36 = vsel %vm905_vm6, %v6105_v12, 0.0 }
0x2501   : > { %4339 = vrot.lane.b32.xlu1 %v6870_v24, %s7173_s25 }
0x2502   : > { %4172 = vrot.lane.b32.xlu0 %v6870_v24, %s7167_s23 }
0x2525   : > { %4168 = vadd.xlane.f32.xlu1 %v4167_v36  ;;  %v6029_v36 = vld [vmem:[%s7115_s15 + $0xa8] sm:$0xff]  }
0x2536   : > { %4506 = vrot.lane.b32.xlu1 %v6870_v24, %s7174_s3 }
0x2579   : > { %v4336_v22 = vpop.xlane.xlu0 %4335 }
0x257d   : > { %v4173_v23 = vpop.permute.xlu0 %4172  ;;  %v4503_v27 = vpop.xlane.xlu1 %4502 }
0x257e   : > { %5856 = vmatpush3.msk.msra.mxu0 %vm921_vm3, %v4173_v23 }
0x257f   : > { %5865 = vmatprep.subr.mxu0 %v6129_v26 }
0x2581   : > { %v4340_v29 = vpop.permute.xlu1 %4339 }
0x25b2   : > { %v4169_v31 = vpop.xlane.xlu1 %4168 }
0x25b3   : > { %6106 = vrcp.f32 %v4169_v31  ;;  %v5404_v31 = vld [vmem:[%s7111_s11 + $0x1] ss:$0 sm:$0xff] }
0x25b4   : > { %6108 = vrcp.f32 %v4336_v22 }
0x25b5   : > { %6110 = vrcp.f32 %v4503_v27 }
0x25b6   : > { %v4507_v37 = vpop.permute.xlu1 %4506 }
0x25bd   : > { %v6107_v32 = vpop.eup %6106 }
0x25be   : > { %v4171_v34 = vmul.f32 %v6107_v32, %v6105_v12  ;;  %v6109_v25 = vpop.eup %6108  ;;  %v6028_v12 = vld [vmem:[%s7115_s15 + $0xe8] sm:$0xff]  }
0x25bf   : > { %v4338_v24 = vmul.f32 %v6109_v25, %v6101_v15  ;;  %v6111_v35 = vpop.eup %6110  ;;  %v6021_v15 = vld [vmem:[%s7115_s15 + $0x88] sm:$0xff]  }
0x25c0   : > { %5858 = vmatmul.mubr.msk.f32.vlgmr.msra.gmra.mrb[56].mxu0 %vm917_vm7, %v4171_v34  ;;  %v4505_v30 = vmul.f32 %v6111_v35, %v6103_v17  ;;  %v6023_v17 = vld [vmem:[%s7115_s15 + $0x90] sm:$0xff]   ;;  %v5405_v34 = vld [vmem:[%s7112_s12 + $0x1] ss:$0 sm:$0xff] }
0x25c1   : > { %5866 = vmatpush3.msk.msra.mxu0 %vm921_vm3, %v4340_v29  ;;  %5867 = vmatprep.mubr.msk.f32.mxu0 %vm6130_vm2, %v6129_v26 }
0x25c2   : > { %5875 = vmatprep.subr.mxu0 %v6129_v26 }
0x25c4   : > { %5868 = vmatmul.mubr.msk.f32.vlgmr.msra.gmra.mrb[58].mxu0 %vm917_vm7, %v4338_v24 }
0x25c5   : > { %5876 = vmatpush3.msk.msra.mxu0 %vm921_vm3, %v4507_v37  ;;  %5877 = vmatprep.mubr.msk.f32.mxu0 %vm6130_vm2, %v6129_v26  ;;  %v6030_v37 = vld [vmem:[%s7115_s15 + $0xf0] sm:$0xff]  }
0x25c8   : > { %5878 = vmatmul.mubr.msk.f32.vlgmr.msra.gmra.mrb[60].mxu0 %vm917_vm7, %v4505_v30  ;;  %v6031_v30 = vld [vmem:[%s7115_s15 + $0xb0] sm:$0xff]  }
0x25c9   : > { %4796 = vmatprep.mubr.bf16.mxu0 %v6128_v11  ;;  %v6005_v11 = vld [vmem:[%s7176_s22 + $0x38] sm:$0xff]  }
0x25ca   : > { %5887 = vmatpush3.bf16.msra.mxu1 %v6005_v11  ;;  %v4714_v11 = vrot.slane %v5414_v40, %v2566_v28 }
0x25cb   : > { %5609 = vmatprep.subr.bf16.mxu1 %v6018_v10 }
0x2693   : > { %v4245_v41 = vpop.f32.mrb[56].mxu0 }
0x2694   : > { %4584 = vrot.lane.b32.xlu0 %v4245_v41, %s7174_s3  ;;  %v5859_v42 = vpop.f32.mrb[57].mxu0  ;;  %v4718_v41 = vrot.slane %v5414_v40, %v2570_v43  ;;  %s7179_s3 = sld [smem:[#allocation13_spill]] }
0x2697   : > { %v4412_v44 = vpop.f32.mrb[58].mxu0 }
0x2698   : > { %4588 = vrot.lane.b32.xlu1 %v4412_v44, %s7173_s25  ;;  %v5869_v45 = vpop.f32.mrb[59].mxu0 }
0x269a   : > { %v5475_v10 = vld [vmem:[%s7179_s3] ss:$0 sm:$0xff] }
0x269b   : > { %v4579_v46 = vpop.f32.mrb[60].mxu0 }
0x269c   : > { %4592 = vrot.lane.b32.xlu0 %v4579_v46, %s7167_s23  ;;  %v5879_v47 = vpop.f32.mrb[61].mxu0 }
0x2706   : > { %v4585_v48 = vpop.permute.xlu0 %4584 }
0x2707   : > { %v4595_v50 = vsel %vm823_vm4, %v6912_v59, %v4585_v48 }
0x270a   : > { %v4589_v49 = vpop.permute.xlu1 %4588 }
0x270b   : > { %v4596_v51 = vsel %vm1512_vm8, %v4595_v50, %v4589_v49 }
0x270e   : > { %v4593_v53 = vpop.permute.xlu0 %4592 }
0x270f   : > { %v4597_v54 = vsel %vm1514_vm9, %v4596_v51, %v4593_v53 }
0x2710   : > { %v4598_v55 = vpack.c.bf16 %v4597_v54, %v4597_v54 }
0x2712   : > { %5889 = vmatmul.mubr.msk.bf16.vlgmr.msra.gmra.mrb[48].mxu1 %vm767_vm1, %v4598_v55 }
0x2713   : > { %5610 = vmatpush3.bf16.msra.mxu1 %v6019_v13 }
0x2714   : > { %5611 = vmatprep.subr.bf16.mxu1 %v6020_v14 }
0x2717   : > { %5612 = vmatpush3.bf16.msra.mxu1 %v6021_v15 }
0x2718   : > { %5613 = vmatprep.subr.bf16.mxu1 %v6022_v16 }
0x271b   : > { %5614 = vmatpush3.bf16.msra.mxu1 %v6023_v17 }
0x271c   : > { %5615 = vmatprep.subr.bf16.mxu1 %v6024_v18 }
0x271f   : > { %5616 = vmatpush3.bf16.msra.mxu1 %v6025_v19 }
0x2720   : > { %5617 = vmatprep.subr.bf16.mxu1 %v6026_v20 }
0x2723   : > { %5618 = vmatpush3.bf16.msra.mxu1 %v6027_v21 }
0x2724   : > { %5619 = vmatprep.subr.bf16.mxu1 %v6028_v12 }
0x2727   : > { %5620 = vmatpush3.bf16.msra.mxu1 %v6029_v36 }
0x2728   : > { %5621 = vmatprep.subr.bf16.mxu1 %v6030_v37 }
0x272b   : > { %5622 = vmatpush3.bf16.msra.mxu1 %v6031_v30 }
0x272c   : > { %5623 = vmatprep.subr.bf16.mxu1 %v6032_v38 }
0x272f   : > { %5624 = vmatpush3.bf16.msra.mxu1 %v6033_v39 }
0x27e5   : > { %v4660_v56 = vpop.f32.mrb[48].mxu1 }
0x27e6   : > { %v6962_v58 = vadd.f32 %v4660_v56, %v6819_v52  ;;  %v5890_v60 = vpop.f32.mrb[49].mxu1  ;;  %v6008_v52 = vld [vmem:[%s7113_s13 + $0x44] ss:$8 sps:$4 sm:$0xff]  }
0x27e7   : > { %v4663_v61 = vpop.f32.mrb[50].mxu1  ;;  %4764 = vmatprep.subr.bf16.mxu0 %v6008_v52  ;;  %v6036_v52 = vld [vmem:[%s7177_s4 + $0x10] sm:$0xff]  }
0x27e8   : > { %v5891_v62 = vpop.f32.mrb[51].mxu1  ;;  %v4671_v63 = vsel %vm689_vm0, %v6962_v58, 0.0  ;;  %4765 = vmatpush1.bf16.msra.mxu0 %v6006_v5  ;;  %v6037_v5 = vld [vmem:[%s7177_s4 + $0x18] sm:$0xff]  }
0x27e9   : > { %4672 = vadd.xlane.f32.xlu1 %v4671_v63  ;;  %4766 = vmatprep.subr.bf16.mxu0 %v6011_v6 }
0x27ec   : > { %4767 = vmatpush1.bf16.msra.mxu0 %v6009_v7 }
0x27ed   : > { %4768 = vmatprep.subr.bf16.mxu0 %v6014_v2 }
0x27f0   : > { %4769 = vmatpush1.bf16.msra.mxu0 %v6012_v57 }
0x27f1   : > { %4770 = vmatprep.subr.bf16.mxu0 %v6017_v8  ;;  %v5474_v8 = vld [vmem:[%s7178_s10] ss:$0 sm:$0xff] }
0x27f4   : > { %4771 = vmatpush1.bf16.msra.mxu0 %v6015_v9 }
0x27f5   : > { %5892 = vmatprep.subr.bf16.mxu0 %v6129_v26 }
0x2876   : > { %v4673_v3 = vpop.xlane.xlu1 %4672 }
0x2877   : > { %v4674_v59 = vmul.f32 0.015625, %v4673_v3 }
0x2879   : > { %v4675_v1 = vsub.f32 %v6962_v58, %v4674_v59 }
0x287b   : > { %v4676_v4 = vmul.f32 %v4675_v1, %v4675_v1 }
0x287d   : > { %v4677_v0 = vsel %vm689_vm0, %v4676_v4, 0.0 }
0x287e   : > { %4678 = vadd.xlane.f32.xlu0 %v4677_v0  ;;  %v6034_v0 = vld [vmem:[%s7177_s4] sm:$0xff]  }
0x290b   : > { %v4679_v22 = vpop.xlane.xlu0 %4678 }
0x290c   : > { %v4680_v23 = vmul.f32 0.015625, %v4679_v22 }
0x290e   : > { %v4681_v27 = vadd.f32 1e-05, %v4680_v23 }
0x2910   : > { %6112 = vrsqrt.f32 %v4681_v27 }
0x291a   : > { %v6113_v29 = vpop.eup %6112 }
0x291b   : > { %v4683_v32 = vmul.f32 %v6113_v29, %v4675_v1 }
0x291d   : > { %v4690_v25 = vmul.f32 %v5404_v31, %v4683_v32  ;;  %v5106_v31 = vld [vmem:[%s680_s2] sm:$0xf] }
0x291f   : > { %v4697_v24 = vadd.f32 %v5405_v34, %v4690_v25 }
0x2921   : > { %v4707_v35 = vpack.c.bf16 %v4697_v24, %v4697_v24 }
0x2923   : > { %5423 = vmatmul.mubr.msk.bf16.vlgmr.msra.gmra.mrb[64].mxu0 %vm767_vm1, %v4707_v35 }
0x2924   : > { %5900 = vmatprep.mubr.msk.bf16.mxu0 %vm6130_vm2, %v6129_v26  ;;  %5893 = vmatpush3.bf16.msra.mxu0 %v6034_v0 }
0x2925   : > { %5894 = vmatprep.subr.bf16.mxu0 %v6129_v26 }
0x29f6   : > { %v4798_v42 = vpop.f32.mrb[64].mxu0 }
0x29f7   : > { %v4799_v44 = vadd.f32 %v4798_v42, %v4714_v11  ;;  %v4800_v45 = vpop.f32.mrb[65].mxu0 }
0x29f8   : > { %v4801_v46 = vadd.f32 %v4800_v45, %v4718_v41  ;;  %v4802_v47 = vpop.f32.mrb[66].mxu0 }
0x29f9   : > { %v4805_v48 = vmax.f32 %v4799_v44, 0.0  ;;  %v4803_v49 = vpop.f32.mrb[67].mxu0 }
0x29fa   : > { %v4806_v50 = vmax.f32 %v4801_v46, 0.0 }
0x29fb   : > { %v4840_v53 = vpack.c.bf16 %v4805_v48, %v4805_v48 }
0x29fc   : > { %v4841_v51 = vpack.c.bf16 %v4806_v50, %v4806_v50 }
0x29fe   : > { %4970 = vmatprep.mubr.bf16.mxu1 %v4841_v51 }
0x29ff   : > { %4971 = vmatmul.mubr.bf16.vlgmr.msra.gmra.mrb[52].mxu1 %v4840_v53 }
0x2ad2   : > { %v5625_v54 = vpop.f32.mrb[52].mxu1 }
0x2ad3   : > { %v5626_v55 = vpop.f32.mrb[53].mxu1 }
0x2ad4   : > { %v5627_v56 = vadd.f32 %v5626_v55, %v5625_v54  ;;  %v5628_v60 = vpop.f32.mrb[54].mxu1 }
0x2ad5   : > { %v5629_v28 = vpop.f32.mrb[55].mxu1 }
0x2ad6   : > { %v4978_v43 = vadd.f32 %v5627_v56, %v6962_v58  ;;  %v6035_v58 = vld [vmem:[%s7177_s4 + $0x8] sm:$0xff]  }
0x2ad7   : > { %5895 = vmatpush3.bf16.msra.mxu0 %v6035_v58 }
0x2ad8   : > { %v4987_v61 = vadd.f32 %v5473_v33, %v4978_v43  ;;  %5896 = vmatprep.subr.bf16.mxu0 %v6129_v26 }
0x2ada   : > { %v4990_v62 = vsel %vm689_vm0, %v4987_v61, 0.0 }
0x2adb   : > { %4991 = vadd.xlane.f32.xlu0 %v4990_v62  ;;  %5897 = vmatpush3.bf16.msra.mxu0 %v6036_v52 }
0x2adc   : > { %5898 = vmatprep.subr.bf16.mxu0 %v6129_v26 }
0x2adf   : > { %5899 = vmatpush3.bf16.msra.mxu0 %v6037_v5 }
0x2b68   : > { %v4992_v63 = vpop.xlane.xlu0 %4991 }
0x2b69   : > { %v4993_v3 = vmul.f32 0.015625, %v4992_v63 }
0x2b6b   : > { %v4994_v59 = vsub.f32 %v4987_v61, %v4993_v3 }
0x2b6d   : > { %v4995_v1 = vmul.f32 %v4994_v59, %v4994_v59 }
0x2b6f   : > { %v4996_v4 = vsel %vm689_vm0, %v4995_v1, 0.0 }
0x2b70   : > { %4997 = vadd.xlane.f32.xlu1 %v4996_v4 }
0x2bfd   : > { %v4998_v6 = vpop.xlane.xlu1 %4997 }
0x2bfe   : > { %v4999_v7 = vmul.f32 0.015625, %v4998_v6 }
0x2c00   : > { %v5000_v2 = vadd.f32 1e-05, %v4999_v7 }
0x2c02   : > { %6114 = vrsqrt.f32 %v5000_v2 }
0x2c0c   : > { %v6115_v57 = vpop.eup %6114 }
0x2c0d   : > { %v5002_v9 = vmul.f32 %v6115_v57, %v4994_v59 }
0x2c0f   : > { %v5009_v13 = vmul.f32 %v5474_v8, %v5002_v9 }
0x2c11   : > { %v5016_v14 = vadd.f32 %v5475_v10, %v5009_v13 }
0x2c13   : > { %v5025_v15 = vpack.c.bf16 %v5016_v14, %v5016_v14 }
0x2c15   : > { %5901 = vmatmul.mubr.msk.bf16.vlgmr.msra.gmra.mrb[68].mxu0 %vm767_vm1, %v5025_v15 }
0x2ce8   : > { %v5087_v26 = vpop.f32.mrb[68].mxu0 }
0x2ce9   : > { %v5902_v16 = vpop.f32.mrb[69].mxu0  ;;  %v5094_v17 = vsel %vm5093_vm10, %v5087_v26, -inf }
0x2cea   : > { %5095 = vmax.xlane.f32.xlu0 %v5094_v17  ;;  %v5090_v18 = vpop.f32.mrb[70].mxu0 }
0x2ceb   : > { %v5903_v19 = vpop.f32.mrb[71].mxu0 }
0x2d77   : > { %v5096_v20 = vpop.xlane.xlu0 %5095 }
0x2d78   : > { %v5097_v21 = vsub.f32 %v5087_v26, %v5096_v20 }
0x2d7a   : > { %v5098_v12 = vmul.f32 1.442695, %v5097_v21 }
0x2d7c   : > { %6116 = vpow2.f32 %v5098_v12 }
0x2d86   : > { %v6117_v36 = vpop.eup %6116 }
0x2d87   : > { %v5100_v22 = vsel %vm5093_vm10, %v6117_v36, 0.0 }
0x2d88   : > { %5101 = vadd.xlane.f32.xlu1 %v5100_v22 }
0x2e15   : > { %v5102_v23 = vpop.xlane.xlu1 %5101 }
0x2e16   : > { %6118 = vlog2.f32 %v5102_v23 }
0x2e20   : > { %v6119_v27 = vpop.eup %6118 }
0x2e21   : > { %v5104_v29 = vmul.f32 0.6931472, %v6119_v27 }
0x2e23   : > { %v5105_v32 = vsub.f32 %v5097_v21, %v5104_v29 }
0x2e25   : > { %v5107_v34 = vmul.f32 %v5106_v31, %v5105_v32 }
0x2e27   : > { %v5108_v25 = vsel %vm5093_vm10, %v5107_v34, 0.0 }
0x2e28   : > { %5109 = vadd.xlane.f32.xlu0 %v5108_v25 }
0x2eb5   : > { %v5110_v24 = vpop.xlane.xlu0 %5109 }
0x2eb6   : > { %v5111_v35 = vsub.f32 0.0, %v5110_v24 }
0x2eb8   : > { %v5112_v37 = vsel %vm921_vm3, %v5111_v35, 0.0 }
0x2eb9   : > { %v5113_v30 = vrot.slane %v5112_v37, 4 }
0x2ebb   : > { %v5114_v38 = vadd.f32 %v5113_v30, %v5112_v37 }
0x2ebd   : > { %v5115_v39 = vrot.slane %v5114_v38, 2 }
0x2ebf   : > { %v5116_v40 = vadd.f32 %v5115_v39, %v5114_v38 }
0x2ec1   : > { %v5117_v11 = vrot.slane %v5116_v40, 1 }
0x2ec3   : > { %v5118_v41 = vadd.f32 %v5117_v11, %v5116_v40 }
0x2ec5   : > { %5120 = vst.msk [vmem:[%s683_s24] sm:$0x1] %vm5119_vm11, %v5118_v41 }
0x2ec6 PF: > { %s7184_s17 = sld [smem:[#allocation2_spill]] }
0x2ecc   : > { %s31_s2 = sadd.s32 1, %s7184_s17  }
0x2ecd   : > { %p28_p4 = scmp.ge.s32.totalorder %s31_s2, 4  }
0x2ecf   :  { %30 = sbr.rel (!%p28_p4) target bundleno = 13 (0xd), region = 155 }

// kernel: patch_network_forward.12
= control target key start
LH: loop header
LB: loop body
LE: loop exit
PB: predicated region body
PF: predicated region fallthrough
CT: control target
= control target key end

     0   :  { %s7069_s0 = inlined_call_operand.vmem [shape: f32[2,4,64], index: 0, kind: input, shape index: {}]   ;;  %s7070_s1 = inlined_call_operand.vmem [shape: f32[2,16,64], index: 1, kind: input, shape index: {}]   ;;  %s7071_s2 = inlined_call_operand.vmem [shape: f32[2,1,64], index: 2, kind: input, shape index: {}]   ;;  %s7072_s3 = inlined_call_operand.vmem [shape: f32[2,1,64], index: 3, kind: input, shape index: {}]   ;;  %s7073_s4 = inlined_call_operand.vmem [shape: bf16[2,64,192], index: 4, kind: input, shape index: {}]   ;;  %s7074_s5 = inlined_call_operand.vmem [shape: bf16[2,64,64], index: 5, kind: input, shape index: {}]   ;;  %s7075_s6 = inlined_call_operand.vmem [shape: f32[2,1,64], index: 6, kind: input, shape index: {}]   ;;  %s7076_s7 = inlined_call_operand.vmem [shape: f32[2,1,64], index: 7, kind: input, shape index: {}]   ;;  %s7077_s8 = inlined_call_operand.vmem [shape: bf16[2,64,64], index: 8, kind: input, shape index: {}]   ;;  %s7078_s9 = inlined_call_operand.vmem [shape: bf16[2,64,128], index: 9, kind: input, shape index: {}]   ;;  %s7079_s10 = inlined_call_operand.vmem [shape: bf16[2,64,64], index: 10, kind: input, shape index: {}]   ;;  %s7080_s11 = inlined_call_operand.vmem [shape: f32[2,1,64], index: 11, kind: input, shape index: {}]   ;;  %s7081_s12 = inlined_call_operand.vmem [shape: f32[2,1,64], index: 12, kind: input, shape index: {}]   ;;  %s7082_s13 = inlined_call_operand.vmem [shape: bf16[2,64,256], index: 13, kind: input, shape index: {}]   ;;  %s7083_s14 = inlined_call_operand.vmem [shape: f32[2,1,256], index: 14, kind: input, shape index: {}]   ;;  %s7084_s15 = inlined_call_operand.vmem [shape: bf16[2,256,64], index: 15, kind: input, shape index: {}]   ;;  %s7085_s16 = inlined_call_operand.vmem [shape: f32[2,1,64], index: 16, kind: input, shape index: {}]   ;;  %s7086_s17 = inlined_call_operand.vmem [shape: f32[1,64], index: 17, kind: input, shape index: {}]   ;;  %s7087_s18 = inlined_call_operand.vmem [shape: f32[1,64], index: 18, kind: input, shape index: {}]   ;;  %s7088_s19 = inlined_call_operand.vmem [shape: f32[2,4,64], index: 19, kind: output, shape index: {}]  }
   0x1   :  { %7109 = sst [smem:[#allocation4_spill]] %s7069_s0  ;;  %s6248_s0 = smov 0  }
   0x2   :  { %7110 = sst [smem:[#allocation5_spill]] %s7070_s1 }
   0x3   :  { %7111 = sst [smem:[#allocation6_spill]] %s7071_s2 }
   0x4   :  { %7112 = sst [smem:[#allocation7_spill]] %s7072_s3 }
   0x5   :  { %7113 = sst [smem:[#allocation8_spill]] %s7079_s10 }
   0x6   :  { %7114 = sst [smem:[#allocation9_spill]] %s7086_s17 }
   0x7   :  { %7115 = sst [smem:[#allocation10_spill]] %s7087_s18 }
   0x8   :  { %7116 = sst [smem:[#allocation11_spill]] %s7088_s19 }
   0x9 LB: > { %7117 = sst [smem:[#allocation2_spill]] %s6135_s0  ;;  %s5054_s30 = sadd.s32 4294967295, %s6135_s0   ;;  %s6135_s0 = sphi %s6248_s0, %s29_s0  }
   0xa   : > { %p5058_p0 = scmp.ge.s32.totalorder %s6135_s0, 1  ;;  %p546_p1 = scmp.lt.s32.totalorder %s6135_s0, 3 }
   0xc   : > { %p547_p2 = pnand %p5058_p0, %p546_p1 }
   0xe   : > { %550 = sbr.rel (%p547_p2) target bundleno = 12261 (0x2fe5), region = 96 }
  0x15   : > { %p605_p3 = scmp.lt.s32.totalorder %s5054_s30, 1  ;;  %vm624_vm0 = vcmask 519168   ;;  %s7119_s22 = sld [smem:[#allocation4_spill]]  ;;  %v5939_v7 = vld [vmem:[%s7073_s4 + $0x4] ss:$8 sps:$4 sm:$0xff]   ;;  %v6137_v11 = vmov 0  }
  0x16   : > { %v5941_v8 = vld [vmem:[%s7073_s4] ss:$8 sps:$4 sm:$0xff]   ;;  %v5942_v9 = vld [vmem:[%s7073_s4 + $0x14] ss:$8 sps:$4 sm:$0xff]   ;;  %706 = vmatprep.subr.bf16.mxu0 %v5939_v7  ;;  %v5944_v10 = vld [vmem:[%s7073_s4 + $0x10] ss:$8 sps:$4 sm:$0xff]   ;;  %738 = vmatprep.mubr.bf16.mxu0 %v6137_v11 }
  0x17   : > { %s7141_s30 = smov (!%p605_p3, %s5054_s30), 1  ;;  %707 = vmatpush1.bf16.msra.mxu0 %v5941_v8  ;;  %v5945_v12 = vld [vmem:[%s7073_s4 + $0x24] ss:$8 sps:$4 sm:$0xff]   ;;  %v5947_v13 = vld [vmem:[%s7073_s4 + $0x20] ss:$8 sps:$4 sm:$0xff]   ;;  %s7120_s28 = sld [smem:[#allocation6_spill]] }
  0x18   : > { %7118 = sst [smem:[#allocation3_spill]] %s7141_s30  ;;  %s7091_s20 = sshll.u32 %s7141_s30, 2  ;;  %708 = vmatprep.subr.bf16.mxu0 %v5942_v9  ;;  %v5948_v14 = vld [vmem:[%s7073_s4 + $0x34] ss:$8 sps:$4 sm:$0xff]   ;;  %v5950_v15 = vld [vmem:[%s7073_s4 + $0x30] ss:$8 sps:$4 sm:$0xff]  }
  0x19   : > { %s7121_s1 = sld [smem:[#allocation7_spill]]  ;;  %vm702_vm1 = vcmask 523264   ;;  %v6138_v26 = vmov 0.0   ;;  %vm6139_vm2 = vmmov 0   ;;  %vm758_vm3 = vcmask 130048   ;;  %s7102_s23 = smov 112  }
  0x1a   : > { %5506 = vmatprep.subr.mxu1 %v6138_v26  ;;  %5508 = vmatprep.mubr.msk.f32.mxu1 %vm6139_vm2, %v6138_v26  ;;  %vm850_vm4 = vcmask 1043456   ;;  %vm834_vm5 = vcmask 27648   ;;  %s7100_s24 = smov 32   ;;  %s7096_s25 = smov 96   ;;  %vm846_vm6 = vcmask 31744   ;;  %vm1438_vm7 = vcmask 261120   ;;  %vm6470_vm9 = vmpackc.low %vm758_vm3, %vm758_vm3 }
  0x1b   : > { %s608_s2 = scalar_lea.vmem %s7119_s22, %s7091_s20  ;;  %709 = vmatpush1.bf16.msra.mxu0 %v5944_v10  ;;  %s7098_s22 = smov 48   ;;  %vm1440_vm8 = vcmask 392192   ;;  %vm1781_vm10 = vcmask 125952  }
  0x1c   : > { %v6264_v0 = vld [vmem:[%s608_s2] sm:$0xf]  ;;  %710 = vmatprep.subr.bf16.mxu0 %v5945_v12  ;;  %s7104_s2 = smov 64   ;;  %s7092_s3 = smov 16  }
  0x1d   : > { %v625_v1 = vsel %vm624_vm0, %v6264_v0, 0.0  ;;  %v5063_v20 = vld [vmem:[%s7120_s28] ss:$0 sm:$0xff]  ;;  %s7094_s26 = smov 80   ;;  %s5341_s29 = sshll.u32 %s7141_s30, 4 }
  0x1e   : > { %626 = vadd.xlane.f32.xlu0 %v625_v1  ;;  %s7122_s20 = sld [smem:[#allocation5_spill]]  ;;  %s7127_s21 = smov 96  }
  0x1f   : > { %711 = vmatpush1.bf16.msra.mxu0 %v5947_v13  ;;  %v5064_v22 = vld [vmem:[%s7121_s1] ss:$0 sm:$0xff]  ;;  %s7132_s10 = sld [smem:[#allocation8_spill]]  ;;  %s7134_s19 = sld [smem:[#allocation3_spill]] }
  0x20   : > { %712 = vmatprep.subr.bf16.mxu0 %v5948_v14 }
  0x23   : > { %713 = vmatpush1.bf16.msra.mxu0 %v5950_v15 }
  0x24   : > { %5531 = vmatprep.subr.mxu0 %v6138_v26 }
  0xab   : > { %v627_v2 = vpop.xlane.xlu0 %626 }
  0xac   : > { %v629_v3 = vmul.f32 0.015625, %v627_v2 }
  0xae   : > { %v630_v4 = vsub.f32 %v6264_v0, %v629_v3 }
  0xb0   : > { %v631_v5 = vmul.f32 %v630_v4, %v630_v4 }
  0xb2   : > { %v632_v6 = vsel %vm624_vm0, %v631_v5, 0.0 }
  0xb3   : > { %633 = vadd.xlane.f32.xlu0 %v632_v6 }
 0x140   : > { %v634_v16 = vpop.xlane.xlu0 %633 }
 0x141   : > { %v635_v17 = vmul.f32 0.015625, %v634_v16 }
 0x143   : > { %v636_v18 = vadd.f32 1e-05, %v635_v17 }
 0x145   : > { %6051 = vrsqrt.f32 %v636_v18 }
 0x14f   : > { %v6052_v19 = vpop.eup %6051 }
 0x150   : > { %v638_v21 = vmul.f32 %v6052_v19, %v630_v4 }
 0x152   : > { %v645_v23 = vmul.f32 %v5063_v20, %v638_v21 }
 0x154   : > { %v652_v24 = vadd.f32 %v5064_v22, %v645_v23 }
 0x156   : > { %v661_v25 = vpack.c.bf16 %v652_v24, %v652_v24 }
 0x158   : > { %5073 = vmatmul.mubr.msk.bf16.vlgmr.msra.gmra.mrb[0].mxu0 %vm702_vm1, %v661_v25 }
 0x159   : > { %5533 = vmatprep.mubr.msk.f32.mxu0 %vm6139_vm2, %v6138_v26 }
 0x22b   : > { %v6308_v27 = vpop.f32.mrb[0].mxu0 }
 0x22c   : > { %926 = vrot.lane.b32.xlu0 %v6308_v27, %s7098_s22  ;;  %756 = vrot.lane.b32.xlu1 %v6308_v27, %s7104_s2  ;;  %v6314_v28 = vpop.f32.mrb[1].mxu0  ;;  %s7130_s2 = smov 80  }
 0x22d   : > { %v744_v29 = vpop.f32.mrb[2].mxu0 }
 0x22e   : > { %v745_v30 = vpop.f32.mrb[3].mxu0 }
 0x29e   : > { %v757_v31 = vpop.permute.xlu1 %756  ;;  %v927_v41 = vpop.permute.xlu0 %926 }
 0x29f   : > { %5507 = vmatpush3.xpose.msk.msra.mxu1 %vm758_vm3, %v757_v31 }
 0x2a0   : > { %5511 = vmatprep.subr.mxu1 %v6138_v26 }
 0x2a2   : > { %5509 = vmatmul.mubr.msk.f32.vlgmr.msra.gmra.mrb[0].mxu1 %vm758_vm3, %v6308_v27 }
 0x2a3   : > { %5512 = vmatpush3.msk.msra.mxu1 %vm850_vm4, %v6314_v28  ;;  %5513 = vmatprep.mubr.msk.f32.mxu1 %vm6139_vm2, %v6138_v26 }
 0x2a4   : > { %5516 = vmatprep.subr.mxu1 %v6138_v26 }
 0x375   : > { %v829_v32 = vpop.f32.mrb[0].mxu1 }
 0x376   : > { %v833_v33 = vmul.f32 0.25, %v829_v32  ;;  %v5510_v34 = vpop.f32.mrb[1].mxu1  ;;  %v5951_v32 = vld [vmem:[%s7074_s5] sm:$0xff]  }
 0x377   : > { %v5953_v34 = vld [vmem:[%s7074_s5 + $0x10] sm:$0xff]  }
 0x378   : > { %v835_v35 = vsel %vm834_vm5, %v833_v33, -inf }
 0x379   : > { %836 = vmax.xlane.f32.xlu1 %v835_v35  ;;  %v5954_v35 = vld [vmem:[%s7074_s5 + $0x18] sm:$0xff]  }
 0x38a   : > { %1014 = vrot.lane.b32.xlu1 %v6314_v28, %s7102_s23 }
 0x38e   : > { %1093 = vrot.lane.b32.xlu1 %v6308_v27, %s7100_s24 }
 0x392   : > { %1091 = vrot.lane.b32.xlu1 %v6308_v27, %s7096_s25 }
 0x406   : > { %v837_v36 = vpop.xlane.xlu1 %836 }
 0x407   : > { %v838_v37 = vsub.f32 %v833_v33, %v837_v36  ;;  %v5952_v33 = vld [vmem:[%s7074_s5 + $0x8] sm:$0xff]  }
 0x409   : > { %v839_v38 = vmul.f32 1.442695, %v838_v37 }
 0x40a   : > { %v1015_v46 = vpop.permute.xlu1 %1014 }
 0x40b   : > { %6053 = vpow2.f32 %v839_v38 }
 0x40e   : > { %v1094_v58 = vpop.permute.xlu1 %1093 }
 0x412   : > { %v1092_v59 = vpop.permute.xlu1 %1091 }
 0x415   : > { %v6054_v39 = vpop.eup %6053 }
 0x416   : > { %v841_v40 = vsel %vm834_vm5, %v6054_v39, 0.0 }
 0x417   : > { %842 = vadd.xlane.f32.xlu0 %v841_v40 }
 0x42d   : > { %924 = vrot.lane.b32.xlu0 %v6308_v27, %s7102_s23  ;;  %s7131_s23 = smov 16  }
 0x4a4   : > { %v843_v42 = vpop.xlane.xlu0 %842 }
 0x4a5   : > { %6055 = vrcp.f32 %v843_v42 }
 0x4a8   : > { %v925_v45 = vpop.permute.xlu0 %924 }
 0x4af   : > { %v6056_v43 = vpop.eup %6055 }
 0x4b0   : > { %v845_v44 = vmul.f32 %v6056_v43, %v6054_v39 }
 0x4b2   : > { %5514 = vmatmul.mubr.msk.f32.vlgmr.msra.gmra.mrb[2].mxu1 %vm846_vm6, %v845_v44 }
 0x4b3   : > { %5517 = vmatpush3.xpose.msk.msra.mxu1 %vm758_vm3, %v927_v41  ;;  %5518 = vmatprep.mubr.msk.f32.mxu1 %vm6139_vm2, %v6138_v26 }
 0x4b4   : > { %5521 = vmatprep.subr.mxu1 %v6138_v26 }
 0x4b6   : > { %5519 = vmatmul.mubr.msk.f32.vlgmr.msra.gmra.mrb[4].mxu1 %vm758_vm3, %v925_v45 }
 0x4b7   : > { %5522 = vmatpush3.msk.msra.mxu1 %vm850_vm4, %v1015_v46  ;;  %5523 = vmatprep.mubr.msk.f32.mxu1 %vm6139_vm2, %v6138_v26 }
 0x4b8   : > { %5526 = vmatprep.subr.mxu1 %v6138_v26 }
 0x585   : > { %v6345_v47 = vpop.f32.mrb[2].mxu1 }
 0x586   : > { %v5515_v48 = vpop.f32.mrb[3].mxu1 }
 0x589   : > { %v998_v49 = vpop.f32.mrb[4].mxu1 }
 0x58a   : > { %v1002_v50 = vmul.f32 0.25, %v998_v49  ;;  %v5520_v51 = vpop.f32.mrb[5].mxu1 }
 0x58c   : > { %v1003_v52 = vsel %vm834_vm5, %v1002_v50, -inf }
 0x58d   : > { %1004 = vmax.xlane.f32.xlu0 %v1003_v52 }
 0x5a3   : > { %1260 = vrot.lane.b32.xlu0 %v6308_v27, %s7092_s3 }
 0x61a   : > { %v1005_v53 = vpop.xlane.xlu0 %1004 }
 0x61b   : > { %v1006_v54 = vsub.f32 %v1002_v50, %v1005_v53  ;;  %v5955_v53 = vld [vmem:[%s7078_s9] sm:$0xff]  }
 0x61d   : > { %v1007_v55 = vmul.f32 1.442695, %v1006_v54  ;;  %v5956_v54 = vld [vmem:[%s7078_s9 + $0x8] sm:$0xff]  }
 0x61e   : > { %v1261_v63 = vpop.permute.xlu0 %1260 }
 0x61f   : > { %6057 = vpow2.f32 %v1007_v55 }
 0x629   : > { %v6058_v56 = vpop.eup %6057 }
 0x62a   : > { %v1009_v57 = vsel %vm834_vm5, %v6058_v56, 0.0 }
 0x62b   : > { %1010 = vadd.xlane.f32.xlu1 %v1009_v57 }
 0x63c   : > { %1258 = vrot.lane.b32.xlu1 %v6308_v27, %s7094_s26 }
 0x6b8   : > { %v1011_v60 = vpop.xlane.xlu1 %1010 }
 0x6b9   : > { %6059 = vrcp.f32 %v1011_v60 }
 0x6bc   : > { %v1259_v1 = vpop.permute.xlu1 %1258 }
 0x6c3   : > { %v6060_v61 = vpop.eup %6059 }
 0x6c4   : > { %v1013_v62 = vmul.f32 %v6060_v61, %v6058_v56 }
 0x6c6   : > { %5524 = vmatmul.mubr.msk.f32.vlgmr.msra.gmra.mrb[6].mxu1 %vm846_vm6, %v1013_v62  ;;  %v5958_v62 = vld [vmem:[%s7078_s9 + $0x18] sm:$0xff]  }
 0x6c7   : > { %5527 = vmatpush3.xpose.msk.msra.mxu1 %vm758_vm3, %v1094_v58  ;;  %5528 = vmatprep.mubr.msk.f32.mxu1 %vm6139_vm2, %v6138_v26 }
 0x6c8   : > { %5536 = vmatprep.subr.mxu1 %v6138_v26 }
 0x6ca   : > { %5529 = vmatmul.mubr.msk.f32.vlgmr.msra.gmra.mrb[8].mxu1 %vm758_vm3, %v1092_v59  ;;  %v5957_v59 = vld [vmem:[%s7078_s9 + $0x10] sm:$0xff]  }
 0x6cb   : > { %5537 = vmatpush3.xpose.msk.msra.mxu1 %vm758_vm3, %v1261_v63  ;;  %5538 = vmatprep.mubr.msk.f32.mxu1 %vm6139_vm2, %v6138_v26 }
 0x6cc   : > { %5570 = vmatprep.subr.bf16.mxu1 %v6138_v26 }
 0x6ce   : > { %5539 = vmatmul.mubr.msk.f32.vlgmr.msra.gmra.mrb[10].mxu1 %vm758_vm3, %v1259_v1  ;;  %v5959_v1 = vld [vmem:[%s7077_s8] sm:$0xff]  }
 0x6cf   : > { %5578 = vmatprep.mubr.msk.bf16.mxu1 %vm6139_vm2, %v6138_v26  ;;  %5571 = vmatpush3.bf16.msra.mxu1 %v5955_v53 }
 0x6d0   : > { %5572 = vmatprep.subr.bf16.mxu1 %v6138_v26 }
 0x6d3   : > { %5573 = vmatpush3.bf16.msra.mxu1 %v5956_v54 }
 0x6d4   : > { %5574 = vmatprep.subr.bf16.mxu1 %v6138_v26 }
 0x6d7   : > { %5575 = vmatpush3.bf16.msra.mxu1 %v5957_v59 }
 0x6d8   : > { %5576 = vmatprep.subr.bf16.mxu1 %v6138_v26 }
 0x6db   : > { %5577 = vmatpush3.bf16.msra.mxu1 %v5958_v62 }
 0x799   : > { %v1087_v2 = vpop.f32.mrb[6].mxu1 }
 0x79a   : > { %v5525_v3 = vpop.f32.mrb[7].mxu1 }
 0x79b   : > { %v5961_v3 = vld [vmem:[%s7077_s8 + $0x10] sm:$0xff]  }
 0x79d   : > { %v1165_v4 = vpop.f32.mrb[8].mxu1 }
 0x79e   : > { %v1169_v5 = vmul.f32 0.25, %v1165_v4  ;;  %v5530_v6 = vpop.f32.mrb[9].mxu1  ;;  %v5962_v4 = vld [vmem:[%s7077_s8 + $0x18] sm:$0xff]  }
 0x7a0   : > { %v1170_v7 = vsel %vm834_vm5, %v1169_v5, -inf }
 0x7a1   : > { %1171 = vmax.xlane.f32.xlu1 %v1170_v7  ;;  %v1332_v8 = vpop.f32.mrb[10].mxu1 }
 0x7a2   : > { %v1336_v9 = vmul.f32 0.25, %v1332_v8  ;;  %v5540_v10 = vpop.f32.mrb[11].mxu1 }
 0x7a3   : > { %v5095_v10 = vld [vmem:[%s7075_s6] ss:$0 sm:$0xff] }
 0x7a4   : > { %v1337_v12 = vsel %vm834_vm5, %v1336_v9, -inf }
 0x7a5   : > { %1338 = vmax.xlane.f32.xlu0 %v1337_v12 }
 0x7bb   : > { %1348 = vrot.lane.b32.xlu0 %v6314_v28, %s7094_s26  ;;  %s7125_s26 = smov 64  }
 0x82e   : > { %v1172_v13 = vpop.xlane.xlu1 %1171 }
 0x82f   : > { %v1173_v14 = vsub.f32 %v1169_v5, %v1172_v13  ;;  %v6147_v5 = vmov 0.0|0.0   ;;  %v5096_v13 = vld [vmem:[%s7076_s7] ss:$0 sm:$0xff] }
 0x830   : > { %5805 = vmatprep.subr.bf16.mxu1 %v6147_v5 }
 0x831   : > { %v1174_v15 = vmul.f32 1.442695, %v1173_v14 }
 0x832   : > { %v1339_v16 = vpop.xlane.xlu0 %1338 }
 0x833   : > { %6061 = vpow2.f32 %v1174_v15  ;;  %v1340_v17 = vsub.f32 %v1336_v9, %v1339_v16 }
 0x835   : > { %v1341_v18 = vmul.f32 1.442695, %v1340_v17 }
 0x836   : > { %v1349_v30 = vpop.permute.xlu0 %1348 }
 0x837   : > { %6063 = vpow2.f32 %v1341_v18 }
 0x83d   : > { %v6062_v19 = vpop.eup %6061 }
 0x83e   : > { %v1176_v20 = vsel %vm834_vm5, %v6062_v19, 0.0 }
 0x83f   : > { %1177 = vadd.xlane.f32.xlu1 %v1176_v20 }
 0x841   : > { %v6064_v21 = vpop.eup %6063 }
 0x842   : > { %v1343_v22 = vsel %vm834_vm5, %v6064_v21, 0.0 }
 0x843   : > { %1344 = vadd.xlane.f32.xlu1 %v1343_v22 }
 0x854   : > { %1181 = vrot.lane.b32.xlu1 %v6314_v28, %s7096_s25  ;;  %s613_s25 = scalar_lea.vmem %s7122_s20, %s5341_s29  ;;  %s7126_s29 = smov 112  }
 0x855   : > { %v620_v60 = vld [vmem:[%s613_s25] sm:$0xff]  ;;  %v621_v61 = vld [vmem:[%s613_s25 + $0x8] sm:$0xff] }
 0x856   : > { %v6436_v63 = vpack.c.bf16 %v621_v61, %v620_v60 }
 0x858   : > { %1426 = vrot.lane.b32.xlu1 %v1087_v2, %s7092_s3  ;;  %5579 = vmatmul.mubr.msk.bf16.vlgmr.msra.gmra.mrb[12].mxu1 %vm702_vm1, %v6436_v63  ;;  %v5960_v2 = vld [vmem:[%s7077_s8 + $0x8] sm:$0xff]   ;;  %s7138_s3 = sld [smem:[#allocation11_spill]] }
 0x859   : > { %5607 = vmatprep.mubr.msk.f32.mxu1 %vm6139_vm2, %v6138_v26 }
 0x8cc   : > { %v1178_v23 = vpop.xlane.xlu1 %1177 }
 0x8cd   : > { %6065 = vrcp.f32 %v1178_v23 }
 0x8d0   : > { %v1345_v24 = vpop.xlane.xlu1 %1344 }
 0x8d1   : > { %6067 = vrcp.f32 %v1345_v24 }
 0x8d4   : > { %v1182_v25 = vpop.permute.xlu1 %1181 }
 0x8d5   : > { %5532 = vmatpush3.msk.msra.mxu0 %vm850_vm4, %v1182_v25 }
 0x8d6   : > { %5541 = vmatprep.subr.mxu0 %v6138_v26 }
 0x8d7   : > { %v6066_v27 = vpop.eup %6065 }
 0x8d8   : > { %v1180_v29 = vmul.f32 %v6066_v27, %v6062_v19  ;;  %v1427_v40 = vpop.permute.xlu1 %1426 }
 0x8d9   : > { %v1437_v42 = vsel %vm758_vm3, %v6345_v47, %v1427_v40 }
 0x8da   : > { %5534 = vmatmul.mubr.msk.f32.vlgmr.msra.gmra.mrb[4].mxu0 %vm846_vm6, %v1180_v29 }
 0x8db   : > { %v6068_v31 = vpop.eup %6067  ;;  %5542 = vmatpush3.msk.msra.mxu0 %vm850_vm4, %v1349_v30  ;;  %5543 = vmatprep.mubr.msk.f32.mxu0 %vm6139_vm2, %v6138_v26 }
 0x8dc   : > { %v1347_v28 = vmul.f32 %v6068_v31, %v6064_v21  ;;  %5546 = vmatprep.subr.bf16.mxu0 %v6138_v26 }
 0x8de   : > { %5544 = vmatmul.mubr.msk.f32.vlgmr.msra.gmra.mrb[6].mxu0 %vm846_vm6, %v1347_v28 }
 0x8df   : > { %5554 = vmatprep.mubr.msk.bf16.mxu0 %vm6139_vm2, %v6138_v26  ;;  %5547 = vmatpush3.bf16.msra.mxu0 %v5951_v32 }
 0x8e0   : > { %5548 = vmatprep.subr.bf16.mxu0 %v6138_v26 }
 0x8e3   : > { %5549 = vmatpush3.bf16.msra.mxu0 %v5952_v33 }
 0x8e4   : > { %5550 = vmatprep.subr.bf16.mxu0 %v6138_v26 }
 0x8e7   : > { %5551 = vmatpush3.bf16.msra.mxu0 %v5953_v34 }
 0x8e8   : > { %5552 = vmatprep.subr.bf16.mxu0 %v6138_v26 }
 0x8eb   : > { %5553 = vmatpush3.bf16.msra.mxu0 %v5954_v35 }
 0x8ec   : > { %5558 = vmatprep.subr.bf16.mxu0 %v6138_v26 }
 0x92b   : > { %v1686_v17 = vpop.f32.mrb[12].mxu1 }
 0x92c   : > { %v5580_v18 = vpop.f32.mrb[13].mxu1 }
 0x92d   : > { %v1689_v19 = vpop.f32.mrb[14].mxu1 }
 0x92e   : > { %v5581_v21 = vpop.f32.mrb[15].mxu1  ;;  %v6474_v22 = vpack.i.bf16 %v1689_v19, %v1686_v17  ;;  %v5795_v23 = vpack.c.bf16 %v1689_v19, %v1686_v17 }
 0x9ad   : > { %v1254_v36 = vpop.f32.mrb[4].mxu0 }
 0x9ae   : > { %1430 = vrot.lane.b32.xlu1 %v1254_v36, %s7100_s24  ;;  %v5535_v37 = vpop.f32.mrb[5].mxu0  ;;  %s7129_s24 = smov 48  }
 0x9b1   : > { %v1421_v38 = vpop.f32.mrb[6].mxu0 }
 0x9b2   : > { %1434 = vrot.lane.b32.xlu1 %v1421_v38, %s7098_s22  ;;  %v5545_v39 = vpop.f32.mrb[7].mxu0  ;;  %s7128_s22 = smov 32  }
 0xa20   : > { %v1431_v41 = vpop.permute.xlu1 %1430 }
 0xa21   : > { %v1439_v43 = vsel %vm1438_vm7, %v1437_v42, %v1431_v41 }
 0xa24   : > { %v1435_v44 = vpop.permute.xlu1 %1434 }
 0xa25   : > { %v1441_v45 = vsel %vm1440_vm8, %v1439_v43, %v1435_v44 }
 0xa26   : > { %v1442_v46 = vpack.c.bf16 %v1441_v45, %v1441_v45 }
 0xa28   : > { %5555 = vmatmul.mubr.msk.bf16.vlgmr.msra.gmra.mrb[8].mxu0 %vm702_vm1, %v1442_v46 }
 0xa29   : > { %5566 = vmatprep.mubr.msk.bf16.mxu0 %vm6139_vm2, %v6138_v26  ;;  %5559 = vmatpush3.bf16.msra.mxu0 %v5959_v1 }
 0xa2a   : > { %5560 = vmatprep.subr.bf16.mxu0 %v6138_v26 }
 0xa2d   : > { %5561 = vmatpush3.bf16.msra.mxu0 %v5960_v2 }
 0xa2e   : > { %5562 = vmatprep.subr.bf16.mxu0 %v6138_v26 }
 0xa31   : > { %5563 = vmatpush3.bf16.msra.mxu0 %v5961_v3 }
 0xa32   : > { %5564 = vmatprep.subr.bf16.mxu0 %v6138_v26 }
 0xa35   : > { %5565 = vmatpush3.bf16.msra.mxu0 %v5962_v4 }
 0xa36   : > { %5794 = vmatprep.subr.bf16.mxu0 %v6147_v5 }
 0xafb   : > { %v1504_v48 = vpop.f32.mrb[8].mxu0 }
 0xafc   : > { %v6411_v49 = vadd.f32 %v1504_v48, %v6264_v0  ;;  %v5556_v50 = vpop.f32.mrb[9].mxu0 }
 0xafd   : > { %v1507_v51 = vpop.f32.mrb[10].mxu0 }
 0xafe   : > { %v5557_v52 = vpop.f32.mrb[11].mxu0  ;;  %v1513_v47 = vsel %vm624_vm0, %v6411_v49, 0.0 }
 0xaff   : > { %1514 = vadd.xlane.f32.xlu0 %v1513_v47 }
 0xb8c   : > { %v1515_v0 = vpop.xlane.xlu0 %1514 }
 0xb8d   : > { %v1516_v55 = vmul.f32 0.015625, %v1515_v0 }
 0xb8f   : > { %v1517_v56 = vsub.f32 %v6411_v49, %v1516_v55 }
 0xb91   : > { %v1518_v57 = vmul.f32 %v1517_v56, %v1517_v56 }
 0xb93   : > { %v1519_v58 = vsel %vm624_vm0, %v1518_v57, 0.0 }
 0xb94   : > { %1520 = vadd.xlane.f32.xlu1 %v1519_v58 }
 0xba5   : > { %5870 = vrot.lane.b32.xlu1 %v6474_v22, %s7125_s26 }
 0xc21   : > { %v1521_v6 = vpop.xlane.xlu1 %1520 }
 0xc22   : > { %v1522_v7 = vmul.f32 0.015625, %v1521_v6 }
 0xc24   : > { %v1523_v8 = vadd.f32 1e-05, %v1522_v7 }
 0xc25   : > { %v5871_v24 = vpop.permute.xlu1 %5870 }
 0xc26   : > { %6069 = vrsqrt.f32 %v1523_v8  ;;  %v5873_v25 = vunpack.i.h.bf16 %v5871_v24  ;;  %v5872_v27 = vunpack.i.l.bf16 %v5871_v24 }
 0xc28   : > { %v5799_v29 = vpack.c.bf16 %v5873_v25, %v5872_v27 }
 0xc30   : > { %v6070_v9 = vpop.eup %6069 }
 0xc31   : > { %v1525_v12 = vmul.f32 %v6070_v9, %v1517_v56 }
 0xc33   : > { %v1532_v14 = vmul.f32 %v5095_v10, %v1525_v12 }
 0xc35   : > { %v1539_v15 = vadd.f32 %v5096_v13, %v1532_v14 }
 0xc37   : > { %v1548_v16 = vpack.c.bf16 %v1539_v15, %v1539_v15 }
 0xc39   : > { %5567 = vmatmul.mubr.msk.bf16.vlgmr.msra.gmra.mrb[12].mxu0 %vm702_vm1, %v1548_v16 }
 0xc3a   : > { %5586 = vmatprep.mubr.msk.f32.mxu0 %vm6139_vm2, %v6138_v26  ;;  %5797 = vmatpush3.bf16.xpose.msk.msra.mxu0 %vm6470_vm9, %v5795_v23 }
 0xc3b   : > { %5798 = vmatprep.subr.bf16.mxu0 %v6147_v5 }
 0xd0c   : > { %v6481_v30 = vpop.f32.mrb[12].mxu0 }
 0xd0d   : > { %1872 = vrot.lane.b32.xlu1 %v6481_v30, %s7126_s29  ;;  %v5568_v31 = vpop.f32.mrb[13].mxu0  ;;  %5587 = vmatmul.mubr.msk.f32.vlgmr.msra.gmra.mrb[16].mxu0 %vm758_vm3, %v6481_v30 }
 0xd0e   : > { %v1613_v28 = vpop.f32.mrb[14].mxu0  ;;  %5800 = vmatpush3.bf16.msra.mxu0 %v5799_v29  ;;  %5593 = vmatprep.mubr.msk.f32.mxu0 %vm6139_vm2, %v6138_v26 }
 0xd0f   : > { %v5569_v32 = vpop.f32.mrb[15].mxu0  ;;  %5801 = vmatprep.subr.bf16.mxu0 %v6147_v5 }
 0xd11   : > { %5880 = vrot.lane.b32.xlu1 %v6474_v22, %s7127_s21 }
 0xd7f   : > { %v1873_v44 = vpop.permute.xlu1 %1872 }
 0xd83   : > { %v5881_v52 = vpop.permute.xlu1 %5880 }
 0xd84   : > { %v5883_v47 = vunpack.i.h.bf16 %v5881_v52  ;;  %v5882_v53 = vunpack.i.l.bf16 %v5881_v52 }
 0xd86   : > { %v5809_v54 = vpack.c.bf16 %v5883_v47, %v5882_v53 }
 0xde0   : > { %v1776_v33 = vpop.f32.mrb[16].mxu0 }
 0xde1   : > { %v1780_v34 = vmul.f32 0.25, %v1776_v33  ;;  %v5588_v35 = vpop.f32.mrb[17].mxu0 }
 0xde3   : > { %v1782_v36 = vsel %vm1781_vm10, %v1780_v34, -inf }
 0xde4   : > { %1783 = vmax.xlane.f32.xlu0 %v1782_v36 }
 0xe71   : > { %v1784_v37 = vpop.xlane.xlu0 %1783 }
 0xe72   : > { %v1785_v38 = vsub.f32 %v1780_v34, %v1784_v37 }
 0xe74   : > { %v1786_v39 = vmul.f32 1.442695, %v1785_v38 }
 0xe76   : > { %6071 = vpow2.f32 %v1786_v39 }
 0xe80   : > { %v6072_v40 = vpop.eup %6071 }
 0xe81   : > { %v1788_v41 = vsel %vm1781_vm10, %v6072_v40, 0.0 }
 0xe82   : > { %1789 = vadd.xlane.f32.xlu0 %v1788_v41 }
 0xe98   : > { %5875 = vrot.lane.b32.xlu0 %v6474_v22, %s7126_s29 }
 0xe9c   : > { %2045 = vrot.lane.b32.xlu0 %v6481_v30, %s7127_s21 }
 0xf0f   : > { %v1790_v42 = vpop.xlane.xlu0 %1789 }
 0xf10   : > { %6073 = vrcp.f32 %v1790_v42 }
 0xf13   : > { %v5876_v43 = vpop.permute.xlu0 %5875 }
 0xf14   : > { %v5878_v45 = vunpack.i.h.bf16 %v5876_v43  ;;  %v5877_v46 = vunpack.i.l.bf16 %v5876_v43 }
 0xf16   : > { %v5802_v51 = vpack.c.bf16 %v5878_v45, %v5877_v46 }
 0xf17   : > { %v2046_v0 = vpop.permute.xlu0 %2045 }
 0xf1a   : > { %v6074_v48 = vpop.eup %6073 }
 0xf1b   : > { %v1792_v50 = vmul.f32 %v6074_v48, %v6072_v40 }
 0xf1d   : > { %5594 = vmatmul.mubr.msk.f32.vlgmr.msra.gmra.mrb[18].mxu0 %vm758_vm3, %v1792_v50 }
 0xf1e   : > { %5804 = vmatpush3.bf16.xpose.msk.msra.mxu0 %vm6470_vm9, %v5802_v51  ;;  %5600 = vmatprep.mubr.msk.f32.mxu0 %vm6139_vm2, %v6138_v26 }
 0xf1f   : > { %5808 = vmatprep.subr.bf16.mxu0 %v6147_v5 }
 0xf25   : > { %5601 = vmatmul.mubr.msk.f32.vlgmr.msra.gmra.mrb[20].mxu0 %vm758_vm3, %v1873_v44 }
 0xf26   : > { %5811 = vmatpush3.bf16.xpose.msk.msra.mxu0 %vm6470_vm9, %v5809_v54  ;;  %5614 = vmatprep.mubr.msk.f32.mxu0 %vm6139_vm2, %v6138_v26 }
 0xf27   : > { %5819 = vmatprep.subr.bf16.mxu0 %v6147_v5 }
 0xf2d   : > { %5615 = vmatmul.mubr.msk.f32.vlgmr.msra.gmra.mrb[22].mxu0 %vm758_vm3, %v2046_v0 }
 0xf2e   : > { %5635 = vmatprep.mubr.msk.f32.mxu0 %vm6139_vm2, %v6138_v26 }
 0xff0   : > { %v6513_v55 = vpop.f32.mrb[18].mxu0 }
 0xff1   : > { %v5595_v56 = vpop.f32.mrb[19].mxu0 }
 0xff8   : > { %v1950_v57 = vpop.f32.mrb[20].mxu0 }
 0xff9   : > { %v1954_v58 = vmul.f32 0.25, %v1950_v57  ;;  %v5602_v59 = vpop.f32.mrb[21].mxu0 }
 0xffa   : > { %v5965_v59 = vld [vmem:[%s7132_s10 + $0x10] sm:$0xff]  }
 0xffb   : > { %v1955_v60 = vsel %vm1781_vm10, %v1954_v58, -inf }
 0xffc   : > { %1956 = vmax.xlane.f32.xlu1 %v1955_v60  ;;  %v5966_v60 = vld [vmem:[%s7132_s10 + $0x18] sm:$0xff]  }
0x1000   : > { %v2123_v61 = vpop.f32.mrb[22].mxu0 }
0x1001   : > { %v2127_v62 = vmul.f32 0.25, %v2123_v61  ;;  %v5616_v1 = vpop.f32.mrb[23].mxu0 }
0x1003   : > { %v2128_v2 = vsel %vm1781_vm10, %v2127_v62, -inf }
0x1004   : > { %2129 = vmax.xlane.f32.xlu0 %v2128_v2 }
0x100d   : > { %5890 = vrot.lane.b32.xlu1 %v6474_v22, %s7128_s22 }
0x1089   : > { %v1957_v3 = vpop.xlane.xlu1 %1956 }
0x108a   : > { %v1958_v4 = vsub.f32 %v1954_v58, %v1957_v3  ;;  %v5964_v58 = vld [vmem:[%s7132_s10 + $0x8] sm:$0xff]  }
0x108c   : > { %v1959_v6 = vmul.f32 1.442695, %v1958_v4 }
0x108d   : > { %v5891_v16 = vpop.permute.xlu1 %5890 }
0x108e   : > { %6075 = vpow2.f32 %v1959_v6  ;;  %v5893_v24 = vunpack.i.h.bf16 %v5891_v16  ;;  %v5892_v25 = vunpack.i.l.bf16 %v5891_v16 }
0x1090   : > { %v5813_v31 = vpack.c.bf16 %v5893_v24, %v5892_v25  ;;  %v5970_v24 = vld [vmem:[%s7082_s13 + $0x10] ss:$8 sps:$4 sm:$0xff]   ;;  %v5975_v25 = vld [vmem:[%s7082_s13 + $0x24] ss:$8 sps:$4 sm:$0xff]  }
0x1091   : > { %v2130_v7 = vpop.xlane.xlu0 %2129 }
0x1092   : > { %v2131_v8 = vsub.f32 %v2127_v62, %v2130_v7 }
0x1094   : > { %v2132_v9 = vmul.f32 1.442695, %v2131_v8 }
0x1096   : > { %6077 = vpow2.f32 %v2132_v9 }
0x1098   : > { %v6076_v10 = vpop.eup %6075 }
0x1099   : > { %v1961_v12 = vsel %vm1781_vm10, %v6076_v10, 0.0 }
0x109a   : > { %1962 = vadd.xlane.f32.xlu0 %v1961_v12 }
0x10a0   : > { %v6078_v13 = vpop.eup %6077 }
0x10a1   : > { %v2134_v14 = vsel %vm1781_vm10, %v6078_v13, 0.0 }
0x10a2   : > { %2135 = vadd.xlane.f32.xlu1 %v2134_v14 }
0x10b0   : > { %5885 = vrot.lane.b32.xlu0 %v6474_v22, %s7129_s24 }
0x10b3   : > { %5895 = vrot.lane.b32.xlu1 %v6474_v22, %s7130_s2 }
0x10b4   : > { %2218 = vrot.lane.b32.xlu0 %v6481_v30, %s7130_s2 }
0x1127   : > { %v1963_v15 = vpop.xlane.xlu0 %1962 }
0x1128   : > { %6079 = vrcp.f32 %v1963_v15 }
0x112b   : > { %v5886_v17 = vpop.permute.xlu0 %5885 }
0x112c   : > { %v5888_v18 = vunpack.i.h.bf16 %v5886_v17  ;;  %v5887_v19 = vunpack.i.l.bf16 %v5886_v17 }
0x112e   : > { %v5806_v21 = vpack.c.bf16 %v5888_v18, %v5887_v19 }
0x112f   : > { %v2136_v23 = vpop.xlane.xlu1 %2135  ;;  %v2219_v36 = vpop.permute.xlu0 %2218 }
0x1130   : > { %6081 = vrcp.f32 %v2136_v23  ;;  %5807 = vmatpush3.bf16.msra.mxu1 %v5806_v21  ;;  %v5967_v21 = vld [vmem:[%s7082_s13] ss:$8 sps:$4 sm:$0xff]   ;;  %v5972_v23 = vld [vmem:[%s7082_s13 + $0x14] ss:$8 sps:$4 sm:$0xff]  }
0x1131   : > { %5812 = vmatprep.subr.bf16.mxu1 %v6147_v5 }
0x1132   : > { %v6080_v27 = vpop.eup %6079 }
0x1133   : > { %v1965_v29 = vmul.f32 %v6080_v27, %v6076_v10  ;;  %v5896_v30 = vpop.permute.xlu1 %5895  ;;  %v5973_v27 = vld [vmem:[%s7082_s13 + $0x20] ss:$8 sps:$4 sm:$0xff]  }
0x1134   : > { %v5898_v28 = vunpack.i.h.bf16 %v5896_v30  ;;  %v5897_v32 = vunpack.i.l.bf16 %v5896_v30  ;;  %v5979_v30 = vld [vmem:[%s7084_s15 + $0x40] sm:$0xff]  }
0x1135   : > { %5608 = vmatmul.mubr.msk.f32.vlgmr.msra.gmra.mrb[16].mxu1 %vm758_vm3, %v1965_v29  ;;  %v5978_v29 = vld [vmem:[%s7082_s13 + $0x34] ss:$8 sps:$4 sm:$0xff]  }
0x1136   : > { %5814 = vmatpush3.bf16.msra.mxu1 %v5813_v31  ;;  %5621 = vmatprep.mubr.msk.f32.mxu1 %vm6139_vm2, %v6138_v26  ;;  %v5816_v35 = vpack.c.bf16 %v5898_v28, %v5897_v32  ;;  %v5976_v31 = vld [vmem:[%s7082_s13 + $0x30] ss:$8 sps:$4 sm:$0xff]   ;;  %v5980_v28 = vld [vmem:[%s7084_s15] sm:$0xff]   ;;  %v5981_v32 = vld [vmem:[%s7084_s15 + $0x48] sm:$0xff]  }
0x1137   : > { %5815 = vmatprep.subr.bf16.mxu1 %v6147_v5 }
0x113a   : > { %v6082_v33 = vpop.eup %6081 }
0x113b   : > { %v2138_v34 = vmul.f32 %v6082_v33, %v6078_v13  ;;  %v5982_v33 = vld [vmem:[%s7084_s15 + $0x8] sm:$0xff]  }
0x113d   : > { %5622 = vmatmul.mubr.msk.f32.vlgmr.msra.gmra.mrb[18].mxu1 %vm758_vm3, %v2138_v34  ;;  %v5983_v34 = vld [vmem:[%s7084_s15 + $0x50] sm:$0xff]  }
0x113e   : > { %5628 = vmatprep.mubr.msk.f32.mxu1 %vm6139_vm2, %v6138_v26 }
0x113f   : > { %5818 = vmatpush3.bf16.xpose.msk.msra.mxu1 %vm6470_vm9, %v5816_v35  ;;  %v5984_v35 = vld [vmem:[%s7084_s15 + $0x10] sm:$0xff]  }
0x1146   : > { %5629 = vmatmul.mubr.msk.f32.vlgmr.msra.gmra.mrb[20].mxu1 %vm758_vm3, %v2219_v36  ;;  %v5985_v36 = vld [vmem:[%s7084_s15 + $0x58] sm:$0xff]  }
0x1147   : > { %2600 = vmatprep.mubr.bf16.mxu1 %v6137_v11 }
0x1208   : > { %v2041_v37 = vpop.f32.mrb[16].mxu1 }
0x1209   : > { %v5609_v38 = vpop.f32.mrb[17].mxu1 }
0x120a   : > { %v5987_v38 = vld [vmem:[%s7084_s15 + $0x60] sm:$0xff]  }
0x1210   : > { %v2214_v39 = vpop.f32.mrb[18].mxu1 }
0x1211   : > { %v5623_v40 = vpop.f32.mrb[19].mxu1 }
0x1212   : > { %v5989_v40 = vld [vmem:[%s7084_s15 + $0x68] sm:$0xff]  }
0x1219   : > { %v2296_v41 = vpop.f32.mrb[20].mxu1 }
0x121a   : > { %v2300_v42 = vmul.f32 0.25, %v2296_v41  ;;  %v5630_v43 = vpop.f32.mrb[21].mxu1  ;;  %v5990_v41 = vld [vmem:[%s7084_s15 + $0x28] sm:$0xff]  }
0x121c   : > { %v2301_v44 = vsel %vm1781_vm10, %v2300_v42, -inf }
0x121d   : > { %2302 = vmax.xlane.f32.xlu1 %v2301_v44 }
0x122e   : > { %2392 = vrot.lane.b32.xlu1 %v2041_v37, %s7131_s23  ;;  %v5986_v37 = vld [vmem:[%s7084_s15 + $0x18] sm:$0xff]  }
0x1232   : > { %2396 = vrot.lane.b32.xlu1 %v2214_v39, %s7128_s22  ;;  %v5988_v39 = vld [vmem:[%s7084_s15 + $0x20] sm:$0xff]  }
0x12aa   : > { %v2303_v45 = vpop.xlane.xlu1 %2302 }
0x12ab   : > { %v2304_v46 = vsub.f32 %v2300_v42, %v2303_v45 }
0x12ad   : > { %v2305_v48 = vmul.f32 1.442695, %v2304_v46  ;;  %v5128_v46 = vld [vmem:[%s7080_s11] ss:$0 sm:$0xff] }
0x12ae   : > { %v2393_v1 = vpop.permute.xlu1 %2392 }
0x12af   : > { %6083 = vpow2.f32 %v2305_v48  ;;  %v2403_v3 = vsel %vm758_vm3, %v6513_v55, %v2393_v1 }
0x12b2   : > { %v2397_v2 = vpop.permute.xlu1 %2396 }
0x12b3   : > { %v2404_v4 = vsel %vm1438_vm7, %v2403_v3, %v2397_v2 }
0x12b9   : > { %v6084_v50 = vpop.eup %6083 }
0x12ba   : > { %v2307_v51 = vsel %vm1781_vm10, %v6084_v50, 0.0 }
0x12bb   : > { %2308 = vadd.xlane.f32.xlu0 %v2307_v51 }
0x12d1   : > { %5900 = vrot.lane.b32.xlu0 %v6474_v22, %s7131_s23  ;;  %v5963_v22 = vld [vmem:[%s7132_s10] sm:$0xff]  }
0x1348   : > { %v2309_v52 = vpop.xlane.xlu0 %2308 }
0x1349   : > { %6085 = vrcp.f32 %v2309_v52 }
0x134c   : > { %v5901_v47 = vpop.permute.xlu0 %5900 }
0x134d   : > { %v5903_v53 = vunpack.i.h.bf16 %v5901_v47  ;;  %v5902_v54 = vunpack.i.l.bf16 %v5901_v47 }
0x134f   : > { %v5820_v0 = vpack.c.bf16 %v5903_v53, %v5902_v54  ;;  %v5991_v53 = vld [vmem:[%s7084_s15 + $0x70] sm:$0xff]  }
0x1350   : > { %v5992_v54 = vld [vmem:[%s7084_s15 + $0x30] sm:$0xff]  }
0x1351   : > { %5821 = vmatpush3.bf16.msra.mxu0 %v5820_v0  ;;  %v5993_v0 = vld [vmem:[%s7084_s15 + $0x78] sm:$0xff]  }
0x1352   : > { %5638 = vmatprep.subr.bf16.mxu0 %v6138_v26 }
0x1353   : > { %v6086_v56 = vpop.eup %6085 }
0x1354   : > { %v2311_v57 = vmul.f32 %v6086_v56, %v6084_v50  ;;  %v5129_v50 = vld [vmem:[%s7081_s12] ss:$0 sm:$0xff]  ;;  %v5994_v56 = vld [vmem:[%s7084_s15 + $0x38] sm:$0xff]  }
0x1356   : > { %5636 = vmatmul.mubr.msk.f32.vlgmr.msra.gmra.mrb[24].mxu0 %vm758_vm3, %v2311_v57  ;;  %v2515_v57 = vlaneseq }
0x1357   : > { %5646 = vmatprep.mubr.msk.bf16.mxu0 %vm6139_vm2, %v6138_v26  ;;  %5639 = vmatpush3.bf16.msra.mxu0 %v5963_v22 }
0x1358   : > { %5640 = vmatprep.subr.bf16.mxu0 %v6138_v26  ;;  %v6658_v22 = vshrl.u32 %v2515_v57, 7 }
0x135b   : > { %5641 = vmatpush3.bf16.msra.mxu0 %v5964_v58  ;;  %v2517_v58 = vsub.s32 0, %v6658_v22 }
0x135c   : > { %5642 = vmatprep.subr.bf16.mxu0 %v6138_v26 }
0x135f   : > { %5643 = vmatpush3.bf16.msra.mxu0 %v5965_v59  ;;  %v2513_v59 = vld [vmem:[%s7083_s14] sm:$0x3] }
0x1360   : > { %5644 = vmatprep.subr.bf16.mxu0 %v6138_v26 }
0x1363   : > { %5645 = vmatpush3.bf16.msra.mxu0 %v5966_v60  ;;  %v2521_v60 = vsub.s32 1, %v6658_v22  ;;  %v5336_v22 = vld [vmem:[%s7085_s16 + $0x1] ss:$0 sm:$0xff] }
0x1364   : > { %5402 = vmatprep.subr.bf16.mxu0 %v5979_v30  ;;  %v6000_v30 = vld [vmem:[%s7073_s4 + $0x54] ss:$8 sps:$4 sm:$0xff]  }
0x1429   : > { %v2387_v61 = vpop.f32.mrb[24].mxu0 }
0x142a   : > { %2400 = vrot.lane.b32.xlu0 %v2387_v61, %s7129_s24  ;;  %v5637_v62 = vpop.f32.mrb[25].mxu0  ;;  %v2518_v61 = vrot.slane %v2513_v59, %v2517_v58 }
0x142b   : > { %v2522_v62 = vrot.slane %v2513_v59, %v2521_v60 }
0x149c   : > { %v2401_v6 = vpop.permute.xlu0 %2400 }
0x149d   : > { %v2405_v7 = vsel %vm1440_vm8, %v2404_v4, %v2401_v6 }
0x149e   : > { %v2406_v8 = vpack.c.bf16 %v2405_v7, %v2405_v7 }
0x14a0   : > { %5647 = vmatmul.mubr.msk.bf16.vlgmr.msra.gmra.mrb[28].mxu0 %vm702_vm1, %v2406_v8 }
0x14a1   : > { %5403 = vmatpush3.bf16.msra.mxu0 %v5980_v28  ;;  %v5998_v28 = vld [vmem:[%s7073_s4 + $0x50] ss:$8 sps:$4 sm:$0xff]  }
0x14a2   : > { %5404 = vmatprep.subr.bf16.mxu0 %v5981_v32  ;;  %v6003_v32 = vld [vmem:[%s7073_s4 + $0x64] ss:$8 sps:$4 sm:$0xff]  }
0x14a5   : > { %5405 = vmatpush3.bf16.msra.mxu0 %v5982_v33  ;;  %v6001_v33 = vld [vmem:[%s7073_s4 + $0x60] ss:$8 sps:$4 sm:$0xff]  }
0x14a6   : > { %5406 = vmatprep.subr.bf16.mxu0 %v5983_v34  ;;  %v6006_v34 = vld [vmem:[%s7073_s4 + $0x74] ss:$8 sps:$4 sm:$0xff]  }
0x14a9   : > { %5407 = vmatpush3.bf16.msra.mxu0 %v5984_v35  ;;  %v6004_v35 = vld [vmem:[%s7073_s4 + $0x70] ss:$8 sps:$4 sm:$0xff]  }
0x14aa   : > { %5408 = vmatprep.subr.bf16.mxu0 %v5985_v36 }
0x14ad   : > { %5409 = vmatpush3.bf16.msra.mxu0 %v5986_v37 }
0x14ae   : > { %5410 = vmatprep.subr.bf16.mxu0 %v5987_v38 }
0x14b1   : > { %5411 = vmatpush3.bf16.msra.mxu0 %v5988_v39 }
0x14b2   : > { %5412 = vmatprep.subr.bf16.mxu0 %v5989_v40  ;;  %v5158_v40 = vld [vmem:[%s7120_s28 + $0x1] ss:$0 sm:$0xff] }
0x14b5   : > { %5413 = vmatpush3.bf16.msra.mxu0 %v5990_v41 }
0x14b6   : > { %5414 = vmatprep.subr.bf16.mxu0 %v5991_v53 }
0x14b9   : > { %5415 = vmatpush3.bf16.msra.mxu0 %v5992_v54 }
0x14ba   : > { %5416 = vmatprep.subr.bf16.mxu0 %v5993_v0 }
0x14bd   : > { %5417 = vmatpush3.bf16.msra.mxu0 %v5994_v56 }
0x14be   : > { %5670 = vmatprep.subr.mxu0 %v6138_v26 }
0x1573   : > { %v2468_v9 = vpop.f32.mrb[28].mxu0 }
0x1574   : > { %v6571_v10 = vadd.f32 %v2468_v9, %v6411_v49  ;;  %v5648_v12 = vpop.f32.mrb[29].mxu0  ;;  %v5969_v49 = vld [vmem:[%s7082_s13 + $0x4] ss:$8 sps:$4 sm:$0xff]  }
0x1575   : > { %v2471_v13 = vpop.f32.mrb[30].mxu0  ;;  %2568 = vmatprep.subr.bf16.mxu1 %v5969_v49 }
0x1576   : > { %v5649_v14 = vpop.f32.mrb[31].mxu0  ;;  %v2477_v15 = vsel %vm624_vm0, %v6571_v10, 0.0  ;;  %2569 = vmatpush1.bf16.msra.mxu1 %v5967_v21 }
0x1577   : > { %2478 = vadd.xlane.f32.xlu1 %v2477_v15  ;;  %2570 = vmatprep.subr.bf16.mxu1 %v5972_v23 }
0x157a   : > { %2571 = vmatpush1.bf16.msra.mxu1 %v5970_v24 }
0x157b   : > { %2572 = vmatprep.subr.bf16.mxu1 %v5975_v25 }
0x157e   : > { %2573 = vmatpush1.bf16.msra.mxu1 %v5973_v27 }
0x157f   : > { %2574 = vmatprep.subr.bf16.mxu1 %v5978_v29 }
0x1582   : > { %2575 = vmatpush1.bf16.msra.mxu1 %v5976_v31  ;;  %v5997_v31 = vld [vmem:[%s7073_s4 + $0x44] ss:$8 sps:$4 sm:$0xff]  }
0x1583   : > { %2874 = vmatprep.subr.bf16.mxu1 %v5997_v31 }
0x1604   : > { %v2479_v55 = vpop.xlane.xlu1 %2478 }
0x1605   : > { %v2480_v16 = vmul.f32 0.015625, %v2479_v55 }
0x1607   : > { %v2481_v17 = vsub.f32 %v6571_v10, %v2480_v16 }
0x1609   : > { %v2482_v18 = vmul.f32 %v2481_v17, %v2481_v17 }
0x160b   : > { %v2483_v19 = vsel %vm624_vm0, %v2482_v18, 0.0 }
0x160c   : > { %2484 = vadd.xlane.f32.xlu0 %v2483_v19 }
0x1699   : > { %v2485_v42 = vpop.xlane.xlu0 %2484 }
0x169a   : > { %v2486_v43 = vmul.f32 0.015625, %v2485_v42  ;;  %v5159_v42 = vld [vmem:[%s7121_s1 + $0x1] ss:$0 sm:$0xff] }
0x169c   : > { %v2487_v44 = vadd.f32 1e-05, %v2486_v43 }
0x169e   : > { %6087 = vrsqrt.f32 %v2487_v44 }
0x16a8   : > { %v6088_v45 = vpop.eup %6087 }
0x16a9   : > { %v2489_v48 = vmul.f32 %v6088_v45, %v2481_v17  ;;  %v5155_v17 = vld [vmem:[%s7085_s16] ss:$0 sm:$0xff] }
0x16ab   : > { %v2496_v51 = vmul.f32 %v5128_v46, %v2489_v48 }
0x16ad   : > { %v2503_v52 = vadd.f32 %v5129_v50, %v2496_v51 }
0x16af   : > { %v2512_v47 = vpack.c.bf16 %v2503_v52, %v2503_v52 }
0x16b1   : > { %5138 = vmatmul.mubr.msk.bf16.vlgmr.msra.gmra.mrb[24].mxu1 %vm702_vm1, %v2512_v47 }
0x16b2   : > { %2906 = vmatprep.mubr.bf16.mxu1 %v6137_v11 }
0x1784   : > { %v2602_v1 = vpop.f32.mrb[24].mxu1 }
0x1785   : > { %v2603_v2 = vadd.f32 %v2602_v1, %v2518_v61  ;;  %v2604_v3 = vpop.f32.mrb[25].mxu1 }
0x1786   : > { %v2605_v4 = vadd.f32 %v2604_v3, %v2522_v62  ;;  %v2606_v6 = vpop.f32.mrb[26].mxu1 }
0x1787   : > { %v2609_v7 = vmax.f32 %v2603_v2, 0.0  ;;  %v2607_v8 = vpop.f32.mrb[27].mxu1 }
0x1788   : > { %v2610_v9 = vmax.f32 %v2605_v4, 0.0 }
0x1789   : > { %v2643_v13 = vpack.c.bf16 %v2609_v7, %v2609_v7 }
0x178a   : > { %v2644_v12 = vpack.c.bf16 %v2610_v9, %v2610_v9 }
0x178c   : > { %2773 = vmatprep.mubr.bf16.mxu0 %v2644_v12 }
0x178d   : > { %2774 = vmatmul.mubr.bf16.vlgmr.msra.gmra.mrb[32].mxu0 %v2643_v13 }
0x178e   : > { %5672 = vmatprep.mubr.msk.f32.mxu0 %vm6139_vm2, %v6138_v26 }
0x1860   : > { %v5418_v14 = vpop.f32.mrb[32].mxu0 }
0x1861   : > { %v5419_v15 = vpop.f32.mrb[33].mxu0 }
0x1862   : > { %v5420_v55 = vadd.f32 %v5419_v15, %v5418_v14  ;;  %v5421_v16 = vpop.f32.mrb[34].mxu0 }
0x1863   : > { %v5422_v18 = vpop.f32.mrb[35].mxu0 }
0x1864   : > { %v2781_v19 = vadd.f32 %v5420_v55, %v6571_v10  ;;  %v5995_v10 = vld [vmem:[%s7073_s4 + $0x40] ss:$8 sps:$4 sm:$0xff]  }
0x1865   : > { %2875 = vmatpush1.bf16.msra.mxu1 %v5995_v10 }
0x1866   : > { %v6675_v49 = vadd.f32 %v5155_v17, %v2781_v19  ;;  %2876 = vmatprep.subr.bf16.mxu1 %v6000_v30 }
0x1868   : > { %v2794_v21 = vsel %vm624_vm0, %v6675_v49, 0.0 }
0x1869   : > { %2795 = vadd.xlane.f32.xlu0 %v2794_v21  ;;  %2877 = vmatpush1.bf16.msra.mxu1 %v5998_v28 }
0x186a   : > { %2878 = vmatprep.subr.bf16.mxu1 %v6003_v32 }
0x186d   : > { %2879 = vmatpush1.bf16.msra.mxu1 %v6001_v33 }
0x186e   : > { %2880 = vmatprep.subr.bf16.mxu1 %v6006_v34 }
0x1871   : > { %2881 = vmatpush1.bf16.msra.mxu1 %v6004_v35 }
0x1872   : > { %5650 = vmatprep.subr.mxu1 %v6138_v26 }
0x18f6   : > { %v2796_v23 = vpop.xlane.xlu0 %2795 }
0x18f7   : > { %v2797_v24 = vmul.f32 0.015625, %v2796_v23 }
0x18f9   : > { %v2798_v25 = vsub.f32 %v6675_v49, %v2797_v24 }
0x18fb   : > { %v2799_v27 = vmul.f32 %v2798_v25, %v2798_v25 }
0x18fd   : > { %v2800_v29 = vsel %vm624_vm0, %v2799_v27, 0.0 }
0x18fe   : > { %2801 = vadd.xlane.f32.xlu1 %v2800_v29 }
0x198b   : > { %v2802_v36 = vpop.xlane.xlu1 %2801 }
0x198c   : > { %v2803_v37 = vmul.f32 0.015625, %v2802_v36 }
0x198e   : > { %v2804_v38 = vadd.f32 1e-05, %v2803_v37 }
0x1990   : > { %6089 = vrsqrt.f32 %v2804_v38 }
0x199a   : > { %v6090_v39 = vpop.eup %6089 }
0x199b   : > { %v2806_v41 = vmul.f32 %v6090_v39, %v2798_v25 }
0x199d   : > { %v2813_v43 = vmul.f32 %v5158_v40, %v2806_v41 }
0x199f   : > { %v2820_v44 = vadd.f32 %v5159_v42, %v2813_v43 }
0x19a1   : > { %v2830_v45 = vpack.c.bf16 %v2820_v44, %v2820_v44 }
0x19a3   : > { %5176 = vmatmul.mubr.msk.bf16.vlgmr.msra.gmra.mrb[28].mxu1 %vm702_vm1, %v2830_v45 }
0x19a4   : > { %5652 = vmatprep.mubr.msk.f32.mxu1 %vm6139_vm2, %v6138_v26 }
0x1a76   : > { %v2908_v46 = vpop.f32.mrb[28].mxu1 }
0x1a77   : > { %2925 = vrot.lane.b32.xlu0 %v2908_v46, %s7125_s26  ;;  %v6716_v48 = vpop.f32.mrb[29].mxu1 }
0x1a78   : > { %v2912_v50 = vpop.f32.mrb[30].mxu1 }
0x1a79   : > { %v2913_v51 = vpop.f32.mrb[31].mxu1 }
0x1a7b   : > { %3089 = vrot.lane.b32.xlu0 %v2908_v46, %s7126_s29 }
0x1a7f   : > { %3258 = vrot.lane.b32.xlu0 %v2908_v46, %s7128_s22 }
0x1a83   : > { %3425 = vrot.lane.b32.xlu0 %v2908_v46, %s7131_s23 }
0x1ae9   : > { %v2926_v52 = vpop.permute.xlu0 %2925 }
0x1aea   : > { %5651 = vmatpush3.xpose.msk.msra.mxu1 %vm758_vm3, %v2926_v52 }
0x1aeb   : > { %5655 = vmatprep.subr.mxu1 %v6138_v26 }
0x1aed   : > { %5653 = vmatmul.mubr.msk.f32.vlgmr.msra.gmra.mrb[22].mxu1 %vm758_vm3, %v2908_v46  ;;  %v3090_v47 = vpop.permute.xlu0 %3089 }
0x1aee   : > { %5656 = vmatpush3.msk.msra.mxu1 %vm850_vm4, %v6716_v48  ;;  %5657 = vmatprep.mubr.msk.f32.mxu1 %vm6139_vm2, %v6138_v26 }
0x1aef   : > { %5660 = vmatprep.subr.mxu1 %v6138_v26 }
0x1af1   : > { %v3259_v53 = vpop.permute.xlu0 %3258 }
0x1af2   : > { %5671 = vmatpush3.xpose.msk.msra.mxu0 %vm758_vm3, %v3259_v53 }
0x1af3   : > { %5680 = vmatprep.subr.mxu0 %v6138_v26 }
0x1af5   : > { %v3426_v7 = vpop.permute.xlu0 %3425 }
0x1bc0   : > { %v2997_v54 = vpop.f32.mrb[22].mxu1 }
0x1bc1   : > { %v3001_v0 = vmul.f32 0.25, %v2997_v54  ;;  %v5654_v56 = vpop.f32.mrb[23].mxu1 }
0x1bc2   : > { %v6007_v56 = vld [vmem:[%s7074_s5 + $0x20] sm:$0xff]  }
0x1bc3   : > { %v3002_v57 = vsel %vm834_vm5, %v3001_v0, -inf }
0x1bc4   : > { %3003 = vmax.xlane.f32.xlu1 %v3002_v57  ;;  %v6008_v57 = vld [vmem:[%s7074_s5 + $0x28] sm:$0xff]  }
0x1bd5   : > { %3091 = vrot.lane.b32.xlu1 %v2908_v46, %s7129_s24 }
0x1c51   : > { %v3004_v59 = vpop.xlane.xlu1 %3003 }
0x1c52   : > { %v3005_v61 = vsub.f32 %v3001_v0, %v3004_v59  ;;  %v6009_v59 = vld [vmem:[%s7074_s5 + $0x30] sm:$0xff]  }
0x1c54   : > { %v3006_v62 = vmul.f32 1.442695, %v3005_v61  ;;  %v6010_v61 = vld [vmem:[%s7074_s5 + $0x38] sm:$0xff]  }
0x1c55   : > { %v3092_v3 = vpop.permute.xlu1 %3091 }
0x1c56   : > { %6091 = vpow2.f32 %v3006_v62 }
0x1c60   : > { %v6092_v1 = vpop.eup %6091 }
0x1c61   : > { %v3008_v2 = vsel %vm834_vm5, %v6092_v1, 0.0 }
0x1c62   : > { %3009 = vadd.xlane.f32.xlu1 %v3008_v2 }
0x1c73   : > { %3256 = vrot.lane.b32.xlu1 %v2908_v46, %s7127_s21 }
0x1c77   : > { %3423 = vrot.lane.b32.xlu1 %v2908_v46, %s7130_s2 }
0x1cef   : > { %v3010_v4 = vpop.xlane.xlu1 %3009 }
0x1cf0   : > { %6093 = vrcp.f32 %v3010_v4 }
0x1cf3   : > { %v3257_v6 = vpop.permute.xlu1 %3256 }
0x1cf4   : > { %5673 = vmatmul.mubr.msk.f32.vlgmr.msra.gmra.mrb[26].mxu0 %vm758_vm3, %v3257_v6 }
0x1cf5   : > { %5681 = vmatpush3.xpose.msk.msra.mxu0 %vm758_vm3, %v3426_v7  ;;  %5682 = vmatprep.mubr.msk.f32.mxu0 %vm6139_vm2, %v6138_v26 }
0x1cf6   : > { %5690 = vmatprep.subr.bf16.mxu0 %v6138_v26 }
0x1cf7   : > { %v3424_v8 = vpop.permute.xlu1 %3423 }
0x1cf8   : > { %5683 = vmatmul.mubr.msk.f32.vlgmr.msra.gmra.mrb[36].mxu0 %vm758_vm3, %v3424_v8 }
0x1cf9   : > { %5698 = vmatprep.mubr.msk.bf16.mxu0 %vm6139_vm2, %v6138_v26  ;;  %5691 = vmatpush3.bf16.msra.mxu0 %v6007_v56 }
0x1cfa   : > { %v6094_v9 = vpop.eup %6093  ;;  %5692 = vmatprep.subr.bf16.mxu0 %v6138_v26 }
0x1cfb   : > { %v3012_v12 = vmul.f32 %v6094_v9, %v6092_v1 }
0x1cfd   : > { %5658 = vmatmul.mubr.msk.f32.vlgmr.msra.gmra.mrb[32].mxu1 %vm846_vm6, %v3012_v12  ;;  %5693 = vmatpush3.bf16.msra.mxu0 %v6008_v57 }
0x1cfe   : > { %5661 = vmatpush3.xpose.msk.msra.mxu1 %vm758_vm3, %v3092_v3  ;;  %5662 = vmatprep.mubr.msk.f32.mxu1 %vm6139_vm2, %v6138_v26 }
0x1cff   : > { %5665 = vmatprep.subr.mxu1 %v6138_v26  ;;  %5694 = vmatprep.subr.bf16.mxu0 %v6138_v26 }
0x1d01   : > { %5663 = vmatmul.mubr.msk.f32.vlgmr.msra.gmra.mrb[34].mxu1 %vm758_vm3, %v3090_v47  ;;  %5695 = vmatpush3.bf16.msra.mxu0 %v6009_v59 }
0x1d02   : > { %5667 = vmatprep.mubr.msk.f32.mxu1 %vm6139_vm2, %v6138_v26  ;;  %5696 = vmatprep.subr.bf16.mxu0 %v6138_v26 }
0x1d05   : > { %5697 = vmatpush3.bf16.msra.mxu0 %v6010_v61 }
0x1d06   : > { %5714 = vmatprep.subr.bf16.mxu0 %v6138_v26 }
0x1dc7   : > { %v3330_v13 = vpop.f32.mrb[26].mxu0 }
0x1dc8   : > { %v3334_v14 = vmul.f32 0.25, %v3330_v13  ;;  %v5674_v15 = vpop.f32.mrb[27].mxu0 }
0x1dca   : > { %v3335_v55 = vsel %vm834_vm5, %v3334_v14, -inf }
0x1dcb   : > { %3336 = vmax.xlane.f32.xlu1 %v3335_v55  ;;  %v3497_v16 = vpop.f32.mrb[36].mxu0 }
0x1dcc   : > { %v5684_v17 = vpop.f32.mrb[37].mxu0  ;;  %v3501_v25 = vmul.f32 0.25, %v3497_v16 }
0x1dce   : > { %v3502_v29 = vsel %vm834_vm5, %v3501_v25, -inf }
0x1dd0   : > { %v6753_v18 = vpop.f32.mrb[32].mxu1 }
0x1dd1   : > { %v5659_v19 = vpop.f32.mrb[33].mxu1 }
0x1dd4   : > { %v3163_v21 = vpop.f32.mrb[34].mxu1 }
0x1dd5   : > { %v3167_v23 = vmul.f32 0.25, %v3163_v21  ;;  %v5664_v24 = vpop.f32.mrb[35].mxu1 }
0x1dd7   : > { %v3168_v27 = vsel %vm834_vm5, %v3167_v23, -inf }
0x1dd8   : > { %3169 = vmax.xlane.f32.xlu0 %v3168_v27 }
0x1ddc   : > { %3503 = vmax.xlane.f32.xlu0 %v3502_v29 }
0x1e58   : > { %v3337_v31 = vpop.xlane.xlu1 %3336 }
0x1e59   : > { %v3338_v10 = vsub.f32 %v3334_v14, %v3337_v31  ;;  %v6012_v31 = vld [vmem:[%s7078_s9 + $0x28] sm:$0xff]  }
0x1e5b   : > { %v3339_v30 = vmul.f32 1.442695, %v3338_v10  ;;  %v6013_v10 = vld [vmem:[%s7078_s9 + $0x30] sm:$0xff]  }
0x1e5d   : > { %6095 = vpow2.f32 %v3339_v30  ;;  %v6015_v30 = vld [vmem:[%s7078_s9 + $0x38] sm:$0xff]  }
0x1e65   : > { %v3170_v28 = vpop.xlane.xlu0 %3169 }
0x1e66   : > { %v3171_v33 = vsub.f32 %v3167_v23, %v3170_v28  ;;  %v6011_v23 = vld [vmem:[%s7078_s9 + $0x20] sm:$0xff]  }
0x1e67   : > { %v6096_v32 = vpop.eup %6095  ;;  %v6014_v28 = vld [vmem:[%s7077_s8 + $0x20] sm:$0xff]  }
0x1e68   : > { %v3341_v34 = vsel %vm834_vm5, %v6096_v32, 0.0  ;;  %v3172_v37 = vmul.f32 1.442695, %v3171_v33  ;;  %v6017_v33 = vld [vmem:[%s7077_s8 + $0x30] sm:$0xff]  }
0x1e69   : > { %3342 = vadd.xlane.f32.xlu1 %v3341_v34  ;;  %v3504_v35 = vpop.xlane.xlu0 %3503  ;;  %v6018_v34 = vld [vmem:[%s7077_s8 + $0x38] sm:$0xff]  }
0x1e6a   : > { %v3505_v36 = vsub.f32 %v3501_v25, %v3504_v35 }
0x1e6c   : > { %v3506_v38 = vmul.f32 1.442695, %v3505_v36 }
0x1e6e   : > { %6097 = vpow2.f32 %v3506_v38  ;;  %v5208_v38 = vld [vmem:[%s7075_s6 + $0x1] ss:$0 sm:$0xff] }
0x1e6f   : > { %6099 = vpow2.f32 %v3172_v37 }
0x1e78   : > { %v6098_v39 = vpop.eup %6097 }
0x1e79   : > { %v3508_v40 = vsel %vm834_vm5, %v6098_v39, 0.0  ;;  %v6100_v41 = vpop.eup %6099 }
0x1e7a   : > { %3179 = vrot.lane.b32.xlu1 %v6716_v48, %s7126_s29  ;;  %3509 = vadd.xlane.f32.xlu0 %v3508_v40  ;;  %v3174_v42 = vsel %vm834_vm5, %v6100_v41, 0.0  ;;  %v5209_v40 = vld [vmem:[%s7076_s7 + $0x1] ss:$0 sm:$0xff] }
0x1e7e   : > { %3513 = vrot.lane.b32.xlu1 %v6716_v48, %s7130_s2  ;;  %3175 = vadd.xlane.f32.xlu0 %v3174_v42 }
0x1e94   : > { %3346 = vrot.lane.b32.xlu0 %v6716_v48, %s7127_s21 }
0x1ef6   : > { %v3343_v43 = vpop.xlane.xlu1 %3342 }
0x1efa   : > { %v3180_v44 = vpop.permute.xlu1 %3179 }
0x1efb   : > { %5666 = vmatpush3.msk.msra.mxu1 %vm850_vm4, %v3180_v44 }
0x1efc   : > { %5675 = vmatprep.subr.mxu1 %v6138_v26 }
0x1efe   : > { %v3514_v54 = vpop.permute.xlu1 %3513 }
0x1f07   : > { %v3510_v45 = vpop.xlane.xlu0 %3509 }
0x1f0b   : > { %v3176_v46 = vpop.xlane.xlu0 %3175 }
0x1f0c   : > { %6101 = vrcp.f32 %v3176_v46 }
0x1f0d   : > { %6103 = vrcp.f32 %v3343_v43 }
0x1f0e   : > { %6105 = vrcp.f32 %v3510_v45 }
0x1f0f   : > { %v3347_v47 = vpop.permute.xlu0 %3346 }
0x1f16   : > { %v6102_v50 = vpop.eup %6101 }
0x1f17   : > { %v3178_v51 = vmul.f32 %v6102_v50, %v6100_v41  ;;  %v6104_v52 = vpop.eup %6103 }
0x1f18   : > { %v3345_v48 = vmul.f32 %v6104_v52, %v6096_v32  ;;  %v6106_v53 = vpop.eup %6105  ;;  %v6016_v32 = vld [vmem:[%s7077_s8 + $0x28] sm:$0xff]  }
0x1f19   : > { %5668 = vmatmul.mubr.msk.f32.vlgmr.msra.gmra.mrb[36].mxu1 %vm846_vm6, %v3178_v51  ;;  %v3512_v0 = vmul.f32 %v6106_v53, %v6098_v39 }
0x1f1a   : > { %5676 = vmatpush3.msk.msra.mxu1 %vm850_vm4, %v3347_v47  ;;  %5677 = vmatprep.mubr.msk.f32.mxu1 %vm6139_vm2, %v6138_v26 }
0x1f1b   : > { %5685 = vmatprep.subr.mxu1 %v6138_v26 }
0x1f1d   : > { %5678 = vmatmul.mubr.msk.f32.vlgmr.msra.gmra.mrb[38].mxu1 %vm846_vm6, %v3345_v48 }
0x1f1e   : > { %5686 = vmatpush3.msk.msra.mxu1 %vm850_vm4, %v3514_v54  ;;  %5687 = vmatprep.mubr.msk.f32.mxu1 %vm6139_vm2, %v6138_v26 }
0x1f1f   : > { %5702 = vmatprep.subr.bf16.mxu1 %v6138_v26 }
0x1f21   : > { %5688 = vmatmul.mubr.msk.f32.vlgmr.msra.gmra.mrb[40].mxu1 %vm846_vm6, %v3512_v0 }
0x1f22   : > { %5710 = vmatprep.mubr.msk.bf16.mxu1 %vm6139_vm2, %v6138_v26  ;;  %5703 = vmatpush3.bf16.msra.mxu1 %v6014_v28 }
0x1f23   : > { %5704 = vmatprep.subr.bf16.mxu1 %v6138_v26 }
0x1f26   : > { %5705 = vmatpush3.bf16.msra.mxu1 %v6016_v32 }
0x1f27   : > { %5706 = vmatprep.subr.bf16.mxu1 %v6138_v26 }
0x1f2a   : > { %5707 = vmatpush3.bf16.msra.mxu1 %v6017_v33 }
0x1f2b   : > { %5708 = vmatprep.subr.bf16.mxu1 %v6138_v26 }
0x1f2e   : > { %5709 = vmatpush3.bf16.msra.mxu1 %v6018_v34 }
0x1f2f   : > { %5822 = vmatprep.subr.bf16.mxu1 %v6147_v5 }
0x1fec   : > { %v3252_v62 = vpop.f32.mrb[36].mxu1 }
0x1fed   : > { %3591 = vrot.lane.b32.xlu1 %v3252_v62, %s7131_s23  ;;  %v5669_v1 = vpop.f32.mrb[37].mxu1 }
0x1ff0   : > { %v3419_v2 = vpop.f32.mrb[38].mxu1 }
0x1ff1   : > { %3595 = vrot.lane.b32.xlu0 %v3419_v2, %s7128_s22  ;;  %v5679_v3 = vpop.f32.mrb[39].mxu1 }
0x1ff4   : > { %v3586_v4 = vpop.f32.mrb[40].mxu1 }
0x1ff5   : > { %3599 = vrot.lane.b32.xlu1 %v3586_v4, %s7129_s24  ;;  %v5689_v6 = vpop.f32.mrb[41].mxu1 }
0x205f   : > { %v3592_v7 = vpop.permute.xlu1 %3591 }
0x2060   : > { %v3602_v9 = vsel %vm758_vm3, %v6753_v18, %v3592_v7 }
0x2063   : > { %v3596_v8 = vpop.permute.xlu0 %3595 }
0x2064   : > { %v3603_v12 = vsel %vm1438_vm7, %v3602_v9, %v3596_v8 }
0x2067   : > { %v3600_v13 = vpop.permute.xlu1 %3599 }
0x2068   : > { %v3604_v14 = vsel %vm1440_vm8, %v3603_v12, %v3600_v13 }
0x2069   : > { %v3605_v15 = vpack.c.bf16 %v3604_v14, %v3604_v14 }
0x206b   : > { %5699 = vmatmul.mubr.msk.bf16.vlgmr.msra.gmra.mrb[40].mxu0 %vm702_vm1, %v3605_v15 }
0x206c   : > { %5722 = vmatprep.mubr.msk.bf16.mxu0 %vm6139_vm2, %v6138_v26  ;;  %5715 = vmatpush3.bf16.msra.mxu0 %v6011_v23 }
0x206d   : > { %5716 = vmatprep.subr.bf16.mxu0 %v6138_v26 }
0x2070   : > { %5717 = vmatpush3.bf16.msra.mxu0 %v6012_v31 }
0x2071   : > { %5718 = vmatprep.subr.bf16.mxu0 %v6138_v26 }
0x2074   : > { %5719 = vmatpush3.bf16.msra.mxu0 %v6013_v10 }
0x2075   : > { %5720 = vmatprep.subr.bf16.mxu0 %v6138_v26 }
0x2078   : > { %5721 = vmatpush3.bf16.msra.mxu0 %v6015_v30 }
0x2079   : > { %5833 = vmatprep.subr.bf16.mxu0 %v6147_v5 }
0x207b   : > { %5723 = vmatmul.mubr.msk.bf16.vlgmr.msra.gmra.mrb[44].mxu0 %vm702_vm1, %v6436_v63 }
0x207c   : > { %5751 = vmatprep.mubr.msk.f32.mxu0 %vm6139_vm2, %v6138_v26 }
0x213e   : > { %v3667_v55 = vpop.f32.mrb[40].mxu0 }
0x213f   : > { %v6808_v16 = vadd.f32 %v3667_v55, %v6675_v49  ;;  %v5700_v17 = vpop.f32.mrb[41].mxu0 }
0x2140   : > { %v3670_v19 = vpop.f32.mrb[42].mxu0 }
0x2141   : > { %v5701_v21 = vpop.f32.mrb[43].mxu0  ;;  %v3678_v18 = vsel %vm624_vm0, %v6808_v16, 0.0 }
0x2142   : > { %3679 = vadd.xlane.f32.xlu0 %v3678_v18 }
0x214e   : > { %v3849_v44 = vpop.f32.mrb[44].mxu0 }
0x214f   : > { %v5724_v45 = vpop.f32.mrb[45].mxu0 }
0x2150   : > { %v3852_v46 = vpop.f32.mrb[46].mxu0 }
0x2151   : > { %v5725_v50 = vpop.f32.mrb[47].mxu0  ;;  %v6859_v51 = vpack.i.bf16 %v3852_v46, %v3849_v44  ;;  %v5823_v52 = vpack.c.bf16 %v3852_v46, %v3849_v44 }
0x21cf   : > { %v3680_v24 = vpop.xlane.xlu0 %3679 }
0x21d0   : > { %v3681_v25 = vmul.f32 0.015625, %v3680_v24 }
0x21d2   : > { %v3682_v27 = vsub.f32 %v6808_v16, %v3681_v25 }
0x21d4   : > { %v3683_v49 = vmul.f32 %v3682_v27, %v3682_v27 }
0x21d6   : > { %v3684_v29 = vsel %vm624_vm0, %v3683_v49, 0.0 }
0x21d7   : > { %3685 = vadd.xlane.f32.xlu1 %v3684_v29 }
0x21e8   : > { %5905 = vrot.lane.b32.xlu1 %v6859_v51, %s7125_s26  ;;  %s7135_s26 = sld [smem:[#allocation9_spill]] }
0x2264   : > { %v3686_v63 = vpop.xlane.xlu1 %3685 }
0x2265   : > { %v3687_v35 = vmul.f32 0.015625, %v3686_v63 }
0x2267   : > { %v3688_v36 = vadd.f32 1e-05, %v3687_v35 }
0x2268   : > { %v5906_v47 = vpop.permute.xlu1 %5905 }
0x2269   : > { %6107 = vrsqrt.f32 %v3688_v36  ;;  %v5908_v48 = vunpack.i.h.bf16 %v5906_v47  ;;  %v5907_v53 = vunpack.i.l.bf16 %v5906_v47 }
0x226b   : > { %v5827_v54 = vpack.c.bf16 %v5908_v48, %v5907_v53 }
0x2273   : > { %v6108_v37 = vpop.eup %6107 }
0x2274   : > { %v3690_v39 = vmul.f32 %v6108_v37, %v3682_v27 }
0x2276   : > { %v3697_v41 = vmul.f32 %v5208_v38, %v3690_v39 }
0x2278   : > { %v3704_v42 = vadd.f32 %v5209_v40, %v3697_v41 }
0x227a   : > { %v3714_v43 = vpack.c.bf16 %v3704_v42, %v3704_v42 }
0x227c   : > { %5711 = vmatmul.mubr.msk.bf16.vlgmr.msra.gmra.mrb[44].mxu1 %vm702_vm1, %v3714_v43 }
0x227d   : > { %5730 = vmatprep.mubr.msk.f32.mxu1 %vm6139_vm2, %v6138_v26  ;;  %5825 = vmatpush3.bf16.xpose.msk.msra.mxu1 %vm6470_vm9, %v5823_v52 }
0x227e   : > { %5826 = vmatprep.subr.bf16.mxu1 %v6147_v5 }
0x234f   : > { %v6866_v0 = vpop.f32.mrb[44].mxu1 }
0x2350   : > { %4035 = vrot.lane.b32.xlu1 %v6866_v0, %s7126_s29  ;;  %v5712_v56 = vpop.f32.mrb[45].mxu1  ;;  %5731 = vmatmul.mubr.msk.f32.vlgmr.msra.gmra.mrb[42].mxu1 %vm758_vm3, %v6866_v0 }
0x2351   : > { %v3779_v57 = vpop.f32.mrb[46].mxu1  ;;  %5828 = vmatpush3.bf16.msra.mxu1 %v5827_v54  ;;  %5737 = vmatprep.mubr.msk.f32.mxu1 %vm6139_vm2, %v6138_v26 }
0x2352   : > { %v5713_v59 = vpop.f32.mrb[47].mxu1  ;;  %5829 = vmatprep.subr.bf16.mxu1 %v6147_v5 }
0x2354   : > { %5915 = vrot.lane.b32.xlu1 %v6859_v51, %s7127_s21 }
0x23c2   : > { %v4036_v13 = vpop.permute.xlu1 %4035 }
0x23c6   : > { %v5916_v21 = vpop.permute.xlu1 %5915 }
0x23c7   : > { %v5918_v18 = vunpack.i.h.bf16 %v5916_v21  ;;  %v5917_v23 = vunpack.i.l.bf16 %v5916_v21 }
0x23c9   : > { %v5837_v24 = vpack.c.bf16 %v5918_v18, %v5917_v23 }
0x2423   : > { %v3940_v61 = vpop.f32.mrb[42].mxu1 }
0x2424   : > { %v3944_v62 = vmul.f32 0.25, %v3940_v61  ;;  %v5732_v1 = vpop.f32.mrb[43].mxu1 }
0x2426   : > { %v3945_v2 = vsel %vm1781_vm10, %v3944_v62, -inf }
0x2427   : > { %3946 = vmax.xlane.f32.xlu0 %v3945_v2 }
0x24b4   : > { %v3947_v3 = vpop.xlane.xlu0 %3946 }
0x24b5   : > { %v3948_v4 = vsub.f32 %v3944_v62, %v3947_v3 }
0x24b7   : > { %v3949_v6 = vmul.f32 1.442695, %v3948_v4 }
0x24b9   : > { %6109 = vpow2.f32 %v3949_v6 }
0x24c3   : > { %v6110_v7 = vpop.eup %6109 }
0x24c4   : > { %v3951_v8 = vsel %vm1781_vm10, %v6110_v7, 0.0 }
0x24c5   : > { %3952 = vadd.xlane.f32.xlu0 %v3951_v8 }
0x24db   : > { %5910 = vrot.lane.b32.xlu0 %v6859_v51, %s7126_s29 }
0x24df   : > { %4208 = vrot.lane.b32.xlu0 %v6866_v0, %s7127_s21  ;;  %s7133_s21 = sld [smem:[#allocation8_spill]] }
0x2552   : > { %v3953_v9 = vpop.xlane.xlu0 %3952 }
0x2553   : > { %6111 = vrcp.f32 %v3953_v9 }
0x2556   : > { %v5911_v12 = vpop.permute.xlu0 %5910 }
0x2557   : > { %v5913_v14 = vunpack.i.h.bf16 %v5911_v12  ;;  %v5912_v15 = vunpack.i.l.bf16 %v5911_v12 }
0x2559   : > { %v5830_v19 = vpack.c.bf16 %v5913_v14, %v5912_v15 }
0x255a   : > { %v4209_v25 = vpop.permute.xlu0 %4208 }
0x255d   : > { %v6112_v55 = vpop.eup %6111 }
0x255e   : > { %v3955_v17 = vmul.f32 %v6112_v55, %v6110_v7 }
0x2560   : > { %5738 = vmatmul.mubr.msk.f32.vlgmr.msra.gmra.mrb[48].mxu1 %vm758_vm3, %v3955_v17 }
0x2561   : > { %5832 = vmatpush3.bf16.xpose.msk.msra.mxu1 %vm6470_vm9, %v5830_v19  ;;  %5744 = vmatprep.mubr.msk.f32.mxu1 %vm6139_vm2, %v6138_v26 }
0x2562   : > { %5836 = vmatprep.subr.bf16.mxu1 %v6147_v5 }
0x2568   : > { %5745 = vmatmul.mubr.msk.f32.vlgmr.msra.gmra.mrb[50].mxu1 %vm758_vm3, %v4036_v13 }
0x2569   : > { %5839 = vmatpush3.bf16.xpose.msk.msra.mxu1 %vm6470_vm9, %v5837_v24  ;;  %5758 = vmatprep.mubr.msk.f32.mxu1 %vm6139_vm2, %v6138_v26 }
0x256a   : > { %5847 = vmatprep.subr.bf16.mxu1 %v6147_v5 }
0x2570   : > { %5759 = vmatmul.mubr.msk.f32.vlgmr.msra.gmra.mrb[52].mxu1 %vm758_vm3, %v4209_v25 }
0x2571   : > { %5779 = vmatprep.mubr.msk.f32.mxu1 %vm6139_vm2, %v6138_v26 }
0x2633   : > { %v6898_v27 = vpop.f32.mrb[48].mxu1 }
0x2634   : > { %v5739_v49 = vpop.f32.mrb[49].mxu1 }
0x263b   : > { %v4113_v29 = vpop.f32.mrb[50].mxu1 }
0x263c   : > { %v4117_v31 = vmul.f32 0.25, %v4113_v29  ;;  %v5746_v10 = vpop.f32.mrb[51].mxu1  ;;  %v6020_v29 = vld [vmem:[%s7133_s21 + $0x28] sm:$0xff]  }
0x263d   : > { %v6022_v10 = vld [vmem:[%s7133_s21 + $0x38] sm:$0xff]  }
0x263e   : > { %v4118_v30 = vsel %vm1781_vm10, %v4117_v31, -inf }
0x263f   : > { %4119 = vmax.xlane.f32.xlu1 %v4118_v30 }
0x2643   : > { %v4286_v28 = vpop.f32.mrb[52].mxu1 }
0x2644   : > { %v4290_v32 = vmul.f32 0.25, %v4286_v28  ;;  %v5760_v33 = vpop.f32.mrb[53].mxu1 }
0x2646   : > { %v4291_v34 = vsel %vm1781_vm10, %v4290_v32, -inf }
0x2647   : > { %4292 = vmax.xlane.f32.xlu0 %v4291_v34 }
0x2650   : > { %5925 = vrot.lane.b32.xlu1 %v6859_v51, %s7128_s22 }
0x26cc   : > { %v4120_v63 = vpop.xlane.xlu1 %4119 }
0x26cd   : > { %v4121_v35 = vsub.f32 %v4117_v31, %v4120_v63  ;;  %v6021_v31 = vld [vmem:[%s7133_s21 + $0x30] sm:$0xff]  }
0x26cf   : > { %v4122_v36 = vmul.f32 1.442695, %v4121_v35 }
0x26d0   : > { %v5926_v45 = vpop.permute.xlu1 %5925 }
0x26d1   : > { %6113 = vpow2.f32 %v4122_v36  ;;  %v5928_v53 = vunpack.i.h.bf16 %v5926_v45  ;;  %v5927_v54 = vunpack.i.l.bf16 %v5926_v45 }
0x26d3   : > { %v5841_v59 = vpack.c.bf16 %v5928_v53, %v5927_v54  ;;  %v6029_v53 = vld [vmem:[%s7082_s13 + $0x60] ss:$8 sps:$4 sm:$0xff]   ;;  %v6034_v54 = vld [vmem:[%s7082_s13 + $0x74] ss:$8 sps:$4 sm:$0xff]  }
0x26d4   : > { %v4293_v37 = vpop.xlane.xlu0 %4292 }
0x26d5   : > { %v4294_v38 = vsub.f32 %v4290_v32, %v4293_v37 }
0x26d7   : > { %v4295_v39 = vmul.f32 1.442695, %v4294_v38 }
0x26d9   : > { %6115 = vpow2.f32 %v4295_v39 }
0x26db   : > { %v6114_v40 = vpop.eup %6113 }
0x26dc   : > { %v4124_v41 = vsel %vm1781_vm10, %v6114_v40, 0.0 }
0x26dd   : > { %4125 = vadd.xlane.f32.xlu0 %v4124_v41 }
0x26e3   : > { %v6116_v42 = vpop.eup %6115 }
0x26e4   : > { %v4297_v43 = vsel %vm1781_vm10, %v6116_v42, 0.0 }
0x26e5   : > { %4298 = vadd.xlane.f32.xlu1 %v4297_v43 }
0x26f3   : > { %5920 = vrot.lane.b32.xlu0 %v6859_v51, %s7129_s24 }
0x26f6   : > { %5930 = vrot.lane.b32.xlu1 %v6859_v51, %s7130_s2 }
0x26f7   : > { %4381 = vrot.lane.b32.xlu0 %v6866_v0, %s7130_s2  ;;  %s7137_s2 = sshll.u32 %s7134_s19, 2 }
0x26f8   : > { %s617_s17 = scalar_lea.vmem %s7138_s3, %s7137_s2 }
0x276a   : > { %v4126_v44 = vpop.xlane.xlu0 %4125 }
0x276b   : > { %6117 = vrcp.f32 %v4126_v44 }
0x276e   : > { %v5921_v46 = vpop.permute.xlu0 %5920 }
0x276f   : > { %v5923_v50 = vunpack.i.h.bf16 %v5921_v46  ;;  %v5922_v52 = vunpack.i.l.bf16 %v5921_v46 }
0x2771   : > { %v5834_v47 = vpack.c.bf16 %v5923_v50, %v5922_v52  ;;  %v6023_v50 = vld [vmem:[%s7082_s13 + $0x40] ss:$8 sps:$4 sm:$0xff]   ;;  %v6028_v52 = vld [vmem:[%s7082_s13 + $0x54] ss:$8 sps:$4 sm:$0xff]  }
0x2772   : > { %v4299_v48 = vpop.xlane.xlu1 %4298  ;;  %v4382_v4 = vpop.permute.xlu0 %4381 }
0x2773   : > { %6119 = vrcp.f32 %v4299_v48  ;;  %5835 = vmatpush3.bf16.msra.mxu0 %v5834_v47  ;;  %v6026_v47 = vld [vmem:[%s7082_s13 + $0x50] ss:$8 sps:$4 sm:$0xff]   ;;  %v6031_v48 = vld [vmem:[%s7082_s13 + $0x64] ss:$8 sps:$4 sm:$0xff]  }
0x2774   : > { %5840 = vmatprep.subr.bf16.mxu0 %v6147_v5 }
0x2775   : > { %v6118_v56 = vpop.eup %6117 }
0x2776   : > { %v4128_v57 = vmul.f32 %v6118_v56, %v6114_v40  ;;  %v5931_v0 = vpop.permute.xlu1 %5930  ;;  %v6032_v56 = vld [vmem:[%s7082_s13 + $0x70] ss:$8 sps:$4 sm:$0xff]  }
0x2777   : > { %v5933_v61 = vunpack.i.h.bf16 %v5931_v0  ;;  %v5932_v62 = vunpack.i.l.bf16 %v5931_v0  ;;  %v6037_v0 = vld [vmem:[%s7084_s15 + $0xc8] sm:$0xff]  }
0x2778   : > { %5752 = vmatmul.mubr.msk.f32.vlgmr.msra.gmra.mrb[38].mxu0 %vm758_vm3, %v4128_v57  ;;  %v6035_v57 = vld [vmem:[%s7084_s15 + $0xc0] sm:$0xff]  }
0x2779   : > { %5842 = vmatpush3.bf16.msra.mxu0 %v5841_v59  ;;  %5765 = vmatprep.mubr.msk.f32.mxu0 %vm6139_vm2, %v6138_v26  ;;  %v5844_v3 = vpack.c.bf16 %v5933_v61, %v5932_v62  ;;  %v6036_v59 = vld [vmem:[%s7084_s15 + $0x80] sm:$0xff]   ;;  %v6038_v61 = vld [vmem:[%s7084_s15 + $0x88] sm:$0xff]   ;;  %v6039_v62 = vld [vmem:[%s7084_s15 + $0xd0] sm:$0xff]  }
0x277a   : > { %5843 = vmatprep.subr.bf16.mxu0 %v6147_v5 }
0x277d   : > { %v6120_v1 = vpop.eup %6119 }
0x277e   : > { %v4301_v2 = vmul.f32 %v6120_v1, %v6116_v42  ;;  %v6040_v1 = vld [vmem:[%s7084_s15 + $0x90] sm:$0xff]  }
0x2780   : > { %5766 = vmatmul.mubr.msk.f32.vlgmr.msra.gmra.mrb[48].mxu0 %vm758_vm3, %v4301_v2  ;;  %v6041_v2 = vld [vmem:[%s7084_s15 + $0xd8] sm:$0xff]  }
0x2781   : > { %5772 = vmatprep.mubr.msk.f32.mxu0 %vm6139_vm2, %v6138_v26 }
0x2782   : > { %5846 = vmatpush3.bf16.xpose.msk.msra.mxu0 %vm6470_vm9, %v5844_v3  ;;  %v6042_v3 = vld [vmem:[%s7084_s15 + $0x98] sm:$0xff]  }
0x2789   : > { %5773 = vmatmul.mubr.msk.f32.vlgmr.msra.gmra.mrb[50].mxu0 %vm758_vm3, %v4382_v4  ;;  %v6043_v4 = vld [vmem:[%s7084_s15 + $0xe0] sm:$0xff]  }
0x278a   : > { %4767 = vmatprep.mubr.bf16.mxu0 %v6137_v11 }
0x284b   : > { %v4204_v6 = vpop.f32.mrb[38].mxu0 }
0x284c   : > { %v5753_v5 = vpop.f32.mrb[39].mxu0 }
0x284d   : > { %v6045_v5 = vld [vmem:[%s7084_s15 + $0xe8] sm:$0xff]  }
0x2853   : > { %v4377_v7 = vpop.f32.mrb[48].mxu0 }
0x2854   : > { %v5767_v8 = vpop.f32.mrb[49].mxu0 }
0x285c   : > { %v4459_v9 = vpop.f32.mrb[50].mxu0 }
0x285d   : > { %v4463_v12 = vmul.f32 0.25, %v4459_v9  ;;  %v5774_v13 = vpop.f32.mrb[51].mxu0 }
0x285f   : > { %v4464_v14 = vsel %vm1781_vm10, %v4463_v12, -inf }
0x2860   : > { %4465 = vmax.xlane.f32.xlu1 %v4464_v14  ;;  %v5267_v14 = vld [vmem:[%s7080_s11 + $0x1] ss:$0 sm:$0xff] }
0x2871   : > { %4555 = vrot.lane.b32.xlu1 %v4204_v6, %s7131_s23  ;;  %v6044_v6 = vld [vmem:[%s7084_s15 + $0xa0] sm:$0xff]  }
0x2875   : > { %4559 = vrot.lane.b32.xlu1 %v4377_v7, %s7128_s22  ;;  %v6046_v7 = vld [vmem:[%s7084_s15 + $0xa8] sm:$0xff]   ;;  %s7136_s22 = sld [smem:[#allocation10_spill]] }
0x28ed   : > { %v4466_v20 = vpop.xlane.xlu1 %4465 }
0x28ee   : > { %v4467_v15 = vsub.f32 %v4463_v12, %v4466_v20 }
0x28f0   : > { %v4468_v55 = vmul.f32 1.442695, %v4467_v15  ;;  %v5268_v15 = vld [vmem:[%s7081_s12 + $0x1] ss:$0 sm:$0xff] }
0x28f1   : > { %v4556_v32 = vpop.permute.xlu1 %4555 }
0x28f2   : > { %6121 = vpow2.f32 %v4468_v55  ;;  %v4566_v34 = vsel %vm758_vm3, %v6898_v27, %v4556_v32 }
0x28f5   : > { %v4560_v33 = vpop.permute.xlu1 %4559 }
0x28f6   : > { %v4567_v63 = vsel %vm1438_vm7, %v4566_v34, %v4560_v33 }
0x28fc   : > { %v6122_v17 = vpop.eup %6121 }
0x28fd   : > { %v4470_v11 = vsel %vm1781_vm10, %v6122_v17, 0.0 }
0x28fe   : > { %4471 = vadd.xlane.f32.xlu0 %v4470_v11 }
0x2914   : > { %5935 = vrot.lane.b32.xlu0 %v6859_v51, %s7131_s23  ;;  %v6019_v51 = vld [vmem:[%s7133_s21 + $0x20] sm:$0xff]  }
0x298b   : > { %v4472_v19 = vpop.xlane.xlu0 %4471 }
0x298c   : > { %6123 = vrcp.f32 %v4472_v19  ;;  %v6047_v19 = vld [vmem:[%s7084_s15 + $0xf0] sm:$0xff]  }
0x298f   : > { %v5936_v21 = vpop.permute.xlu0 %5935 }
0x2990   : > { %v5938_v18 = vunpack.i.h.bf16 %v5936_v21  ;;  %v5937_v23 = vunpack.i.l.bf16 %v5936_v21  ;;  %v6048_v21 = vld [vmem:[%s7084_s15 + $0xb0] sm:$0xff]  }
0x2992   : > { %v5848_v24 = vpack.c.bf16 %v5938_v18, %v5937_v23  ;;  %v6049_v18 = vld [vmem:[%s7084_s15 + $0xf8] sm:$0xff]  }
0x2993   : > { %v6050_v23 = vld [vmem:[%s7084_s15 + $0xb8] sm:$0xff]  }
0x2994   : > { %5849 = vmatpush3.bf16.msra.mxu1 %v5848_v24  ;;  %v5277_v24 = vld [vmem:[%s7083_s14 + $0x2] sm:$0x3] }
0x2995   : > { %5782 = vmatprep.subr.bf16.mxu1 %v6138_v26 }
0x2996   : > { %v6124_v25 = vpop.eup %6123 }
0x2997   : > { %v4474_v49 = vmul.f32 %v6124_v25, %v6122_v17  ;;  %v4685_v25 = vrot.slane %v5277_v24, %v2517_v58 }
0x2999   : > { %5780 = vmatmul.mubr.msk.f32.vlgmr.msra.gmra.mrb[54].mxu1 %vm758_vm3, %v4474_v49  ;;  %v4689_v49 = vrot.slane %v5277_v24, %v2521_v60 }
0x299a   : > { %5790 = vmatprep.mubr.msk.bf16.mxu1 %vm6139_vm2, %v6138_v26  ;;  %5783 = vmatpush3.bf16.msra.mxu1 %v6019_v51 }
0x299b   : > { %5784 = vmatprep.subr.bf16.mxu1 %v6138_v26 }
0x299e   : > { %5785 = vmatpush3.bf16.msra.mxu1 %v6020_v29 }
0x299f   : > { %5786 = vmatprep.subr.bf16.mxu1 %v6138_v26 }
0x29a2   : > { %5787 = vmatpush3.bf16.msra.mxu1 %v6021_v31 }
0x29a3   : > { %5788 = vmatprep.subr.bf16.mxu1 %v6138_v26 }
0x29a6   : > { %5789 = vmatpush3.bf16.msra.mxu1 %v6022_v10 }
0x29a7   : > { %5484 = vmatprep.subr.bf16.mxu1 %v6035_v57 }
0x2a6c   : > { %v4550_v30 = vpop.f32.mrb[54].mxu1 }
0x2a6d   : > { %4563 = vrot.lane.b32.xlu0 %v4550_v30, %s7129_s24  ;;  %v5781_v28 = vpop.f32.mrb[55].mxu1 }
0x2adf   : > { %v4564_v35 = vpop.permute.xlu0 %4563 }
0x2ae0   : > { %v4568_v36 = vsel %vm1440_vm8, %v4567_v63, %v4564_v35 }
0x2ae1   : > { %v4569_v26 = vpack.c.bf16 %v4568_v36, %v4568_v36 }
0x2ae3   : > { %5791 = vmatmul.mubr.msk.bf16.vlgmr.msra.gmra.mrb[56].mxu1 %vm702_vm1, %v4569_v26 }
0x2ae4   : > { %5485 = vmatpush3.bf16.msra.mxu1 %v6036_v59 }
0x2ae5   : > { %5486 = vmatprep.subr.bf16.mxu1 %v6037_v0 }
0x2ae8   : > { %5487 = vmatpush3.bf16.msra.mxu1 %v6038_v61 }
0x2ae9   : > { %5488 = vmatprep.subr.bf16.mxu1 %v6039_v62 }
0x2aec   : > { %5489 = vmatpush3.bf16.msra.mxu1 %v6040_v1 }
0x2aed   : > { %5490 = vmatprep.subr.bf16.mxu1 %v6041_v2 }
0x2af0   : > { %5491 = vmatpush3.bf16.msra.mxu1 %v6042_v3 }
0x2af1   : > { %5492 = vmatprep.subr.bf16.mxu1 %v6043_v4 }
0x2af4   : > { %5493 = vmatpush3.bf16.msra.mxu1 %v6044_v6 }
0x2af5   : > { %5494 = vmatprep.subr.bf16.mxu1 %v6045_v5 }
0x2af8   : > { %5495 = vmatpush3.bf16.msra.mxu1 %v6046_v7 }
0x2af9   : > { %5496 = vmatprep.subr.bf16.mxu1 %v6047_v19 }
0x2afc   : > { %5497 = vmatpush3.bf16.msra.mxu1 %v6048_v21 }
0x2afd   : > { %5498 = vmatprep.subr.bf16.mxu1 %v6049_v18 }
0x2b00   : > { %5499 = vmatpush3.bf16.msra.mxu1 %v6050_v23 }
0x2bb6   : > { %v4631_v37 = vpop.f32.mrb[56].mxu1 }
0x2bb7   : > { %v6956_v38 = vadd.f32 %v4631_v37, %v6808_v16  ;;  %v5792_v39 = vpop.f32.mrb[57].mxu1  ;;  %v6025_v16 = vld [vmem:[%s7082_s13 + $0x44] ss:$8 sps:$4 sm:$0xff]  }
0x2bb8   : > { %v4634_v40 = vpop.f32.mrb[58].mxu1  ;;  %4735 = vmatprep.subr.bf16.mxu0 %v6025_v16 }
0x2bb9   : > { %v5793_v41 = vpop.f32.mrb[59].mxu1  ;;  %v4642_v42 = vsel %vm624_vm0, %v6956_v38, 0.0  ;;  %4736 = vmatpush1.bf16.msra.mxu0 %v6023_v50 }
0x2bba   : > { %4643 = vadd.xlane.f32.xlu1 %v4642_v42  ;;  %4737 = vmatprep.subr.bf16.mxu0 %v6028_v52 }
0x2bbd   : > { %4738 = vmatpush1.bf16.msra.mxu0 %v6026_v47  ;;  %v5338_v47 = vld [vmem:[%s7136_s22] ss:$0 sm:$0xff] }
0x2bbe   : > { %4739 = vmatprep.subr.bf16.mxu0 %v6031_v48 }
0x2bc1   : > { %4740 = vmatpush1.bf16.msra.mxu0 %v6029_v53 }
0x2bc2   : > { %4741 = vmatprep.subr.bf16.mxu0 %v6034_v54 }
0x2bc5   : > { %4742 = vmatpush1.bf16.msra.mxu0 %v6032_v56 }
0x2c47   : > { %v4644_v27 = vpop.xlane.xlu1 %4643 }
0x2c48   : > { %v4645_v43 = vmul.f32 0.015625, %v4644_v27 }
0x2c4a   : > { %v4646_v44 = vsub.f32 %v6956_v38, %v4645_v43 }
0x2c4c   : > { %v4647_v45 = vmul.f32 %v4646_v44, %v4646_v44 }
0x2c4e   : > { %v4648_v46 = vsel %vm624_vm0, %v4647_v45, 0.0 }
0x2c4f   : > { %4649 = vadd.xlane.f32.xlu0 %v4648_v46 }
0x2cdc   : > { %v4650_v8 = vpop.xlane.xlu0 %4649 }
0x2cdd   : > { %v4651_v9 = vmul.f32 0.015625, %v4650_v8 }
0x2cdf   : > { %v4652_v12 = vadd.f32 1e-05, %v4651_v9 }
0x2ce1   : > { %6125 = vrsqrt.f32 %v4652_v12 }
0x2ceb   : > { %v6126_v13 = vpop.eup %6125 }
0x2cec   : > { %v4654_v20 = vmul.f32 %v6126_v13, %v4646_v44 }
0x2cee   : > { %v4661_v55 = vmul.f32 %v5267_v14, %v4654_v20 }
0x2cf0   : > { %v4668_v17 = vadd.f32 %v5268_v15, %v4661_v55 }
0x2cf2   : > { %v4678_v11 = vpack.c.bf16 %v4668_v17, %v4668_v17 }
0x2cf4   : > { %5286 = vmatmul.mubr.msk.bf16.vlgmr.msra.gmra.mrb[52].mxu0 %vm702_vm1, %v4678_v11 }
0x2dc7   : > { %v4769_v51 = vpop.f32.mrb[52].mxu0 }
0x2dc8   : > { %v4770_v29 = vadd.f32 %v4769_v51, %v4685_v25  ;;  %v4771_v31 = vpop.f32.mrb[53].mxu0 }
0x2dc9   : > { %v4772_v10 = vadd.f32 %v4771_v31, %v4689_v49  ;;  %v4773_v30 = vpop.f32.mrb[54].mxu0 }
0x2dca   : > { %v4776_v28 = vmax.f32 %v4770_v29, 0.0  ;;  %v4774_v32 = vpop.f32.mrb[55].mxu0 }
0x2dcb   : > { %v4777_v33 = vmax.f32 %v4772_v10, 0.0 }
0x2dcc   : > { %v4811_v63 = vpack.c.bf16 %v4776_v28, %v4776_v28 }
0x2dcd   : > { %v4812_v34 = vpack.c.bf16 %v4777_v33, %v4777_v33 }
0x2dcf   : > { %4941 = vmatprep.mubr.bf16.mxu1 %v4812_v34 }
0x2dd0   : > { %4942 = vmatmul.mubr.bf16.vlgmr.msra.gmra.mrb[60].mxu1 %v4811_v63 }
0x2ea3   : > { %v5500_v35 = vpop.f32.mrb[60].mxu1 }
0x2ea4   : > { %v5501_v36 = vpop.f32.mrb[61].mxu1 }
0x2ea5   : > { %v5502_v26 = vadd.f32 %v5501_v36, %v5500_v35  ;;  %v5503_v37 = vpop.f32.mrb[62].mxu1 }
0x2ea6   : > { %v5504_v58 = vpop.f32.mrb[63].mxu1 }
0x2ea7   : > { %v4949_v60 = vadd.f32 %v5502_v26, %v6956_v38  ;;  %v5337_v38 = vld [vmem:[%s7135_s26] ss:$0 sm:$0xff] }
0x2ea9   : > { %v4958_v39 = vadd.f32 %v5336_v22, %v4949_v60 }
0x2eab   : > { %v4961_v40 = vsel %vm624_vm0, %v4958_v39, 0.0 }
0x2eac   : > { %4962 = vadd.xlane.f32.xlu0 %v4961_v40 }
0x2f39   : > { %v4963_v41 = vpop.xlane.xlu0 %4962 }
0x2f3a   : > { %v4964_v42 = vmul.f32 0.015625, %v4963_v41 }
0x2f3c   : > { %v4965_v27 = vsub.f32 %v4958_v39, %v4964_v42 }
0x2f3e   : > { %v4966_v43 = vmul.f32 %v4965_v27, %v4965_v27 }
0x2f40   : > { %v4967_v44 = vsel %vm624_vm0, %v4966_v43, 0.0 }
0x2f41   : > { %4968 = vadd.xlane.f32.xlu1 %v4967_v44 }
0x2fce   : > { %v4969_v45 = vpop.xlane.xlu1 %4968 }
0x2fcf   : > { %v4970_v46 = vmul.f32 0.015625, %v4969_v45 }
0x2fd1   : > { %v4971_v16 = vadd.f32 1e-05, %v4970_v46 }
0x2fd3   : > { %6127 = vrsqrt.f32 %v4971_v16 }
0x2fdd   : > { %v6128_v50 = vpop.eup %6127 }
0x2fde   : > { %v4973_v52 = vmul.f32 %v6128_v50, %v4965_v27 }
0x2fe0   : > { %v4980_v48 = vmul.f32 %v5337_v38, %v4973_v52 }
0x2fe2   : > { %v4987_v53 = vadd.f32 %v5338_v47, %v4980_v48 }
0x2fe4   : > { %4988 = vst.msk [vmem:[%s617_s17] sm:$0xf] %vm624_vm0, %v4987_v53 }
0x2fe5 PF: > { %s7139_s24 = sld [smem:[#allocation2_spill]] }
0x2feb   : > { %s29_s0 = sadd.s32 1, %s7139_s24  }
0x2fec   : > { %p26_p4 = scmp.ge.s32.totalorder %s29_s0, 4  }
0x2fee   :  { %28 = sbr.rel (!%p26_p4) target bundleno = 9 (0x9), region = 144 }

</bundles_post_ra>
